<compile_context>
chip_gen: v5e
topology: v5e:2x2
jax: 0.10.0
libtpu: 0.0.40
codegen_flags: <defaults>
</compile_context>

<pallas_src>
import functools

import jax
import jax.numpy as jnp
import numpy as np
from jax.experimental import pallas as pl
from jax.experimental.pallas import tpu as pltpu


F = 32            # conv / recurrent filters (canonical RIM uses 64; scaled for demo)
GRAD_CH = 4       # gradient channels [pred_re, pred_im, ll_re, ll_im]
K0_PAD = 128      # conv0 im2col depth, zero-padded 25*4=100 -> 128 (one lane tile)


# --------------------------- static conv helpers ---------------------------

def _tap_masks_np(H, W, KH, KW):
    """(KH*KW, H*W) 0/1 masks: per tap, which output pixels read inside the image
    (zero 'same' padding elsewhere).  Computed with NumPy at trace time."""
    ph, pw = (KH - 1) // 2, (KW - 1) // 2
    hw = np.arange(H * W)
    h, w = hw // W, hw % W
    rows = []
    for ky in range(KH):
        for kx in range(KW):
            dy, dx = ky - ph, kx - pw
            ok = (h + dy >= 0) & (h + dy < H) & (w + dx >= 0) & (w + dx < W)
            rows.append(ok.astype(np.float32))
    return np.stack(rows)


def _full_tap_mask(H, W, KH, KW, cin, pad_to=None):
    """Boundary mask pre-broadcast to the full im2col patch-matrix shape
    (tap-major / channel-minor row order), optionally zero-padded to pad_to rows,
    so the kernel applies it with a single elementwise multiply."""
    m = np.repeat(_tap_masks_np(H, W, KH, KW), cin, axis=0)       # (KH*KW*cin, HW)
    if pad_to is not None and pad_to > m.shape[0]:
        m = np.concatenate(
            [m, np.zeros((pad_to - m.shape[0], H * W), np.float32)], axis=0)
    return jnp.asarray(m, jnp.float32)


# ------------------------------ Pallas kernel ------------------------------

def _rim_step_kernel(br_ref, bi_ref, sr_ref, si_ref, pred_ref, h0_ref, h1_ref,
                     mask5_ref, mask3_ref, w0_ref, w1_ref, w2_ref, cb_ref,
                     gwrz_ref, gbrz_ref, gwn_ref, gbn_ref,
                     newpred_ref, newh0_ref, newh1_ref, er_ref, ei_ref,
                     *, H, W):
    """One full RIM time step (minus the FFTs) for one batch element.

    Layout: channel-major, spatial flattened on lanes -> activations (chan, H*W).
    """
    HW = H * W

    # -------- log-likelihood gradient (fused coil combine) --------
    # 1/sigma^2 is already folded into w0 (the 5x5 conv is linear).
    br = br_ref[0]; bi = bi_ref[0]; sr = sr_ref[0]; si = si_ref[0]     # (C, HW)
    ll_re = jnp.sum(br * sr + bi * si, axis=0, keepdims=True)          # (1, HW)
    ll_im = jnp.sum(bi * sr - br * si, axis=0, keepdims=True)
    pred = pred_ref[0]                                                 # (2, HW)
    grad = jnp.concatenate([pred, ll_re, ll_im], axis=0)               # (4, HW)

    # -------- helpers --------
    def im2col(x, KH, KW, pad_to=None):
        # x: (Cin, HW) -> (KH*KW*Cin [+pad], HW); tap-major / channel-minor rows.
        ph, pw = (KH - 1) // 2, (KW - 1) // 2
        cin = x.shape[0]
        cols = []
        for ky in range(KH):
            for kx in range(KW):
                s = (ky - ph) * W + (kx - pw)            # want out[i] = x[i + s]
                # pltpu.roll is jnp.roll-style (out[i] = x[i - shift]) -> negate.
                cols.append(x if s % HW == 0 else pltpu.roll(x, (-s) % HW, axis=1))
        if pad_to is not None and pad_to > KH * KW * cin:
            cols.append(jnp.zeros((pad_to - KH * KW * cin, HW), x.dtype))
        return jnp.concatenate(cols, axis=0)

    def conv(x, w_ref, m_ref, bias, KH, KW, relu, pad_to=None):
        patch = im2col(x, KH, KW, pad_to)
        # One boundary-mask multiply over the whole patch matrix, fused with the
        # bf16 cast at the MXU boundary (weights already bf16).
        patch = (patch * m_ref[...]).astype(jnp.bfloat16)
        y = jnp.dot(w_ref[...], patch, preferred_element_type=jnp.float32)
        if bias is not None:
            y = y + bias
        if relu:
            y = jnp.maximum(y, 0.0)
        return y                                                        # (Cout, HW)

    def gru(x, h, layer):
        # mridc ConvGRUCell (1x1 recurrent convs); r/z gates via ONE K=2F matmul
        # of [W_ih_rz | W_hh_rz] against [x; h] (bias pre-summed at init).
        xb = x.astype(jnp.bfloat16)
        hb = h.astype(jnp.bfloat16)
        xh = jnp.concatenate([xb, hb], axis=0)                          # (2F, HW)
        rz = jnp.dot(gwrz_ref[layer], xh,
                     preferred_element_type=jnp.float32) + gbrz_ref[layer]
        r = jax.nn.sigmoid(rz[0:F])
        z = jax.nn.sigmoid(rz[F:2 * F])
        gi_n = jnp.dot(gwn_ref[layer, 0], xb,
                       preferred_element_type=jnp.float32) + gbn_ref[layer, 0]
        gh_n = jnp.dot(gwn_ref[layer, 1], hb,
                       preferred_element_type=jnp.float32) + gbn_ref[layer, 1]
        n = jnp.tanh(gi_n + r * gh_n)
        return n + z * (h - n)                                          # (F, HW)

    # -------- ConvRNN stack --------
    x = conv(grad, w0_ref, mask5_ref, cb_ref[0], 5, 5, relu=True, pad_to=K0_PAD)
    h0 = gru(x, h0_ref[0], 0)
    x = conv(h0, w1_ref, mask3_ref, cb_ref[1], 3, 3, relu=True)
    h1 = gru(x, h1_ref[0], 1)
    g = conv(h1, w2_ref, mask3_ref, None, 3, 3, relu=False)             # (2, HW)

    new_pred = pred + g
    newpred_ref[0] = new_pred
    newh0_ref[0] = h0
    newh1_ref[0] = h1

    # -------- fused sens_expand: coil image for the NEXT step's fft2 --------
    pr = new_pred[0:1, :]
    pi = new_pred[1:2, :]
    er_ref[0] = pr * sr - pi * si
    ei_ref[0] = pr * si + pi * sr


# -------------------------------- wrapper --------------------------------

# TODO(synk): generation-specific sharding/tiling: on single-TC v5e/v6e fold B
# into the matmul N axis (grid=(1,)); on v7x keep a 2-way "parallel" grid axis.
# At realistic MRI sizes (e.g. 15 coils x 320^2, F=64) add row-band / coil-group
# grid axes, set vmem_limit_bytes explicitly (v7x has 64 MiB VMEM), and consider
# pipeline_mode=pl.Buffered(3) on the coil inputs if DMA is exposed.

def rim_step(br, bi, sr, si, pred, h0, h1,
             mask5, mask3, w0, w1, w2, cb, gwrz, gbrz, gwn, gbn, H, W):
    B, C, HW = br.shape
    kern = functools.partial(_rim_step_kernel, H=H, W=W)

    cs = pl.BlockSpec((1, C, HW), lambda b: (b, 0, 0))
    ps = pl.BlockSpec((1, 2, HW), lambda b: (b, 0, 0))
    hs = pl.BlockSpec((1, F, HW), lambda b: (b, 0, 0))

    consts = [mask5, mask3, w0, w1, w2, cb, gwrz, gbrz, gwn, gbn]
    const_specs = [pl.BlockSpec(c.shape, lambda b, n=c.ndim: (0,) * n)
                   for c in consts]

    return pl.pallas_call(
        kern,
        out_shape=(jax.ShapeDtypeStruct((B, 2, HW), jnp.float32),
                   jax.ShapeDtypeStruct((B, F, HW), jnp.float32),
                   jax.ShapeDtypeStruct((B, F, HW), jnp.float32),
                   jax.ShapeDtypeStruct((B, C, HW), jnp.float32),
                   jax.ShapeDtypeStruct((B, C, HW), jnp.float32)),
        grid_spec=pltpu.PrefetchScalarGridSpec(
            num_scalar_prefetch=0, grid=(B,),
            in_specs=[cs, cs, cs, cs, ps, hs, hs] + const_specs,
            out_specs=[ps, hs, hs, cs, cs]),
        # update prediction / hidden-state buffers in place
        input_output_aliases={4: 0, 5: 1, 6: 2},
        compiler_params=pltpu.CompilerParams(
            dimension_semantics=("parallel",)),
    )(br, bi, sr, si, pred, h0, h1, *consts)


# ------------------------- plain-JAX glue (FFT) -------------------------
# TODO(synk): 2-D FFT/IFFT has no Pallas TPU primitive; kept in jnp.fft
# (fft_centered=False, normalization='backward', spatial_dims=(-2, -1)).

def _fft2_planar(re, im, H, W):
    B, C, HW = re.shape
    z = jnp.fft.fft2((re + 1j * im).reshape(B, C, H, W),
                     axes=(-2, -1), norm="backward")
    return (jnp.real(z).reshape(B, C, HW).astype(jnp.float32),
            jnp.imag(z).reshape(B, C, HW).astype(jnp.float32))


def _ifft2_planar(re, im, H, W):
    B, C, HW = re.shape
    z = jnp.fft.ifft2((re + 1j * im).reshape(B, C, H, W),
                      axes=(-2, -1), norm="backward")
    return (jnp.real(z).reshape(B, C, HW).astype(jnp.float32),
            jnp.imag(z).reshape(B, C, HW).astype(jnp.float32))


# --------------------------- parameters & forward ---------------------------

def init_params(key):
    ks = jax.random.split(key, 5)

    def rand(k, shape, scale=0.1):
        return scale * jax.random.normal(k, shape, jnp.float32)

    # conv0: ConvNonlinear(4 -> F, k=5, relu).  Stored transposed for the
    # channel-major matmul; columns are tap-major / channel-minor and K is
    # zero-padded 100 -> 128 so the patch matrix is one full lane tile deep.
    w0 = jnp.pad(rand(ks[0], (F, 25, GRAD_CH)).reshape(F, 25 * GRAD_CH),
                 ((0, 0), (0, K0_PAD - 25 * GRAD_CH)))
    w1 = rand(ks[1], (F, 9, F)).reshape(F, 9 * F)   # ConvNonlinear(F->F, k=3, relu)
    w2 = rand(ks[2], (2, 9, F)).reshape(2, 9 * F)   # final ConvNonlinear(F->2, k=3, no bias)
    cb = jnp.zeros((2, F, 1), jnp.float32)          # conv0 / conv1 biases

    # ConvGRU weights: r/z gates pre-concatenated as [W_ih_rz | W_hh_rz] (2F, 2F)
    # with pre-summed bias; candidate (n) gate kept split [layer, ih|hh].
    gwrz = rand(ks[3], (2, 2 * F, 2 * F))
    gbrz = jnp.zeros((2, 2 * F, 1), jnp.float32)
    gwn = rand(ks[4], (2, 2, F, F))
    gbn = jnp.zeros((2, 2, F, 1), jnp.float32)
    return dict(w0=w0, w1=w1, w2=w2, cb=cb,
                gwrz=gwrz, gbrz=gbrz, gwn=gwn, gbn=gbn)


def rim_block_forward(params, pred, masked_kspace, sens, mask,
                      sigma=1.0, time_steps=2):
    """RIMBlock.forward with dimensionality=2, consecutive_slices=1, no_dc=True,
    prediction=None, hx=None, keep_prediction=False.  Inputs follow the torch
    layout [B, C, H, W, 2]."""
    B, C, H, W = masked_kspace.shape[:4]
    HW = H * W

    def planar(x):  # [B,C,H,W,2] -> (re, im), each [B, C, H*W] (lane-dense)
        return (x[..., 0].reshape(B, C, HW).astype(jnp.float32),
                x[..., 1].reshape(B, C, HW).astype(jnp.float32))

    pr, pi = planar(pred)
    yr, yi = planar(masked_kspace)
    sr, si = planar(sens)
    mr, mi = planar(mask)

    mask5 = _full_tap_mask(H, W, 5, 5, GRAD_CH, pad_to=K0_PAD)   # (128, HW)
    mask3 = _full_tap_mask(H, W, 3, 3, F)                        # (9F, HW)

    # 1/sigma^2 is linear through conv0 -> fold into its weights; weights go to
    # bf16 once here (skips per-call in-kernel casts, halves their DMA).
    inv_sigma2 = jnp.float32(1.0 / (sigma * sigma))
    w0 = (params["w0"] * inv_sigma2).astype(jnp.bfloat16)
    w1 = params["w1"].astype(jnp.bfloat16)
    w2 = params["w2"].astype(jnp.bfloat16)
    gwrz = params["gwrz"].astype(jnp.bfloat16)
    gwn = params["gwn"].astype(jnp.bfloat16)
    cb, gbrz, gbn = params["cb"], params["gbrz"], params["gbn"]

    # initial prediction = sum_coils(complex_mul(ifft2(pred), conj(sens)))
    # (one-shot; plain jnp so XLA fuses it with the IFFT post-pass)
    ir, ii = _ifft2_planar(pr, pi, H, W)
    img = jnp.stack([jnp.sum(ir * sr + ii * si, axis=1),
                     jnp.sum(ii * sr - ir * si, axis=1)], axis=1)    # [B, 2, HW]

    # initial sens_expand (subsequent ones come fused out of the step kernel)
    er = img[:, 0:1, :] * sr - img[:, 1:2, :] * si
    ei = img[:, 0:1, :] * si + img[:, 1:2, :] * sr

    h0 = jnp.zeros((B, F, HW), jnp.float32)
    h1 = jnp.zeros((B, F, HW), jnp.float32)

    predictions = []
    for _ in range(time_steps):
        # log_likelihood_gradient FFT leg (plain jnp, fuses with FFT pre/post)
        kr, ki = _fft2_planar(er, ei, H, W)
        rr = mr * (kr - yr)      # mask channels identical -> per-plane multiply
        ri = mi * (ki - yi)
        br, bi = _ifft2_planar(rr, ri, H, W)

        # one fused pallas_call: gradient coil-combine + ConvRNN stack +
        # prediction update + sens_expand for the next step
        img, h0, h1, er, ei = rim_step(br, bi, sr, si, img, h0, h1,
                                       mask5, mask3, w0, w1, w2, cb,
                                       gwrz, gbrz, gwn, gbn, H, W)

        # output formatting only: [B, 2, H*W] -> [B, H, W, 2] (torch permute)
        predictions.append(img.reshape(B, 2, H, W).transpose(0, 2, 3, 1))

    # no_dc=True -> return image-space predictions list and hidden states
    hidden = [h0.reshape(B, F, H, W), h1.reshape(B, F, H, W)]
    return predictions, hidden


# --------------------------------- main ---------------------------------

if __name__ == "__main__":
    B, C, H, W = 2, 4, 16, 16
    key = jax.random.PRNGKey(0)
    kparam, kdata, ksens, kmask = jax.random.split(key, 4)

    params = init_params(kparam)

    full_kspace = jax.random.normal(kdata, (B, C, H, W, 2), jnp.float32)
    sens = 0.5 * jax.random.normal(ksens, (B, C, H, W, 2), jnp.float32)
    mask_cols = (jax.random.uniform(kmask, (W,)) > 0.4).astype(jnp.float32)
    mask = jnp.broadcast_to(mask_cols[None, None, None, :, None], (B, C, H, W, 2))
    masked_kspace = full_kspace * mask
    pred = masked_kspace  # predicted k-space initialised with the measured data

    fwd = jax.jit(functools.partial(rim_block_forward, sigma=1.0, time_steps=2))
    predictions, hidden = fwd(params, pred, masked_kspace, sens, mask)
    jax.block_until_ready(predictions)
    jax.block_until_ready(hidden)

    assert len(predictions) == 2
    assert predictions[-1].shape == (B, H, W, 2)
    assert hidden[0].shape == (B, F, H, W) and hidden[1].shape == (B, F, H, W)
    assert bool(jnp.isfinite(predictions[-1]).all())
    assert bool(jnp.isfinite(hidden[0]).all()) and bool(jnp.isfinite(hidden[1]).all())
    print("KERNEL_OK")
</pallas_src>

<mosaic_0001>
module attributes {stable_mosaic.version = 11 : i64} {
  func.func @_rim_step_kernel(%arg0: i32, %arg1: memref<1x4x256xf32, #tpu.memory_space<vmem>>, %arg2: memref<1x4x256xf32, #tpu.memory_space<vmem>>, %arg3: memref<1x4x256xf32, #tpu.memory_space<vmem>>, %arg4: memref<1x4x256xf32, #tpu.memory_space<vmem>>, %arg5: memref<1x2x256xf32, #tpu.memory_space<vmem>>, %arg6: memref<1x32x256xf32, #tpu.memory_space<vmem>>, %arg7: memref<1x32x256xf32, #tpu.memory_space<vmem>>, %arg8: memref<128x256xf32, #tpu.memory_space<vmem>>, %arg9: memref<288x256xf32, #tpu.memory_space<vmem>>, %arg10: memref<32x128xbf16, #tpu.memory_space<vmem>>, %arg11: memref<32x288xbf16, #tpu.memory_space<vmem>>, %arg12: memref<2x288xbf16, #tpu.memory_space<vmem>>, %arg13: memref<2x32x1xf32, #tpu.memory_space<vmem>>, %arg14: memref<2x64x64xbf16, #tpu.memory_space<vmem>>, %arg15: memref<2x64x1xf32, #tpu.memory_space<vmem>>, %arg16: memref<2x2x32x32xbf16, #tpu.memory_space<vmem>>, %arg17: memref<2x2x32x1xf32, #tpu.memory_space<vmem>>, %arg18: memref<1x2x256xf32, #tpu.memory_space<vmem>>, %arg19: memref<1x32x256xf32, #tpu.memory_space<vmem>>, %arg20: memref<1x32x256xf32, #tpu.memory_space<vmem>>, %arg21: memref<1x4x256xf32, #tpu.memory_space<vmem>>, %arg22: memref<1x4x256xf32, #tpu.memory_space<vmem>>) attributes {dimension_semantics = [#tpu.dimension_semantics<parallel>], iteration_bounds = array<i64: 2>, scalar_prefetch = 0 : i64, scratch_operands = 0 : i64, tpu.core_type = #tpu.core_type<tc>, window_params = [{transform_indices = @transform_0, window_bounds = array<i64: 1, 4, 256>}, {transform_indices = @transform_1, window_bounds = array<i64: 1, 4, 256>}, {transform_indices = @transform_2, window_bounds = array<i64: 1, 4, 256>}, {transform_indices = @transform_3, window_bounds = array<i64: 1, 4, 256>}, {transform_indices = @transform_4, window_bounds = array<i64: 1, 2, 256>}, {transform_indices = @transform_5, window_bounds = array<i64: 1, 32, 256>}, {transform_indices = @transform_6, window_bounds = array<i64: 1, 32, 256>}, {pipeline_mode = #tpu.pipeline_mode<synchronous>, transform_indices = @transform_7, window_bounds = array<i64: 128, 256>}, {pipeline_mode = #tpu.pipeline_mode<synchronous>, transform_indices = @transform_8, window_bounds = array<i64: 288, 256>}, {pipeline_mode = #tpu.pipeline_mode<synchronous>, transform_indices = @transform_9, window_bounds = array<i64: 32, 128>}, {pipeline_mode = #tpu.pipeline_mode<synchronous>, transform_indices = @transform_10, window_bounds = array<i64: 32, 288>}, {pipeline_mode = #tpu.pipeline_mode<synchronous>, transform_indices = @transform_11, window_bounds = array<i64: 2, 288>}, {pipeline_mode = #tpu.pipeline_mode<synchronous>, transform_indices = @transform_12, window_bounds = array<i64: 2, 32, 1>}, {pipeline_mode = #tpu.pipeline_mode<synchronous>, transform_indices = @transform_13, window_bounds = array<i64: 2, 64, 64>}, {pipeline_mode = #tpu.pipeline_mode<synchronous>, transform_indices = @transform_14, window_bounds = array<i64: 2, 64, 1>}, {pipeline_mode = #tpu.pipeline_mode<synchronous>, transform_indices = @transform_15, window_bounds = array<i64: 2, 2, 32, 32>}, {pipeline_mode = #tpu.pipeline_mode<synchronous>, transform_indices = @transform_16, window_bounds = array<i64: 2, 2, 32, 1>}, {transform_indices = @transform_17, window_bounds = array<i64: 1, 2, 256>}, {transform_indices = @transform_18, window_bounds = array<i64: 1, 32, 256>}, {transform_indices = @transform_19, window_bounds = array<i64: 1, 32, 256>}, {transform_indices = @transform_20, window_bounds = array<i64: 1, 4, 256>}, {transform_indices = @transform_21, window_bounds = array<i64: 1, 4, 256>}]} {
    %c0 = arith.constant 0 : index
    %c0_0 = arith.constant 0 : index
    %c0_1 = arith.constant 0 : index
    %0 = vector.load %arg1[%c0, %c0_0, %c0_1] : memref<1x4x256xf32, #tpu.memory_space<vmem>>, vector<1x4x256xf32>
    %1 = vector.shape_cast %0 : vector<1x4x256xf32> to vector<4x256xf32>
    %c0_2 = arith.constant 0 : index
    %c0_3 = arith.constant 0 : index
    %c0_4 = arith.constant 0 : index
    %2 = vector.load %arg2[%c0_2, %c0_3, %c0_4] : memref<1x4x256xf32, #tpu.memory_space<vmem>>, vector<1x4x256xf32>
    %3 = vector.shape_cast %2 : vector<1x4x256xf32> to vector<4x256xf32>
    %c0_5 = arith.constant 0 : index
    %c0_6 = arith.constant 0 : index
    %c0_7 = arith.constant 0 : index
    %4 = vector.load %arg3[%c0_5, %c0_6, %c0_7] : memref<1x4x256xf32, #tpu.memory_space<vmem>>, vector<1x4x256xf32>
    %5 = vector.shape_cast %4 : vector<1x4x256xf32> to vector<4x256xf32>
    %c0_8 = arith.constant 0 : index
    %c0_9 = arith.constant 0 : index
    %c0_10 = arith.constant 0 : index
    %6 = vector.load %arg4[%c0_8, %c0_9, %c0_10] : memref<1x4x256xf32, #tpu.memory_space<vmem>>, vector<1x4x256xf32>
    %7 = vector.shape_cast %6 : vector<1x4x256xf32> to vector<4x256xf32>
    %8 = arith.mulf %1, %5 : vector<4x256xf32>
    %9 = arith.mulf %3, %7 : vector<4x256xf32>
    %10 = arith.addf %8, %9 : vector<4x256xf32>
    %cst = arith.constant dense<0.000000e+00> : vector<256xf32>
    %11 = vector.multi_reduction <add>, %10, %cst [0] : vector<4x256xf32> to vector<256xf32>
    %12 = vector.shape_cast %11 : vector<256xf32> to vector<1x256xf32>
    %13 = arith.mulf %3, %5 : vector<4x256xf32>
    %14 = arith.mulf %1, %7 : vector<4x256xf32>
    %15 = arith.subf %13, %14 : vector<4x256xf32>
    %cst_11 = arith.constant dense<0.000000e+00> : vector<256xf32>
    %16 = vector.multi_reduction <add>, %15, %cst_11 [0] : vector<4x256xf32> to vector<256xf32>
    %17 = vector.shape_cast %16 : vector<256xf32> to vector<1x256xf32>
    %c0_12 = arith.constant 0 : index
    %c0_13 = arith.constant 0 : index
    %c0_14 = arith.constant 0 : index
    %18 = vector.load %arg5[%c0_12, %c0_13, %c0_14] : memref<1x2x256xf32, #tpu.memory_space<vmem>>, vector<1x2x256xf32>
    %19 = vector.shape_cast %18 : vector<1x2x256xf32> to vector<2x256xf32>
    %20 = tpu.concatenate %19, %12, %17 in 0 : vector<2x256xf32>, vector<1x256xf32>, vector<1x256xf32> -> vector<4x256xf32>
    %c0_15 = arith.constant 0 : index
    %c0_16 = arith.constant 0 : index
    %c0_17 = arith.constant 0 : index
    %21 = vector.load %arg13[%c0_15, %c0_16, %c0_17] : memref<2x32x1xf32, #tpu.memory_space<vmem>>, vector<1x32x1xf32>
    %22 = vector.shape_cast %21 : vector<1x32x1xf32> to vector<32x1xf32>
    %c34_i32 = arith.constant 34 : i32
    %23 = tpu.dynamic_rotate %20 by %c34_i32 dim 1 : vector<4x256xf32>, i32 -> vector<4x256xf32>
    %c33_i32 = arith.constant 33 : i32
    %24 = tpu.dynamic_rotate %20 by %c33_i32 dim 1 : vector<4x256xf32>, i32 -> vector<4x256xf32>
    %c32_i32 = arith.constant 32 : i32
    %25 = tpu.dynamic_rotate %20 by %c32_i32 dim 1 : vector<4x256xf32>, i32 -> vector<4x256xf32>
    %c31_i32 = arith.constant 31 : i32
    %26 = tpu.dynamic_rotate %20 by %c31_i32 dim 1 : vector<4x256xf32>, i32 -> vector<4x256xf32>
    %c30_i32 = arith.constant 30 : i32
    %27 = tpu.dynamic_rotate %20 by %c30_i32 dim 1 : vector<4x256xf32>, i32 -> vector<4x256xf32>
    %c18_i32 = arith.constant 18 : i32
    %28 = tpu.dynamic_rotate %20 by %c18_i32 dim 1 : vector<4x256xf32>, i32 -> vector<4x256xf32>
    %c17_i32 = arith.constant 17 : i32
    %29 = tpu.dynamic_rotate %20 by %c17_i32 dim 1 : vector<4x256xf32>, i32 -> vector<4x256xf32>
    %c16_i32 = arith.constant 16 : i32
    %30 = tpu.dynamic_rotate %20 by %c16_i32 dim 1 : vector<4x256xf32>, i32 -> vector<4x256xf32>
    %c15_i32 = arith.constant 15 : i32
    %31 = tpu.dynamic_rotate %20 by %c15_i32 dim 1 : vector<4x256xf32>, i32 -> vector<4x256xf32>
    %c14_i32 = arith.constant 14 : i32
    %32 = tpu.dynamic_rotate %20 by %c14_i32 dim 1 : vector<4x256xf32>, i32 -> vector<4x256xf32>
    %c2_i32 = arith.constant 2 : i32
    %33 = tpu.dynamic_rotate %20 by %c2_i32 dim 1 : vector<4x256xf32>, i32 -> vector<4x256xf32>
    %c1_i32 = arith.constant 1 : i32
    %34 = tpu.dynamic_rotate %20 by %c1_i32 dim 1 : vector<4x256xf32>, i32 -> vector<4x256xf32>
    %c255_i32 = arith.constant 255 : i32
    %35 = tpu.dynamic_rotate %20 by %c255_i32 dim 1 : vector<4x256xf32>, i32 -> vector<4x256xf32>
    %c254_i32 = arith.constant 254 : i32
    %36 = tpu.dynamic_rotate %20 by %c254_i32 dim 1 : vector<4x256xf32>, i32 -> vector<4x256xf32>
    %c242_i32 = arith.constant 242 : i32
    %37 = tpu.dynamic_rotate %20 by %c242_i32 dim 1 : vector<4x256xf32>, i32 -> vector<4x256xf32>
    %c241_i32 = arith.constant 241 : i32
    %38 = tpu.dynamic_rotate %20 by %c241_i32 dim 1 : vector<4x256xf32>, i32 -> vector<4x256xf32>
    %c240_i32 = arith.constant 240 : i32
    %39 = tpu.dynamic_rotate %20 by %c240_i32 dim 1 : vector<4x256xf32>, i32 -> vector<4x256xf32>
    %c239_i32 = arith.constant 239 : i32
    %40 = tpu.dynamic_rotate %20 by %c239_i32 dim 1 : vector<4x256xf32>, i32 -> vector<4x256xf32>
    %c238_i32 = arith.constant 238 : i32
    %41 = tpu.dynamic_rotate %20 by %c238_i32 dim 1 : vector<4x256xf32>, i32 -> vector<4x256xf32>
    %c226_i32 = arith.constant 226 : i32
    %42 = tpu.dynamic_rotate %20 by %c226_i32 dim 1 : vector<4x256xf32>, i32 -> vector<4x256xf32>
    %c225_i32 = arith.constant 225 : i32
    %43 = tpu.dynamic_rotate %20 by %c225_i32 dim 1 : vector<4x256xf32>, i32 -> vector<4x256xf32>
    %c224_i32 = arith.constant 224 : i32
    %44 = tpu.dynamic_rotate %20 by %c224_i32 dim 1 : vector<4x256xf32>, i32 -> vector<4x256xf32>
    %c223_i32 = arith.constant 223 : i32
    %45 = tpu.dynamic_rotate %20 by %c223_i32 dim 1 : vector<4x256xf32>, i32 -> vector<4x256xf32>
    %c222_i32 = arith.constant 222 : i32
    %46 = tpu.dynamic_rotate %20 by %c222_i32 dim 1 : vector<4x256xf32>, i32 -> vector<4x256xf32>
    %cst_18 = arith.constant 0.000000e+00 : f32
    %47 = vector.broadcast %cst_18 : f32 to vector<28x256xf32>
    %48 = tpu.concatenate %23, %24, %25, %26, %27, %28, %29, %30, %31, %32, %33, %34, %20, %35, %36, %37 in 0 : vector<4x256xf32>, vector<4x256xf32>, vector<4x256xf32>, vector<4x256xf32>, vector<4x256xf32>, vector<4x256xf32>, vector<4x256xf32>, vector<4x256xf32>, vector<4x256xf32>, vector<4x256xf32>, vector<4x256xf32>, vector<4x256xf32>, vector<4x256xf32>, vector<4x256xf32>, vector<4x256xf32>, vector<4x256xf32> -> vector<64x256xf32>
    %49 = tpu.concatenate %38, %39, %40, %41, %42, %43, %44, %45, %46, %47 in 0 : vector<4x256xf32>, vector<4x256xf32>, vector<4x256xf32>, vector<4x256xf32>, vector<4x256xf32>, vector<4x256xf32>, vector<4x256xf32>, vector<4x256xf32>, vector<4x256xf32>, vector<28x256xf32> -> vector<64x256xf32>
    %50 = tpu.concatenate %48, %49 in 0 : vector<64x256xf32>, vector<64x256xf32> -> vector<128x256xf32>
    %c0_19 = arith.constant 0 : index
    %c0_20 = arith.constant 0 : index
    %51 = vector.load %arg8[%c0_19, %c0_20] : memref<128x256xf32, #tpu.memory_space<vmem>>, vector<128x256xf32>
    %52 = arith.mulf %50, %51 : vector<128x256xf32>
    %53 = arith.truncf %52 : vector<128x256xf32> to vector<128x256xbf16>
    %c0_21 = arith.constant 0 : index
    %c0_22 = arith.constant 0 : index
    %54 = vector.load %arg10[%c0_21, %c0_22] : memref<32x128xbf16, #tpu.memory_space<vmem>>, vector<32x128xbf16>
    %cst_23 = arith.constant dense<0.000000e+00> : vector<32x256xf32>
    %55 = tpu.matmul %54, %53, %cst_23 {dimension_numbers = #tpu.dot_dimension_numbers<[1], [0], [0], [1], [0, 0, 1, 1], [], []>} : vector<32x128xbf16>, vector<128x256xbf16>, vector<32x256xf32> -> vector<32x256xf32>
    %56 = vector.broadcast %22 : vector<32x1xf32> to vector<32x256xf32>
    %57 = arith.addf %55, %56 : vector<32x256xf32>
    %cst_24 = arith.constant 0.000000e+00 : f32
    %58 = vector.broadcast %cst_24 : f32 to vector<32x256xf32>
    %59 = arith.maximumf %57, %58 : vector<32x256xf32>
    %c0_25 = arith.constant 0 : index
    %c0_26 = arith.constant 0 : index
    %c0_27 = arith.constant 0 : index
    %60 = vector.load %arg6[%c0_25, %c0_26, %c0_27] : memref<1x32x256xf32, #tpu.memory_space<vmem>>, vector<1x32x256xf32>
    %61 = vector.shape_cast %60 : vector<1x32x256xf32> to vector<32x256xf32>
    %62 = arith.truncf %59 : vector<32x256xf32> to vector<32x256xbf16>
    %63 = arith.truncf %61 : vector<32x256xf32> to vector<32x256xbf16>
    %64 = tpu.concatenate %62, %63 in 0 : vector<32x256xbf16>, vector<32x256xbf16> -> vector<64x256xbf16>
    %c0_28 = arith.constant 0 : index
    %c0_29 = arith.constant 0 : index
    %c0_30 = arith.constant 0 : index
    %65 = vector.load %arg14[%c0_28, %c0_29, %c0_30] : memref<2x64x64xbf16, #tpu.memory_space<vmem>>, vector<1x64x64xbf16>
    %66 = vector.shape_cast %65 : vector<1x64x64xbf16> to vector<64x64xbf16>
    %cst_31 = arith.constant dense<0.000000e+00> : vector<64x256xf32>
    %67 = tpu.matmul %66, %64, %cst_31 {dimension_numbers = #tpu.dot_dimension_numbers<[1], [0], [0], [1], [0, 0, 1, 1], [], []>} : vector<64x64xbf16>, vector<64x256xbf16>, vector<64x256xf32> -> vector<64x256xf32>
    %c0_32 = arith.constant 0 : index
    %c0_33 = arith.constant 0 : index
    %c0_34 = arith.constant 0 : index
    %68 = vector.load %arg15[%c0_32, %c0_33, %c0_34] : memref<2x64x1xf32, #tpu.memory_space<vmem>>, vector<1x64x1xf32>
    %69 = vector.shape_cast %68 : vector<1x64x1xf32> to vector<64x1xf32>
    %70 = vector.broadcast %69 : vector<64x1xf32> to vector<64x256xf32>
    %71 = arith.addf %67, %70 : vector<64x256xf32>
    %72 = vector.extract_strided_slice %71 {offsets = [0, 0], sizes = [32, 256], strides = [1, 1]} : vector<64x256xf32> to vector<32x256xf32>
    %73 = arith.negf %72 : vector<32x256xf32>
    %74 = math.exp %73 : vector<32x256xf32>
    %cst_35 = arith.constant 1.000000e+00 : f32
    %75 = vector.broadcast %cst_35 : f32 to vector<32x256xf32>
    %76 = arith.addf %75, %74 : vector<32x256xf32>
    %77 = arith.divf %75, %76 : vector<32x256xf32>
    %78 = vector.extract_strided_slice %71 {offsets = [32, 0], sizes = [32, 256], strides = [1, 1]} : vector<64x256xf32> to vector<32x256xf32>
    %79 = arith.negf %78 : vector<32x256xf32>
    %80 = math.exp %79 : vector<32x256xf32>
    %cst_36 = arith.constant 1.000000e+00 : f32
    %81 = vector.broadcast %cst_36 : f32 to vector<32x256xf32>
    %82 = arith.addf %81, %80 : vector<32x256xf32>
    %83 = arith.divf %81, %82 : vector<32x256xf32>
    %c0_37 = arith.constant 0 : index
    %c0_38 = arith.constant 0 : index
    %c0_39 = arith.constant 0 : index
    %c0_40 = arith.constant 0 : index
    %84 = vector.load %arg16[%c0_37, %c0_38, %c0_39, %c0_40] : memref<2x2x32x32xbf16, #tpu.memory_space<vmem>>, vector<1x1x32x32xbf16>
    %85 = vector.shape_cast %84 : vector<1x1x32x32xbf16> to vector<32x32xbf16>
    %cst_41 = arith.constant dense<0.000000e+00> : vector<32x256xf32>
    %86 = tpu.matmul %85, %62, %cst_41 {dimension_numbers = #tpu.dot_dimension_numbers<[1], [0], [0], [1], [0, 0, 1, 1], [], []>} : vector<32x32xbf16>, vector<32x256xbf16>, vector<32x256xf32> -> vector<32x256xf32>
    %c0_42 = arith.constant 0 : index
    %c0_43 = arith.constant 0 : index
    %c0_44 = arith.constant 0 : index
    %c0_45 = arith.constant 0 : index
    %87 = vector.load %arg17[%c0_42, %c0_43, %c0_44, %c0_45] : memref<2x2x32x1xf32, #tpu.memory_space<vmem>>, vector<1x1x32x1xf32>
    %88 = vector.shape_cast %87 : vector<1x1x32x1xf32> to vector<32x1xf32>
    %89 = vector.broadcast %88 : vector<32x1xf32> to vector<32x256xf32>
    %90 = arith.addf %86, %89 : vector<32x256xf32>
    %c0_46 = arith.constant 0 : index
    %c1 = arith.constant 1 : index
    %c0_47 = arith.constant 0 : index
    %c0_48 = arith.constant 0 : index
    %91 = vector.load %arg16[%c0_46, %c1, %c0_47, %c0_48] : memref<2x2x32x32xbf16, #tpu.memory_space<vmem>>, vector<1x1x32x32xbf16>
    %92 = vector.shape_cast %91 : vector<1x1x32x32xbf16> to vector<32x32xbf16>
    %cst_49 = arith.constant dense<0.000000e+00> : vector<32x256xf32>
    %93 = tpu.matmul %92, %63, %cst_49 {dimension_numbers = #tpu.dot_dimension_numbers<[1], [0], [0], [1], [0, 0, 1, 1], [], []>} : vector<32x32xbf16>, vector<32x256xbf16>, vector<32x256xf32> -> vector<32x256xf32>
    %c0_50 = arith.constant 0 : index
    %c1_51 = arith.constant 1 : index
    %c0_52 = arith.constant 0 : index
    %c0_53 = arith.constant 0 : index
    %94 = vector.load %arg17[%c0_50, %c1_51, %c0_52, %c0_53] : memref<2x2x32x1xf32, #tpu.memory_space<vmem>>, vector<1x1x32x1xf32>
    %95 = vector.shape_cast %94 : vector<1x1x32x1xf32> to vector<32x1xf32>
    %96 = vector.broadcast %95 : vector<32x1xf32> to vector<32x256xf32>
    %97 = arith.addf %93, %96 : vector<32x256xf32>
    %98 = arith.mulf %77, %97 : vector<32x256xf32>
    %99 = arith.addf %90, %98 : vector<32x256xf32>
    %100 = math.tanh %99 : vector<32x256xf32>
    %101 = arith.subf %61, %100 : vector<32x256xf32>
    %102 = arith.mulf %83, %101 : vector<32x256xf32>
    %103 = arith.addf %100, %102 : vector<32x256xf32>
    %c1_54 = arith.constant 1 : index
    %c0_55 = arith.constant 0 : index
    %c0_56 = arith.constant 0 : index
    %104 = vector.load %arg13[%c1_54, %c0_55, %c0_56] : memref<2x32x1xf32, #tpu.memory_space<vmem>>, vector<1x32x1xf32>
    %105 = vector.shape_cast %104 : vector<1x32x1xf32> to vector<32x1xf32>
    %c17_i32_57 = arith.constant 17 : i32
    %106 = tpu.dynamic_rotate %103 by %c17_i32_57 dim 1 : vector<32x256xf32>, i32 -> vector<32x256xf32>
    %c16_i32_58 = arith.constant 16 : i32
    %107 = tpu.dynamic_rotate %103 by %c16_i32_58 dim 1 : vector<32x256xf32>, i32 -> vector<32x256xf32>
    %c15_i32_59 = arith.constant 15 : i32
    %108 = tpu.dynamic_rotate %103 by %c15_i32_59 dim 1 : vector<32x256xf32>, i32 -> vector<32x256xf32>
    %c1_i32_60 = arith.constant 1 : i32
    %109 = tpu.dynamic_rotate %103 by %c1_i32_60 dim 1 : vector<32x256xf32>, i32 -> vector<32x256xf32>
    %c255_i32_61 = arith.constant 255 : i32
    %110 = tpu.dynamic_rotate %103 by %c255_i32_61 dim 1 : vector<32x256xf32>, i32 -> vector<32x256xf32>
    %c241_i32_62 = arith.constant 241 : i32
    %111 = tpu.dynamic_rotate %103 by %c241_i32_62 dim 1 : vector<32x256xf32>, i32 -> vector<32x256xf32>
    %c240_i32_63 = arith.constant 240 : i32
    %112 = tpu.dynamic_rotate %103 by %c240_i32_63 dim 1 : vector<32x256xf32>, i32 -> vector<32x256xf32>
    %c239_i32_64 = arith.constant 239 : i32
    %113 = tpu.dynamic_rotate %103 by %c239_i32_64 dim 1 : vector<32x256xf32>, i32 -> vector<32x256xf32>
    %114 = tpu.concatenate %106, %107, %108, %109, %103, %110, %111, %112, %113 in 0 : vector<32x256xf32>, vector<32x256xf32>, vector<32x256xf32>, vector<32x256xf32>, vector<32x256xf32>, vector<32x256xf32>, vector<32x256xf32>, vector<32x256xf32>, vector<32x256xf32> -> vector<288x256xf32>
    %c0_65 = arith.constant 0 : index
    %c0_66 = arith.constant 0 : index
    %115 = vector.load %arg9[%c0_65, %c0_66] : memref<288x256xf32, #tpu.memory_space<vmem>>, vector<288x256xf32>
    %116 = arith.mulf %114, %115 : vector<288x256xf32>
    %117 = arith.truncf %116 : vector<288x256xf32> to vector<288x256xbf16>
    %c0_67 = arith.constant 0 : index
    %c0_68 = arith.constant 0 : index
    %118 = vector.load %arg11[%c0_67, %c0_68] : memref<32x288xbf16, #tpu.memory_space<vmem>>, vector<32x288xbf16>
    %cst_69 = arith.constant dense<0.000000e+00> : vector<32x256xf32>
    %119 = tpu.matmul %118, %117, %cst_69 {dimension_numbers = #tpu.dot_dimension_numbers<[1], [0], [0], [1], [0, 0, 1, 1], [], []>} : vector<32x288xbf16>, vector<288x256xbf16>, vector<32x256xf32> -> vector<32x256xf32>
    %120 = vector.broadcast %105 : vector<32x1xf32> to vector<32x256xf32>
    %121 = arith.addf %119, %120 : vector<32x256xf32>
    %cst_70 = arith.constant 0.000000e+00 : f32
    %122 = vector.broadcast %cst_70 : f32 to vector<32x256xf32>
    %123 = arith.maximumf %121, %122 : vector<32x256xf32>
    %c0_71 = arith.constant 0 : index
    %c0_72 = arith.constant 0 : index
    %c0_73 = arith.constant 0 : index
    %124 = vector.load %arg7[%c0_71, %c0_72, %c0_73] : memref<1x32x256xf32, #tpu.memory_space<vmem>>, vector<1x32x256xf32>
    %125 = vector.shape_cast %124 : vector<1x32x256xf32> to vector<32x256xf32>
    %126 = arith.truncf %123 : vector<32x256xf32> to vector<32x256xbf16>
    %127 = arith.truncf %125 : vector<32x256xf32> to vector<32x256xbf16>
    %128 = tpu.concatenate %126, %127 in 0 : vector<32x256xbf16>, vector<32x256xbf16> -> vector<64x256xbf16>
    %c1_74 = arith.constant 1 : index
    %c0_75 = arith.constant 0 : index
    %c0_76 = arith.constant 0 : index
    %129 = vector.load %arg14[%c1_74, %c0_75, %c0_76] : memref<2x64x64xbf16, #tpu.memory_space<vmem>>, vector<1x64x64xbf16>
    %130 = vector.shape_cast %129 : vector<1x64x64xbf16> to vector<64x64xbf16>
    %cst_77 = arith.constant dense<0.000000e+00> : vector<64x256xf32>
    %131 = tpu.matmul %130, %128, %cst_77 {dimension_numbers = #tpu.dot_dimension_numbers<[1], [0], [0], [1], [0, 0, 1, 1], [], []>} : vector<64x64xbf16>, vector<64x256xbf16>, vector<64x256xf32> -> vector<64x256xf32>
    %c1_78 = arith.constant 1 : index
    %c0_79 = arith.constant 0 : index
    %c0_80 = arith.constant 0 : index
    %132 = vector.load %arg15[%c1_78, %c0_79, %c0_80] : memref<2x64x1xf32, #tpu.memory_space<vmem>>, vector<1x64x1xf32>
    %133 = vector.shape_cast %132 : vector<1x64x1xf32> to vector<64x1xf32>
    %134 = vector.broadcast %133 : vector<64x1xf32> to vector<64x256xf32>
    %135 = arith.addf %131, %134 : vector<64x256xf32>
    %136 = vector.extract_strided_slice %135 {offsets = [0, 0], sizes = [32, 256], strides = [1, 1]} : vector<64x256xf32> to vector<32x256xf32>
    %137 = arith.negf %136 : vector<32x256xf32>
    %138 = math.exp %137 : vector<32x256xf32>
    %cst_81 = arith.constant 1.000000e+00 : f32
    %139 = vector.broadcast %cst_81 : f32 to vector<32x256xf32>
    %140 = arith.addf %139, %138 : vector<32x256xf32>
    %141 = arith.divf %139, %140 : vector<32x256xf32>
    %142 = vector.extract_strided_slice %135 {offsets = [32, 0], sizes = [32, 256], strides = [1, 1]} : vector<64x256xf32> to vector<32x256xf32>
    %143 = arith.negf %142 : vector<32x256xf32>
    %144 = math.exp %143 : vector<32x256xf32>
    %cst_82 = arith.constant 1.000000e+00 : f32
    %145 = vector.broadcast %cst_82 : f32 to vector<32x256xf32>
    %146 = arith.addf %145, %144 : vector<32x256xf32>
    %147 = arith.divf %145, %146 : vector<32x256xf32>
    %c1_83 = arith.constant 1 : index
    %c0_84 = arith.constant 0 : index
    %c0_85 = arith.constant 0 : index
    %c0_86 = arith.constant 0 : index
    %148 = vector.load %arg16[%c1_83, %c0_84, %c0_85, %c0_86] : memref<2x2x32x32xbf16, #tpu.memory_space<vmem>>, vector<1x1x32x32xbf16>
    %149 = vector.shape_cast %148 : vector<1x1x32x32xbf16> to vector<32x32xbf16>
    %cst_87 = arith.constant dense<0.000000e+00> : vector<32x256xf32>
    %150 = tpu.matmul %149, %126, %cst_87 {dimension_numbers = #tpu.dot_dimension_numbers<[1], [0], [0], [1], [0, 0, 1, 1], [], []>} : vector<32x32xbf16>, vector<32x256xbf16>, vector<32x256xf32> -> vector<32x256xf32>
    %c1_88 = arith.constant 1 : index
    %c0_89 = arith.constant 0 : index
    %c0_90 = arith.constant 0 : index
    %c0_91 = arith.constant 0 : index
    %151 = vector.load %arg17[%c1_88, %c0_89, %c0_90, %c0_91] : memref<2x2x32x1xf32, #tpu.memory_space<vmem>>, vector<1x1x32x1xf32>
    %152 = vector.shape_cast %151 : vector<1x1x32x1xf32> to vector<32x1xf32>
    %153 = vector.broadcast %152 : vector<32x1xf32> to vector<32x256xf32>
    %154 = arith.addf %150, %153 : vector<32x256xf32>
    %c1_92 = arith.constant 1 : index
    %c1_93 = arith.constant 1 : index
    %c0_94 = arith.constant 0 : index
    %c0_95 = arith.constant 0 : index
    %155 = vector.load %arg16[%c1_92, %c1_93, %c0_94, %c0_95] : memref<2x2x32x32xbf16, #tpu.memory_space<vmem>>, vector<1x1x32x32xbf16>
    %156 = vector.shape_cast %155 : vector<1x1x32x32xbf16> to vector<32x32xbf16>
    %cst_96 = arith.constant dense<0.000000e+00> : vector<32x256xf32>
    %157 = tpu.matmul %156, %127, %cst_96 {dimension_numbers = #tpu.dot_dimension_numbers<[1], [0], [0], [1], [0, 0, 1, 1], [], []>} : vector<32x32xbf16>, vector<32x256xbf16>, vector<32x256xf32> -> vector<32x256xf32>
    %c1_97 = arith.constant 1 : index
    %c1_98 = arith.constant 1 : index
    %c0_99 = arith.constant 0 : index
    %c0_100 = arith.constant 0 : index
    %158 = vector.load %arg17[%c1_97, %c1_98, %c0_99, %c0_100] : memref<2x2x32x1xf32, #tpu.memory_space<vmem>>, vector<1x1x32x1xf32>
    %159 = vector.shape_cast %158 : vector<1x1x32x1xf32> to vector<32x1xf32>
    %160 = vector.broadcast %159 : vector<32x1xf32> to vector<32x256xf32>
    %161 = arith.addf %157, %160 : vector<32x256xf32>
    %162 = arith.mulf %141, %161 : vector<32x256xf32>
    %163 = arith.addf %154, %162 : vector<32x256xf32>
    %164 = math.tanh %163 : vector<32x256xf32>
    %165 = arith.subf %125, %164 : vector<32x256xf32>
    %166 = arith.mulf %147, %165 : vector<32x256xf32>
    %167 = arith.addf %164, %166 : vector<32x256xf32>
    %c17_i32_101 = arith.constant 17 : i32
    %168 = tpu.dynamic_rotate %167 by %c17_i32_101 dim 1 : vector<32x256xf32>, i32 -> vector<32x256xf32>
    %c16_i32_102 = arith.constant 16 : i32
    %169 = tpu.dynamic_rotate %167 by %c16_i32_102 dim 1 : vector<32x256xf32>, i32 -> vector<32x256xf32>
    %c15_i32_103 = arith.constant 15 : i32
    %170 = tpu.dynamic_rotate %167 by %c15_i32_103 dim 1 : vector<32x256xf32>, i32 -> vector<32x256xf32>
    %c1_i32_104 = arith.constant 1 : i32
    %171 = tpu.dynamic_rotate %167 by %c1_i32_104 dim 1 : vector<32x256xf32>, i32 -> vector<32x256xf32>
    %c255_i32_105 = arith.constant 255 : i32
    %172 = tpu.dynamic_rotate %167 by %c255_i32_105 dim 1 : vector<32x256xf32>, i32 -> vector<32x256xf32>
    %c241_i32_106 = arith.constant 241 : i32
    %173 = tpu.dynamic_rotate %167 by %c241_i32_106 dim 1 : vector<32x256xf32>, i32 -> vector<32x256xf32>
    %c240_i32_107 = arith.constant 240 : i32
    %174 = tpu.dynamic_rotate %167 by %c240_i32_107 dim 1 : vector<32x256xf32>, i32 -> vector<32x256xf32>
    %c239_i32_108 = arith.constant 239 : i32
    %175 = tpu.dynamic_rotate %167 by %c239_i32_108 dim 1 : vector<32x256xf32>, i32 -> vector<32x256xf32>
    %176 = tpu.concatenate %168, %169, %170, %171, %167, %172, %173, %174, %175 in 0 : vector<32x256xf32>, vector<32x256xf32>, vector<32x256xf32>, vector<32x256xf32>, vector<32x256xf32>, vector<32x256xf32>, vector<32x256xf32>, vector<32x256xf32>, vector<32x256xf32> -> vector<288x256xf32>
    %c0_109 = arith.constant 0 : index
    %c0_110 = arith.constant 0 : index
    %177 = vector.load %arg9[%c0_109, %c0_110] : memref<288x256xf32, #tpu.memory_space<vmem>>, vector<288x256xf32>
    %178 = arith.mulf %176, %177 : vector<288x256xf32>
    %179 = arith.truncf %178 : vector<288x256xf32> to vector<288x256xbf16>
    %c0_111 = arith.constant 0 : index
    %c0_112 = arith.constant 0 : index
    %180 = vector.load %arg12[%c0_111, %c0_112] : memref<2x288xbf16, #tpu.memory_space<vmem>>, vector<2x288xbf16>
    %cst_113 = arith.constant dense<0.000000e+00> : vector<2x256xf32>
    %181 = tpu.matmul %180, %179, %cst_113 {dimension_numbers = #tpu.dot_dimension_numbers<[1], [0], [0], [1], [0, 0, 1, 1], [], []>} : vector<2x288xbf16>, vector<288x256xbf16>, vector<2x256xf32> -> vector<2x256xf32>
    %182 = arith.addf %19, %181 : vector<2x256xf32>
    %c0_114 = arith.constant 0 : index
    %c0_115 = arith.constant 0 : index
    %c0_116 = arith.constant 0 : index
    %183 = vector.load %arg18[%c0_114, %c0_115, %c0_116] : memref<1x2x256xf32, #tpu.memory_space<vmem>>, vector<1x2x256xf32>
    %184 = vector.shape_cast %183 : vector<1x2x256xf32> to vector<2x256xf32>
    %185 = vector.shape_cast %182 : vector<2x256xf32> to vector<1x2x256xf32>
    tpu.vector_store %arg18[%c0_114, %c0_115, %c0_116], %185 {strides = array<i32>} : memref<1x2x256xf32, #tpu.memory_space<vmem>>, vector<1x2x256xf32>,
    %c0_117 = arith.constant 0 : index
    %c0_118 = arith.constant 0 : index
    %c0_119 = arith.constant 0 : index
    %186 = vector.load %arg19[%c0_117, %c0_118, %c0_119] : memref<1x32x256xf32, #tpu.memory_space<vmem>>, vector<1x32x256xf32>
    %187 = vector.shape_cast %186 : vector<1x32x256xf32> to vector<32x256xf32>
    %188 = vector.shape_cast %103 : vector<32x256xf32> to vector<1x32x256xf32>
    tpu.vector_store %arg19[%c0_117, %c0_118, %c0_119], %188 {strides = array<i32>} : memref<1x32x256xf32, #tpu.memory_space<vmem>>, vector<1x32x256xf32>,
    %c0_120 = arith.constant 0 : index
    %c0_121 = arith.constant 0 : index
    %c0_122 = arith.constant 0 : index
    %189 = vector.load %arg20[%c0_120, %c0_121, %c0_122] : memref<1x32x256xf32, #tpu.memory_space<vmem>>, vector<1x32x256xf32>
    %190 = vector.shape_cast %189 : vector<1x32x256xf32> to vector<32x256xf32>
    %191 = vector.shape_cast %167 : vector<32x256xf32> to vector<1x32x256xf32>
    tpu.vector_store %arg20[%c0_120, %c0_121, %c0_122], %191 {strides = array<i32>} : memref<1x32x256xf32, #tpu.memory_space<vmem>>, vector<1x32x256xf32>,
    %192 = vector.extract_strided_slice %182 {offsets = [0, 0], sizes = [1, 256], strides = [1, 1]} : vector<2x256xf32> to vector<1x256xf32>
    %193 = vector.extract_strided_slice %182 {offsets = [1, 0], sizes = [1, 256], strides = [1, 1]} : vector<2x256xf32> to vector<1x256xf32>
    %194 = vector.broadcast %192 : vector<1x256xf32> to vector<4x256xf32>
    %195 = arith.mulf %194, %5 : vector<4x256xf32>
    %196 = vector.broadcast %193 : vector<1x256xf32> to vector<4x256xf32>
    %197 = arith.mulf %196, %7 : vector<4x256xf32>
    %198 = arith.subf %195, %197 : vector<4x256xf32>
    %c0_123 = arith.constant 0 : index
    %c0_124 = arith.constant 0 : index
    %c0_125 = arith.constant 0 : index
    %199 = vector.load %arg21[%c0_123, %c0_124, %c0_125] : memref<1x4x256xf32, #tpu.memory_space<vmem>>, vector<1x4x256xf32>
    %200 = vector.shape_cast %199 : vector<1x4x256xf32> to vector<4x256xf32>
    %201 = vector.shape_cast %198 : vector<4x256xf32> to vector<1x4x256xf32>
    tpu.vector_store %arg21[%c0_123, %c0_124, %c0_125], %201 {strides = array<i32>} : memref<1x4x256xf32, #tpu.memory_space<vmem>>, vector<1x4x256xf32>,
    %202 = vector.broadcast %192 : vector<1x256xf32> to vector<4x256xf32>
    %203 = arith.mulf %202, %7 : vector<4x256xf32>
    %204 = vector.broadcast %193 : vector<1x256xf32> to vector<4x256xf32>
    %205 = arith.mulf %204, %5 : vector<4x256xf32>
    %206 = arith.addf %203, %205 : vector<4x256xf32>
    %c0_126 = arith.constant 0 : index
    %c0_127 = arith.constant 0 : index
    %c0_128 = arith.constant 0 : index
    %207 = vector.load %arg22[%c0_126, %c0_127, %c0_128] : memref<1x4x256xf32, #tpu.memory_space<vmem>>, vector<1x4x256xf32>
    %208 = vector.shape_cast %207 : vector<1x4x256xf32> to vector<4x256xf32>
    %209 = vector.shape_cast %206 : vector<4x256xf32> to vector<1x4x256xf32>
    tpu.vector_store %arg22[%c0_126, %c0_127, %c0_128], %209 {strides = array<i32>} : memref<1x4x256xf32, #tpu.memory_space<vmem>>, vector<1x4x256xf32>,
    return
  }
  func.func @transform_0(%arg0: i32) -> (i32, i32, i32) {
    %c0_i32 = arith.constant 0 : i32
    %c0_i32_0 = arith.constant 0 : i32
    %c0_i32_1 = arith.constant 0 : i32
    return %arg0, %c0_i32, %c0_i32_0 : i32, i32, i32
  }
  func.func @transform_1(%arg0: i32) -> (i32, i32, i32) {
    %c0_i32 = arith.constant 0 : i32
    %c0_i32_0 = arith.constant 0 : i32
    %c0_i32_1 = arith.constant 0 : i32
    return %arg0, %c0_i32, %c0_i32_0 : i32, i32, i32
  }
  func.func @transform_2(%arg0: i32) -> (i32, i32, i32) {
    %c0_i32 = arith.constant 0 : i32
    %c0_i32_0 = arith.constant 0 : i32
    %c0_i32_1 = arith.constant 0 : i32
    return %arg0, %c0_i32, %c0_i32_0 : i32, i32, i32
  }
  func.func @transform_3(%arg0: i32) -> (i32, i32, i32) {
    %c0_i32 = arith.constant 0 : i32
    %c0_i32_0 = arith.constant 0 : i32
    %c0_i32_1 = arith.constant 0 : i32
    return %arg0, %c0_i32, %c0_i32_0 : i32, i32, i32
  }
  func.func @transform_4(%arg0: i32) -> (i32, i32, i32) {
    %c0_i32 = arith.constant 0 : i32
    %c0_i32_0 = arith.constant 0 : i32
    %c0_i32_1 = arith.constant 0 : i32
    return %arg0, %c0_i32, %c0_i32_0 : i32, i32, i32
  }
  func.func @transform_5(%arg0: i32) -> (i32, i32, i32) {
    %c0_i32 = arith.constant 0 : i32
    %c0_i32_0 = arith.constant 0 : i32
    %c0_i32_1 = arith.constant 0 : i32
    return %arg0, %c0_i32, %c0_i32_0 : i32, i32, i32
  }
  func.func @transform_6(%arg0: i32) -> (i32, i32, i32) {
    %c0_i32 = arith.constant 0 : i32
    %c0_i32_0 = arith.constant 0 : i32
    %c0_i32_1 = arith.constant 0 : i32
    return %arg0, %c0_i32, %c0_i32_0 : i32, i32, i32
  }
  func.func @transform_7(%arg0: i32) -> (i32, i32) {
    %c0_i32 = arith.constant 0 : i32
    %c0_i32_0 = arith.constant 0 : i32
    %c0_i32_1 = arith.constant 0 : i32
    return %c0_i32, %c0_i32_0 : i32, i32
  }
  func.func @transform_8(%arg0: i32) -> (i32, i32) {
    %c0_i32 = arith.constant 0 : i32
    %c0_i32_0 = arith.constant 0 : i32
    %c0_i32_1 = arith.constant 0 : i32
    return %c0_i32, %c0_i32_0 : i32, i32
  }
  func.func @transform_9(%arg0: i32) -> (i32, i32) {
    %c0_i32 = arith.constant 0 : i32
    %c0_i32_0 = arith.constant 0 : i32
    %c0_i32_1 = arith.constant 0 : i32
    return %c0_i32, %c0_i32_0 : i32, i32
  }
  func.func @transform_10(%arg0: i32) -> (i32, i32) {
    %c0_i32 = arith.constant 0 : i32
    %c0_i32_0 = arith.constant 0 : i32
    %c0_i32_1 = arith.constant 0 : i32
    return %c0_i32, %c0_i32_0 : i32, i32
  }
  func.func @transform_11(%arg0: i32) -> (i32, i32) {
    %c0_i32 = arith.constant 0 : i32
    %c0_i32_0 = arith.constant 0 : i32
    %c0_i32_1 = arith.constant 0 : i32
    return %c0_i32, %c0_i32_0 : i32, i32
  }
  func.func @transform_12(%arg0: i32) -> (i32, i32, i32) {
    %c0_i32 = arith.constant 0 : i32
    %c0_i32_0 = arith.constant 0 : i32
    %c0_i32_1 = arith.constant 0 : i32
    %c0_i32_2 = arith.constant 0 : i32
    return %c0_i32, %c0_i32_0, %c0_i32_1 : i32, i32, i32
  }
  func.func @transform_13(%arg0: i32) -> (i32, i32, i32) {
    %c0_i32 = arith.constant 0 : i32
    %c0_i32_0 = arith.constant 0 : i32
    %c0_i32_1 = arith.constant 0 : i32
    %c0_i32_2 = arith.constant 0 : i32
    return %c0_i32, %c0_i32_0, %c0_i32_1 : i32, i32, i32
  }
  func.func @transform_14(%arg0: i32) -> (i32, i32, i32) {
    %c0_i32 = arith.constant 0 : i32
    %c0_i32_0 = arith.constant 0 : i32
    %c0_i32_1 = arith.constant 0 : i32
    %c0_i32_2 = arith.constant 0 : i32
    return %c0_i32, %c0_i32_0, %c0_i32_1 : i32, i32, i32
  }
  func.func @transform_15(%arg0: i32) -> (i32, i32, i32, i32) {
    %c0_i32 = arith.constant 0 : i32
    %c0_i32_0 = arith.constant 0 : i32
    %c0_i32_1 = arith.constant 0 : i32
    %c0_i32_2 = arith.constant 0 : i32
    %c0_i32_3 = arith.constant 0 : i32
    return %c0_i32, %c0_i32_0, %c0_i32_1, %c0_i32_2 : i32, i32, i32, i32
  }
  func.func @transform_16(%arg0: i32) -> (i32, i32, i32, i32) {
    %c0_i32 = arith.constant 0 : i32
    %c0_i32_0 = arith.constant 0 : i32
    %c0_i32_1 = arith.constant 0 : i32
    %c0_i32_2 = arith.constant 0 : i32
    %c0_i32_3 = arith.constant 0 : i32
    return %c0_i32, %c0_i32_0, %c0_i32_1, %c0_i32_2 : i32, i32, i32, i32
  }
  func.func @transform_17(%arg0: i32) -> (i32, i32, i32) {
    %c0_i32 = arith.constant 0 : i32
    %c0_i32_0 = arith.constant 0 : i32
    %c0_i32_1 = arith.constant 0 : i32
    return %arg0, %c0_i32, %c0_i32_0 : i32, i32, i32
  }
  func.func @transform_18(%arg0: i32) -> (i32, i32, i32) {
    %c0_i32 = arith.constant 0 : i32
    %c0_i32_0 = arith.constant 0 : i32
    %c0_i32_1 = arith.constant 0 : i32
    return %arg0, %c0_i32, %c0_i32_0 : i32, i32, i32
  }
  func.func @transform_19(%arg0: i32) -> (i32, i32, i32) {
    %c0_i32 = arith.constant 0 : i32
    %c0_i32_0 = arith.constant 0 : i32
    %c0_i32_1 = arith.constant 0 : i32
    return %arg0, %c0_i32, %c0_i32_0 : i32, i32, i32
  }
  func.func @transform_20(%arg0: i32) -> (i32, i32, i32) {
    %c0_i32 = arith.constant 0 : i32
    %c0_i32_0 = arith.constant 0 : i32
    %c0_i32_1 = arith.constant 0 : i32
    return %arg0, %c0_i32, %c0_i32_0 : i32, i32, i32
  }
  func.func @transform_21(%arg0: i32) -> (i32, i32, i32) {
    %c0_i32 = arith.constant 0 : i32
    %c0_i32_0 = arith.constant 0 : i32
    %c0_i32_1 = arith.constant 0 : i32
    return %arg0, %c0_i32, %c0_i32_0 : i32, i32, i32
  }
}

module attributes {stable_mosaic.version = 11 : i64} {
  func.func @_rim_step_kernel(%arg0: i32, %arg1: memref<1x4x256xf32, #tpu.memory_space<vmem>>, %arg2: memref<1x4x256xf32, #tpu.memory_space<vmem>>, %arg3: memref<1x4x256xf32, #tpu.memory_space<vmem>>, %arg4: memref<1x4x256xf32, #tpu.memory_space<vmem>>, %arg5: memref<1x2x256xf32, #tpu.memory_space<vmem>>, %arg6: memref<1x32x256xf32, #tpu.memory_space<vmem>>, %arg7: memref<1x32x256xf32, #tpu.memory_space<vmem>>, %arg8: memref<128x256xf32, #tpu.memory_space<vmem>>, %arg9: memref<288x256xf32, #tpu.memory_space<vmem>>, %arg10: memref<32x128xbf16, #tpu.memory_space<vmem>>, %arg11: memref<32x288xbf16, #tpu.memory_space<vmem>>, %arg12: memref<2x288xbf16, #tpu.memory_space<vmem>>, %arg13: memref<2x32x1xf32, #tpu.memory_space<vmem>>, %arg14: memref<2x64x64xbf16, #tpu.memory_space<vmem>>, %arg15: memref<2x64x1xf32, #tpu.memory_space<vmem>>, %arg16: memref<2x2x32x32xbf16, #tpu.memory_space<vmem>>, %arg17: memref<2x2x32x1xf32, #tpu.memory_space<vmem>>, %arg18: memref<1x2x256xf32, #tpu.memory_space<vmem>>, %arg19: memref<1x32x256xf32, #tpu.memory_space<vmem>>, %arg20: memref<1x32x256xf32, #tpu.memory_space<vmem>>, %arg21: memref<1x4x256xf32, #tpu.memory_space<vmem>>, %arg22: memref<1x4x256xf32, #tpu.memory_space<vmem>>) attributes {dimension_semantics = [#tpu.dimension_semantics<parallel>], iteration_bounds = array<i64: 2>, scalar_prefetch = 0 : i64, scratch_operands = 0 : i64, tpu.core_type = #tpu.core_type<tc>, window_params = [{transform_indices = @transform_0, window_bounds = array<i64: 1, 4, 256>}, {transform_indices = @transform_1, window_bounds = array<i64: 1, 4, 256>}, {transform_indices = @transform_2, window_bounds = array<i64: 1, 4, 256>}, {transform_indices = @transform_3, window_bounds = array<i64: 1, 4, 256>}, {transform_indices = @transform_4, window_bounds = array<i64: 1, 2, 256>}, {transform_indices = @transform_5, window_bounds = array<i64: 1, 32, 256>}, {transform_indices = @transform_6, window_bounds = array<i64: 1, 32, 256>}, {pipeline_mode = #tpu.pipeline_mode<synchronous>, transform_indices = @transform_7, window_bounds = array<i64: 128, 256>}, {pipeline_mode = #tpu.pipeline_mode<synchronous>, transform_indices = @transform_8, window_bounds = array<i64: 288, 256>}, {pipeline_mode = #tpu.pipeline_mode<synchronous>, transform_indices = @transform_9, window_bounds = array<i64: 32, 128>}, {pipeline_mode = #tpu.pipeline_mode<synchronous>, transform_indices = @transform_10, window_bounds = array<i64: 32, 288>}, {pipeline_mode = #tpu.pipeline_mode<synchronous>, transform_indices = @transform_11, window_bounds = array<i64: 2, 288>}, {pipeline_mode = #tpu.pipeline_mode<synchronous>, transform_indices = @transform_12, window_bounds = array<i64: 2, 32, 1>}, {pipeline_mode = #tpu.pipeline_mode<synchronous>, transform_indices = @transform_13, window_bounds = array<i64: 2, 64, 64>}, {pipeline_mode = #tpu.pipeline_mode<synchronous>, transform_indices = @transform_14, window_bounds = array<i64: 2, 64, 1>}, {pipeline_mode = #tpu.pipeline_mode<synchronous>, transform_indices = @transform_15, window_bounds = array<i64: 2, 2, 32, 32>}, {pipeline_mode = #tpu.pipeline_mode<synchronous>, transform_indices = @transform_16, window_bounds = array<i64: 2, 2, 32, 1>}, {transform_indices = @transform_17, window_bounds = array<i64: 1, 2, 256>}, {transform_indices = @transform_18, window_bounds = array<i64: 1, 32, 256>}, {transform_indices = @transform_19, window_bounds = array<i64: 1, 32, 256>}, {transform_indices = @transform_20, window_bounds = array<i64: 1, 4, 256>}, {transform_indices = @transform_21, window_bounds = array<i64: 1, 4, 256>}]} {
    %c0 = arith.constant 0 : index
    %c0_0 = arith.constant 0 : index
    %c0_1 = arith.constant 0 : index
    %0 = vector.load %arg1[%c0, %c0_0, %c0_1] : memref<1x4x256xf32, #tpu.memory_space<vmem>>, vector<1x4x256xf32>
    %1 = vector.shape_cast %0 : vector<1x4x256xf32> to vector<4x256xf32>
    %c0_2 = arith.constant 0 : index
    %c0_3 = arith.constant 0 : index
    %c0_4 = arith.constant 0 : index
    %2 = vector.load %arg2[%c0_2, %c0_3, %c0_4] : memref<1x4x256xf32, #tpu.memory_space<vmem>>, vector<1x4x256xf32>
    %3 = vector.shape_cast %2 : vector<1x4x256xf32> to vector<4x256xf32>
    %c0_5 = arith.constant 0 : index
    %c0_6 = arith.constant 0 : index
    %c0_7 = arith.constant 0 : index
    %4 = vector.load %arg3[%c0_5, %c0_6, %c0_7] : memref<1x4x256xf32, #tpu.memory_space<vmem>>, vector<1x4x256xf32>
    %5 = vector.shape_cast %4 : vector<1x4x256xf32> to vector<4x256xf32>
    %c0_8 = arith.constant 0 : index
    %c0_9 = arith.constant 0 : index
    %c0_10 = arith.constant 0 : index
    %6 = vector.load %arg4[%c0_8, %c0_9, %c0_10] : memref<1x4x256xf32, #tpu.memory_space<vmem>>, vector<1x4x256xf32>
    %7 = vector.shape_cast %6 : vector<1x4x256xf32> to vector<4x256xf32>
    %8 = arith.mulf %1, %5 : vector<4x256xf32>
    %9 = arith.mulf %3, %7 : vector<4x256xf32>
    %10 = arith.addf %8, %9 : vector<4x256xf32>
    %cst = arith.constant dense<0.000000e+00> : vector<256xf32>
    %11 = vector.multi_reduction <add>, %10, %cst [0] : vector<4x256xf32> to vector<256xf32>
    %12 = vector.shape_cast %11 : vector<256xf32> to vector<1x256xf32>
    %13 = arith.mulf %3, %5 : vector<4x256xf32>
    %14 = arith.mulf %1, %7 : vector<4x256xf32>
    %15 = arith.subf %13, %14 : vector<4x256xf32>
    %cst_11 = arith.constant dense<0.000000e+00> : vector<256xf32>
    %16 = vector.multi_reduction <add>, %15, %cst_11 [0] : vector<4x256xf32> to vector<256xf32>
    %17 = vector.shape_cast %16 : vector<256xf32> to vector<1x256xf32>
    %c0_12 = arith.constant 0 : index
    %c0_13 = arith.constant 0 : index
    %c0_14 = arith.constant 0 : index
    %18 = vector.load %arg5[%c0_12, %c0_13, %c0_14] : memref<1x2x256xf32, #tpu.memory_space<vmem>>, vector<1x2x256xf32>
    %19 = vector.shape_cast %18 : vector<1x2x256xf32> to vector<2x256xf32>
    %20 = tpu.concatenate %19, %12, %17 in 0 : vector<2x256xf32>, vector<1x256xf32>, vector<1x256xf32> -> vector<4x256xf32>
    %c0_15 = arith.constant 0 : index
    %c0_16 = arith.constant 0 : index
    %c0_17 = arith.constant 0 : index
    %21 = vector.load %arg13[%c0_15, %c0_16, %c0_17] : memref<2x32x1xf32, #tpu.memory_space<vmem>>, vector<1x32x1xf32>
    %22 = vector.shape_cast %21 : vector<1x32x1xf32> to vector<32x1xf32>
    %c34_i32 = arith.constant 34 : i32
    %23 = tpu.dynamic_rotate %20 by %c34_i32 dim 1 : vector<4x256xf32>, i32 -> vector<4x256xf32>
    %c33_i32 = arith.constant 33 : i32
    %24 = tpu.dynamic_rotate %20 by %c33_i32 dim 1 : vector<4x256xf32>, i32 -> vector<4x256xf32>
    %c32_i32 = arith.constant 32 : i32
    %25 = tpu.dynamic_rotate %20 by %c32_i32 dim 1 : vector<4x256xf32>, i32 -> vector<4x256xf32>
    %c31_i32 = arith.constant 31 : i32
    %26 = tpu.dynamic_rotate %20 by %c31_i32 dim 1 : vector<4x256xf32>, i32 -> vector<4x256xf32>
    %c30_i32 = arith.constant 30 : i32
    %27 = tpu.dynamic_rotate %20 by %c30_i32 dim 1 : vector<4x256xf32>, i32 -> vector<4x256xf32>
    %c18_i32 = arith.constant 18 : i32
    %28 = tpu.dynamic_rotate %20 by %c18_i32 dim 1 : vector<4x256xf32>, i32 -> vector<4x256xf32>
    %c17_i32 = arith.constant 17 : i32
    %29 = tpu.dynamic_rotate %20 by %c17_i32 dim 1 : vector<4x256xf32>, i32 -> vector<4x256xf32>
    %c16_i32 = arith.constant 16 : i32
    %30 = tpu.dynamic_rotate %20 by %c16_i32 dim 1 : vector<4x256xf32>, i32 -> vector<4x256xf32>
    %c15_i32 = arith.constant 15 : i32
    %31 = tpu.dynamic_rotate %20 by %c15_i32 dim 1 : vector<4x256xf32>, i32 -> vector<4x256xf32>
    %c14_i32 = arith.constant 14 : i32
    %32 = tpu.dynamic_rotate %20 by %c14_i32 dim 1 : vector<4x256xf32>, i32 -> vector<4x256xf32>
    %c2_i32 = arith.constant 2 : i32
    %33 = tpu.dynamic_rotate %20 by %c2_i32 dim 1 : vector<4x256xf32>, i32 -> vector<4x256xf32>
    %c1_i32 = arith.constant 1 : i32
    %34 = tpu.dynamic_rotate %20 by %c1_i32 dim 1 : vector<4x256xf32>, i32 -> vector<4x256xf32>
    %c255_i32 = arith.constant 255 : i32
    %35 = tpu.dynamic_rotate %20 by %c255_i32 dim 1 : vector<4x256xf32>, i32 -> vector<4x256xf32>
    %c254_i32 = arith.constant 254 : i32
    %36 = tpu.dynamic_rotate %20 by %c254_i32 dim 1 : vector<4x256xf32>, i32 -> vector<4x256xf32>
    %c242_i32 = arith.constant 242 : i32
    %37 = tpu.dynamic_rotate %20 by %c242_i32 dim 1 : vector<4x256xf32>, i32 -> vector<4x256xf32>
    %c241_i32 = arith.constant 241 : i32
    %38 = tpu.dynamic_rotate %20 by %c241_i32 dim 1 : vector<4x256xf32>, i32 -> vector<4x256xf32>
    %c240_i32 = arith.constant 240 : i32
    %39 = tpu.dynamic_rotate %20 by %c240_i32 dim 1 : vector<4x256xf32>, i32 -> vector<4x256xf32>
    %c239_i32 = arith.constant 239 : i32
    %40 = tpu.dynamic_rotate %20 by %c239_i32 dim 1 : vector<4x256xf32>, i32 -> vector<4x256xf32>
    %c238_i32 = arith.constant 238 : i32
    %41 = tpu.dynamic_rotate %20 by %c238_i32 dim 1 : vector<4x256xf32>, i32 -> vector<4x256xf32>
    %c226_i32 = arith.constant 226 : i32
    %42 = tpu.dynamic_rotate %20 by %c226_i32 dim 1 : vector<4x256xf32>, i32 -> vector<4x256xf32>
    %c225_i32 = arith.constant 225 : i32
    %43 = tpu.dynamic_rotate %20 by %c225_i32 dim 1 : vector<4x256xf32>, i32 -> vector<4x256xf32>
    %c224_i32 = arith.constant 224 : i32
    %44 = tpu.dynamic_rotate %20 by %c224_i32 dim 1 : vector<4x256xf32>, i32 -> vector<4x256xf32>
    %c223_i32 = arith.constant 223 : i32
    %45 = tpu.dynamic_rotate %20 by %c223_i32 dim 1 : vector<4x256xf32>, i32 -> vector<4x256xf32>
    %c222_i32 = arith.constant 222 : i32
    %46 = tpu.dynamic_rotate %20 by %c222_i32 dim 1 : vector<4x256xf32>, i32 -> vector<4x256xf32>
    %cst_18 = arith.constant 0.000000e+00 : f32
    %47 = vector.broadcast %cst_18 : f32 to vector<28x256xf32>
    %48 = tpu.concatenate %23, %24, %25, %26, %27, %28, %29, %30, %31, %32, %33, %34, %20, %35, %36, %37 in 0 : vector<4x256xf32>, vector<4x256xf32>, vector<4x256xf32>, vector<4x256xf32>, vector<4x256xf32>, vector<4x256xf32>, vector<4x256xf32>, vector<4x256xf32>, vector<4x256xf32>, vector<4x256xf32>, vector<4x256xf32>, vector<4x256xf32>, vector<4x256xf32>, vector<4x256xf32>, vector<4x256xf32>, vector<4x256xf32> -> vector<64x256xf32>
    %49 = tpu.concatenate %38, %39, %40, %41, %42, %43, %44, %45, %46, %47 in 0 : vector<4x256xf32>, vector<4x256xf32>, vector<4x256xf32>, vector<4x256xf32>, vector<4x256xf32>, vector<4x256xf32>, vector<4x256xf32>, vector<4x256xf32>, vector<4x256xf32>, vector<28x256xf32> -> vector<64x256xf32>
    %50 = tpu.concatenate %48, %49 in 0 : vector<64x256xf32>, vector<64x256xf32> -> vector<128x256xf32>
    %c0_19 = arith.constant 0 : index
    %c0_20 = arith.constant 0 : index
    %51 = vector.load %arg8[%c0_19, %c0_20] : memref<128x256xf32, #tpu.memory_space<vmem>>, vector<128x256xf32>
    %52 = arith.mulf %50, %51 : vector<128x256xf32>
    %53 = arith.truncf %52 : vector<128x256xf32> to vector<128x256xbf16>
    %c0_21 = arith.constant 0 : index
    %c0_22 = arith.constant 0 : index
    %54 = vector.load %arg10[%c0_21, %c0_22] : memref<32x128xbf16, #tpu.memory_space<vmem>>, vector<32x128xbf16>
    %cst_23 = arith.constant dense<0.000000e+00> : vector<32x256xf32>
    %55 = tpu.matmul %54, %53, %cst_23 {dimension_numbers = #tpu.dot_dimension_numbers<[1], [0], [0], [1], [0, 0, 1, 1], [], []>} : vector<32x128xbf16>, vector<128x256xbf16>, vector<32x256xf32> -> vector<32x256xf32>
    %56 = vector.broadcast %22 : vector<32x1xf32> to vector<32x256xf32>
    %57 = arith.addf %55, %56 : vector<32x256xf32>
    %cst_24 = arith.constant 0.000000e+00 : f32
    %58 = vector.broadcast %cst_24 : f32 to vector<32x256xf32>
    %59 = arith.maximumf %57, %58 : vector<32x256xf32>
    %c0_25 = arith.constant 0 : index
    %c0_26 = arith.constant 0 : index
    %c0_27 = arith.constant 0 : index
    %60 = vector.load %arg6[%c0_25, %c0_26, %c0_27] : memref<1x32x256xf32, #tpu.memory_space<vmem>>, vector<1x32x256xf32>
    %61 = vector.shape_cast %60 : vector<1x32x256xf32> to vector<32x256xf32>
    %62 = arith.truncf %59 : vector<32x256xf32> to vector<32x256xbf16>
    %63 = arith.truncf %61 : vector<32x256xf32> to vector<32x256xbf16>
    %64 = tpu.concatenate %62, %63 in 0 : vector<32x256xbf16>, vector<32x256xbf16> -> vector<64x256xbf16>
    %c0_28 = arith.constant 0 : index
    %c0_29 = arith.constant 0 : index
    %c0_30 = arith.constant 0 : index
    %65 = vector.load %arg14[%c0_28, %c0_29, %c0_30] : memref<2x64x64xbf16, #tpu.memory_space<vmem>>, vector<1x64x64xbf16>
    %66 = vector.shape_cast %65 : vector<1x64x64xbf16> to vector<64x64xbf16>
    %cst_31 = arith.constant dense<0.000000e+00> : vector<64x256xf32>
    %67 = tpu.matmul %66, %64, %cst_31 {dimension_numbers = #tpu.dot_dimension_numbers<[1], [0], [0], [1], [0, 0, 1, 1], [], []>} : vector<64x64xbf16>, vector<64x256xbf16>, vector<64x256xf32> -> vector<64x256xf32>
    %c0_32 = arith.constant 0 : index
    %c0_33 = arith.constant 0 : index
    %c0_34 = arith.constant 0 : index
    %68 = vector.load %arg15[%c0_32, %c0_33, %c0_34] : memref<2x64x1xf32, #tpu.memory_space<vmem>>, vector<1x64x1xf32>
    %69 = vector.shape_cast %68 : vector<1x64x1xf32> to vector<64x1xf32>
    %70 = vector.broadcast %69 : vector<64x1xf32> to vector<64x256xf32>
    %71 = arith.addf %67, %70 : vector<64x256xf32>
    %72 = vector.extract_strided_slice %71 {offsets = [0, 0], sizes = [32, 256], strides = [1, 1]} : vector<64x256xf32> to vector<32x256xf32>
    %73 = arith.negf %72 : vector<32x256xf32>
    %74 = math.exp %73 : vector<32x256xf32>
    %cst_35 = arith.constant 1.000000e+00 : f32
    %75 = vector.broadcast %cst_35 : f32 to vector<32x256xf32>
    %76 = arith.addf %75, %74 : vector<32x256xf32>
    %77 = arith.divf %75, %76 : vector<32x256xf32>
    %78 = vector.extract_strided_slice %71 {offsets = [32, 0], sizes = [32, 256], strides = [1, 1]} : vector<64x256xf32> to vector<32x256xf32>
    %79 = arith.negf %78 : vector<32x256xf32>
    %80 = math.exp %79 : vector<32x256xf32>
    %cst_36 = arith.constant 1.000000e+00 : f32
    %81 = vector.broadcast %cst_36 : f32 to vector<32x256xf32>
    %82 = arith.addf %81, %80 : vector<32x256xf32>
    %83 = arith.divf %81, %82 : vector<32x256xf32>
    %c0_37 = arith.constant 0 : index
    %c0_38 = arith.constant 0 : index
    %c0_39 = arith.constant 0 : index
    %c0_40 = arith.constant 0 : index
    %84 = vector.load %arg16[%c0_37, %c0_38, %c0_39, %c0_40] : memref<2x2x32x32xbf16, #tpu.memory_space<vmem>>, vector<1x1x32x32xbf16>
    %85 = vector.shape_cast %84 : vector<1x1x32x32xbf16> to vector<32x32xbf16>
    %cst_41 = arith.constant dense<0.000000e+00> : vector<32x256xf32>
    %86 = tpu.matmul %85, %62, %cst_41 {dimension_numbers = #tpu.dot_dimension_numbers<[1], [0], [0], [1], [0, 0, 1, 1], [], []>} : vector<32x32xbf16>, vector<32x256xbf16>, vector<32x256xf32> -> vector<32x256xf32>
    %c0_42 = arith.constant 0 : index
    %c0_43 = arith.constant 0 : index
    %c0_44 = arith.constant 0 : index
    %c0_45 = arith.constant 0 : index
    %87 = vector.load %arg17[%c0_42, %c0_43, %c0_44, %c0_45] : memref<2x2x32x1xf32, #tpu.memory_space<vmem>>, vector<1x1x32x1xf32>
    %88 = vector.shape_cast %87 : vector<1x1x32x1xf32> to vector<32x1xf32>
    %89 = vector.broadcast %88 : vector<32x1xf32> to vector<32x256xf32>
    %90 = arith.addf %86, %89 : vector<32x256xf32>
    %c0_46 = arith.constant 0 : index
    %c1 = arith.constant 1 : index
    %c0_47 = arith.constant 0 : index
    %c0_48 = arith.constant 0 : index
    %91 = vector.load %arg16[%c0_46, %c1, %c0_47, %c0_48] : memref<2x2x32x32xbf16, #tpu.memory_space<vmem>>, vector<1x1x32x32xbf16>
    %92 = vector.shape_cast %91 : vector<1x1x32x32xbf16> to vector<32x32xbf16>
    %cst_49 = arith.constant dense<0.000000e+00> : vector<32x256xf32>
    %93 = tpu.matmul %92, %63, %cst_49 {dimension_numbers = #tpu.dot_dimension_numbers<[1], [0], [0], [1], [0, 0, 1, 1], [], []>} : vector<32x32xbf16>, vector<32x256xbf16>, vector<32x256xf32> -> vector<32x256xf32>
    %c0_50 = arith.constant 0 : index
    %c1_51 = arith.constant 1 : index
    %c0_52 = arith.constant 0 : index
    %c0_53 = arith.constant 0 : index
    %94 = vector.load %arg17[%c0_50, %c1_51, %c0_52, %c0_53] : memref<2x2x32x1xf32, #tpu.memory_space<vmem>>, vector<1x1x32x1xf32>
    %95 = vector.shape_cast %94 : vector<1x1x32x1xf32> to vector<32x1xf32>
    %96 = vector.broadcast %95 : vector<32x1xf32> to vector<32x256xf32>
    %97 = arith.addf %93, %96 : vector<32x256xf32>
    %98 = arith.mulf %77, %97 : vector<32x256xf32>
    %99 = arith.addf %90, %98 : vector<32x256xf32>
    %100 = math.tanh %99 : vector<32x256xf32>
    %101 = arith.subf %61, %100 : vector<32x256xf32>
    %102 = arith.mulf %83, %101 : vector<32x256xf32>
    %103 = arith.addf %100, %102 : vector<32x256xf32>
    %c1_54 = arith.constant 1 : index
    %c0_55 = arith.constant 0 : index
    %c0_56 = arith.constant 0 : index
    %104 = vector.load %arg13[%c1_54, %c0_55, %c0_56] : memref<2x32x1xf32, #tpu.memory_space<vmem>>, vector<1x32x1xf32>
    %105 = vector.shape_cast %104 : vector<1x32x1xf32> to vector<32x1xf32>
    %c17_i32_57 = arith.constant 17 : i32
    %106 = tpu.dynamic_rotate %103 by %c17_i32_57 dim 1 : vector<32x256xf32>, i32 -> vector<32x256xf32>
    %c16_i32_58 = arith.constant 16 : i32
    %107 = tpu.dynamic_rotate %103 by %c16_i32_58 dim 1 : vector<32x256xf32>, i32 -> vector<32x256xf32>
    %c15_i32_59 = arith.constant 15 : i32
    %108 = tpu.dynamic_rotate %103 by %c15_i32_59 dim 1 : vector<32x256xf32>, i32 -> vector<32x256xf32>
    %c1_i32_60 = arith.constant 1 : i32
    %109 = tpu.dynamic_rotate %103 by %c1_i32_60 dim 1 : vector<32x256xf32>, i32 -> vector<32x256xf32>
    %c255_i32_61 = arith.constant 255 : i32
    %110 = tpu.dynamic_rotate %103 by %c255_i32_61 dim 1 : vector<32x256xf32>, i32 -> vector<32x256xf32>
    %c241_i32_62 = arith.constant 241 : i32
    %111 = tpu.dynamic_rotate %103 by %c241_i32_62 dim 1 : vector<32x256xf32>, i32 -> vector<32x256xf32>
    %c240_i32_63 = arith.constant 240 : i32
    %112 = tpu.dynamic_rotate %103 by %c240_i32_63 dim 1 : vector<32x256xf32>, i32 -> vector<32x256xf32>
    %c239_i32_64 = arith.constant 239 : i32
    %113 = tpu.dynamic_rotate %103 by %c239_i32_64 dim 1 : vector<32x256xf32>, i32 -> vector<32x256xf32>
    %114 = tpu.concatenate %106, %107, %108, %109, %103, %110, %111, %112, %113 in 0 : vector<32x256xf32>, vector<32x256xf32>, vector<32x256xf32>, vector<32x256xf32>, vector<32x256xf32>, vector<32x256xf32>, vector<32x256xf32>, vector<32x256xf32>, vector<32x256xf32> -> vector<288x256xf32>
    %c0_65 = arith.constant 0 : index
    %c0_66 = arith.constant 0 : index
    %115 = vector.load %arg9[%c0_65, %c0_66] : memref<288x256xf32, #tpu.memory_space<vmem>>, vector<288x256xf32>
    %116 = arith.mulf %114, %115 : vector<288x256xf32>
    %117 = arith.truncf %116 : vector<288x256xf32> to vector<288x256xbf16>
    %c0_67 = arith.constant 0 : index
    %c0_68 = arith.constant 0 : index
    %118 = vector.load %arg11[%c0_67, %c0_68] : memref<32x288xbf16, #tpu.memory_space<vmem>>, vector<32x288xbf16>
    %cst_69 = arith.constant dense<0.000000e+00> : vector<32x256xf32>
    %119 = tpu.matmul %118, %117, %cst_69 {dimension_numbers = #tpu.dot_dimension_numbers<[1], [0], [0], [1], [0, 0, 1, 1], [], []>} : vector<32x288xbf16>, vector<288x256xbf16>, vector<32x256xf32> -> vector<32x256xf32>
    %120 = vector.broadcast %105 : vector<32x1xf32> to vector<32x256xf32>
    %121 = arith.addf %119, %120 : vector<32x256xf32>
    %cst_70 = arith.constant 0.000000e+00 : f32
    %122 = vector.broadcast %cst_70 : f32 to vector<32x256xf32>
    %123 = arith.maximumf %121, %122 : vector<32x256xf32>
    %c0_71 = arith.constant 0 : index
    %c0_72 = arith.constant 0 : index
    %c0_73 = arith.constant 0 : index
    %124 = vector.load %arg7[%c0_71, %c0_72, %c0_73] : memref<1x32x256xf32, #tpu.memory_space<vmem>>, vector<1x32x256xf32>
    %125 = vector.shape_cast %124 : vector<1x32x256xf32> to vector<32x256xf32>
    %126 = arith.truncf %123 : vector<32x256xf32> to vector<32x256xbf16>
    %127 = arith.truncf %125 : vector<32x256xf32> to vector<32x256xbf16>
    %128 = tpu.concatenate %126, %127 in 0 : vector<32x256xbf16>, vector<32x256xbf16> -> vector<64x256xbf16>
    %c1_74 = arith.constant 1 : index
    %c0_75 = arith.constant 0 : index
    %c0_76 = arith.constant 0 : index
    %129 = vector.load %arg14[%c1_74, %c0_75, %c0_76] : memref<2x64x64xbf16, #tpu.memory_space<vmem>>, vector<1x64x64xbf16>
    %130 = vector.shape_cast %129 : vector<1x64x64xbf16> to vector<64x64xbf16>
    %cst_77 = arith.constant dense<0.000000e+00> : vector<64x256xf32>
    %131 = tpu.matmul %130, %128, %cst_77 {dimension_numbers = #tpu.dot_dimension_numbers<[1], [0], [0], [1], [0, 0, 1, 1], [], []>} : vector<64x64xbf16>, vector<64x256xbf16>, vector<64x256xf32> -> vector<64x256xf32>
    %c1_78 = arith.constant 1 : index
    %c0_79 = arith.constant 0 : index
    %c0_80 = arith.constant 0 : index
    %132 = vector.load %arg15[%c1_78, %c0_79, %c0_80] : memref<2x64x1xf32, #tpu.memory_space<vmem>>, vector<1x64x1xf32>
    %133 = vector.shape_cast %132 : vector<1x64x1xf32> to vector<64x1xf32>
    %134 = vector.broadcast %133 : vector<64x1xf32> to vector<64x256xf32>
    %135 = arith.addf %131, %134 : vector<64x256xf32>
    %136 = vector.extract_strided_slice %135 {offsets = [0, 0], sizes = [32, 256], strides = [1, 1]} : vector<64x256xf32> to vector<32x256xf32>
    %137 = arith.negf %136 : vector<32x256xf32>
    %138 = math.exp %137 : vector<32x256xf32>
    %cst_81 = arith.constant 1.000000e+00 : f32
    %139 = vector.broadcast %cst_81 : f32 to vector<32x256xf32>
    %140 = arith.addf %139, %138 : vector<32x256xf32>
    %141 = arith.divf %139, %140 : vector<32x256xf32>
    %142 = vector.extract_strided_slice %135 {offsets = [32, 0], sizes = [32, 256], strides = [1, 1]} : vector<64x256xf32> to vector<32x256xf32>
    %143 = arith.negf %142 : vector<32x256xf32>
    %144 = math.exp %143 : vector<32x256xf32>
    %cst_82 = arith.constant 1.000000e+00 : f32
    %145 = vector.broadcast %cst_82 : f32 to vector<32x256xf32>
    %146 = arith.addf %145, %144 : vector<32x256xf32>
    %147 = arith.divf %145, %146 : vector<32x256xf32>
    %c1_83 = arith.constant 1 : index
    %c0_84 = arith.constant 0 : index
    %c0_85 = arith.constant 0 : index
    %c0_86 = arith.constant 0 : index
    %148 = vector.load %arg16[%c1_83, %c0_84, %c0_85, %c0_86] : memref<2x2x32x32xbf16, #tpu.memory_space<vmem>>, vector<1x1x32x32xbf16>
    %149 = vector.shape_cast %148 : vector<1x1x32x32xbf16> to vector<32x32xbf16>
    %cst_87 = arith.constant dense<0.000000e+00> : vector<32x256xf32>
    %150 = tpu.matmul %149, %126, %cst_87 {dimension_numbers = #tpu.dot_dimension_numbers<[1], [0], [0], [1], [0, 0, 1, 1], [], []>} : vector<32x32xbf16>, vector<32x256xbf16>, vector<32x256xf32> -> vector<32x256xf32>
    %c1_88 = arith.constant 1 : index
    %c0_89 = arith.constant 0 : index
    %c0_90 = arith.constant 0 : index
    %c0_91 = arith.constant 0 : index
    %151 = vector.load %arg17[%c1_88, %c0_89, %c0_90, %c0_91] : memref<2x2x32x1xf32, #tpu.memory_space<vmem>>, vector<1x1x32x1xf32>
    %152 = vector.shape_cast %151 : vector<1x1x32x1xf32> to vector<32x1xf32>
    %153 = vector.broadcast %152 : vector<32x1xf32> to vector<32x256xf32>
    %154 = arith.addf %150, %153 : vector<32x256xf32>
    %c1_92 = arith.constant 1 : index
    %c1_93 = arith.constant 1 : index
    %c0_94 = arith.constant 0 : index
    %c0_95 = arith.constant 0 : index
    %155 = vector.load %arg16[%c1_92, %c1_93, %c0_94, %c0_95] : memref<2x2x32x32xbf16, #tpu.memory_space<vmem>>, vector<1x1x32x32xbf16>
    %156 = vector.shape_cast %155 : vector<1x1x32x32xbf16> to vector<32x32xbf16>
    %cst_96 = arith.constant dense<0.000000e+00> : vector<32x256xf32>
    %157 = tpu.matmul %156, %127, %cst_96 {dimension_numbers = #tpu.dot_dimension_numbers<[1], [0], [0], [1], [0, 0, 1, 1], [], []>} : vector<32x32xbf16>, vector<32x256xbf16>, vector<32x256xf32> -> vector<32x256xf32>
    %c1_97 = arith.constant 1 : index
    %c1_98 = arith.constant 1 : index
    %c0_99 = arith.constant 0 : index
    %c0_100 = arith.constant 0 : index
    %158 = vector.load %arg17[%c1_97, %c1_98, %c0_99, %c0_100] : memref<2x2x32x1xf32, #tpu.memory_space<vmem>>, vector<1x1x32x1xf32>
    %159 = vector.shape_cast %158 : vector<1x1x32x1xf32> to vector<32x1xf32>
    %160 = vector.broadcast %159 : vector<32x1xf32> to vector<32x256xf32>
    %161 = arith.addf %157, %160 : vector<32x256xf32>
    %162 = arith.mulf %141, %161 : vector<32x256xf32>
    %163 = arith.addf %154, %162 : vector<32x256xf32>
    %164 = math.tanh %163 : vector<32x256xf32>
    %165 = arith.subf %125, %164 : vector<32x256xf32>
    %166 = arith.mulf %147, %165 : vector<32x256xf32>
    %167 = arith.addf %164, %166 : vector<32x256xf32>
    %c17_i32_101 = arith.constant 17 : i32
    %168 = tpu.dynamic_rotate %167 by %c17_i32_101 dim 1 : vector<32x256xf32>, i32 -> vector<32x256xf32>
    %c16_i32_102 = arith.constant 16 : i32
    %169 = tpu.dynamic_rotate %167 by %c16_i32_102 dim 1 : vector<32x256xf32>, i32 -> vector<32x256xf32>
    %c15_i32_103 = arith.constant 15 : i32
    %170 = tpu.dynamic_rotate %167 by %c15_i32_103 dim 1 : vector<32x256xf32>, i32 -> vector<32x256xf32>
    %c1_i32_104 = arith.constant 1 : i32
    %171 = tpu.dynamic_rotate %167 by %c1_i32_104 dim 1 : vector<32x256xf32>, i32 -> vector<32x256xf32>
    %c255_i32_105 = arith.constant 255 : i32
    %172 = tpu.dynamic_rotate %167 by %c255_i32_105 dim 1 : vector<32x256xf32>, i32 -> vector<32x256xf32>
    %c241_i32_106 = arith.constant 241 : i32
    %173 = tpu.dynamic_rotate %167 by %c241_i32_106 dim 1 : vector<32x256xf32>, i32 -> vector<32x256xf32>
    %c240_i32_107 = arith.constant 240 : i32
    %174 = tpu.dynamic_rotate %167 by %c240_i32_107 dim 1 : vector<32x256xf32>, i32 -> vector<32x256xf32>
    %c239_i32_108 = arith.constant 239 : i32
    %175 = tpu.dynamic_rotate %167 by %c239_i32_108 dim 1 : vector<32x256xf32>, i32 -> vector<32x256xf32>
    %176 = tpu.concatenate %168, %169, %170, %171, %167, %172, %173, %174, %175 in 0 : vector<32x256xf32>, vector<32x256xf32>, vector<32x256xf32>, vector<32x256xf32>, vector<32x256xf32>, vector<32x256xf32>, vector<32x256xf32>, vector<32x256xf32>, vector<32x256xf32> -> vector<288x256xf32>
    %c0_109 = arith.constant 0 : index
    %c0_110 = arith.constant 0 : index
    %177 = vector.load %arg9[%c0_109, %c0_110] : memref<288x256xf32, #tpu.memory_space<vmem>>, vector<288x256xf32>
    %178 = arith.mulf %176, %177 : vector<288x256xf32>
    %179 = arith.truncf %178 : vector<288x256xf32> to vector<288x256xbf16>
    %c0_111 = arith.constant 0 : index
    %c0_112 = arith.constant 0 : index
    %180 = vector.load %arg12[%c0_111, %c0_112] : memref<2x288xbf16, #tpu.memory_space<vmem>>, vector<2x288xbf16>
    %cst_113 = arith.constant dense<0.000000e+00> : vector<2x256xf32>
    %181 = tpu.matmul %180, %179, %cst_113 {dimension_numbers = #tpu.dot_dimension_numbers<[1], [0], [0], [1], [0, 0, 1, 1], [], []>} : vector<2x288xbf16>, vector<288x256xbf16>, vector<2x256xf32> -> vector<2x256xf32>
    %182 = arith.addf %19, %181 : vector<2x256xf32>
    %c0_114 = arith.constant 0 : index
    %c0_115 = arith.constant 0 : index
    %c0_116 = arith.constant 0 : index
    %183 = vector.load %arg18[%c0_114, %c0_115, %c0_116] : memref<1x2x256xf32, #tpu.memory_space<vmem>>, vector<1x2x256xf32>
    %184 = vector.shape_cast %183 : vector<1x2x256xf32> to vector<2x256xf32>
    %185 = vector.shape_cast %182 : vector<2x256xf32> to vector<1x2x256xf32>
    tpu.vector_store %arg18[%c0_114, %c0_115, %c0_116], %185 {strides = array<i32>} : memref<1x2x256xf32, #tpu.memory_space<vmem>>, vector<1x2x256xf32>,
    %c0_117 = arith.constant 0 : index
    %c0_118 = arith.constant 0 : index
    %c0_119 = arith.constant 0 : index
    %186 = vector.load %arg19[%c0_117, %c0_118, %c0_119] : memref<1x32x256xf32, #tpu.memory_space<vmem>>, vector<1x32x256xf32>
    %187 = vector.shape_cast %186 : vector<1x32x256xf32> to vector<32x256xf32>
    %188 = vector.shape_cast %103 : vector<32x256xf32> to vector<1x32x256xf32>
    tpu.vector_store %arg19[%c0_117, %c0_118, %c0_119], %188 {strides = array<i32>} : memref<1x32x256xf32, #tpu.memory_space<vmem>>, vector<1x32x256xf32>,
    %c0_120 = arith.constant 0 : index
    %c0_121 = arith.constant 0 : index
    %c0_122 = arith.constant 0 : index
    %189 = vector.load %arg20[%c0_120, %c0_121, %c0_122] : memref<1x32x256xf32, #tpu.memory_space<vmem>>, vector<1x32x256xf32>
    %190 = vector.shape_cast %189 : vector<1x32x256xf32> to vector<32x256xf32>
    %191 = vector.shape_cast %167 : vector<32x256xf32> to vector<1x32x256xf32>
    tpu.vector_store %arg20[%c0_120, %c0_121, %c0_122], %191 {strides = array<i32>} : memref<1x32x256xf32, #tpu.memory_space<vmem>>, vector<1x32x256xf32>,
    %192 = vector.extract_strided_slice %182 {offsets = [0, 0], sizes = [1, 256], strides = [1, 1]} : vector<2x256xf32> to vector<1x256xf32>
    %193 = vector.extract_strided_slice %182 {offsets = [1, 0], sizes = [1, 256], strides = [1, 1]} : vector<2x256xf32> to vector<1x256xf32>
    %194 = vector.broadcast %192 : vector<1x256xf32> to vector<4x256xf32>
    %195 = arith.mulf %194, %5 : vector<4x256xf32>
    %196 = vector.broadcast %193 : vector<1x256xf32> to vector<4x256xf32>
    %197 = arith.mulf %196, %7 : vector<4x256xf32>
    %198 = arith.subf %195, %197 : vector<4x256xf32>
    %c0_123 = arith.constant 0 : index
    %c0_124 = arith.constant 0 : index
    %c0_125 = arith.constant 0 : index
    %199 = vector.load %arg21[%c0_123, %c0_124, %c0_125] : memref<1x4x256xf32, #tpu.memory_space<vmem>>, vector<1x4x256xf32>
    %200 = vector.shape_cast %199 : vector<1x4x256xf32> to vector<4x256xf32>
    %201 = vector.shape_cast %198 : vector<4x256xf32> to vector<1x4x256xf32>
    tpu.vector_store %arg21[%c0_123, %c0_124, %c0_125], %201 {strides = array<i32>} : memref<1x4x256xf32, #tpu.memory_space<vmem>>, vector<1x4x256xf32>,
    %202 = vector.broadcast %192 : vector<1x256xf32> to vector<4x256xf32>
    %203 = arith.mulf %202, %7 : vector<4x256xf32>
    %204 = vector.broadcast %193 : vector<1x256xf32> to vector<4x256xf32>
    %205 = arith.mulf %204, %5 : vector<4x256xf32>
    %206 = arith.addf %203, %205 : vector<4x256xf32>
    %c0_126 = arith.constant 0 : index
    %c0_127 = arith.constant 0 : index
    %c0_128 = arith.constant 0 : index
    %207 = vector.load %arg22[%c0_126, %c0_127, %c0_128] : memref<1x4x256xf32, #tpu.memory_space<vmem>>, vector<1x4x256xf32>
    %208 = vector.shape_cast %207 : vector<1x4x256xf32> to vector<4x256xf32>
    %209 = vector.shape_cast %206 : vector<4x256xf32> to vector<1x4x256xf32>
    tpu.vector_store %arg22[%c0_126, %c0_127, %c0_128], %209 {strides = array<i32>} : memref<1x4x256xf32, #tpu.memory_space<vmem>>, vector<1x4x256xf32>,
    return
  }
  func.func @transform_0(%arg0: i32) -> (i32, i32, i32) {
    %c0_i32 = arith.constant 0 : i32
    %c0_i32_0 = arith.constant 0 : i32
    %c0_i32_1 = arith.constant 0 : i32
    return %arg0, %c0_i32, %c0_i32_0 : i32, i32, i32
  }
  func.func @transform_1(%arg0: i32) -> (i32, i32, i32) {
    %c0_i32 = arith.constant 0 : i32
    %c0_i32_0 = arith.constant 0 : i32
    %c0_i32_1 = arith.constant 0 : i32
    return %arg0, %c0_i32, %c0_i32_0 : i32, i32, i32
  }
  func.func @transform_2(%arg0: i32) -> (i32, i32, i32) {
    %c0_i32 = arith.constant 0 : i32
    %c0_i32_0 = arith.constant 0 : i32
    %c0_i32_1 = arith.constant 0 : i32
    return %arg0, %c0_i32, %c0_i32_0 : i32, i32, i32
  }
  func.func @transform_3(%arg0: i32) -> (i32, i32, i32) {
    %c0_i32 = arith.constant 0 : i32
    %c0_i32_0 = arith.constant 0 : i32
    %c0_i32_1 = arith.constant 0 : i32
    return %arg0, %c0_i32, %c0_i32_0 : i32, i32, i32
  }
  func.func @transform_4(%arg0: i32) -> (i32, i32, i32) {
    %c0_i32 = arith.constant 0 : i32
    %c0_i32_0 = arith.constant 0 : i32
    %c0_i32_1 = arith.constant 0 : i32
    return %arg0, %c0_i32, %c0_i32_0 : i32, i32, i32
  }
  func.func @transform_5(%arg0: i32) -> (i32, i32, i32) {
    %c0_i32 = arith.constant 0 : i32
    %c0_i32_0 = arith.constant 0 : i32
    %c0_i32_1 = arith.constant 0 : i32
    return %arg0, %c0_i32, %c0_i32_0 : i32, i32, i32
  }
  func.func @transform_6(%arg0: i32) -> (i32, i32, i32) {
    %c0_i32 = arith.constant 0 : i32
    %c0_i32_0 = arith.constant 0 : i32
    %c0_i32_1 = arith.constant 0 : i32
    return %arg0, %c0_i32, %c0_i32_0 : i32, i32, i32
  }
  func.func @transform_7(%arg0: i32) -> (i32, i32) {
    %c0_i32 = arith.constant 0 : i32
    %c0_i32_0 = arith.constant 0 : i32
    %c0_i32_1 = arith.constant 0 : i32
    return %c0_i32, %c0_i32_0 : i32, i32
  }
  func.func @transform_8(%arg0: i32) -> (i32, i32) {
    %c0_i32 = arith.constant 0 : i32
    %c0_i32_0 = arith.constant 0 : i32
    %c0_i32_1 = arith.constant 0 : i32
    return %c0_i32, %c0_i32_0 : i32, i32
  }
  func.func @transform_9(%arg0: i32) -> (i32, i32) {
    %c0_i32 = arith.constant 0 : i32
    %c0_i32_0 = arith.constant 0 : i32
    %c0_i32_1 = arith.constant 0 : i32
    return %c0_i32, %c0_i32_0 : i32, i32
  }
  func.func @transform_10(%arg0: i32) -> (i32, i32) {
    %c0_i32 = arith.constant 0 : i32
    %c0_i32_0 = arith.constant 0 : i32
    %c0_i32_1 = arith.constant 0 : i32
    return %c0_i32, %c0_i32_0 : i32, i32
  }
  func.func @transform_11(%arg0: i32) -> (i32, i32) {
    %c0_i32 = arith.constant 0 : i32
    %c0_i32_0 = arith.constant 0 : i32
    %c0_i32_1 = arith.constant 0 : i32
    return %c0_i32, %c0_i32_0 : i32, i32
  }
  func.func @transform_12(%arg0: i32) -> (i32, i32, i32) {
    %c0_i32 = arith.constant 0 : i32
    %c0_i32_0 = arith.constant 0 : i32
    %c0_i32_1 = arith.constant 0 : i32
    %c0_i32_2 = arith.constant 0 : i32
    return %c0_i32, %c0_i32_0, %c0_i32_1 : i32, i32, i32
  }
  func.func @transform_13(%arg0: i32) -> (i32, i32, i32) {
    %c0_i32 = arith.constant 0 : i32
    %c0_i32_0 = arith.constant 0 : i32
    %c0_i32_1 = arith.constant 0 : i32
    %c0_i32_2 = arith.constant 0 : i32
    return %c0_i32, %c0_i32_0, %c0_i32_1 : i32, i32, i32
  }
  func.func @transform_14(%arg0: i32) -> (i32, i32, i32) {
    %c0_i32 = arith.constant 0 : i32
    %c0_i32_0 = arith.constant 0 : i32
    %c0_i32_1 = arith.constant 0 : i32
    %c0_i32_2 = arith.constant 0 : i32
    return %c0_i32, %c0_i32_0, %c0_i32_1 : i32, i32, i32
  }
  func.func @transform_15(%arg0: i32) -> (i32, i32, i32, i32) {
    %c0_i32 = arith.constant 0 : i32
    %c0_i32_0 = arith.constant 0 : i32
    %c0_i32_1 = arith.constant 0 : i32
    %c0_i32_2 = arith.constant 0 : i32
    %c0_i32_3 = arith.constant 0 : i32
    return %c0_i32, %c0_i32_0, %c0_i32_1, %c0_i32_2 : i32, i32, i32, i32
  }
  func.func @transform_16(%arg0: i32) -> (i32, i32, i32, i32) {
    %c0_i32 = arith.constant 0 : i32
    %c0_i32_0 = arith.constant 0 : i32
    %c0_i32_1 = arith.constant 0 : i32
    %c0_i32_2 = arith.constant 0 : i32
    %c0_i32_3 = arith.constant 0 : i32
    return %c0_i32, %c0_i32_0, %c0_i32_1, %c0_i32_2 : i32, i32, i32, i32
  }
  func.func @transform_17(%arg0: i32) -> (i32, i32, i32) {
    %c0_i32 = arith.constant 0 : i32
    %c0_i32_0 = arith.constant 0 : i32
    %c0_i32_1 = arith.constant 0 : i32
    return %arg0, %c0_i32, %c0_i32_0 : i32, i32, i32
  }
  func.func @transform_18(%arg0: i32) -> (i32, i32, i32) {
    %c0_i32 = arith.constant 0 : i32
    %c0_i32_0 = arith.constant 0 : i32
    %c0_i32_1 = arith.constant 0 : i32
    return %arg0, %c0_i32, %c0_i32_0 : i32, i32, i32
  }
  func.func @transform_19(%arg0: i32) -> (i32, i32, i32) {
    %c0_i32 = arith.constant 0 : i32
    %c0_i32_0 = arith.constant 0 : i32
    %c0_i32_1 = arith.constant 0 : i32
    return %arg0, %c0_i32, %c0_i32_0 : i32, i32, i32
  }
  func.func @transform_20(%arg0: i32) -> (i32, i32, i32) {
    %c0_i32 = arith.constant 0 : i32
    %c0_i32_0 = arith.constant 0 : i32
    %c0_i32_1 = arith.constant 0 : i32
    return %arg0, %c0_i32, %c0_i32_0 : i32, i32, i32
  }
  func.func @transform_21(%arg0: i32) -> (i32, i32, i32) {
    %c0_i32 = arith.constant 0 : i32
    %c0_i32_0 = arith.constant 0 : i32
    %c0_i32_1 = arith.constant 0 : i32
    return %arg0, %c0_i32, %c0_i32_0 : i32, i32, i32
  }
}

</mosaic_0001>

<bundles_post_ra>
// kernel: squeeze.12
= control target key start
LH: loop header
LB: loop body
LE: loop exit
PB: predicated region body
PF: predicated region fallthrough
CT: control target
= control target key end

     0   :  { %vm35_vm0 = vcmask 1043458   ;;  %vm40_vm1 = vcmask 1045508   ;;  %vm45_vm2 = vcmask 1047558   ;;  %s79_s6 = smov 3  ;;  %s82_s7 = smov 12  ;;  %vm4_vm3 = vcmask 1047556   ;;  %s726_s0 = inlined_call_operand.vmem [shape: f32[2,4,16,16,1], index: 0, kind: input, shape index: {}]   ;;  %s727_s1 = inlined_call_operand.vmem [shape: f32[2,4,256], index: 1, kind: output, shape index: {}]  }
   0x1   :  { %v406_v0 = vld [vmem:[%s726_s0 + $0x6] ss:$16 sm:%s79_s6]   ;;  %s87_s12 = smov 48  ;;  %s92_s13 = smov 192  ;;  %vm6_vm4 = vcmask 130048   ;;  %vm49_vm5 = vcmask 1048448  }
   0x2   :  { %v407_v1 = vld [vmem:[%s726_s0 + $0x6] ss:$16 sm:%s82_s7]   ;;  %v408_v3 = vld [vmem:[%s726_s0 - $0x32] ss:$16 sm:%s87_s12]   ;;  %s30_s18 = smov 3  ;;  %s33_s21 = smov 12 }
   0x3   :  { %v85_v2 = vsel %vm35_vm0, %v407_v1, %v406_v0  ;;  %v409_v4 = vld [vmem:[%s726_s0 - $0x32] ss:$16 sm:%s92_s13]   ;;  %v398_v6 = vld [vmem:[%s726_s0 + $0x7] ss:$16 sm:%s30_s18]   ;;  %s38_s22 = smov 48  ;;  %s43_s27 = smov 192 }
   0x4   :  { %v90_v5 = vsel %vm40_vm1, %v408_v3, %v85_v2  ;;  %v399_v8 = vld [vmem:[%s726_s0 + $0x7] ss:$16 sm:%s33_s21]   ;;  %v400_v9 = vld [vmem:[%s726_s0 - $0x31] ss:$16 sm:%s38_s22]   ;;  %s464_s28 = smov 96   ;;  %s103_s2 = smov 3 }
   0x5   :  { %v95_v7 = vsel %vm45_vm2, %v409_v4, %v90_v5  ;;  %v36_v10 = vsel %vm35_vm0, %v399_v8, %v398_v6  ;;  %v401_v11 = vld [vmem:[%s726_s0 - $0x31] ss:$16 sm:%s43_s27]   ;;  %s106_s3 = smov 12  ;;  %v410_v13 = vld [vmem:[%s726_s0 + $0x46] ss:$16 sm:%s103_s2]   ;;  %s111_s8 = smov 48 }
   0x6   :  { %96 = vrot.lane.b32.xlu1 %v95_v7, %s464_s28  ;;  %v41_v12 = vsel %vm40_vm1, %v400_v9, %v36_v10  ;;  %v411_v14 = vld [vmem:[%s726_s0 + $0x46] ss:$16 sm:%s106_s3]   ;;  %s116_s9 = smov 192  ;;  %s54_s14 = smov 3  ;;  %vm98_vm6 = vcmask 917248   ;;  %vm147_vm7 = vcmask 786048  }
   0x7   :  { %v46_v15 = vsel %vm45_vm2, %v401_v11, %v41_v12  ;;  %v109_v16 = vsel %vm35_vm0, %v411_v14, %v410_v13  ;;  %v412_v17 = vld [vmem:[%s726_s0 + $0xe] ss:$16 sm:%s111_s8]   ;;  %s57_s15 = smov 12  ;;  %s465_s16 = smov 112   ;;  %v402_v20 = vld [vmem:[%s726_s0 + $0x47] ss:$16 sm:%s54_s14]  }
   0x8   :  { %v413_v18 = vld [vmem:[%s726_s0 + $0xe] ss:$16 sm:%s116_s9]   ;;  %47 = vrot.lane.b32.xlu0 %v46_v15, %s465_s16  ;;  %v114_v19 = vsel %vm40_vm1, %v412_v17, %v109_v16  ;;  %s62_s19 = smov 48  ;;  %s67_s20 = smov 192  ;;  %vm196_vm8 = vcmask 654848   ;;  %vm245_vm9 = vcmask 523648  }
   0x9   :  { %v403_v21 = vld [vmem:[%s726_s0 + $0x47] ss:$16 sm:%s57_s15]   ;;  %v404_v22 = vld [vmem:[%s726_s0 + $0xf] ss:$16 sm:%s62_s19]   ;;  %s201_s25 = smov 3  ;;  %v119_v23 = vsel %vm45_vm2, %v413_v18, %v114_v19  ;;  %s204_s2 = smov 12 }
   0xa   :  { %v60_v24 = vsel %vm35_vm0, %v403_v21, %v402_v20  ;;  %v405_v25 = vld [vmem:[%s726_s0 + $0xf] ss:$16 sm:%s67_s20]   ;;  %v426_v26 = vld [vmem:[%s726_s0 + $0x44] ss:$16 sm:%s201_s25]   ;;  %s209_s3 = smov 48  ;;  %s214_s6 = smov 192 }
   0xb   :  { %v65_v27 = vsel %vm40_vm1, %v404_v22, %v60_v24  ;;  %v427_v28 = vld [vmem:[%s726_s0 + $0x44] ss:$16 sm:%s204_s2]   ;;  %s177_s7 = smov 3  ;;  %v428_v30 = vld [vmem:[%s726_s0 + $0xc] ss:$16 sm:%s209_s3]   ;;  %s180_s12 = smov 12 }
   0xc   :  { %v207_v29 = vsel %vm35_vm0, %v427_v28, %v426_v26  ;;  %v422_v31 = vld [vmem:[%s726_s0 + $0x4] ss:$16 sm:%s177_s7]   ;;  %s185_s13 = smov 48  ;;  %v70_v32 = vsel %vm45_vm2, %v405_v25, %v65_v27  ;;  %s190_s15 = smov 192  ;;  %v429_v35 = vld [vmem:[%s726_s0 + $0xc] ss:$16 sm:%s214_s6]  }
   0xd   :  { %v423_v33 = vld [vmem:[%s726_s0 + $0x4] ss:$16 sm:%s180_s12]   ;;  %s275_s17 = smov 3  ;;  %s278_s18 = smov 12  ;;  %v212_v34 = vsel %vm40_vm1, %v428_v30, %v207_v29  ;;  %v424_v37 = vld [vmem:[%s726_s0 - $0x34] ss:$16 sm:%s185_s13]  }
   0xe   :  { %120 = vrot.lane.b32.xlu1 %v119_v23, %s464_s28  ;;  %v183_v36 = vsel %vm35_vm0, %v423_v33, %v422_v31  ;;  %s283_s23 = smov 48  ;;  %v425_v38 = vld [vmem:[%s726_s0 - $0x34] ss:$16 sm:%s190_s15]   ;;  %s250_s25 = smov 3  ;;  %v217_v41 = vsel %vm45_vm2, %v429_v35, %v212_v34  ;;  %vm294_vm10 = vcmask 392448   ;;  %vm343_vm11 = vcmask 261248  }
   0xf   :  { %v438_v39 = vld [vmem:[%s726_s0 + $0x2] ss:$16 sm:%s275_s17]   ;;  %s288_s2 = smov 192  ;;  %s253_s3 = smov 12  ;;  %v188_v42 = vsel %vm40_vm1, %v424_v37, %v183_v36  ;;  %v440_v43 = vld [vmem:[%s726_s0 - $0x36] ss:$16 sm:%s283_s23]  }
  0x10   :  { %71 = vrot.lane.b32.xlu0 %v70_v32, %s465_s16  ;;  %v439_v40 = vld [vmem:[%s726_s0 + $0x2] ss:$16 sm:%s278_s18]   ;;  %s128_s8 = smov 3  ;;  %s131_s13 = smov 12  ;;  %v193_v50 = vsel %vm45_vm2, %v425_v38, %v188_v42 }
  0x11   :  { %v434_v44 = vld [vmem:[%s726_s0 + $0x43] ss:$16 sm:%s250_s25]   ;;  %v414_v46 = vld [vmem:[%s726_s0 + $0x5] ss:$16 sm:%s128_s8]   ;;  %s136_s28 = smov 48  ;;  %v281_v47 = vsel %vm35_vm0, %v439_v40, %v438_v39  ;;  %s258_s14 = smov 48 }
  0x12   :  { %v435_v45 = vld [vmem:[%s726_s0 + $0x43] ss:$16 sm:%s253_s3]   ;;  %v415_v48 = vld [vmem:[%s726_s0 + $0x5] ss:$16 sm:%s131_s13]   ;;  %s141_s20 = smov 192  ;;  %s466_s21 = smov 64   ;;  %v286_v54 = vsel %vm40_vm1, %v440_v43, %v281_v47 }
  0x13   :  { %v416_v49 = vld [vmem:[%s726_s0 - $0x33] ss:$16 sm:%s136_s28]   ;;  %s263_s22 = smov 192  ;;  %v134_v51 = vsel %vm35_vm0, %v415_v48, %v414_v46  ;;  %s348_s24 = smov 3  ;;  %v441_v55 = vld [vmem:[%s726_s0 - $0x36] ss:$16 sm:%s288_s2]   ;;  %v256_v56 = vsel %vm35_vm0, %v435_v45, %v434_v44 }
  0x14   :  { %v417_v52 = vld [vmem:[%s726_s0 - $0x33] ss:$16 sm:%s141_s20]   ;;  %v139_v53 = vsel %vm40_vm1, %v416_v49, %v134_v51  ;;  %s351_s25 = smov 12  ;;  %v436_v57 = vld [vmem:[%s726_s0 + $0xb] ss:$16 sm:%s258_s14]   ;;  %s356_s2 = smov 48  ;;  %v291_v62 = vsel %vm45_vm2, %v441_v55, %v286_v54 }
  0x15   :  { %v144_v58 = vsel %vm45_vm2, %v417_v52, %v139_v53  ;;  %s324_s3 = smov 3  ;;  %v437_v59 = vld [vmem:[%s726_s0 + $0xb] ss:$16 sm:%s263_s22]   ;;  %s467_s6 = smov 80   ;;  %v450_v60 = vld [vmem:[%s726_s0 + $0x41] ss:$16 sm:%s348_s24]   ;;  %v261_v63 = vsel %vm40_vm1, %v436_v57, %v256_v56 }
  0x16   :  { %218 = vrot.lane.b32.xlu1 %v217_v41, %s466_s21  ;;  %145 = vrot.lane.b32.xlu2 %v144_v58, %s467_s6  ;;  %s361_s7 = smov 192  ;;  %s327_s8 = smov 12  ;;  %v451_v61 = vld [vmem:[%s726_s0 + $0x41] ss:$16 sm:%s351_s25]   ;;  %v266_v9 = vsel %vm45_vm2, %v437_v59, %v261_v63 }
  0x17   :  { %s624_s13 = smov 48  ;;  %s152_s28 = smov 3  ;;  %v452_v0 = vld [vmem:[%s726_s0 + $0x9] ss:$16 sm:%s356_s2]   ;;  %v446_v1 = vld [vmem:[%s726_s0 + $0x1] ss:$16 sm:%s324_s3]   ;;  %v354_v5 = vsel %vm35_vm0, %v451_v61, %v450_v60 }
  0x18   :  { %194 = vrot.lane.b32.xlu0 %v193_v50, %s466_s21  ;;  %v447_v2 = vld [vmem:[%s726_s0 + $0x1] ss:$16 sm:%s327_s8]   ;;  %s155_s21 = smov 12  ;;  %s160_s22 = smov 48  ;;  %v359_v15 = vsel %vm40_vm1, %v452_v0, %v354_v5 }
  0x19   :  { %v418_v3 = vld [vmem:[%s726_s0 + $0x45] ss:$16 sm:%s152_s28]   ;;  %s165_s26 = smov 192  ;;  %s226_s27 = smov 3  ;;  %v420_v7 = vld [vmem:[%s726_s0 + $0xd] ss:$16 sm:%s160_s22]   ;;  %v330_v16 = vsel %vm35_vm0, %v447_v2, %v446_v1 }
  0x1a   :  { %v419_v4 = vld [vmem:[%s726_s0 + $0x45] ss:$16 sm:%s155_s21]   ;;  %v421_v8 = vld [vmem:[%s726_s0 + $0xd] ss:$16 sm:%s165_s26]   ;;  %s229_s4 = smov 12  ;;  %s234_s5 = smov 48 }
  0x1b   :  { %v158_v6 = vsel %vm35_vm0, %v419_v4, %v418_v3  ;;  %s468_s8 = smov 32   ;;  %v430_v11 = vld [vmem:[%s726_s0 + $0x3] ss:$16 sm:%s226_s27]   ;;  %v453_v12 = vld [vmem:[%s726_s0 + $0x9] ss:$16 sm:%s361_s7]   ;;  %s239_s19 = smov 192 }
  0x1c   :  { %v163_v10 = vsel %vm40_vm1, %v420_v7, %v158_v6  ;;  %v431_v14 = vld [vmem:[%s726_s0 + $0x3] ss:$16 sm:%s229_s4]   ;;  %v448_v17 = vld [vmem:[%s726_s0 - $0x37] ss:$16 sm:%s624_s13]   ;;  %s337_s13 = smov 192  ;;  %s469_s20 = smov 48   ;;  %v364_v20 = vsel %vm45_vm2, %v453_v12, %v359_v15 }
  0x1d   :  { %v168_v13 = vsel %vm45_vm2, %v421_v8, %v163_v10  ;;  %v232_v18 = vsel %vm35_vm0, %v431_v14, %v430_v11  ;;  %v432_v19 = vld [vmem:[%s726_s0 - $0x35] ss:$16 sm:%s234_s5]   ;;  %s302_s21 = smov 12  ;;  %v335_v21 = vsel %vm40_vm1, %v448_v17, %v330_v16  ;;  %v449_v22 = vld [vmem:[%s726_s0 - $0x37] ss:$16 sm:%s337_s13]   ;;  %s307_s30 = smov 48 }
  0x1e   :  { %292 = vrot.lane.b32.xlu1 %v291_v62, %s468_s8  ;;  %169 = vrot.lane.b32.xlu2 %v168_v13, %s467_s6  ;;  %s299_s6 = smov 3  ;;  %v237_v23 = vsel %vm40_vm1, %v432_v19, %v232_v18  ;;  %v433_v24 = vld [vmem:[%s726_s0 - $0x35] ss:$16 sm:%s239_s19]   ;;  %s470_s2 = smov 16   ;;  %v340_v27 = vsel %vm45_vm2, %v449_v22, %v335_v21 }
  0x1f   :  { %v442_v25 = vld [vmem:[%s726_s0 + $0x42] ss:$16 sm:%s299_s6]   ;;  %v242_v28 = vsel %vm45_vm2, %v433_v24, %v237_v23  ;;  %v444_v30 = vld [vmem:[%s726_s0 + $0xa] ss:$16 sm:%s307_s30]   ;;  %s312_s5 = smov 192 }
  0x20   :  { %267 = vrot.lane.b32.xlu0 %v266_v9, %s469_s20  ;;  %v443_v26 = vld [vmem:[%s726_s0 + $0x42] ss:$16 sm:%s302_s21]   ;;  %v2_v34 = vld [vmem:[%s726_s0] ss:$8 sm:$0xf]  }
  0x21   :  { %v305_v29 = vsel %vm35_vm0, %v443_v26, %v442_v25  ;;  %v445_v32 = vld [vmem:[%s726_s0 + $0xa] ss:$16 sm:%s312_s5]   ;;  %v3_v35 = vld [vmem:[%s726_s0] ss:$8 sm:$0xf0]  }
  0x22   :  { %v310_v31 = vsel %vm40_vm1, %v444_v30, %v305_v29  ;;  %v5_v36 = vsel %vm4_vm3, %v3_v35, %v2_v34  ;;  %v396_v37 = vld [vmem:[%s726_s0 + $0x40] ss:$8 sm:$0xf]  }
  0x23   :  { %v315_v33 = vsel %vm45_vm2, %v445_v32, %v310_v31  ;;  %7 = vst.msk [vmem:[#allocation0] ss:$8 sm:$0x3] %vm6_vm4, %v5_v36   ;;  %v397_v38 = vld [vmem:[%s726_s0 + $0x40] ss:$8 sm:$0xf0]  }
  0x24   :  { %9 = vst.msk [vmem:[#allocation0 - $0xf] ss:$8 sm:$0xc] %vm6_vm4, %v5_v36   ;;  %v19_v39 = vsel %vm4_vm3, %v397_v38, %v396_v37 }
  0x25   :  { %11 = vst.msk [vmem:[#allocation0 - $0x1e] ss:$8 sm:$0x30] %vm6_vm4, %v5_v36  }
  0x26   :  { %365 = vrot.lane.b32.xlu1 %v364_v20, %s470_s2  ;;  %243 = vrot.lane.b32.xlu2 %v242_v28, %s469_s20  ;;  %13 = vst.msk [vmem:[#allocation0 - $0x2d] ss:$8 sm:$0xc0] %vm6_vm4, %v5_v36  }
  0x27   :  { %22 = vst.msk [vmem:[#allocation0 + $0x10] ss:$8 sm:$0x3] %vm6_vm4, %v19_v39  }
  0x28   :  { %341 = vrot.lane.b32.xlu0 %v340_v27, %s470_s2  ;;  %24 = vst.msk [vmem:[#allocation0 + $0x1] ss:$8 sm:$0xc] %vm6_vm4, %v19_v39  }
  0x29   :  { %26 = vst.msk [vmem:[#allocation0 - $0xe] ss:$8 sm:$0x30] %vm6_vm4, %v19_v39  }
  0x2a   :  { %28 = vst.msk [vmem:[#allocation0 - $0x1d] ss:$8 sm:$0xc0] %vm6_vm4, %v19_v39  }
  0x2e   :  { %316 = vrot.lane.b32.xlu2 %v315_v33, %s468_s8 }
  0x70   :  { %v146_v40 = vpop.permute.xlu2 %145  }
  0x78   :  { %v97_v41 = vpop.permute.xlu1 %96   ;;  %v170_v43 = vpop.permute.xlu2 %169  }
  0x7a   :  { %v48_v42 = vpop.permute.xlu0 %47  }
  0x7b   :  { %50 = vst.msk [vmem:[#allocation0] sm:$0xf] %vm49_vm5, %v48_v42  }
  0x7c   :  { %52 = vst.msk [vmem:[#allocation0 + $0x4] sm:$0xf0] %vm49_vm5, %v48_v42  }
  0x7d   :  { %99 = vst.msk [vmem:[#allocation0] sm:$0xf] %vm98_vm6, %v97_v41  }
  0x7e   :  { %101 = vst.msk [vmem:[#allocation0 + $0x4] sm:$0xf0] %vm98_vm6, %v97_v41  }
  0x7f   :  { %148 = vst.msk [vmem:[#allocation0] sm:$0xf] %vm147_vm7, %v146_v40  }
  0x80   :  { %v121_v44 = vpop.permute.xlu1 %120   ;;  %150 = vst.msk [vmem:[#allocation0 + $0x4] sm:$0xf0] %vm147_vm7, %v146_v40   ;;  %v244_v46 = vpop.permute.xlu2 %243  }
  0x82   :  { %v72_v45 = vpop.permute.xlu0 %71  }
  0x83   :  { %75 = vst.msk [vmem:[#allocation0 + $0x10] sm:$0xf] %vm49_vm5, %v72_v45  }
  0x84   :  { %77 = vst.msk [vmem:[#allocation0 + $0x14] sm:$0xf0] %vm49_vm5, %v72_v45  }
  0x85   :  { %124 = vst.msk [vmem:[#allocation0 + $0x10] sm:$0xf] %vm98_vm6, %v121_v44  }
  0x86   :  { %126 = vst.msk [vmem:[#allocation0 + $0x14] sm:$0xf0] %vm98_vm6, %v121_v44  }
  0x87   :  { %173 = vst.msk [vmem:[#allocation0 + $0x10] sm:$0xf] %vm147_vm7, %v170_v43  }
  0x88   :  { %v219_v47 = vpop.permute.xlu1 %218   ;;  %175 = vst.msk [vmem:[#allocation0 + $0x14] sm:$0xf0] %vm147_vm7, %v170_v43   ;;  %v317_v49 = vpop.permute.xlu2 %316  }
  0x89   :  { %222 = vst.msk [vmem:[#allocation0 + $0x10] sm:$0xf] %vm196_vm8, %v219_v47  }
  0x8a   :  { %224 = vst.msk [vmem:[#allocation0 + $0x14] sm:$0xf0] %vm196_vm8, %v219_v47   ;;  %v195_v48 = vpop.permute.xlu0 %194  }
  0x8b   :  { %197 = vst.msk [vmem:[#allocation0] sm:$0xf] %vm196_vm8, %v195_v48  }
  0x8c   :  { %199 = vst.msk [vmem:[#allocation0 + $0x4] sm:$0xf0] %vm196_vm8, %v195_v48  }
  0x8d   :  { %246 = vst.msk [vmem:[#allocation0] sm:$0xf] %vm245_vm9, %v244_v46  }
  0x8e   :  { %248 = vst.msk [vmem:[#allocation0 + $0x4] sm:$0xf0] %vm245_vm9, %v244_v46  }
  0x90   :  { %v293_v50 = vpop.permute.xlu1 %292  }
  0x91   :  { %295 = vst.msk [vmem:[#allocation0] sm:$0xf] %vm294_vm10, %v293_v50  }
  0x92   :  { %297 = vst.msk [vmem:[#allocation0 + $0x4] sm:$0xf0] %vm294_vm10, %v293_v50   ;;  %v268_v51 = vpop.permute.xlu0 %267  }
  0x93   :  { %271 = vst.msk [vmem:[#allocation0 + $0x10] sm:$0xf] %vm245_vm9, %v268_v51  }
  0x94   :  { %273 = vst.msk [vmem:[#allocation0 + $0x14] sm:$0xf0] %vm245_vm9, %v268_v51  }
  0x95   :  { %320 = vst.msk [vmem:[#allocation0 + $0x10] sm:$0xf] %vm294_vm10, %v317_v49  }
  0x96   :  { %322 = vst.msk [vmem:[#allocation0 + $0x14] sm:$0xf0] %vm294_vm10, %v317_v49  }
  0x98   :  { %v366_v52 = vpop.permute.xlu1 %365  }
  0x99   :  { %369 = vst.msk [vmem:[#allocation0 + $0x10] sm:$0xf] %vm343_vm11, %v366_v52  }
  0x9a   :  { %371 = vst.msk [vmem:[#allocation0 + $0x14] sm:$0xf0] %vm343_vm11, %v366_v52   ;;  %v342_v53 = vpop.permute.xlu0 %341  }
  0x9b   :  { %344 = vst.msk [vmem:[#allocation0] sm:$0xf] %vm343_vm11, %v342_v53  }
  0x9c   :  { %346 = vst.msk [vmem:[#allocation0 + $0x4] sm:$0xf0] %vm343_vm11, %v342_v53  }
  0xa0   :  { %v385_v54 = vld [vmem:[#allocation0 + $0x10] sm:$0xf] }
  0xa1   :  { %455 = vst [vmem:[%s727_s1 + $0x8] sm:$0xf] %v385_v54  ;;  %v391_v55 = vld [vmem:[#allocation0 + $0x18] sm:$0xf] }
  0xa2   :  { %456 = vst [vmem:[%s727_s1 + $0xc] sm:$0xf] %v391_v55  ;;  %v374_v56 = vld [vmem:[#allocation0] sm:$0xf] }
  0xa3   :  { %377 = vst [vmem:[%s727_s1] sm:$0xf] %v374_v56  ;;  %v379_v57 = vld [vmem:[#allocation0 + $0x8] sm:$0xf] }
  0xa4   :  { %454 = vst [vmem:[%s727_s1 + $0x4] sm:$0xf] %v379_v57 }

// kernel: rim_block_forward.2
= control target key start
LH: loop header
LB: loop body
LE: loop exit
PB: predicated region body
PF: predicated region fallthrough
CT: control target
= control target key end

     0   :  { %s7829_s0 = inlined_call_operand.vmem [shape: f32[2,4,256], index: 0, kind: input, shape index: {}]   ;;  %s7830_s1 = inlined_call_operand.vmem [shape: f32[2,4,256], index: 1, kind: input, shape index: {}]   ;;  %s7831_s2 = inlined_call_operand.vmem [shape: f32[2,4,256], index: 2, kind: input, shape index: {}]   ;;  %s7832_s3 = inlined_call_operand.vmem [shape: f32[2,4,256], index: 3, kind: input, shape index: {}]   ;;  %s7833_s4 = inlined_call_operand.vmem [shape: f32[2,2,256], index: 4, kind: input, shape index: {}, may-alias: {4,17}]   ;;  %s7834_s5 = inlined_call_operand.vmem [shape: f32[2,32,256], index: 5, kind: input, shape index: {}, may-alias: {5,18}]   ;;  %s7835_s6 = inlined_call_operand.vmem [shape: f32[2,32,256], index: 6, kind: input, shape index: {}, may-alias: {6,19}]   ;;  %s7836_s7 = inlined_call_operand.vmem [shape: f32[128,256], index: 7, kind: input, shape index: {}]   ;;  %s7837_s8 = inlined_call_operand.vmem [shape: f32[288,256], index: 8, kind: input, shape index: {}]   ;;  %s7838_s9 = inlined_call_operand.vmem [shape: bf16[32,128], index: 9, kind: input, shape index: {}]   ;;  %s7839_s10 = inlined_call_operand.vmem [shape: bf16[32,288], index: 10, kind: input, shape index: {}]   ;;  %s7840_s11 = inlined_call_operand.vmem [shape: bf16[2,288], index: 11, kind: input, shape index: {}]   ;;  %s7841_s12 = inlined_call_operand.vmem [shape: f32[2,32,1], index: 12, kind: input, shape index: {}]   ;;  %s7842_s13 = inlined_call_operand.vmem [shape: bf16[2,64,64], index: 13, kind: input, shape index: {}]   ;;  %s7843_s14 = inlined_call_operand.vmem [shape: f32[2,64,1], index: 14, kind: input, shape index: {}]   ;;  %s7844_s15 = inlined_call_operand.vmem [shape: bf16[2,2,32,32], index: 15, kind: input, shape index: {}]   ;;  %s7845_s16 = inlined_call_operand.vmem [shape: f32[2,2,32,1], index: 16, kind: input, shape index: {}]   ;;  %s7846_s17 = inlined_call_operand.vmem [shape: f32[2,2,256], index: 17, kind: output, shape index: {0}, may-alias: {4,17}]   ;;  %s7847_s18 = inlined_call_operand.vmem [shape: f32[2,32,256], index: 18, kind: output, shape index: {1}, may-alias: {5,18}]   ;;  %s7848_s19 = inlined_call_operand.vmem [shape: f32[2,32,256], index: 19, kind: output, shape index: {2}, may-alias: {6,19}]   ;;  %s7849_s20 = inlined_call_operand.vmem [shape: f32[2,4,256], index: 20, kind: output, shape index: {3}]   ;;  %s7850_s21 = inlined_call_operand.vmem [shape: f32[2,4,256], index: 21, kind: output, shape index: {4}]  }
   0x1   :  { %7890 = sst [smem:[#allocation11_spill]] %s7829_s0 }
   0x2   :  { %7891 = sst [smem:[#allocation12_spill]] %s7830_s1 }
   0x3   :  { %7892 = sst [smem:[#allocation13_spill]] %s7831_s2  ;;  %s4753_s2 = smov 0  }
   0x4   :  { %7893 = sst [smem:[#allocation14_spill]] %s7832_s3 }
   0x5   :  { %7894 = sst [smem:[#allocation15_spill]] %s7833_s4 }
   0x6   :  { %7895 = sst [smem:[#allocation16_spill]] %s7834_s5 }
   0x7   :  { %7896 = sst [smem:[#allocation17_spill]] %s7846_s17 }
   0x8   :  { %7897 = sst [smem:[#allocation18_spill]] %s7849_s20 }
   0x9   :  { %7898 = sst [smem:[#allocation19_spill]] %s7850_s21 }
   0xa LB: > { %7899 = sst [smem:[#allocation2_spill]] %s4616_s2  ;;  %s4063_s25 = sadd.s32 4294967295, %s4616_s2   ;;  %s4616_s2 = sphi %s4753_s2, %s32_s2  }
   0xb   : > { %p4067_p0 = scmp.ge.s32.totalorder %s4616_s2, 1  ;;  %p656_p1 = scmp.lt.s32.totalorder %s4616_s2, 3 }
   0xd   : > { %p657_p2 = pnand %p4067_p0, %p656_p1 }
   0xf   : > { %660 = sbr.rel (%p657_p2) target bundleno = 1820 (0x71c), region = 88 }
  0x14   : > { %p766_p3 = scmp.lt.s32.totalorder %s4063_s25, 1  ;;  %s7900_s28 = sld [smem:[#allocation11_spill]]  ;;  %vm7857_vm0 = vcmask 1043456   ;;  %vm7858_vm1 = vcmask 1041408   ;;  %vm888_vm2 = vcmask 1042432   ;;  %v1191_v49 = vld [vmem:[%s7836_s7 + $0xe0] sm:$0xff]  ;;  %v899_v62 = vlaneseq }
  0x15   : > { %s7901_s30 = sld [smem:[#allocation12_spill]]  ;;  %s4618_s3 = smov 97   ;;  %v1193_v50 = vld [vmem:[%s7836_s7 + $0xf0] sm:$0xff]  ;;  %v1223_v51 = vmul.f32 0.0, %v1191_v49  ;;  %v1192_v53 = vld [vmem:[%s7836_s7 + $0xe8] sm:$0xff]  ;;  %v1194_v54 = vld [vmem:[%s7836_s7 + $0xf8] sm:$0xff] }
  0x16   : > { %s8145_s25 = smov (!%p766_p3, %s4063_s25), 1  ;;  %s7902_s1 = sld [smem:[#allocation13_spill]]  ;;  %v1225_v52 = vmul.f32 0.0, %v1193_v50  ;;  %v1224_v55 = vmul.f32 0.0, %v1192_v53  ;;  %v1226_v56 = vmul.f32 0.0, %v1194_v54 }
  0x17   : > { %s4764_s26 = sshll.u32 %s8145_s25, 3  ;;  %s7903_s20 = sld [smem:[#allocation14_spill]] }
  0x18   : > { %s7906_s2 = sld [smem:[#allocation15_spill]]  ;;  %s4621_s0 = smov 98   ;;  %v1241_v58 = vpack.c.bf16 %v1225_v52, %v1223_v51  ;;  %v1242_v59 = vpack.c.bf16 %v1226_v56, %v1224_v55 }
  0x19   : > { %s4622_s4 = smov 96   ;;  %s7879_s22 = smov 113  }
  0x1a   : > { %s770_s29 = scalar_lea.vmem %s7900_s28, %s4764_s26  ;;  %s4619_s28 = smov 94   ;;  %1279 = vmatpush.bf16.msra.mxu0 %v1241_v58  ;;  %1298 = vmatpush.bf16.msra.mxu1 %v1242_v59 }
  0x1b   : > { %s775_s5 = scalar_lea.vmem %s7901_s30, %s4764_s26  ;;  %v827_v0 = vld [vmem:[%s770_s29] sm:$0xff]  ;;  %s4620_s29 = smov 95  }
  0x1c   : > { %s780_s24 = scalar_lea.vmem %s7902_s1, %s4764_s26  ;;  %v828_v1 = vld [vmem:[%s775_s5] sm:$0xff]  ;;  %s7885_s30 = smov 112  }
  0x1d   : > { %s785_s17 = scalar_lea.vmem %s7903_s20, %s4764_s26  ;;  %v4782_v2 = vld [vmem:[%s780_s24] sm:$0xff]  ;;  %s7852_s20 = sshll.u32 %s8145_s25, 2 }
  0x1e   : > { %7904 = vst [vmem:[#allocation3_spill] sm:$0xff] %v4782_v2  ;;  %v4784_v3 = vld [vmem:[%s785_s17] sm:$0xff]  ;;  %v831_v4 = vmul.f32 %v4782_v2, %v827_v0  ;;  %v855_v7 = vmul.f32 %v4782_v2, %v828_v1  ;;  %s790_s27 = scalar_lea.vmem %s7906_s2, %s7852_s20  ;;  %s4624_s5 = smov 110  }
  0x1f   : > { %7905 = vst [vmem:[#allocation4_spill] sm:$0xff] %v4784_v3  ;;  %v832_v5 = vmul.f32 %v4784_v3, %v828_v1  ;;  %v856_v8 = vmul.f32 %v4784_v3, %v827_v0  ;;  %v4798_v19 = vld [vmem:[%s790_s27] sm:$0xf]  ;;  %s7853_s23 = smov 111   ;;  %s7875_s1 = smov 127  }
  0x20   : > { %7907 = vst [vmem:[#allocation5_spill] sm:$0xff] %v4798_v19  ;;  %s4628_s24 = smov 114   ;;  %s4629_s17 = smov 126  }
  0x21   : > { %v833_v6 = vadd.f32 %v832_v5, %v831_v4  ;;  %v857_v9 = vsub.f32 %v855_v7, %v856_v8  ;;  %s4630_s21 = smov 14   ;;  %s7883_s2 = smov 1   ;;  %v4884_v4 = vand.u32 127, %v899_v62  ;;  %v1189_v5 = vld [vmem:[%s7836_s7 + $0xd0] sm:$0xff] }
  0x22   : > { %s7881_s27 = smov 15   ;;  %s4639_s20 = smov 31  }
  0x23   : > { %835 = vst [vmem:[#allocation1] ss:$2 sm:$0xff] %v833_v6  ;;  %vm1062_vm3 = vcmp.lt.s32.totalorder %v4884_v4, 94  ;;  %v1190_v6 = vld [vmem:[%s7836_s7 + $0xd8] sm:$0xff]  ;;  %vm1041_vm4 = vcmp.lt.s32.totalorder %v4884_v4, 97  ;;  %vm1055_vm5 = vcmp.lt.s32.totalorder %v4884_v4, 95 }
  0x24   : > { %7908 = vst [vmem:[#allocation6_spill] sm:$0xff] %v4884_v4  ;;  %vm1034_vm6 = vcmp.lt.s32.totalorder %v4884_v4, 98  ;;  %vm1048_vm7 = vcmp.lt.s32.totalorder %v4884_v4, 96  ;;  %vm7872_vm8 = vcmp.lt.s32.totalorder %v4884_v4, 112  ;;  %vm1027_vm9 = vcmp.lt.s32.totalorder %v4884_v4, 110 }
  0x25   : > { %vm7861_vm10 = vcmp.lt.s32.totalorder %v4884_v4, 111  ;;  %vm1006_vm11 = vcmp.lt.s32.totalorder %v4884_v4, 113  ;;  %vm7873_vm12 = vcmp.lt.s32.totalorder %v4884_v4, 127  ;;  %vm999_vm13 = vcmp.lt.s32.totalorder %v4884_v4, 114 }
  0x26   : > { %vm992_vm14 = vcmp.lt.s32.totalorder %v4884_v4, 126  ;;  %vm964_vm15 = vcmp.lt.s32.totalorder %v4884_v4, 14 }
  0x2a   : > { %v836_v10 = vld.sshfl [vmem:[#allocation1] sm:$0xff pattern:$0x75316420]  ;;  %v837_v11 = vld.sshfl [vmem:[#allocation1 + $0x8] sm:$0xff pattern:$0x75316420] }
  0x2b   : > { %v841_v12 = vsel %vm7857_vm0, %v836_v10, 0.0  ;;  %859 = vst [vmem:[#allocation1] ss:$2 sm:$0xff] %v857_v9  ;;  %v848_v13 = vsel %vm7857_vm0, %v837_v11, 0.0  ;;  %v1187_v9 = vld [vmem:[%s7836_s7 + $0xc0] sm:$0xff]  ;;  %v1188_v10 = vld [vmem:[%s7836_s7 + $0xc8] sm:$0xff] }
  0x2c   : > { %v842_v14 = vrot.slane %v841_v12, 4  ;;  %v849_v15 = vrot.slane %v848_v13, 4 }
  0x2e   : > { %v843_v16 = vadd.f32 %v842_v14, %v841_v12  ;;  %v850_v17 = vadd.f32 %v849_v15, %v848_v13  ;;  %v1221_v13 = vmul.f32 0.0, %v1189_v5  ;;  %v1222_v14 = vmul.f32 0.0, %v1190_v6  ;;  %v1181_v5 = vld [vmem:[%s7836_s7 + $0x90] sm:$0xff] }
  0x30   : > { %v844_v18 = vrot.slane %v843_v16, 2  ;;  %v851_v24 = vrot.slane %v850_v17, 2 }
  0x32   : > { %v845_v20 = vadd.f32 %v844_v18, %v843_v16  ;;  %v860_v21 = vld.sshfl [vmem:[#allocation1] sm:$0xff pattern:$0x75316420]  ;;  %v861_v22 = vld.sshfl [vmem:[#allocation1 + $0x8] sm:$0xff pattern:$0x75316420]  ;;  %v852_v31 = vadd.f32 %v851_v24, %v850_v17 }
  0x33   : > { %v864_v23 = vsel %vm7857_vm0, %v860_v21, 0.0  ;;  %880 = vst [vmem:[#allocation1] ss:$4 sm:$0xff] %v4798_v19  ;;  %v871_v25 = vsel %vm7857_vm0, %v861_v22, 0.0 }
  0x34   : > { %v865_v26 = vrot.slane %v864_v23, 4  ;;  %v872_v27 = vrot.slane %v871_v25, 4  ;;  %v846_v28 = vrot.slane %v845_v20, 1  ;;  %v853_v38 = vrot.slane %v852_v31, 1 }
  0x36   : > { %v866_v29 = vadd.f32 %v865_v26, %v864_v23  ;;  %v873_v30 = vadd.f32 %v872_v27, %v871_v25  ;;  %v847_v34 = vadd.f32 %v846_v28, %v845_v20  ;;  %v854_v43 = vadd.f32 %v853_v38, %v852_v31 }
  0x38   : > { %v867_v32 = vrot.slane %v866_v29, 2  ;;  %v874_v33 = vrot.slane %v873_v30, 2 }
  0x3a   : > { %v868_v35 = vadd.f32 %v867_v32, %v866_v29  ;;  %v881_v36 = vld.sshfl [vmem:[#allocation1] sm:$0xff pattern:$0x73625140]  ;;  %v875_v37 = vadd.f32 %v874_v33, %v873_v30  ;;  %v882_v45 = vld.sshfl [vmem:[#allocation1 + $0x8] sm:$0xff pattern:$0x73625140] }
  0x3b   : > { %v886_v40 = vsel %vm7858_vm1, %v881_v36, %v847_v34  ;;  %v887_v47 = vsel %vm7858_vm1, %v882_v45, %v854_v43  ;;  %v1183_v34 = vld [vmem:[%s7836_s7 + $0xa0] sm:$0xff]  ;;  %v1186_v43 = vld [vmem:[%s7836_s7 + $0xb8] sm:$0xff] }
  0x3c   : > { %v869_v39 = vrot.slane %v868_v35, 1  ;;  %v876_v42 = vrot.slane %v875_v37, 1 }
  0x3e   : > { %v870_v41 = vadd.f32 %v869_v39, %v868_v35  ;;  %v877_v46 = vadd.f32 %v876_v42, %v875_v37  ;;  %v1184_v42 = vld [vmem:[%s7836_s7 + $0xa8] sm:$0xff] }
  0x40   : > { %v4804_v44 = vsel %vm888_vm2, %v886_v40, %v870_v41  ;;  %v4810_v48 = vsel %vm888_vm2, %v887_v47, %v877_v46  ;;  %v1185_v40 = vld [vmem:[%s7836_s7 + $0xb0] sm:$0xff]  ;;  %vm957_vm2 = vcmp.lt.s32.totalorder %v4884_v4, 15 }
  0x41   : > { %1037 = vrot.lane.b32.xlu1 %v4804_v44, %s4618_s3  ;;  %1058 = vrot.lane.b32.xlu0 %v4804_v44, %s4619_s28 }
  0x42   : > { %1051 = vrot.lane.b32.xlu2 %v4804_v44, %s4620_s29 }
  0x49   : > { %1039 = vrot.lane.b32.xlu1 %v4810_v48, %s4618_s3  ;;  %1060 = vrot.lane.b32.xlu0 %v4810_v48, %s4619_s28  ;;  %s4633_s3 = smov 2   ;;  %s4634_s28 = smov 18  }
  0x4a   : > { %1053 = vrot.lane.b32.xlu2 %v4810_v48, %s4620_s29  ;;  %s7877_s29 = smov 16  }
  0x51   : > { %1032 = vrot.lane.b32.xlu1 %v4810_v48, %s4621_s0  ;;  %1030 = vrot.lane.b32.xlu0 %v4804_v44, %s4621_s0  ;;  %s7855_s0 = smov 17  }
  0x52   : > { %1044 = vrot.lane.b32.xlu2 %v4804_v44, %s4622_s4 }
  0x59   : > { %1009 = vrot.lane.b32.xlu1 %v4804_v44, %s7885_s30  ;;  %1046 = vrot.lane.b32.xlu0 %v4810_v48, %s4622_s4  ;;  %s4638_s4 = smov 33  }
  0x5a   : > { %1011 = vrot.lane.b32.xlu2 %v4810_v48, %s7885_s30 }
  0x61   : > { %1025 = vrot.lane.b32.xlu1 %v4810_v48, %s4624_s5  ;;  %1023 = vrot.lane.b32.xlu0 %v4804_v44, %s4624_s5  ;;  %s4640_s5 = smov 34  }
  0x62   : > { %1002 = vrot.lane.b32.xlu2 %v4804_v44, %s7879_s22 }
  0x69   : > { %1016 = vrot.lane.b32.xlu1 %v4804_v44, %s7853_s23  ;;  %1004 = vrot.lane.b32.xlu0 %v4810_v48, %s7879_s22 }
  0x6a   : > { %1018 = vrot.lane.b32.xlu2 %v4810_v48, %s7853_s23 }
  0x71   : > { %983 = vrot.lane.b32.xlu1 %v4810_v48, %s7875_s1  ;;  %981 = vrot.lane.b32.xlu0 %v4804_v44, %s7875_s1 }
  0x72   : > { %995 = vrot.lane.b32.xlu2 %v4804_v44, %s4628_s24 }
  0x79   : > { %988 = vrot.lane.b32.xlu1 %v4804_v44, %s4629_s17  ;;  %997 = vrot.lane.b32.xlu0 %v4810_v48, %s4628_s24  ;;  %s4641_s24 = smov 32  }
  0x7a   : > { %990 = vrot.lane.b32.xlu2 %v4810_v48, %s4629_s17  ;;  %s5138_s17 = sshll.u32 %s8145_s25, 6 }
  0x81   : > { %962 = vrot.lane.b32.xlu1 %v4810_v48, %s4630_s21  ;;  %960 = vrot.lane.b32.xlu0 %v4804_v44, %s4630_s21  ;;  %s6930_s21 = scalar_lea.vmem %s7848_s19, %s5138_s17 }
  0x82   : > { %974 = vrot.lane.b32.xlu2 %v4804_v44, %s7883_s2 }
  0x89   : > { %953 = vrot.lane.b32.xlu1 %v4804_v44, %s7881_s27  ;;  %976 = vrot.lane.b32.xlu0 %v4810_v48, %s7883_s2 }
  0x8a   : > { %955 = vrot.lane.b32.xlu2 %v4810_v48, %s7881_s27 }
  0x91   : > { %969 = vrot.lane.b32.xlu1 %v4810_v48, %s4633_s3  ;;  %967 = vrot.lane.b32.xlu0 %v4804_v44, %s4633_s3  ;;  %s8066_s3 = smov 1  }
  0x92   : > { %932 = vrot.lane.b32.xlu2 %v4804_v44, %s4634_s28 }
  0x99   : > { %946 = vrot.lane.b32.xlu1 %v4804_v44, %s7877_s29  ;;  %934 = vrot.lane.b32.xlu0 %v4810_v48, %s4634_s28  ;;  %s4636_s28 = smov 30  }
  0x9a   : > { %948 = vrot.lane.b32.xlu2 %v4810_v48, %s7877_s29 }
  0x9c   : > { %v1052_v57 = vpop.permute.xlu2 %1051 }
  0xa1   : > { %927 = vrot.lane.b32.xlu1 %v4810_v48, %s4636_s28  ;;  %925 = vrot.lane.b32.xlu0 %v4804_v44, %s4636_s28 }
  0xa2   : > { %939 = vrot.lane.b32.xlu2 %v4804_v44, %s7855_s0 }
  0xa4   : > { %v1054_v60 = vpop.permute.xlu2 %1053 }
  0xa5   : > { %v1056_v28 = vsel %vm1055_vm5, %v1052_v57, %v1054_v60  ;;  %v1057_v29 = vsel %vm1055_vm5, %v1054_v60, %v1052_v57  ;;  %vm936_vm5 = vcmp.lt.s32.totalorder %v4884_v4, 18 }
  0xa6   : > { %v1149_v35 = vrot.slane %v1056_v28, 4  ;;  %v1150_v36 = vrot.slane %v1057_v29, 4 }
  0xa9   : > { %904 = vrot.lane.b32.xlu1 %v4804_v44, %s4638_s4  ;;  %941 = vrot.lane.b32.xlu0 %v4810_v48, %s7855_s0  ;;  %s7909_s0 = sld [smem:[#allocation16_spill]] }
  0xaa   : > { %906 = vrot.lane.b32.xlu2 %v4810_v48, %s4638_s4  ;;  %s7974_s4 = smov 17  }
  0xac   : > { %v1045_v61 = vpop.permute.xlu2 %1044 }
  0xaf   : > { %s795_s28 = scalar_lea.vmem %s7909_s0, %s5138_s17  ;;  %s5681_s0 = scalar_lea.vmem %s7847_s18, %s5138_s17 }
  0xb1   : > { %920 = vrot.lane.b32.xlu1 %v4810_v48, %s4639_s20  ;;  %918 = vrot.lane.b32.xlu0 %v4804_v44, %s4639_s20  ;;  %s7980_s20 = smov 111  }
  0xb2   : > { %895 = vrot.lane.b32.xlu2 %v4804_v44, %s4640_s5 }
  0xb3   : > { %v1038_v63 = vpop.permute.xlu1 %1037  ;;  %v1059_v0 = vpop.permute.xlu0 %1058 }
  0xb4   : > { %v4882_v1 = vpop.permute.xlu2 %1011 }
  0xb9   : > { %911 = vrot.lane.b32.xlu1 %v4804_v44, %s4641_s24  ;;  %897 = vrot.lane.b32.xlu0 %v4810_v48, %s4640_s5  ;;  %s8140_s5 = sld [smem:[#allocation19_spill]] }
  0xba   : > { %913 = vrot.lane.b32.xlu2 %v4810_v48, %s4641_s24 }
  0xbb   : > { %v1040_v7 = vpop.permute.xlu1 %1039  ;;  %v1061_v8 = vpop.permute.xlu0 %1060 }
  0xbc   : > { %v1063_v11 = vsel %vm1062_vm3, %v1059_v0, %v1061_v8  ;;  %v1064_v12 = vsel %vm1062_vm3, %v1061_v8, %v1059_v0  ;;  %v4902_v15 = vpop.permute.xlu2 %1002  ;;  %v1042_v26 = vsel %vm1041_vm4, %v1038_v63, %v1040_v7  ;;  %v1043_v27 = vsel %vm1041_vm4, %v1040_v7, %v1038_v63  ;;  %v1179_v0 = vld [vmem:[%s7836_s7 + $0x80] sm:$0xff] }
  0xbd   : > { %v1161_v16 = vsel %vm7857_vm0, %v1063_v11, 0.0  ;;  %v1162_v17 = vsel %vm7857_vm0, %v1064_v12, 0.0  ;;  %v1143_v32 = vrot.slane %v1042_v26, 4  ;;  %v1144_v33 = vrot.slane %v1043_v27, 4  ;;  %v1180_v11 = vld [vmem:[%s7836_s7 + $0x88] sm:$0xff]  ;;  %v1182_v12 = vld [vmem:[%s7836_s7 + $0x98] sm:$0xff] }
  0xbe   : > { %v1219_v18 = vmul.f32 %v1187_v9, %v1161_v16  ;;  %v1220_v20 = vmul.f32 %v1188_v10, %v1162_v17  ;;  %vm978_vm3 = vcmp.lt.s32.totalorder %v4884_v4, 1  ;;  %vm971_vm4 = vcmp.lt.s32.totalorder %v4884_v4, 2 }
  0xbf   : > { %s825_s23 = scalar_lea.vmem %s8140_s5, %s4764_s26 }
  0xc0   : > { %v1239_v21 = vpack.c.bf16 %v1221_v13, %v1219_v18  ;;  %v1240_v22 = vpack.c.bf16 %v1222_v14, %v1220_v20 }
  0xc2   : > { %1280 = vmatpush.bf16.msra.mxu0 %v1239_v21  ;;  %1299 = vmatpush.bf16.msra.mxu1 %v1240_v22 }
  0xc3   : > { %v1033_v23 = vpop.permute.xlu1 %1032  ;;  %v1031_v24 = vpop.permute.xlu0 %1030 }
  0xc4   : > { %v1019_v25 = vpop.permute.xlu2 %1018  ;;  %v1035_v30 = vsel %vm1034_vm6, %v1031_v24, %v1033_v23  ;;  %v1036_v31 = vsel %vm1034_vm6, %v1033_v23, %v1031_v24  ;;  %vm7874_vm6 = vcmp.lt.s32.totalorder %v4884_v4, 16 }
  0xc5   : > { %v1157_v39 = vsel %vm7857_vm0, %v1035_v30, %v1143_v32  ;;  %v1158_v41 = vsel %vm7857_vm0, %v1036_v31, %v1144_v33 }
  0xc6   : > { %v1215_v50 = vmul.f32 %v1183_v34, %v1157_v39  ;;  %v1216_v52 = vmul.f32 %v1184_v42, %v1158_v41  ;;  %v1175_v39 = vld [vmem:[%s7836_s7 + $0x60] sm:$0xff] }
  0xcb   : > { %v1010_v37 = vpop.permute.xlu1 %1009  ;;  %v1047_v38 = vpop.permute.xlu0 %1046 }
  0xcc   : > { %v1049_v45 = vsel %vm1048_vm7, %v1045_v61, %v1047_v38  ;;  %v1050_v46 = vsel %vm1048_vm7, %v1047_v38, %v1045_v61  ;;  %v996_v54 = vpop.permute.xlu2 %995  ;;  %v1014_v59 = vsel %vm7872_vm8, %v1010_v37, %v4882_v1  ;;  %v1015_v60 = vsel %vm7872_vm8, %v4882_v1, %v1010_v37 }
  0xcd   : > { %v1159_v47 = vsel %vm7857_vm0, %v1049_v45, %v1149_v35  ;;  %v1160_v49 = vsel %vm7857_vm0, %v1050_v46, %v1150_v36  ;;  %v1131_v6 = vrot.slane %v1014_v59, 4  ;;  %v1132_v7 = vrot.slane %v1015_v60, 4  ;;  %v1177_v45 = vld [vmem:[%s7836_s7 + $0x70] sm:$0xff] }
  0xce   : > { %v1217_v51 = vmul.f32 %v1185_v40, %v1159_v47  ;;  %v1218_v53 = vmul.f32 %v1186_v43, %v1160_v49  ;;  %v1176_v47 = vld [vmem:[%s7836_s7 + $0x68] sm:$0xff]  ;;  %v1178_v49 = vld [vmem:[%s7836_s7 + $0x78] sm:$0xff]  ;;  %vm929_vm7 = vcmp.lt.s32.totalorder %v4884_v4, 30 }
  0xd0   : > { %v1237_v55 = vpack.c.bf16 %v1217_v51, %v1215_v50  ;;  %v1238_v56 = vpack.c.bf16 %v1218_v53, %v1216_v52 }
  0xd2   : > { %1281 = vmatpush.bf16.msra.mxu0 %v1237_v55  ;;  %1300 = vmatpush.bf16.msra.mxu1 %v1238_v56 }
  0xd3   : > { %v1026_v57 = vpop.permute.xlu1 %1025  ;;  %v1024_v58 = vpop.permute.xlu0 %1023 }
  0xd4   : > { %v1028_v61 = vsel %vm1027_vm9, %v1024_v58, %v1026_v57  ;;  %v1029_v62 = vsel %vm1027_vm9, %v1026_v57, %v1024_v58  ;;  %v991_v63 = vpop.permute.xlu2 %990  ;;  %vm7871_vm9 = vcmp.lt.s32.totalorder %v4884_v4, 17 }
  0xd5   : > { %v1137_v8 = vrot.slane %v1028_v61, 4  ;;  %v1138_v9 = vrot.slane %v1029_v62, 4 }
  0xdb   : > { %v1017_v1 = vpop.permute.xlu1 %1016  ;;  %v1005_v10 = vpop.permute.xlu0 %1004 }
  0xdc   : > { %v1021_v13 = vsel %vm7861_vm10, %v1017_v1, %v1019_v25  ;;  %v1022_v14 = vsel %vm7861_vm10, %v1019_v25, %v1017_v1  ;;  %v1007_v16 = vsel %vm1006_vm11, %v4902_v15, %v1005_v10  ;;  %v1008_v17 = vsel %vm1006_vm11, %v1005_v10, %v4902_v15  ;;  %v975_v29 = vpop.permute.xlu2 %974 }
  0xdd   : > { %v1153_v18 = vsel %vm7857_vm0, %v1007_v16, %v1131_v6  ;;  %v1155_v20 = vsel %vm7857_vm0, %v1021_v13, %v1137_v8  ;;  %v1154_v21 = vsel %vm7857_vm0, %v1008_v17, %v1132_v7  ;;  %v1156_v22 = vsel %vm7857_vm0, %v1022_v14, %v1138_v9 }
  0xde   : > { %v1211_v23 = vmul.f32 %v1179_v0, %v1153_v18  ;;  %v1213_v24 = vmul.f32 %v1181_v5, %v1155_v20  ;;  %v1212_v26 = vmul.f32 %v1180_v11, %v1154_v21  ;;  %v1214_v25 = vmul.f32 %v1182_v12, %v1156_v22  ;;  %v1171_v11 = vld [vmem:[%s7836_s7 + $0x40] sm:$0xff]  ;;  %v1172_v12 = vld [vmem:[%s7836_s7 + $0x48] sm:$0xff]  ;;  %v1173_v20 = vld [vmem:[%s7836_s7 + $0x50] sm:$0xff] }
  0xdf   : > { %v1174_v22 = vld [vmem:[%s7836_s7 + $0x58] sm:$0xff] }
  0xe0   : > { %v1235_v27 = vpack.c.bf16 %v1213_v24, %v1211_v23  ;;  %v1236_v28 = vpack.c.bf16 %v1214_v25, %v1212_v26  ;;  %v4642_v23 = vmov 0   ;;  %v894_v24 = vld [vmem:[%s7841_s12 + $0x18] sm:$0xff] }
  0xe1   : > { %4374 = vset.pattern.permute.xlu1 %v4642_v23  ;;  %4373 = vset.pattern.permute.xlu0 %v4642_v23 }
  0xe2   : > { %1282 = vmatpush.bf16.msra.mxu0 %v1235_v27  ;;  %1301 = vmatpush.bf16.msra.mxu1 %v1236_v28 }
  0xe3   : > { %v984_v30 = vpop.permute.xlu1 %983  ;;  %v982_v15 = vpop.permute.xlu0 %981  ;;  %1264 = vperm.xlu1 %4374, %v894_v24   ;;  %4375 = vset.pattern.permute.xlu2 %v4642_v23 }
  0xe4   : > { %v986_v31 = vsel %vm7873_vm12, %v982_v15, %v984_v30  ;;  %v987_v32 = vsel %vm7873_vm12, %v984_v30, %v982_v15  ;;  %v956_v40 = vpop.permute.xlu2 %955 }
  0xe5   : > { %v1103_v33 = vrot.slane %v986_v31, 4  ;;  %v1104_v34 = vrot.slane %v987_v32, 4 }
  0xe7   : > { %v1125_v43 = vsel %vm7857_vm0, %v4804_v44, %v1103_v33  ;;  %v1126_v46 = vsel %vm7857_vm0, %v4810_v48, %v1104_v34 }
  0xe8   : > { %v1207_v53 = vmul.f32 %v1175_v39, %v1125_v43  ;;  %v1208_v55 = vmul.f32 %v1176_v47, %v1126_v46  ;;  %v1389_v39 = vld [vmem:[%s7843_s14] sm:$0xff]  ;;  %v1392_v43 = vld [vmem:[%s7843_s14 + $0x18] sm:$0xff] }
  0xe9   : > { %v891_v47 = vld [vmem:[%s7841_s12] sm:$0xff] }
  0xea   : > { %1249 = vperm.xlu2 %4375, %v891_v47  }
  0xeb   : > { %v989_v35 = vpop.permute.xlu1 %988  ;;  %v998_v36 = vpop.permute.xlu0 %997 }
  0xec   : > { %v1000_v37 = vsel %vm999_vm13, %v996_v54, %v998_v36  ;;  %v1001_v38 = vsel %vm999_vm13, %v998_v36, %v996_v54  ;;  %v993_v50 = vsel %vm992_vm14, %v989_v35, %v991_v63  ;;  %v994_v51 = vsel %vm992_vm14, %v991_v63, %v989_v35  ;;  %v933_v60 = vpop.permute.xlu2 %932 }
  0xed   : > { %v1109_v41 = vrot.slane %v1000_v37, 4  ;;  %v1110_v42 = vrot.slane %v1001_v38, 4  ;;  %v892_v37 = vld [vmem:[%s7841_s12 + $0x8] sm:$0xff]  ;;  %v893_v38 = vld [vmem:[%s7841_s12 + $0x10] sm:$0xff]  ;;  %vm908_vm13 = vcmp.lt.s32.totalorder %v4884_v4, 33  ;;  %vm922_vm14 = vcmp.lt.s32.totalorder %v4884_v4, 31 }
  0xee   : > { %1254 = vperm.xlu1 %4374, %v892_v37   ;;  %1259 = vperm.xlu0 %4373, %v893_v38   ;;  %v1838_v37 = vld [vmem:[%s7845_s16 + $0x10] sm:$0xff] }
  0xef   : > { %v1127_v52 = vsel %vm7857_vm0, %v993_v50, %v1109_v41  ;;  %v1128_v44 = vsel %vm7857_vm0, %v994_v51, %v1110_v42 }
  0xf0   : > { %v1209_v54 = vmul.f32 %v1177_v45, %v1127_v52  ;;  %v1210_v56 = vmul.f32 %v1178_v49, %v1128_v44 }
  0xf2   : > { %v1233_v57 = vpack.c.bf16 %v1209_v54, %v1207_v53  ;;  %v1234_v48 = vpack.c.bf16 %v1210_v56, %v1208_v55  ;;  %v1396_v54 = vld [vmem:[%s7843_s14 + $0x38] sm:$0xff]  ;;  %v1167_v55 = vld [vmem:[%s7836_s7 + $0x20] sm:$0xff]  ;;  %v1168_v56 = vld [vmem:[%s7836_s7 + $0x28] sm:$0xff] }
  0xf3   : > { %v963_v58 = vpop.permute.xlu1 %962  ;;  %v961_v59 = vpop.permute.xlu0 %960 }
  0xf4   : > { %1283 = vmatpush.bf16.msra.mxu0 %v1233_v57  ;;  %1302 = vmatpush.bf16.msra.mxu1 %v1234_v48  ;;  %v965_v63 = vsel %vm964_vm15, %v961_v59, %v963_v58  ;;  %v966_v0 = vsel %vm964_vm15, %v963_v58, %v961_v59  ;;  %v949_v9 = vpop.permute.xlu2 %948  ;;  %vm915_vm15 = vcmp.lt.s32.totalorder %v4884_v4, 32 }
  0xf5   : > { %v1091_v1 = vrot.slane %v966_v0, 4  ;;  %v1092_v10 = vrot.slane %v965_v63, 4  ;;  %v1170_v63 = vld [vmem:[%s7836_s7 + $0x38] sm:$0xff]  ;;  %v1395_v0 = vld [vmem:[%s7843_s14 + $0x30] sm:$0xff] }
  0xf6   : > { %1399 = vperm.xlu1 %4374, %v1389_v39   ;;  %1414 = vperm.xlu0 %4373, %v1392_v43  }
  0xfb   : > { %v954_v61 = vpop.permute.xlu1 %953  ;;  %v977_v62 = vpop.permute.xlu0 %976 }
  0xfc   : > { %v958_v5 = vsel %vm957_vm2, %v954_v61, %v956_v40  ;;  %v959_v6 = vsel %vm957_vm2, %v956_v40, %v954_v61  ;;  %v979_v7 = vsel %vm978_vm3, %v975_v29, %v977_v62  ;;  %v980_v8 = vsel %vm978_vm3, %v977_v62, %v975_v29  ;;  %v940_v34 = vpop.permute.xlu2 %939  ;;  %v1169_v61 = vld [vmem:[%s7836_s7 + $0x30] sm:$0xff] }
  0xfd   : > { %v1097_v13 = vrot.slane %v980_v8, 4  ;;  %v1098_v14 = vrot.slane %v979_v7, 4  ;;  %v1121_v18 = vsel %vm7857_vm0, %v959_v6, %v1091_v1  ;;  %v1122_v21 = vsel %vm7857_vm0, %v958_v5, %v1092_v10 }
  0xfe   : > { %v1203_v29 = vmul.f32 %v1171_v11, %v1121_v18  ;;  %v1204_v15 = vmul.f32 %v1172_v12, %v1122_v21  ;;  %1434 = vperm.xlu1 %4374, %v1396_v54   ;;  %1429 = vperm.xlu0 %4373, %v1395_v0   ;;  %v1391_v21 = vld [vmem:[%s7843_s14 + $0x10] sm:$0xff]  ;;  %v4316_v54 = vld [vmem:[%s7838_s9] sm:$0xff]  ;;  %v5150_v0 = vld [vmem:[%s795_s28 + $0x38] sm:$0xff] }
  0xff   : > { %1409 = vperm.xlu2 %4375, %v1391_v21   ;;  %7911 = vst [vmem:[#allocation8_spill] sm:$0xff] %v5150_v0 }
 0x103   : > { %v970_v16 = vpop.permute.xlu1 %969  ;;  %v968_v17 = vpop.permute.xlu0 %967 }
 0x104   : > { %v972_v26 = vsel %vm971_vm4, %v968_v17, %v970_v16  ;;  %v973_v25 = vsel %vm971_vm4, %v970_v16, %v968_v17  ;;  %v907_v42 = vpop.permute.xlu2 %906  ;;  %v4158_v16 = vld [vmem:[%s7845_s16 + $0x30] sm:$0xff]  ;;  %vm901_vm4 = vcmp.lt.s32.totalorder %v4884_v4, 34 }
 0x105   : > { %v1123_v27 = vsel %vm7857_vm0, %v973_v25, %v1097_v13  ;;  %v1124_v28 = vsel %vm7857_vm0, %v972_v26, %v1098_v14 }
 0x106   : > { %v1205_v30 = vmul.f32 %v1173_v20, %v1123_v27  ;;  %v1206_v31 = vmul.f32 %v1174_v22, %v1124_v28  ;;  %1937 = vperm.xlu1 %4374, %v4158_v16   ;;  %v1394_v20 = vld [vmem:[%s7843_s14 + $0x28] sm:$0xff]  ;;  %v1839_v27 = vld [vmem:[%s7845_s16 + $0x18] sm:$0xff]  ;;  %v1163_v28 = vld [vmem:[%s7836_s7] sm:$0xff] }
 0x107   : > { %1424 = vperm.xlu0 %4373, %v1394_v20  }
 0x108   : > { %v1231_v32 = vpack.c.bf16 %v1205_v30, %v1203_v29  ;;  %v1232_v33 = vpack.c.bf16 %v1206_v31, %v1204_v15  ;;  %v1165_v29 = vld [vmem:[%s7836_s7 + $0x10] sm:$0xff]  ;;  %v1164_v30 = vld [vmem:[%s7836_s7 + $0x8] sm:$0xff] }
 0x10a   : > { %1284 = vmatpush.bf16.msra.mxu0 %v1231_v32  ;;  %1303 = vmatpush.bf16.msra.mxu1 %v1232_v33 }
 0x10b   : > { %v947_v35 = vpop.permute.xlu1 %946  ;;  %v935_v36 = vpop.permute.xlu0 %934 }
 0x10c   : > { %v937_v45 = vsel %vm936_vm5, %v933_v60, %v935_v36  ;;  %v938_v46 = vsel %vm936_vm5, %v935_v36, %v933_v60  ;;  %v951_v49 = vsel %vm7874_vm6, %v947_v35, %v949_v9  ;;  %v952_v50 = vsel %vm7874_vm6, %v949_v9, %v947_v35  ;;  %v896_v12 = vpop.permute.xlu2 %895  ;;  %v1166_v36 = vld [vmem:[%s7836_s7 + $0x18] sm:$0xff] }
 0x10d   : > { %v1079_v44 = vrot.slane %v938_v46, 4  ;;  %v1080_v53 = vrot.slane %v937_v45, 4  ;;  %v1085_v57 = vrot.slane %v952_v50, 4  ;;  %v1086_v48 = vrot.slane %v951_v49, 4 }
 0x10e   : > { %1857 = vperm.xlu1 %4374, %v1839_v27   ;;  %vm7859_vm5 = vcmask 523264  }
 0x10f   : > { %1852 = vperm.xlu0 %4373, %v1838_v37  }
 0x113   : > { %v928_v40 = vpop.permute.xlu1 %927  ;;  %v926_v41 = vpop.permute.xlu0 %925 }
 0x114   : > { %v930_v51 = vsel %vm929_vm7, %v926_v41, %v928_v40  ;;  %v931_v52 = vsel %vm929_vm7, %v928_v40, %v926_v41  ;;  %v914_v25 = vpop.permute.xlu2 %913  ;;  %vm7860_vm7 = vcmask 261120  }
 0x115   : > { %v1117_v60 = vsel %vm7857_vm0, %v931_v52, %v1079_v44  ;;  %v1118_v62 = vsel %vm7857_vm0, %v930_v51, %v1080_v53 }
 0x116   : > { %v1199_v9 = vmul.f32 %v1167_v55, %v1117_v60  ;;  %v1200_v10 = vmul.f32 %v1168_v56, %v1118_v62  ;;  %v1836_v55 = vld [vmem:[%s7845_s16] sm:$0xff]  ;;  %v4157_v56 = vld [vmem:[%s7845_s16 + $0x28] sm:$0xff] }
 0x117   : > { %1842 = vperm.xlu1 %4374, %v1836_v55   ;;  %1932 = vperm.xlu0 %4373, %v4157_v56   ;;  %v1837_v60 = vld [vmem:[%s7845_s16 + $0x8] sm:$0xff] }
 0x118   : > { %v5146_v62 = vld [vmem:[%s795_s28 + $0x28] sm:$0xff] }
 0x11b   : > { %v905_v58 = vpop.permute.xlu1 %904  ;;  %v942_v59 = vpop.permute.xlu0 %941 }
 0x11c   : > { %v944_v5 = vsel %vm7871_vm9, %v940_v34, %v942_v59  ;;  %v945_v6 = vsel %vm7871_vm9, %v942_v59, %v940_v34  ;;  %v909_v22 = vsel %vm908_vm13, %v905_v58, %v907_v42  ;;  %v910_v23 = vsel %vm908_vm13, %v907_v42, %v905_v58  ;;  %v1390_v42 = vld [vmem:[%s7843_s14 + $0x8] sm:$0xff]  ;;  %v4156_v59 = vld [vmem:[%s7845_s16 + $0x20] sm:$0xff] }
 0x11d   : > { %v1119_v7 = vsel %vm7857_vm0, %v945_v6, %v1085_v57  ;;  %v1120_v8 = vsel %vm7857_vm0, %v944_v5, %v1086_v48  ;;  %v1067_v15 = vrot.slane %v910_v23, 4  ;;  %v1068_v31 = vrot.slane %v909_v22, 4  ;;  %1404 = vperm.xlu2 %4375, %v1390_v42   ;;  %v1393_v57 = vld [vmem:[%s7843_s14 + $0x20] sm:$0xff]  ;;  %v4159_v48 = vld [vmem:[%s7845_s16 + $0x38] sm:$0xff]  ;;  %v4317_v58 = vld [vmem:[%s7838_s9 + $0x8] sm:$0xff] }
 0x11e   : > { %v1201_v1 = vmul.f32 %v1169_v61, %v1119_v7  ;;  %v1202_v11 = vmul.f32 %v1170_v63, %v1120_v8  ;;  %v5144_v61 = vld [vmem:[%s795_s28 + $0x20] sm:$0xff]  ;;  %v5148_v63 = vld [vmem:[%s795_s28 + $0x30] sm:$0xff] }
 0x11f   : > { %7910 = vst [vmem:[#allocation7_spill] sm:$0xff] %v5148_v63  ;;  %v1339_v5 = vpack.c.bf16 %v5146_v62, %v5144_v61  ;;  %v1340_v6 = vpack.c.bf16 %v5150_v0, %v5148_v63 }
 0x120   : > { %v1229_v13 = vpack.c.bf16 %v1201_v1, %v1199_v9  ;;  %v1230_v14 = vpack.c.bf16 %v1202_v11, %v1200_v10  ;;  %v5156_v10 = vld [vmem:[%s795_s28] sm:$0xff]  ;;  %v5158_v11 = vld [vmem:[%s795_s28 + $0x8] sm:$0xff] }
 0x121   : > { %v1369_v7 = vunpack.c.l.b16 %v1339_v5  ;;  %v1370_v8 = vunpack.c.h.b16 %v1339_v5  ;;  %v1371_v9 = vunpack.c.l.b16 %v1340_v6  ;;  %v1372_v1 = vunpack.c.h.b16 %v1340_v6 }
 0x122   : > { %1285 = vmatpush.bf16.msra.mxu0 %v1229_v13  ;;  %1304 = vmatpush.bf16.msra.mxu1 %v1230_v14  ;;  %v5162_v13 = vld [vmem:[%s795_s28 + $0x18] sm:$0xff]  ;;  %v1337_v14 = vpack.c.bf16 %v5158_v11, %v5156_v10 }
 0x123   : > { %v921_v17 = vpop.permute.xlu1 %920  ;;  %v919_v18 = vpop.permute.xlu0 %918  ;;  %v5166_v16 = vpack.c.b16 %v1371_v9, %v1369_v7 }
 0x124   : > { %v923_v24 = vsel %vm922_vm14, %v919_v18, %v921_v17  ;;  %v924_v26 = vsel %vm922_vm14, %v921_v17, %v919_v18  ;;  %v5168_v17 = vpack.c.b16 %v1372_v1, %v1370_v8  ;;  %v1365_v20 = vunpack.c.l.b16 %v1337_v14 }
 0x125   : > { %v1073_v32 = vrot.slane %v924_v26, 4  ;;  %v1074_v33 = vrot.slane %v923_v24, 4  ;;  %1419 = vperm.xlu2 %4375, %v1393_v57   ;;  %v1366_v21 = vunpack.c.h.b16 %v1337_v14  ;;  %1474 = vmatpush.bf16.msra.mxu2 %v5166_v16 }
 0x126   : > { %1503 = vmatpush.bf16.msra.mxu3 %v5168_v17 }
 0x12b   : > { %v912_v34 = vpop.permute.xlu1 %911  ;;  %v898_v35 = vpop.permute.xlu0 %897 }
 0x12c   : > { %v916_v38 = vsel %vm915_vm15, %v912_v34, %v914_v25  ;;  %v917_v39 = vsel %vm915_vm15, %v914_v25, %v912_v34  ;;  %v902_v40 = vsel %vm901_vm4, %v896_v12, %v898_v35  ;;  %v903_v41 = vsel %vm901_vm4, %v898_v35, %v896_v12  ;;  %v5160_v12 = vld [vmem:[%s795_s28 + $0x10] sm:$0xff]  ;;  %s8071_s28 = smov 113  }
 0x12d   : > { %v1113_v43 = vsel %vm7857_vm0, %v903_v41, %v1067_v15  ;;  %v1115_v45 = vsel %vm7857_vm0, %v917_v39, %v1073_v32  ;;  %v1114_v46 = vsel %vm7857_vm0, %v902_v40, %v1068_v31  ;;  %v1116_v47 = vsel %vm7857_vm0, %v916_v38, %v1074_v33  ;;  %1942 = vperm.xlu2 %4375, %v4159_v48  }
 0x12e   : > { %v1195_v49 = vmul.f32 %v1163_v28, %v1113_v43  ;;  %v1197_v50 = vmul.f32 %v1165_v29, %v1115_v45  ;;  %v1196_v51 = vmul.f32 %v1164_v30, %v1114_v46  ;;  %v1198_v52 = vmul.f32 %v1166_v36, %v1116_v47 }
 0x12f   : > { %v1338_v18 = vpack.c.bf16 %v5162_v13, %v5160_v12 }
 0x130   : > { %v1227_v44 = vpack.c.bf16 %v1197_v50, %v1195_v49  ;;  %v1228_v53 = vpack.c.bf16 %v1198_v52, %v1196_v51 }
 0x131   : > { %v1367_v22 = vunpack.c.l.b16 %v1338_v18  ;;  %v1368_v23 = vunpack.c.h.b16 %v1338_v18 }
 0x132   : > { %1286 = vmatpush.bf16.msra.mxu0 %v1227_v44  ;;  %1305 = vmatpush.bf16.msra.mxu1 %v1228_v53 }
 0x133   : > { %v5174_v24 = vpack.c.b16 %v1367_v22, %v1365_v20  ;;  %v5176_v26 = vpack.c.b16 %v1368_v23, %v1366_v21  ;;  %v4318_v20 = vld [vmem:[%s7842_s13] sm:$0xff]  ;;  %v4319_v22 = vld [vmem:[%s7842_s13 + $0x8] sm:$0xff]  ;;  %v4321_v23 = vld [vmem:[%s7842_s13 + $0x18] sm:$0xff] }
 0x134   : > { %v4322_v21 = vld [vmem:[%s7844_s15] sm:$0xff] }
 0x135   : > { %1287 = vmatmul.bf16.vlgmr.msra.gmra.mxu0 %v4316_v54  ;;  %1306 = vmatmul.bf16.vlgmr.msra.gmra.mxu1 %v4316_v54 }
 0x136   : > { %1927 = vperm.xlu2 %4375, %v4156_v59   ;;  %1475 = vmatpush.bf16.msra.mxu2 %v5174_v24 }
 0x137   : > { %1504 = vmatpush.bf16.msra.mxu3 %v5176_v26 }
 0x13e   : > { %1847 = vperm.xlu2 %4375, %v1837_v60  }
 0x144   : > { %v1250_v36 = vpop.permute.xlu2 %1249 }
 0x145   : > { %1292 = vmatmul.bf16.gmra.mxu0 %v4317_v58  ;;  %1311 = vmatmul.bf16.gmra.mxu1 %v4317_v58 }
 0x155   : > { %v1265_v30 = vpop.permute.xlu1 %1264 }
 0x160   : > { %v1260_v32 = vpop.permute.xlu0 %1259  ;;  %v1255_v35 = vpop.permute.xlu1 %1254 }
 0x1b2   : > { %v1288_v25 = vpop.f32.mrf.mxu0  ;;  %v1307_v27 = vpop.f32.mrf.mxu1 }
 0x1b3   : > { %v1289_v39 = vadd.f32 %v1288_v25, %v1250_v36  ;;  %v1308_v40 = vadd.f32 %v1307_v27, %v1250_v36  ;;  %v1410_v25 = vpop.permute.xlu2 %1409  ;;  %v1400_v27 = vpop.permute.xlu1 %1399 }
 0x1b4   : > { %v1415_v36 = vpop.permute.xlu0 %1414 }
 0x1b5   : > { %v1317_v51 = vmax.f32 %v1289_v39, 0.0  ;;  %v1318_v52 = vmax.f32 %v1308_v40, 0.0 }
 0x1b7   : > { %v1333_v57 = vpack.c.bf16 %v1318_v52, %v1317_v51 }
 0x1b9   : > { %v1345_v9 = vunpack.c.l.b16 %v1333_v57  ;;  %v1346_v1 = vunpack.c.h.b16 %v1333_v57 }
 0x1ba   : > { %v1290_v28 = vpop.f32.mrf.mxu0  ;;  %v1309_v29 = vpop.f32.mrf.mxu1 }
 0x1bb   : > { %v1291_v37 = vadd.f32 %v1290_v28, %v1255_v35  ;;  %v1310_v38 = vadd.f32 %v1309_v29, %v1255_v35  ;;  %v1405_v28 = vpop.permute.xlu2 %1404 }
 0x1bc   : > { %v5232_v51 = vpop.permute.xlu0 %1429 }
 0x1bd   : > { %v1319_v46 = vmax.f32 %v1291_v37, 0.0  ;;  %v1320_v47 = vmax.f32 %v1310_v38, 0.0 }
 0x1bf   : > { %v1334_v55 = vpack.c.bf16 %v1320_v47, %v1319_v46 }
 0x1c1   : > { %v1347_v7 = vunpack.c.l.b16 %v1334_v55  ;;  %v1348_v8 = vunpack.c.h.b16 %v1334_v55 }
 0x1c2   : > { %v1293_v15 = vpop.f32.mrf.mxu0  ;;  %v1312_v31 = vpop.f32.mrf.mxu1 }
 0x1c3   : > { %v1294_v33 = vadd.f32 %v1293_v15, %v1260_v32  ;;  %v1313_v34 = vadd.f32 %v1312_v31, %v1260_v32  ;;  %v1353_v14 = vpack.c.b16 %v1347_v7, %v1345_v9  ;;  %v1354_v18 = vpack.c.b16 %v1348_v8, %v1346_v1  ;;  %v5224_v15 = vpop.permute.xlu1 %1434 }
 0x1c5   : > { %v1321_v41 = vmax.f32 %v1294_v33, 0.0  ;;  %v1322_v42 = vmax.f32 %v1313_v34, 0.0  ;;  %v5226_v33 = vpop.permute.xlu2 %1419 }
 0x1c7   : > { %v1335_v44 = vpack.c.bf16 %v1322_v42, %v1321_v41 }
 0x1c9   : > { %v1349_v48 = vunpack.c.l.b16 %v1335_v44  ;;  %v1350_v59 = vunpack.c.h.b16 %v1335_v44 }
 0x1ca   : > { %v1295_v43 = vpop.f32.mrf.mxu0  ;;  %v1314_v45 = vpop.f32.mrf.mxu1 }
 0x1cb   : > { %v1296_v49 = vadd.f32 %v1295_v43, %v1265_v30  ;;  %v1315_v50 = vadd.f32 %v1314_v45, %v1265_v30  ;;  %v5228_v43 = vpop.permute.xlu1 %1937 }
 0x1cd   : > { %v1323_v53 = vmax.f32 %v1296_v49, 0.0  ;;  %v1324_v54 = vmax.f32 %v1315_v50, 0.0  ;;  %v5230_v49 = vpop.permute.xlu2 %1942 }
 0x1cf   : > { %v1336_v56 = vpack.c.bf16 %v1324_v54, %v1323_v53 }
 0x1d1   : > { %v1351_v58 = vunpack.c.l.b16 %v1336_v56  ;;  %v1352_v60 = vunpack.c.h.b16 %v1336_v56 }
 0x1d3   : > { %v1355_v5 = vpack.c.b16 %v1351_v58, %v1349_v48  ;;  %v1356_v6 = vpack.c.b16 %v1352_v60, %v1350_v59  ;;  %v5240_v59 = vpop.permute.xlu1 %1857 }
 0x1d5   : > { %1476 = vmatpush.bf16.msra.mxu2 %v1355_v5  ;;  %1505 = vmatpush.bf16.msra.mxu3 %v1356_v6 }
 0x1d6   : > { %1883 = vmatpush.bf16.msrb.mxu0 %v1355_v5  ;;  %1902 = vmatpush.bf16.msrb.mxu1 %v1356_v6  ;;  %v5242_v6 = vpop.permute.xlu2 %1927 }
 0x1d9   : > { %1477 = vmatpush.bf16.msra.mxu2 %v1353_v14  ;;  %1506 = vmatpush.bf16.msra.mxu3 %v1354_v18 }
 0x1da   : > { %1884 = vmatpush.bf16.msrb.mxu0 %v1353_v14  ;;  %1903 = vmatpush.bf16.msrb.mxu1 %v1354_v18  ;;  %v5246_v14 = vpop.permute.xlu0 %1424 }
 0x1dc   : > { %4116 = vmatmul.msk.bf16.vlgmr.msra.gmra.mxu2 %vm7859_vm5, %v4318_v20  ;;  %4120 = vmatmul.msk.bf16.vlgmr.msra.gmra.mxu3 %vm7859_vm5, %v4318_v20 }
 0x1dd   : > { %1967 = vmatpush.bf16.msrb.mxu2 %v5166_v16  ;;  %1986 = vmatpush.bf16.msrb.mxu3 %v5168_v17  ;;  %v4323_v16 = vld [vmem:[%s7844_s15 + $0x8] sm:$0xff]  ;;  %v4320_v17 = vld [vmem:[%s7842_s13 + $0x10] sm:$0xff] }
 0x1de   : > { %4148 = vmatmul.msk.bf16.vlgmr.msrb.gmra.mxu0 %vm7860_vm7, %v4322_v21  ;;  %4150 = vmatmul.msk.bf16.vlgmr.msrb.gmra.mxu1 %vm7860_vm7, %v4322_v21 }
 0x1e1   : > { %1968 = vmatpush.bf16.msrb.mxu2 %v5174_v24  ;;  %1987 = vmatpush.bf16.msrb.mxu3 %v5176_v26  ;;  %v4324_v24 = vld [vmem:[%s7844_s15 + $0x10] sm:$0xff]  ;;  %v4325_v26 = vld [vmem:[%s7844_s15 + $0x18] sm:$0xff] }
 0x1ec   : > { %4117 = vmatmul.msk.bf16.gmra.mxu2 %vm7859_vm5, %v4319_v22  ;;  %4121 = vmatmul.msk.bf16.gmra.mxu3 %vm7859_vm5, %v4319_v22 }
 0x1ee   : > { %4149 = vmatmul.msk.bf16.gmra.mxu0 %vm7860_vm7, %v4323_v16  ;;  %4151 = vmatmul.msk.bf16.gmra.mxu1 %vm7860_vm7, %v4323_v16 }
 0x1fc   : > { %4118 = vmatmul.msk.bf16.gmra.mxu2 %vm7859_vm5, %v4320_v17  ;;  %4122 = vmatmul.msk.bf16.gmra.mxu3 %vm7859_vm5, %v4320_v17 }
 0x20c   : > { %4119 = vmatmul.msk.bf16.gmra.mxu2 %vm7859_vm5, %v4321_v23  ;;  %4123 = vmatmul.msk.bf16.gmra.mxu3 %vm7859_vm5, %v4321_v23 }
 0x21c   : > { %4168 = vmatmul.msk.bf16.vlgmr.msrb.gmra.mxu2 %vm7860_vm7, %v4324_v24  ;;  %4170 = vmatmul.msk.bf16.vlgmr.msrb.gmra.mxu3 %vm7860_vm7, %v4324_v24 }
 0x22c   : > { %4169 = vmatmul.msk.bf16.gmra.mxu2 %vm7860_vm7, %v4325_v26  ;;  %4171 = vmatmul.msk.bf16.gmra.mxu3 %vm7860_vm7, %v4325_v26 }
 0x25b   : > { %v1886_v39 = vpop.f32.mrf.mxu0  ;;  %v1905_v40 = vpop.f32.mrf.mxu1 }
 0x25f   : > { %v1479_v29 = vpop.f32.mrf.mxu2  ;;  %v1508_v30 = vpop.f32.mrf.mxu3 }
 0x260   : > { %v1480_v31 = vadd.f32 %v1479_v29, %v1400_v27  ;;  %v1509_v32 = vadd.f32 %v1508_v30, %v1400_v27  ;;  %v1843_v27 = vpop.permute.xlu1 %1842 }
 0x262   : > { %v4124_v34 = vmul.f32 -1.442695, %v1480_v31  ;;  %v4125_v35 = vmul.f32 -1.442695, %v1509_v32 }
 0x263   : > { %v1888_v56 = vpop.f32.mrf.mxu0  ;;  %v1907_v57 = vpop.f32.mrf.mxu1 }
 0x264   : > { %4376 = vpow2.f32 %v4124_v34 }
 0x265   : > { %4378 = vpow2.f32 %v4125_v35  ;;  %v1848_v35 = vpop.permute.xlu2 %1847 }
 0x267   : > { %v1481_v37 = vpop.f32.mrf.mxu2  ;;  %v1510_v38 = vpop.f32.mrf.mxu3 }
 0x268   : > { %v1482_v41 = vadd.f32 %v1481_v37, %v1405_v28  ;;  %v1511_v42 = vadd.f32 %v1510_v38, %v1405_v28  ;;  %v5262_v37 = vadd.f32 %v1886_v39, %v1843_v27 }
 0x26a   : > { %v4377_v45 = vpop.eup %4376  ;;  %v4126_v46 = vmul.f32 -1.442695, %v1482_v41  ;;  %v4127_v50 = vmul.f32 -1.442695, %v1511_v42 }
 0x26b   : > { %v4379_v47 = vpop.eup %4378  ;;  %v5234_v52 = vadd.f32 1.0, %v4377_v45  ;;  %v1891_v24 = vpop.f32.mrf.mxu0  ;;  %v5266_v45 = vadd.f32 %v1905_v40, %v1843_v27 }
 0x26c   : > { %v5236_v44 = vadd.f32 1.0, %v4379_v47  ;;  %4380 = vpow2.f32 %v4126_v46  ;;  %v1910_v26 = vpop.f32.mrf.mxu1  ;;  %v5268_v46 = vadd.f32 %v1888_v56, %v1848_v35  ;;  %v5270_v47 = vadd.f32 %v1907_v57, %v1848_v35 }
 0x26d   : > { %4382 = vpow2.f32 %v4127_v50  ;;  %vm1565_vm13 = vweird.f32 %v5234_v52 }
 0x26e   : > { %4384 = vrcp.f32 %v5234_v52  ;;  %vm1580_vm14 = vweird.f32 %v5236_v44 }
 0x26f   : > { %v1484_v53 = vpop.f32.mrf.mxu2  ;;  %v1513_v54 = vpop.f32.mrf.mxu3  ;;  %4386 = vrcp.f32 %v5236_v44 }
 0x270   : > { %v1485_v55 = vadd.f32 %v1484_v53, %v1410_v25  ;;  %v1514_v58 = vadd.f32 %v1513_v54, %v1410_v25  ;;  %v1853_v53 = vpop.permute.xlu0 %1852 }
 0x271   : > { %v5281_v40 = vadd.f32 %v1910_v26, %v1853_v53 }
 0x272   : > { %v4128_v48 = vmul.f32 -1.442695, %v1485_v55  ;;  %v4381_v60 = vpop.eup %4380  ;;  %v4129_v7 = vmul.f32 -1.442695, %v1514_v58  ;;  %v1571_v55 = vand.u32 2147483648, %v5234_v52 }
 0x273   : > { %v4383_v5 = vpop.eup %4382  ;;  %v5248_v18 = vadd.f32 1.0, %v4381_v60 }
 0x274   : > { %4388 = vpow2.f32 %v4128_v48  ;;  %v5244_v1 = vpop.eup %4384  ;;  %v5252_v22 = vadd.f32 1.0, %v4383_v5 }
 0x275   : > { %v5250_v21 = vpop.eup %4386  ;;  %4390 = vpow2.f32 %v4129_v7  ;;  %v1561_v23 = vmul.f32 %v5244_v1, %v5234_v52  ;;  %v1584_v7 = vand.u32 2147483647, %v5236_v44  ;;  %vm1566_vm15 = vweird.f32 %v5244_v1 }
 0x276   : > { %4392 = vrcp.f32 %v5248_v18  ;;  %v1576_v25 = vmul.f32 %v5250_v21, %v5236_v44  ;;  %vm1581_vm0 = vweird.f32 %v5250_v21  ;;  %vm5325_vm5 = vmor %vm1565_vm13, %vm1566_vm15 }
 0x277   : > { %v1486_v8 = vpop.f32.mrf.mxu2  ;;  %v1515_v9 = vpop.f32.mrf.mxu3  ;;  %4394 = vrcp.f32 %v5252_v22  ;;  %v1562_v32 = vsub.f32 1.0, %v1561_v23  ;;  %v1572_v23 = vor.u32 1.1754944e-38, %v1571_v55  ;;  %vm5310_vm1 = vcmp.eq.f32.partialorder %v1584_v7, 8.507059e+37  ;;  %vm5334_vm7 = vmor %vm1580_vm14, %vm1581_vm0 }
 0x278   : > { %v1487_v20 = vadd.f32 %v1486_v8, %v1415_v36  ;;  %v1516_v29 = vadd.f32 %v1515_v9, %v1415_v36  ;;  %v1577_v42 = vsub.f32 1.0, %v1576_v25  ;;  %v1569_v36 = vand.u32 2147483647, %v5234_v52 }
 0x279   : > { %v1563_v57 = vmul.f32 %v5244_v1, %v1562_v32  ;;  %v1586_v8 = vand.u32 2147483648, %v5236_v44  ;;  %vm1595_vm0 = vweird.f32 %v5248_v18  ;;  %vm1610_vm14 = vweird.f32 %v5252_v22 }
 0x27a   : > { %v4130_v16 = vmul.f32 -1.442695, %v1487_v20  ;;  %v4389_v17 = vpop.eup %4388  ;;  %v4131_v39 = vmul.f32 -1.442695, %v1516_v29  ;;  %v1578_v5 = vmul.f32 %v5250_v21, %v1577_v42  ;;  %v1893_v20 = vpop.f32.mrf.mxu0  ;;  %vm5294_vm4 = vcmp.eq.f32.partialorder %v1569_v36, 8.507059e+37 }
 0x27b   : > { %v5260_v28 = vadd.f32 1.0, %v4389_v17  ;;  %v4391_v34 = vpop.eup %4390  ;;  %v1564_v27 = vadd.f32 %v5244_v1, %v1563_v57  ;;  %v1601_v42 = vand.u32 2147483648, %v5248_v18 }
 0x27c   : > { %4396 = vpow2.f32 %v4130_v16  ;;  %v5273_v50 = vpop.eup %4392  ;;  %v5283_v56 = vadd.f32 1.0, %v4391_v34  ;;  %v1912_v16 = vpop.f32.mrf.mxu1  ;;  %v1579_v34 = vadd.f32 %v5250_v21, %v1578_v5 }
 0x27d   : > { %4398 = vrcp.f32 %v5260_v28  ;;  %v5277_v48 = vpop.eup %4394  ;;  %v1591_v9 = vmul.f32 %v5273_v50, %v5248_v18  ;;  %v1568_v7 = vsel %vm5325_vm5, %v5244_v1, %v1564_v27  ;;  %vm1596_vm13 = vweird.f32 %v5273_v50 }
 0x27e   : > { %v1606_v29 = vmul.f32 %v5277_v48, %v5252_v22  ;;  %v1583_v44 = vsel %vm5334_vm7, %v5250_v21, %v1579_v34  ;;  %v1616_v1 = vand.u32 2147483648, %v5252_v22  ;;  %v5359_v21 = vsel %vm5294_vm4, %v1572_v23, %v1568_v7  ;;  %vm5399_vm4 = vmor %vm1595_vm0, %vm1596_vm13 }
 0x27f   : > { %v1489_v30 = vpop.f32.mrf.mxu2  ;;  %v1518_v31 = vpop.f32.mrf.mxu3  ;;  %vm1611_vm7 = vweird.f32 %v5277_v48  ;;  %vm1625_vm15 = vweird.f32 %v5260_v28  ;;  %vm1640_vm13 = vweird.f32 %v5283_v56 }
 0x280   : > { %v1490_v38 = vadd.f32 %v1489_v30, %v5226_v33  ;;  %v1519_v41 = vadd.f32 %v1518_v31, %v5226_v33  ;;  %v5279_v33 = vadd.f32 %v1891_v24, %v1853_v53  ;;  %v5316_v53 = vadd.f32 %v1893_v20, %v5240_v59  ;;  %vm5422_vm0 = vmor %vm1610_vm14, %vm1611_vm7 }
 0x281   : > { %v1602_v20 = vor.u32 1.1754944e-38, %v1601_v42  ;;  %v1629_v42 = vand.u32 2147483647, %v5260_v28  ;;  %v1617_v57 = vor.u32 1.1754944e-38, %v1616_v1 }
 0x282   : > { %v4132_v54 = vmul.f32 -1.442695, %v1490_v38  ;;  %v4397_v58 = vpop.eup %4396  ;;  %v4133_v60 = vmul.f32 -1.442695, %v1519_v41  ;;  %v1587_v38 = vor.u32 1.1754944e-38, %v1586_v8  ;;  %v1592_v41 = vsub.f32 1.0, %v1591_v9 }
 0x283   : > { %v5300_v24 = vadd.f32 1.0, %v4397_v58  ;;  %v5305_v30 = vpop.eup %4398  ;;  %v1607_v58 = vsub.f32 1.0, %v1606_v29  ;;  %vm5410_vm10 = vcmp.eq.f32.partialorder %v1629_v42, 8.507059e+37 }
 0x284   : > { %4400 = vpow2.f32 %v4132_v54  ;;  %v1621_v52 = vmul.f32 %v5305_v30, %v5260_v28  ;;  %v1593_v9 = vmul.f32 %v5273_v50, %v1592_v41  ;;  %v5363_v29 = vsel %vm5310_vm1, %v1587_v38, %v1583_v44 }
 0x285   : > { %4402 = vpow2.f32 %v4131_v39  ;;  %v5319_v39 = vadd.f32 %v1912_v16, %v5240_v59  ;;  %v1599_v59 = vand.u32 2147483647, %v5248_v18  ;;  %v1614_v16 = vand.u32 2147483647, %v5252_v22 }
 0x286   : > { %4404 = vrcp.f32 %v5283_v56  ;;  %v1622_v34 = vsub.f32 1.0, %v1621_v52  ;;  %vm1626_vm14 = vweird.f32 %v5305_v30 }
 0x287   : > { %v1491_v26 = vpop.f32.mrf.mxu2  ;;  %v1520_v25 = vpop.f32.mrf.mxu3  ;;  %4406 = vpow2.f32 %v4133_v60  ;;  %vm5365_vm5 = vcmp.eq.f32.partialorder %v1599_v59, 8.507059e+37  ;;  %vm5383_vm1 = vcmp.eq.f32.partialorder %v1614_v16, 8.507059e+37  ;;  %v1631_v59 = vand.u32 2147483648, %v5260_v28 }
 0x288   : > { %v1492_v31 = vadd.f32 %v1491_v26, %v5246_v14  ;;  %v1521_v32 = vadd.f32 %v1520_v25, %v5246_v14  ;;  %4408 = vrcp.f32 %v5300_v24  ;;  %v1644_v16 = vand.u32 2147483647, %v5283_v56 }
 0x28a   : > { %v4401_v36 = vpop.eup %4400  ;;  %v4134_v54 = vmul.f32 -1.442695, %v1492_v31  ;;  %v4135_v55 = vmul.f32 -1.442695, %v1521_v32  ;;  %v1608_v32 = vmul.f32 %v5277_v48, %v1607_v58 }
 0x28b   : > { %v4403_v60 = vpop.eup %4402  ;;  %v5341_v5 = vadd.f32 1.0, %v4401_v36 }
 0x28c   : > { %4410 = vpow2.f32 %v4134_v54  ;;  %v5349_v8 = vpop.eup %4404  ;;  %v5370_v41 = vadd.f32 1.0, %v4403_v60  ;;  %v1594_v54 = vadd.f32 %v5273_v50, %v1593_v9  ;;  %v1609_v60 = vadd.f32 %v5277_v48, %v1608_v32 }
 0x28d   : > { %v4407_v26 = vpop.eup %4406  ;;  %4412 = vpow2.f32 %v4135_v55  ;;  %v1636_v17 = vmul.f32 %v5349_v8, %v5283_v56  ;;  %vm1641_vm7 = vweird.f32 %v5349_v8 }
 0x28e   : > { %4414 = vrcp.f32 %v5341_v5  ;;  %v5376_v23 = vpop.eup %4408  ;;  %v5378_v35 = vadd.f32 1.0, %v4407_v26  ;;  %vm1670_vm6 = vweird.f32 %v5370_v41 }
 0x28f   : > { %v1494_v25 = vpop.f32.mrf.mxu2  ;;  %v1523_v27 = vpop.f32.mrf.mxu3  ;;  %4416 = vrcp.f32 %v5370_v41  ;;  %v1637_v9 = vsub.f32 1.0, %v1636_v17  ;;  %v1651_v26 = vmul.f32 %v5376_v23, %v5300_v24  ;;  %v1632_v17 = vor.u32 1.1754944e-38, %v1631_v59 }
 0x290   : > { %v1495_v38 = vadd.f32 %v1494_v25, %v5232_v51  ;;  %v1524_v36 = vadd.f32 %v1523_v27, %v5232_v51  ;;  %v1623_v51 = vmul.f32 %v5305_v30, %v1622_v34  ;;  %4418 = vrcp.f32 %v5378_v35 }
 0x291   : > { %v1598_v25 = vsel %vm5399_vm4, %v5273_v50, %v1594_v54  ;;  %v1646_v50 = vand.u32 2147483648, %v5283_v56  ;;  %v1652_v59 = vsub.f32 1.0, %v1651_v26  ;;  %vm5457_vm4 = vcmp.eq.f32.partialorder %v1644_v16, 8.507059e+37 }
 0x292   : > { %v4411_v14 = vpop.eup %4410  ;;  %v4136_v52 = vmul.f32 -1.442695, %v1495_v38  ;;  %v4137_v1 = vmul.f32 -1.442695, %v1524_v36  ;;  %v1613_v36 = vsel %vm5422_vm0, %v5277_v48, %v1609_v60  ;;  %v1624_v54 = vadd.f32 %v5305_v30, %v1623_v51 }
 0x293   : > { %v5390_v58 = vadd.f32 1.0, %v4411_v14  ;;  %v4413_v7 = vpop.eup %4412  ;;  %v5437_v22 = vsel %vm5365_vm5, %v1602_v20, %v1598_v25  ;;  %v1638_v14 = vmul.f32 %v5349_v8, %v1637_v9  ;;  %v5449_v31 = vsel %vm5383_vm1, %v1617_v57, %v1613_v36  ;;  %vm5453_vm5 = vmor %vm1625_vm15, %vm1626_vm14 }
 0x294   : > { %v5414_v18 = vpop.eup %4414  ;;  %v5416_v32 = vadd.f32 1.0, %v4413_v7  ;;  %4420 = vpow2.f32 %v4136_v52  ;;  %v1647_v44 = vor.u32 1.1754944e-38, %v1646_v50  ;;  %v1659_v9 = vand.u32 2147483647, %v5300_v24 }
 0x295   : > { %4422 = vrcp.f32 %v5390_v58  ;;  %v1713_v52 = vmul.f32 %v5414_v18, %v5341_v5  ;;  %v5444_v48 = vpop.eup %4416  ;;  %v1628_v28 = vsel %vm5453_vm5, %v5305_v30, %v1624_v54  ;;  %v1661_v57 = vand.u32 2147483648, %v5300_v24 }
 0x296   : > { %4424 = vrcp.f32 %v5416_v32  ;;  %v5462_v26 = vpop.eup %4418  ;;  %v1639_v16 = vadd.f32 %v5349_v8, %v1638_v14  ;;  %v1653_v34 = vmul.f32 %v5376_v23, %v1652_v59  ;;  %vm1655_vm1 = vweird.f32 %v5300_v24 }
 0x297   : > { %v1496_v42 = vpop.f32.mrf.mxu2  ;;  %v1525_v38 = vpop.f32.mrf.mxu3  ;;  %4426 = vpow2.f32 %v4137_v1  ;;  %vm1656_vm15 = vweird.f32 %v5376_v23  ;;  %v1721_v30 = vand.u32 2147483647, %v5341_v5  ;;  %v1728_v54 = vmul.f32 %v5462_v26, %v5378_v35 }
 0x298   : > { %v1497_v7 = vadd.f32 %v1496_v42, %v5224_v15  ;;  %v1526_v60 = vadd.f32 %v1525_v38, %v5224_v15  ;;  %v1723_v15 = vand.u32 2147483648, %v5341_v5  ;;  %v1714_v42 = vsub.f32 1.0, %v1713_v52  ;;  %vm5536_vm5 = vmor %vm1655_vm1, %vm1656_vm15 }
 0x299   : > { %v5484_v14 = vsel %vm5410_vm10, %v1632_v17, %v1628_v28  ;;  %vm5486_vm0 = vcmp.eq.f32.partialorder %v1659_v9, 8.507059e+37  ;;  %vm1717_vm14 = vweird.f32 %v5341_v5  ;;  %vm5499_vm10 = vmor %vm1640_vm13, %vm1641_vm7  ;;  %v1662_v17 = vor.u32 1.1754944e-38, %v1661_v57 }
 0x29a   : > { %v4138_v55 = vmul.f32 -1.442695, %v1497_v7  ;;  %v4421_v1 = vpop.eup %4420  ;;  %v4139_v25 = vmul.f32 -1.442695, %v1526_v60  ;;  %v5491_v7 = vor.u32 1.1754944e-38, %v1723_v15  ;;  %v1738_v60 = vand.u32 2147483648, %v5378_v35 }
 0x29b   : > { %v5472_v50 = vpop.eup %4422  ;;  %v5474_v38 = vadd.f32 1.0, %v4421_v1  ;;  %v1643_v15 = vsel %vm5499_vm10, %v5349_v8, %v1639_v16  ;;  %v1654_v28 = vadd.f32 %v5376_v23, %v1653_v34  ;;  %v1666_v1 = vmul.f32 %v5444_v48, %v5370_v41 }
 0x29c   : > { %4428 = vpow2.f32 %v4138_v55  ;;  %v5477_v36 = vpop.eup %4424  ;;  %v1736_v56 = vand.u32 2147483647, %v5378_v35  ;;  %v1743_v19 = vmul.f32 %v5472_v50, %v5390_v58  ;;  %v1753_v3 = vand.u32 2147483648, %v5390_v58 }
 0x29d   : > { %4430 = vpow2.f32 %v4139_v25  ;;  %v4427_v52 = vpop.eup %4426  ;;  %v1715_v25 = vmul.f32 %v5414_v18, %v1714_v42  ;;  %v1758_v8 = vmul.f32 %v5477_v36, %v5416_v32  ;;  %vm1718_vm13 = vweird.f32 %v5414_v18 }
 0x29e   : > { %4432 = vrcp.f32 %v5474_v38  ;;  %v5503_v9 = vadd.f32 1.0, %v4427_v52  ;;  %v1729_v52 = vsub.f32 1.0, %v1728_v54  ;;  %vm5521_vm7 = vcmp.eq.f32.partialorder %v1721_v30, 8.507059e+37  ;;  %vm5571_vm15 = vmor %vm1717_vm14, %vm1718_vm13 }
 0x29f   : > { %v1970_v20 = vpop.f32.mrf.mxu2  ;;  %v1989_v55 = vpop.f32.mrf.mxu3  ;;  %v5525_v42 = vor.u32 1.1754944e-38, %v1738_v60  ;;  %v5530_v54 = vsel %vm5457_vm4, %v1647_v44, %v1643_v15  ;;  %vm1732_vm10 = vweird.f32 %v5378_v35  ;;  %v1768_v60 = vand.u32 2147483648, %v5416_v32 }
 0x2a0   : > { %v1971_v57 = vadd.f32 %v1970_v20, %v5242_v6  ;;  %4434 = vrcp.f32 %v5503_v9  ;;  %v1990_v27 = vadd.f32 %v1989_v55, %v5242_v6  ;;  %v1658_v6 = vsel %vm5536_vm5, %v5376_v23, %v1654_v28 }
 0x2a1   : > { %v1667_v51 = vsub.f32 1.0, %v1666_v1  ;;  %v1716_v24 = vadd.f32 %v5414_v18, %v1715_v25  ;;  %v1744_v55 = vsub.f32 1.0, %v1743_v19  ;;  %v1751_v15 = vand.u32 2147483647, %v5390_v58 }
 0x2a2   : > { %v4429_v16 = vpop.eup %4428  ;;  %v1999_v2 = vmul.f32 %v1971_v57, %v5359_v21  ;;  %v1730_v0 = vmul.f32 %v5462_v26, %v1729_v52  ;;  %vm1733_vm4 = vweird.f32 %v5462_v26  ;;  %v5554_v63 = vor.u32 1.1754944e-38, %v1753_v3 }
 0x2a3   : > { %v4431_v30 = vpop.eup %4430  ;;  %v5550_v4 = vadd.f32 1.0, %v4429_v16  ;;  %v1759_v21 = vsub.f32 1.0, %v1758_v8  ;;  %vm1747_vm1 = vweird.f32 %v5390_v58  ;;  %v1766_v23 = vand.u32 2147483647, %v5416_v32  ;;  %vm5618_vm8 = vmor %vm1732_vm10, %vm1733_vm4 }
 0x2a4   : > { %v5546_v44 = vpop.eup %4432  ;;  %v5558_v28 = vadd.f32 1.0, %v4431_v30  ;;  %v2000_v1 = vmul.f32 %v1990_v27, %v5363_v29  ;;  %v5563_v57 = vsel %vm5486_vm0, %v1662_v17, %v1658_v6  ;;  %vm5575_vm5 = vcmp.eq.f32.partialorder %v1736_v56, 8.507059e+37  ;;  %v1933_v27 = vpop.permute.xlu0 %1932 }
 0x2a5   : > { %vm1762_vm9 = vweird.f32 %v5416_v32  ;;  %v5580_v29 = vor.u32 1.1754944e-38, %v1768_v60  ;;  %v1773_v59 = vmul.f32 %v5546_v44, %v5474_v38  ;;  %v2007_v17 = vadd.f32 %v1999_v2, %v5262_v37 }
 0x2a6   : > { %v5565_v52 = vpop.eup %4434  ;;  %v1668_v16 = vmul.f32 %v5444_v48, %v1667_v51  ;;  %v1745_v5 = vmul.f32 %v5472_v50, %v1744_v55  ;;  %vm1748_vm0 = vweird.f32 %v5472_v50  ;;  %4436 = vrcp.f32 %v5550_v4 }
 0x2a7   : > { %v1972_v19 = vpop.f32.mrf.mxu2  ;;  %v1991_v25 = vpop.f32.mrf.mxu3  ;;  %v1720_v56 = vsel %vm5571_vm15, %v5414_v18, %v1716_v24  ;;  %v1731_v20 = vadd.f32 %v5462_v26, %v1730_v0  ;;  %v1760_v30 = vmul.f32 %v5477_v36, %v1759_v21  ;;  %v1788_v2 = vmul.f32 %v5565_v52, %v5503_v9 }
 0x2a8   : > { %4438 = vtanh.f32 %v2007_v17  ;;  %v1783_v37 = vand.u32 2147483648, %v5474_v38  ;;  %v2008_v60 = vadd.f32 %v2000_v1, %v5266_v45  ;;  %v1973_v6 = vadd.f32 %v1972_v19, %v1933_v27 }
 0x2a9   : > { %4440 = vrcp.f32 %v5558_v28  ;;  %vm1671_vm14 = vweird.f32 %v5444_v48  ;;  %vm5600_vm13 = vcmp.eq.f32.partialorder %v1751_v15, 8.507059e+37  ;;  %vm5604_vm15 = vcmp.eq.f32.partialorder %v1766_v23, 8.507059e+37 }
 0x2aa   : > { %v1774_v51 = vsub.f32 1.0, %v1773_v59  ;;  %v1725_v24 = vsel %vm5521_vm7, %v5491_v7, %v1720_v56  ;;  %v1992_v55 = vadd.f32 %v1991_v25, %v1933_v27  ;;  %v5612_v21 = vadd.f32 %v5444_v48, %v1668_v16  ;;  %vm5709_vm4 = vmor %vm1670_vm6, %vm1671_vm14 }
 0x2ab   : > { %v1746_v15 = vadd.f32 %v5472_v50, %v1745_v5  ;;  %vm1763_vm12 = vweird.f32 %v5477_v36  ;;  %4442 = vtanh.f32 %v2008_v60  ;;  %v1674_v7 = vand.u32 2147483647, %v5370_v41 }
 0x2ac   : > { %v1761_v34 = vadd.f32 %v5477_v36, %v1760_v30  ;;  %v1789_v23 = vsub.f32 1.0, %v1788_v2  ;;  %v1735_v35 = vsel %vm5618_vm8, %v5462_v26, %v1731_v20  ;;  %v2001_v1 = vmul.f32 %v1973_v6, %v5437_v22  ;;  %v5631_v19 = vpop.eup %4436  ;;  %vm5642_vm8 = vmor %vm1747_vm1, %vm1748_vm0 }
 0x2ad   : > { %v1781_v25 = vand.u32 2147483647, %v5474_v38  ;;  %v5634_v3 = vor.u32 1.1754944e-38, %v1783_v37  ;;  %v1796_v59 = vand.u32 2147483647, %v5503_v9  ;;  %v2002_v17 = vmul.f32 %v1992_v55, %v5449_v31  ;;  %vm5656_vm7 = vmor %vm1762_vm9, %vm1763_vm12 }
 0x2ae   : > { %v4439_v56 = vpop.eup %4438  ;;  %v1775_v22 = vmul.f32 %v5546_v44, %v1774_v51  ;;  %v1798_v27 = vand.u32 2147483648, %v5503_v9  ;;  %v2009_v20 = vadd.f32 %v2001_v1, %v5268_v46  ;;  %vm1777_vm10 = vweird.f32 %v5474_v38 }
 0x2af   : > { %v1975_v16 = vpop.f32.mrf.mxu2  ;;  %v1994_v5 = vpop.f32.mrf.mxu3  ;;  %v2023_v2 = vsub.f32 %v5156_v10, %v4439_v56  ;;  %v1740_v46 = vsel %vm5575_vm5, %v5525_v42, %v1735_v35  ;;  %v1750_v37 = vsel %vm5642_vm8, %v5472_v50, %v1746_v15  ;;  %v2010_v60 = vadd.f32 %v2002_v17, %v5270_v47 }
 0x2b0   : > { %v1976_v30 = vadd.f32 %v1975_v16, %v5228_v43  ;;  %v5650_v31 = vpop.eup %4440  ;;  %v1790_v32 = vmul.f32 %v5565_v52, %v1789_v23  ;;  %4444 = vtanh.f32 %v2009_v20  ;;  %v1765_v6 = vsel %vm5656_vm7, %v5477_v36, %v1761_v34 }
 0x2b1   : > { %v4443_v10 = vpop.eup %4442  ;;  %v1803_v8 = vmul.f32 %v5631_v19, %v5550_v4  ;;  %v2031_v42 = vmul.f32 %v2023_v2, %v1725_v24  ;;  %4446 = vtanh.f32 %v2010_v60  ;;  %v1995_v55 = vadd.f32 %v1994_v5, %v5228_v43 }
 0x2b2   : > { %v2003_v51 = vmul.f32 %v1976_v30, %v5484_v14  ;;  %v1776_v47 = vadd.f32 %v5546_v44, %v1775_v22  ;;  %vm1792_vm12 = vweird.f32 %v5503_v9  ;;  %v1818_v50 = vmul.f32 %v5650_v31, %v5558_v28 }
 0x2b3   : > { %v2024_v36 = vsub.f32 %v5158_v11, %v4443_v10  ;;  %vm5689_vm9 = vcmp.eq.f32.partialorder %v1781_v25, 8.507059e+37  ;;  %v5693_v43 = vadd.f32 %v4439_v56, %v2031_v42  ;;  %v1755_v45 = vsel %vm5600_vm13, %v5554_v63, %v1750_v37  ;;  %v2269_v42 = vld [vmem:[%s7837_s8 + $0xc8] sm:$0xff] }
 0x2b4   : > { %v2011_v14 = vadd.f32 %v2003_v51, %v5279_v33  ;;  %v1770_v15 = vsel %vm5604_vm15, %v5580_v29, %v1765_v6  ;;  %v2004_v34 = vmul.f32 %v1995_v55, %v5530_v54  ;;  %v5703_v11 = vadd.f32 %v5565_v52, %v1790_v32 }
 0x2b5   : > { %v2032_v33 = vmul.f32 %v2024_v36, %v1740_v46  ;;  %v1676_v63 = vand.u32 2147483648, %v5370_v41  ;;  %vm1778_vm1 = vweird.f32 %v5546_v44  ;;  %v1804_v29 = vsub.f32 1.0, %v1803_v8  ;;  %3729 = vst [vmem:[%s5681_s0] sm:$0xff] %v5693_v43  ;;  %2196 = vrot.lane.b32.xlu0 %v5693_v43, %s7885_s30  ;;  %2124 = vrot.lane.b32.xlu2 %v5693_v43, %s7883_s2 }
 0x2b6   : > { %4448 = vtanh.f32 %v2011_v14  ;;  %v2012_v54 = vadd.f32 %v2004_v34, %v5281_v40  ;;  %v1673_v0 = vsel %vm5709_vm4, %v5444_v48, %v5612_v21  ;;  %v4445_v1 = vpop.eup %4444  ;;  %vm5726_vm6 = vcmp.eq.f32.partialorder %v1796_v59, 8.507059e+37  ;;  %vm5741_vm0 = vmor %vm1777_vm10, %vm1778_vm1 }
 0x2b7   : > { %v1977_v18 = vpop.f32.mrf.mxu2  ;;  %v1996_v35 = vpop.f32.mrf.mxu3  ;;  %v1819_v40 = vsub.f32 1.0, %v1818_v50  ;;  %v5730_v17 = vadd.f32 %v4443_v10, %v2032_v33  ;;  %v1677_v5 = vor.u32 1.1754944e-38, %v1676_v63  ;;  %v2025_v26 = vsub.f32 %v5160_v12, %v4445_v1 }
 0x2b8   : > { %v1978_v16 = vadd.f32 %v1977_v18, %v5230_v49  ;;  %v4447_v56 = vpop.eup %4446  ;;  %4450 = vtanh.f32 %v2012_v54  ;;  %vm1675_vm5 = vcmp.eq.f32.partialorder %v1674_v7, 8.507059e+37  ;;  %v1997_v48 = vadd.f32 %v1996_v35, %v5230_v49 }
 0x2b9   : > { %vm1793_vm14 = vweird.f32 %v5565_v52  ;;  %3730 = vst [vmem:[%s5681_s0 + $0x8] sm:$0xff] %v5730_v17  ;;  %v2026_v12 = vsub.f32 %v5162_v13, %v4447_v56  ;;  %2132 = vrot.lane.b32.xlu1 %v5730_v17, %s7883_s2  ;;  %v1678_v49 = vsel %vm1675_vm5, %v1677_v5, %v1673_v0  ;;  %v1805_v7 = vmul.f32 %v5631_v19, %v1804_v29 }
 0x2ba   : > { %v2005_v41 = vmul.f32 %v1978_v16, %v5563_v57  ;;  %v2033_v59 = vmul.f32 %v2025_v26, %v1755_v45  ;;  %v1780_v38 = vsel %vm5741_vm0, %v5546_v44, %v1776_v47  ;;  %v2006_v22 = vmul.f32 %v1997_v48, %v1678_v49  ;;  %vm5764_vm13 = vmor %vm1792_vm12, %vm1793_vm14  ;;  %v7975_v16 = vld [vmem:[#allocation6_spill] sm:$0xff] }
 0x2bb   : > { %v1799_v30 = vor.u32 1.1754944e-38, %v1798_v27  ;;  %v1820_v13 = vmul.f32 %v5650_v31, %v1819_v40  ;;  %v2034_v58 = vmul.f32 %v2026_v12, %v1770_v15  ;;  %vm1807_vm15 = vweird.f32 %v5550_v4  ;;  %v7972_v15 = vld [vmem:[#allocation7_spill] sm:$0xff] }
 0x2bc   : > { %v4449_v20 = vpop.eup %4448  ;;  %v2013_v2 = vadd.f32 %v2005_v41, %v5316_v53  ;;  %v5769_v44 = vadd.f32 %v4445_v1, %v2033_v59  ;;  %v2014_v46 = vadd.f32 %v2006_v22, %v5319_v39  ;;  %v1785_v53 = vsel %vm5689_vm9, %v5634_v3, %v1780_v38 }
 0x2bd   : > { %v2027_v27 = vsub.f32 %v5144_v61, %v4449_v20  ;;  %v5773_v37 = vadd.f32 %v4447_v56, %v2034_v58  ;;  %v1795_v9 = vsel %vm5764_vm13, %v5565_v52, %v5703_v11  ;;  %v1806_v32 = vadd.f32 %v5631_v19, %v1805_v7  ;;  %2100 = vrot.lane.b32.xlu0 %v5693_v43, %s7881_s27 }
 0x2be   : > { %4452 = vtanh.f32 %v2013_v2  ;;  %v4451_v60 = vpop.eup %4450  ;;  %vm1808_vm8 = vweird.f32 %v5631_v19  ;;  %3731 = vst [vmem:[%s5681_s0 + $0x10] sm:$0xff] %v5769_v44  ;;  %2204 = vrot.lane.b32.xlu2 %v5730_v17, %s7885_s30  ;;  %v1813_v39 = vand.u32 2147483648, %v5550_v4  ;;  %v1821_v52 = vadd.f32 %v5650_v31, %v1820_v13 }
 0x2bf   : > { %7966 = vst [vmem:[#allocation9_spill] sm:$0xff] %v5773_v37  ;;  %v2035_v61 = vmul.f32 %v2027_v27, %v1785_v53  ;;  %4454 = vtanh.f32 %v2014_v46  ;;  %vm1823_vm7 = vweird.f32 %v5650_v31  ;;  %v2028_v3 = vsub.f32 %v5146_v62, %v4451_v60  ;;  %vm5806_vm10 = vmor %vm1807_vm15, %vm1808_vm8 }
 0x2c0   : > { %3732 = vst [vmem:[%s5681_s0 + $0x18] sm:$0xff] %v5773_v37  ;;  %v1811_v6 = vand.u32 2147483647, %v5550_v4  ;;  %v1828_v51 = vand.u32 2147483648, %v5558_v28  ;;  %v1800_v8 = vsel %vm5726_vm6, %v1799_v30, %v1795_v9  ;;  %vm1822_vm12 = vweird.f32 %v5558_v28 }
 0x2c1   : > { %v5798_v10 = vadd.f32 %v4449_v20, %v2035_v61  ;;  %v1826_v62 = vand.u32 2147483647, %v5558_v28  ;;  %v2036_v55 = vmul.f32 %v2028_v3, %v1800_v8  ;;  %2172 = vrot.lane.b32.xlu1 %v5693_v43, %s7879_s22  ;;  %vm5814_vm9 = vmor %vm1822_vm12, %vm1823_vm7  ;;  %v1810_v4 = vsel %vm5806_vm10, %v5631_v19, %v1806_v32  ;;  %v7973_v19 = vld [vmem:[#allocation8_spill] sm:$0xff]  ;;  %v2268_v8 = vld [vmem:[%s7837_s8 + $0xc0] sm:$0xff] }
 0x2c2   : > { %v1814_v36 = vor.u32 1.1754944e-38, %v1813_v39  ;;  %v1825_v28 = vsel %vm5814_vm9, %v5650_v31, %v1821_v52  ;;  %vm1812_vm4 = vcmp.eq.f32.partialorder %v1811_v6, 8.507059e+37  ;;  %v1829_v45 = vor.u32 1.1754944e-38, %v1828_v51  ;;  %v2270_v3 = vld [vmem:[%s7837_s8 + $0xd0] sm:$0xff]  ;;  %v2271_v6 = vld [vmem:[%s7837_s8 + $0xd8] sm:$0xff] }
 0x2c3   : > { %3733 = vst [vmem:[%s5681_s0 + $0x20] sm:$0xff] %v5798_v10  ;;  %v5823_v14 = vadd.f32 %v4451_v60, %v2036_v55  ;;  %vm1827_vm1 = vcmp.eq.f32.partialorder %v1826_v62, 8.507059e+37  ;;  %vm7976_vm6 = vcmp.lt.s32.totalorder %v7975_v16, 16  ;;  %vm7978_vm0 = vcmp.lt.s32.totalorder %v7975_v16, 127 }
 0x2c4   : > { %v4453_v50 = vpop.eup %4452  ;;  %v1815_v11 = vsel %vm1812_vm4, %v1814_v36, %v1810_v4  ;;  %v1830_v63 = vsel %vm1827_vm1, %v1829_v45, %v1825_v28  ;;  %vm7977_vm5 = vmmov %vm7976_vm6  ;;  %vm7981_vm13 = vcmp.lt.s32.totalorder %v7975_v16, 112 }
 0x2c5   : > { %7971 = vst [vmem:[#allocation10_spill] sm:$0xff] %v5823_v14  ;;  %v4455_v24 = vpop.eup %4454  ;;  %v2029_v34 = vsub.f32 %v7972_v15, %v4453_v50  ;;  %2180 = vrot.lane.b32.xlu0 %v5730_v17, %s7879_s22  ;;  %vm7979_vm14 = vmmov %vm7978_vm0  ;;  %v2302_v15 = vld [vmem:[%s7837_s8 + $0x1d0] sm:$0xff] }
 0x2c6   : > { %3734 = vst [vmem:[%s5681_s0 + $0x28] sm:$0xff] %v5823_v14  ;;  %v2030_v33 = vsub.f32 %v7973_v19, %v4455_v24  ;;  %2108 = vrot.lane.b32.xlu2 %v5730_v17, %s7881_s27  ;;  %vm7982_vm15 = vmmov %vm7981_vm13  ;;  %v4175_v19 = vld [vmem:[%s7841_s12 + $0x38] sm:$0xff] }
 0x2c7   : > { %v2037_v23 = vmul.f32 %v2029_v34, %v1815_v11  ;;  %v2303_v34 = vld [vmem:[%s7837_s8 + $0x1d8] sm:$0xff]  ;;  %vm7983_vm8 = vmmov %vm7981_vm13 }
 0x2c8   : > { %v2038_v31 = vmul.f32 %v2030_v33, %v1830_v63  ;;  %v2300_v33 = vld [vmem:[%s7837_s8 + $0x1c0] sm:$0xff]  ;;  %vm7984_vm7 = vmmov %vm7983_vm8 }
 0x2c9   : > { %v5836_v29 = vadd.f32 %v4453_v50, %v2037_v23  ;;  %2076 = vrot.lane.b32.xlu1 %v5693_v43, %s7877_s29  ;;  %v2301_v23 = vld [vmem:[%s7837_s8 + $0x1c8] sm:$0xff]  ;;  %vm7985_vm10 = vmmov %vm7978_vm0 }
 0x2ca   : > { %v5838_v54 = vadd.f32 %v4455_v24, %v2038_v31  ;;  %vm7986_vm12 = vmmov %vm7978_vm0 }
 0x2cb   : > { %3735 = vst [vmem:[%s5681_s0 + $0x30] sm:$0xff] %v5836_v29  ;;  %vm7987_vm9 = vmmov %vm7977_vm5 }
 0x2cc   : > { %3736 = vst [vmem:[%s5681_s0 + $0x38] sm:$0xff] %v5838_v54  ;;  %vm7988_vm4 = vmmov %vm7977_vm5 }
 0x2cd   : > { %2084 = vrot.lane.b32.xlu0 %v5730_v17, %s7877_s29  ;;  %vm7989_vm1 = vmmov %vm7984_vm7 }
 0x2ce   : > { %2148 = vrot.lane.b32.xlu2 %v5693_v43, %s7875_s1 }
 0x2d1   : > { %2156 = vrot.lane.b32.xlu1 %v5730_v17, %s7875_s1 }
 0x2d5   : > { %2126 = vrot.lane.b32.xlu0 %v5769_v44, %s7883_s2 }
 0x2d6   : > { %2134 = vrot.lane.b32.xlu2 %v5773_v37, %s7883_s2 }
 0x2d9   : > { %2198 = vrot.lane.b32.xlu1 %v5769_v44, %s7885_s30 }
 0x2dd   : > { %2206 = vrot.lane.b32.xlu0 %v5773_v37, %s7885_s30 }
 0x2de   : > { %2174 = vrot.lane.b32.xlu2 %v5769_v44, %s7879_s22 }
 0x2e1   : > { %2102 = vrot.lane.b32.xlu1 %v5769_v44, %s7881_s27 }
 0x2e5   : > { %2110 = vrot.lane.b32.xlu0 %v5773_v37, %s7881_s27 }
 0x2e6   : > { %2078 = vrot.lane.b32.xlu2 %v5769_v44, %s7877_s29 }
 0x2e9   : > { %2182 = vrot.lane.b32.xlu1 %v5773_v37, %s7879_s22 }
 0x2ed   : > { %2150 = vrot.lane.b32.xlu0 %v5769_v44, %s7875_s1 }
 0x2ee   : > { %2158 = vrot.lane.b32.xlu2 %v5773_v37, %s7875_s1 }
 0x2f1   : > { %2086 = vrot.lane.b32.xlu1 %v5773_v37, %s7877_s29 }
 0x2f5   : > { %2128 = vrot.lane.b32.xlu0 %v5798_v10, %s7883_s2 }
 0x2f6   : > { %2136 = vrot.lane.b32.xlu2 %v5823_v14, %s7883_s2 }
 0x2f9   : > { %2200 = vrot.lane.b32.xlu1 %v5798_v10, %s7885_s30 }
 0x2fd   : > { %2208 = vrot.lane.b32.xlu0 %v5823_v14, %s7885_s30 }
 0x2fe   : > { %2176 = vrot.lane.b32.xlu2 %v5798_v10, %s7879_s22 }
 0x301   : > { %2104 = vrot.lane.b32.xlu1 %v5798_v10, %s7881_s27 }
 0x305   : > { %2112 = vrot.lane.b32.xlu0 %v5823_v14, %s7881_s27 }
 0x306   : > { %2080 = vrot.lane.b32.xlu2 %v5798_v10, %s7877_s29 }
 0x309   : > { %2184 = vrot.lane.b32.xlu1 %v5823_v14, %s7879_s22 }
 0x30d   : > { %2152 = vrot.lane.b32.xlu0 %v5798_v10, %s7875_s1 }
 0x30e   : > { %2160 = vrot.lane.b32.xlu2 %v5823_v14, %s7875_s1 }
 0x30f   : > { %v2125_v18 = vpop.permute.xlu2 %2124 }
 0x311   : > { %2088 = vrot.lane.b32.xlu1 %v5823_v14, %s7877_s29 }
 0x315   : > { %2056 = vrot.lane.b32.xlu0 %v5798_v10, %s7974_s4 }
 0x316   : > { %2202 = vrot.lane.b32.xlu2 %v5836_v29, %s7885_s30 }
 0x318   : > { %v5904_v0 = vpop.permute.xlu2 %2204 }
 0x319   : > { %2130 = vrot.lane.b32.xlu1 %v5836_v29, %s7883_s2 }
 0x31d   : > { %2138 = vrot.lane.b32.xlu0 %v5838_v54, %s7883_s2  ;;  %s8069_s2 = smov 15  }
 0x31e   : > { %2106 = vrot.lane.b32.xlu2 %v5836_v29, %s7881_s27 }
 0x320   : > { %v2109_v35 = vpop.permute.xlu2 %2108 }
 0x321   : > { %2210 = vrot.lane.b32.xlu1 %v5838_v54, %s7885_s30 }
 0x325   : > { %2178 = vrot.lane.b32.xlu0 %v5836_v29, %s7879_s22 }
 0x326   : > { %2186 = vrot.lane.b32.xlu2 %v5838_v54, %s7879_s22  ;;  %s8076_s22 = smov 16  }
 0x327   : > { %v5918_v25 = vpop.permute.xlu0 %2196 }
 0x328   : > { %v2149_v1 = vpop.permute.xlu2 %2148  ;;  %v2212_v63 = vsel %vm7983_vm8, %v5918_v25, %v5904_v0  ;;  %v2216_v31 = vsel %vm7984_vm7, %v5904_v0, %v5918_v25  ;;  %vm7999_vm8 = vmmov %vm7988_vm4 }
 0x329   : > { %2114 = vrot.lane.b32.xlu1 %v5838_v54, %s7881_s27  ;;  %v6072_v0 = vmul.f32 %v2301_v23, %v2216_v31  ;;  %v2287_v31 = vld [vmem:[%s7837_s8 + $0x158] sm:$0xff]  ;;  %v2274_v23 = vld [vmem:[%s7837_s8 + $0xf0] sm:$0xff]  ;;  %s800_s27 = scalar_lea.vmem %s7835_s6, %s5138_s17  ;;  %s8065_s17 = smov 112  }
 0x32b   : > { %v2133_v40 = vpop.permute.xlu1 %2132 }
 0x32c   : > { %v2140_v5 = vsel %vm978_vm3, %v2125_v18, %v2133_v40  ;;  %v2144_v56 = vsel %vm978_vm3, %v2133_v40, %v2125_v18 }
 0x32d   : > { %2082 = vrot.lane.b32.xlu0 %v5836_v29, %s7877_s29  ;;  %v6020_v4 = vmul.f32 %v2268_v8, %v2144_v56  ;;  %v6022_v50 = vmul.f32 %v2269_v42, %v2140_v5  ;;  %v4174_v5 = vld [vmem:[%s7841_s12 + $0x30] sm:$0xff]  ;;  %v6070_v56 = vmul.f32 %v2300_v33, %v2212_v63 }
 0x32e   : > { %2090 = vrot.lane.b32.xlu2 %v5838_v54, %s7877_s29 }
 0x32f   : > { %v2101_v48 = vpop.permute.xlu0 %2100 }
 0x330   : > { %v2135_v26 = vpop.permute.xlu2 %2134  ;;  %v5934_v21 = vsel %vm957_vm2, %v2101_v48, %v2109_v35  ;;  %v5938_v12 = vsel %vm957_vm2, %v2109_v35, %v2101_v48 }
 0x331   : > { %2052 = vrot.lane.b32.xlu1 %v5693_v43, %s7974_s4 }
 0x333   : > { %v2173_v41 = vpop.permute.xlu1 %2172 }
 0x335   : > { %2162 = vrot.lane.b32.xlu0 %v5838_v54, %s7875_s1 }
 0x336   : > { %2064 = vrot.lane.b32.xlu2 %v5823_v14, %s7974_s4 }
 0x337   : > { %v2181_v7 = vpop.permute.xlu0 %2180 }
 0x338   : > { %v2175_v49 = vpop.permute.xlu2 %2174  ;;  %v5948_v59 = vsel %vm1006_vm11, %v2173_v41, %v2181_v7  ;;  %v5952_v38 = vsel %vm1006_vm11, %v2181_v7, %v2173_v41  ;;  %v4265_v7 = vld [vmem:[%s7845_s16 + $0x48] sm:$0xff] }
 0x339   : > { %2154 = vrot.lane.b32.xlu1 %v5836_v29, %s7875_s1  ;;  %s8139_s1 = sld [smem:[#allocation18_spill]] }
 0x33b   : > { %v2077_v22 = vpop.permute.xlu1 %2076 }
 0x33d   : > { %2066 = vrot.lane.b32.xlu0 %v5838_v54, %s7974_s4 }
 0x33e   : > { %2054 = vrot.lane.b32.xlu2 %v5769_v44, %s7974_s4 }
 0x33f   : > { %v2085_v20 = vpop.permute.xlu0 %2084  ;;  %s820_s29 = scalar_lea.vmem %s8139_s1, %s4764_s26 }
 0x340   : > { %v5962_v30 = vsel %vm7976_vm6, %v2077_v22, %v2085_v20  ;;  %v5966_v13 = vsel %vm7977_vm5, %v2085_v20, %v2077_v22  ;;  %v5968_v58 = vpop.permute.xlu2 %2078  ;;  %v2294_v22 = vld [vmem:[%s7837_s8 + $0x190] sm:$0xff]  ;;  %v2295_v20 = vld [vmem:[%s7837_s8 + $0x198] sm:$0xff]  ;;  %vm7990_vm6 = vmmov %vm7978_vm0 }
 0x341   : > { %2058 = vrot.lane.b32.xlu1 %v5836_v29, %s7974_s4  ;;  %vm7991_vm5 = vmmov %vm7989_vm1 }
 0x342   : > { %vm8003_vm7 = vmmov %vm7990_vm6 }
 0x343   : > { %v2157_v2 = vpop.permute.xlu1 %2156 }
 0x344   : > { %v5972_v57 = vsel %vm7978_vm0, %v2149_v1, %v2157_v2  ;;  %v5976_v27 = vsel %vm7979_vm14, %v2157_v2, %v2149_v1  ;;  %v2262_v2 = vld [vmem:[%s7837_s8 + $0x90] sm:$0xff]  ;;  %vm7992_vm0 = vmmov %vm7989_vm1 }
 0x345   : > { %2060 = vrot.lane.b32.xlu0 %v5730_v17, %s7974_s4  ;;  %vm7996_vm14 = vmmov %vm7988_vm4 }
 0x346   : > { %2224 = vrot.lane.b32.xlu2 %v5798_v10, %s7980_s20 }
 0x347   : > { %v2127_v46 = vpop.permute.xlu0 %2126 }
 0x348   : > { %v2141_v53 = vsel %vm978_vm3, %v2127_v46, %v2135_v26  ;;  %v2145_v9 = vsel %vm978_vm3, %v2135_v26, %v2127_v46  ;;  %v2159_v32 = vpop.permute.xlu2 %2158  ;;  %v2263_v46 = vld [vmem:[%s7837_s8 + $0x98] sm:$0xff] }
 0x349   : > { %2062 = vrot.lane.b32.xlu1 %v5773_v37, %s7974_s4  ;;  %v6010_v62 = vmul.f32 %v2270_v3, %v2145_v9  ;;  %v6012_v55 = vmul.f32 %v2271_v6, %v2141_v53  ;;  %v4214_v9 = vld [vmem:[%s7843_s14 + $0x50] sm:$0xff]  ;;  %v2261_v3 = vld [vmem:[%s7837_s8 + $0x88] sm:$0xff] }
 0x34a   : > { %v2293_v6 = vld [vmem:[%s7837_s8 + $0x188] sm:$0xff] }
 0x34b   : > { %v2199_v60 = vpop.permute.xlu1 %2198 }
 0x34d   : > { %2220 = vrot.lane.b32.xlu0 %v5693_v43, %s7980_s20 }
 0x34e   : > { %2234 = vrot.lane.b32.xlu2 %v5838_v54, %s7980_s20 }
 0x34f   : > { %v2207_v61 = vpop.permute.xlu0 %2206 }
 0x350   : > { %v2213_v39 = vsel %vm7981_vm13, %v2199_v60, %v2207_v61  ;;  %v2217_v52 = vsel %vm7982_vm15, %v2207_v61, %v2199_v60  ;;  %v6014_v47 = vpop.permute.xlu2 %2136  ;;  %v4172_v60 = vld [vmem:[%s7841_s12 + $0x20] sm:$0xff]  ;;  %vm7997_vm13 = vmmov %vm7988_vm4 }
 0x351   : > { %2232 = vrot.lane.b32.xlu1 %v5823_v14, %s7980_s20  ;;  %v6061_v1 = vmul.f32 %v2302_v15, %v2213_v39  ;;  %v6063_v40 = vmul.f32 %v2303_v34, %v2217_v52  ;;  %v2292_v61 = vld [vmem:[%s7837_s8 + $0x180] sm:$0xff]  ;;  %vm7998_vm15 = vmmov %vm7988_vm4 }
 0x352   : > { %v6135_v34 = vmul.f32 %v2292_v61, %v5948_v59  ;;  %v2254_v59 = vld [vmem:[%s7837_s8 + $0x50] sm:$0xff] }
 0x353   : > { %v2103_v51 = vpop.permute.xlu1 %2102 }
 0x355   : > { %2226 = vrot.lane.b32.xlu0 %v5836_v29, %s7980_s20 }
 0x356   : > { %2228 = vrot.lane.b32.xlu2 %v5730_v17, %s7980_s20 }
 0x357   : > { %v2111_v36 = vpop.permute.xlu0 %2110 }
 0x358   : > { %v2117_v28 = vsel %vm957_vm2, %v2103_v51, %v2111_v36  ;;  %v2121_v24 = vsel %vm957_vm2, %v2111_v36, %v2103_v51  ;;  %v6074_v25 = vpop.permute.xlu2 %2176 }
 0x359   : > { %2222 = vrot.lane.b32.xlu1 %v5769_v44, %s7980_s20  ;;  %v6122_v8 = vmul.f32 %v2262_v2, %v2121_v24  ;;  %v6126_v36 = vmul.f32 %v2263_v46, %v2117_v28  ;;  %v6141_v24 = vmul.f32 %v2293_v6, %v5952_v38  ;;  %v2286_v38 = vld [vmem:[%s7837_s8 + $0x150] sm:$0xff]  ;;  %v2285_v2 = vld [vmem:[%s7837_s8 + $0x148] sm:$0xff] }
 0x35b   : > { %v2183_v11 = vpop.permute.xlu1 %2182 }
 0x35c   : > { %v2189_v18 = vsel %vm1006_vm11, %v2175_v49, %v2183_v11  ;;  %v2193_v35 = vsel %vm1006_vm11, %v2183_v11, %v2175_v49  ;;  %v6138_v11 = vmul.f32 %v2261_v3, %v5934_v21  ;;  %v2255_v21 = vld [vmem:[%s7837_s8 + $0x58] sm:$0xff] }
 0x35d   : > { %2230 = vrot.lane.b32.xlu0 %v5773_v37, %s7980_s20  ;;  %v6120_v51 = vmul.f32 %v2294_v22, %v2189_v18  ;;  %v6124_v42 = vmul.f32 %v2295_v20, %v2193_v35  ;;  %v4213_v35 = vld [vmem:[%s7843_s14 + $0x48] sm:$0xff]  ;;  %v2284_v20 = vld [vmem:[%s7837_s8 + $0x140] sm:$0xff] }
 0x35e   : > { %2449 = vperm.xlu2 %4375, %v4175_v19   ;;  %v2253_v22 = vld [vmem:[%s7837_s8 + $0x48] sm:$0xff] }
 0x35f   : > { %v2151_v26 = vpop.permute.xlu0 %2150  ;;  %v6202_v3 = vmul.f32 %v2253_v22, %v5962_v30  ;;  %v2273_v30 = vld [vmem:[%s7837_s8 + $0xe8] sm:$0xff] }
 0x360   : > { %v2165_v48 = vsel %vm7985_vm10, %v2151_v26, %v2159_v32  ;;  %v2169_v41 = vsel %vm7986_vm12, %v2159_v32, %v2151_v26  ;;  %v2260_v32 = vld [vmem:[%s7837_s8 + $0x80] sm:$0xff]  ;;  %vm8004_vm10 = vmmov %vm7990_vm6  ;;  %vm8007_vm12 = vcmp.lt.s32.totalorder %v7975_v16, 17 }
 0x361   : > { %2444 = vperm.xlu1 %4374, %v4174_v5   ;;  %v6132_v15 = vmul.f32 %v2260_v32, %v5938_v12  ;;  %v6149_v12 = vpop.permute.xlu2 %2080  ;;  %v4215_v5 = vld [vmem:[%s7843_s14 + $0x58] sm:$0xff]  ;;  %v2252_v26 = vld [vmem:[%s7837_s8 + $0x40] sm:$0xff] }
 0x362   : > { %v4212_v32 = vld [vmem:[%s7843_s14 + $0x40] sm:$0xff]  ;;  %v6199_v61 = vmul.f32 %v2252_v26, %v5966_v13  ;;  %v4217_v26 = vld [vmem:[%s7843_s14 + $0x68] sm:$0xff] }
 0x363   : > { %v2087_v53 = vpop.permute.xlu1 %2086 }
 0x364   : > { %v2093_v39 = vsel %vm7987_vm9, %v5968_v58, %v2087_v53  ;;  %v2097_v52 = vsel %vm7988_vm4, %v2087_v53, %v5968_v58  ;;  %v4173_v58 = vld [vmem:[%s7841_s12 + $0x28] sm:$0xff]  ;;  %vm8008_vm9 = vmmov %vm8007_vm12 }
 0x365   : > { %2434 = vperm.xlu0 %4373, %v4172_v60   ;;  %v6187_v46 = vmul.f32 %v2254_v59, %v2097_v52  ;;  %v6189_v53 = vmul.f32 %v2255_v21, %v2093_v39  ;;  %v6193_v60 = vmul.f32 %v2287_v31, %v2169_v41  ;;  %v6205_v52 = vmul.f32 %v2284_v20, %v5972_v57  ;;  %v4218_v59 = vld [vmem:[%s7843_s14 + $0x70] sm:$0xff]  ;;  %v4285_v57 = vld [vmem:[%s7845_s16 + $0x68] sm:$0xff]  ;;  %vm8009_vm4 = vmmov %vm8008_vm9 }
 0x366   : > { %2696 = vperm.xlu2 %4375, %v4214_v9   ;;  %v6191_v9 = vmul.f32 %v2286_v38, %v2165_v48  ;;  %v6208_v48 = vmul.f32 %v2285_v2, %v5976_v27  ;;  %v4219_v38 = vld [vmem:[%s7843_s14 + $0x78] sm:$0xff]  ;;  %v4286_v2 = vld [vmem:[%s7845_s16 + $0x70] sm:$0xff] }
 0x367   : > { %v6143_v28 = vpop.permute.xlu0 %2128 }
 0x368   : > { %v2142_v13 = vsel %vm978_vm3, %v6143_v28, %v6014_v47 }
 0x369   : > { %2439 = vperm.xlu1 %4374, %v4173_v58   ;;  %v4216_v58 = vld [vmem:[%s7843_s14 + $0x60] sm:$0xff]  ;;  %v6231_v21 = vpop.permute.xlu2 %2160  ;;  %v2345_v45 = vmul.f32 %v2273_v30, %v2142_v13 }
 0x36b   : > { %v6167_v18 = vpop.permute.xlu1 %2200 }
 0x36d   : > { %2701 = vperm.xlu0 %4373, %v4215_v5   ;;  %v4287_v5 = vld [vmem:[%s7845_s16 + $0x78] sm:$0xff] }
 0x36e   : > { %2691 = vperm.xlu2 %4375, %v4213_v35  }
 0x36f   : > { %v2209_v41 = vpop.permute.xlu0 %2208 }
 0x370   : > { %v6213_v39 = vsel %vm7989_vm1, %v2209_v41, %v6167_v18  ;;  %vm8010_vm1 = vmmov %vm8009_vm4 }
 0x371   : > { %2686 = vperm.xlu1 %4374, %v4212_v32   ;;  %v6249_v20 = vpop.permute.xlu2 %2202 }
 0x373   : > { %v6223_v6 = vpop.permute.xlu1 %2104 }
 0x375   : > { %2716 = vperm.xlu0 %4373, %v4218_v59  }
 0x376   : > { %2706 = vperm.xlu2 %4375, %v4216_v58  }
 0x377   : > { %v6236_v31 = vpop.permute.xlu0 %2112 }
 0x379   : > { %2721 = vperm.xlu1 %4374, %v4219_v38   ;;  %v4284_v38 = vld [vmem:[%s7845_s16 + $0x60] sm:$0xff] }
 0x37b   : > { %v2185_v35 = vpop.permute.xlu1 %2184 }
 0x37c   : > { %v6247_v22 = vsel %vm1006_vm11, %v2185_v35, %v6074_v25 }
 0x37d   : > { %2711 = vperm.xlu0 %4373, %v4217_v26   ;;  %v4267_v26 = vld [vmem:[%s7845_s16 + $0x58] sm:$0xff] }
 0x37e   : > { %3229 = vperm.xlu2 %4375, %v4287_v5   ;;  %v4266_v5 = vld [vmem:[%s7845_s16 + $0x50] sm:$0xff] }
 0x37f   : > { %v6254_v32 = vpop.permute.xlu0 %2152 }
 0x380   : > { %v6260_v58 = vsel %vm7990_vm6, %v6231_v21, %v6254_v32  ;;  %vm8012_vm6 = vmmov %vm7992_vm0 }
 0x381   : > { %3224 = vperm.xlu1 %4374, %v4286_v2   ;;  %v2107_v2 = vpop.permute.xlu2 %2106 }
 0x383   : > { %v6262_v59 = vpop.permute.xlu1 %2088 }
 0x385   : > { %3140 = vperm.xlu0 %4373, %v4266_v5   ;;  %v2146_v5 = vsel %vm978_vm3, %v6014_v47, %v6143_v28  ;;  %v2304_v47 = vld [vmem:[%s7837_s8 + $0x1e0] sm:$0xff]  ;;  %v2214_v28 = vsel %vm7991_vm5, %v6167_v18, %v2209_v41  ;;  %v2298_v41 = vld [vmem:[%s7837_s8 + $0x1b0] sm:$0xff]  ;;  %vm8013_vm5 = vmmov %vm8010_vm1 }
 0x386   : > { %3214 = vperm.xlu2 %4375, %v4284_v38   ;;  %v2272_v38 = vld [vmem:[%s7837_s8 + $0xe0] sm:$0xff]  ;;  %v2376_v30 = vmul.f32 %v2304_v47, %v2214_v28  ;;  %v2267_v47 = vld [vmem:[%s7837_s8 + $0xb8] sm:$0xff] }
 0x387   : > { %v6273_v27 = vpop.permute.xlu0 %2056  ;;  %v2344_v19 = vmul.f32 %v2272_v38, %v2146_v5  ;;  %v2306_v38 = vld [vmem:[%s7837_s8 + $0x1f0] sm:$0xff] }
 0x389   : > { %3145 = vperm.xlu1 %4374, %v4267_v26   ;;  %v4264_v26 = vld [vmem:[%s7845_s16 + $0x40] sm:$0xff]  ;;  %v6314_v17 = vpop.permute.xlu2 %2186 }
 0x38b   : > { %v2131_v63 = vpop.permute.xlu1 %2130 }
 0x38d   : > { %3219 = vperm.xlu0 %4373, %v4285_v57  }
 0x38e   : > { %3135 = vperm.xlu2 %4375, %v4265_v7   ;;  %v2275_v7 = vld [vmem:[%s7837_s8 + $0xf8] sm:$0xff] }
 0x38f   : > { %v2139_v33 = vpop.permute.xlu0 %2138 }
 0x390   : > { %v2143_v57 = vsel %vm978_vm3, %v2131_v63, %v2139_v33  ;;  %v2147_v49 = vsel %vm978_vm3, %v2139_v33, %v2131_v63 }
 0x391   : > { %3130 = vperm.xlu1 %4374, %v4264_v26   ;;  %v2346_v5 = vmul.f32 %v2274_v23, %v2147_v49  ;;  %v2347_v26 = vmul.f32 %v2275_v7, %v2143_v57  ;;  %v2296_v49 = vld [vmem:[%s7837_s8 + $0x1a0] sm:$0xff]  ;;  %v2190_v23 = vsel %vm1006_vm11, %v6074_v25, %v2185_v35  ;;  %v2265_v25 = vld [vmem:[%s7837_s8 + $0xa8] sm:$0xff]  ;;  %v2118_v35 = vsel %vm957_vm2, %v6223_v6, %v6236_v31  ;;  %v2266_v57 = vld [vmem:[%s7837_s8 + $0xb0] sm:$0xff] }
 0x393   : > { %v6319_v37 = vpop.permute.xlu1 %2210  ;;  %v2402_v63 = vpack.c.bf16 %v2346_v5, %v2344_v19  ;;  %v2403_v13 = vpack.c.bf16 %v2347_v26, %v2345_v45  ;;  %v2264_v45 = vld [vmem:[%s7837_s8 + $0xa0] sm:$0xff]  ;;  %v7994_v5 = vpack.c.bf16 %v6012_v55, %v6022_v50  ;;  %v2368_v26 = vmul.f32 %v2296_v49, %v2190_v23  ;;  %v2258_v49 = vld [vmem:[%s7837_s8 + $0x70] sm:$0xff]  ;;  %v2259_v23 = vld [vmem:[%s7837_s8 + $0x78] sm:$0xff] }
 0x394   : > { %v2215_v33 = vsel %vm7992_vm0, %v6249_v20, %v6319_v37  ;;  %vm8014_vm0 = vmmov %vm8010_vm1 }
 0x395   : > { %v2378_v14 = vmul.f32 %v2306_v38, %v2215_v33  ;;  %2488 = vmatpush.bf16.msra.mxu0 %v2402_v63  ;;  %2545 = vmatpush.bf16.msra.mxu3 %v2403_v13  ;;  %v7993_v38 = vpack.c.bf16 %v6010_v62, %v6020_v4  ;;  %v7995_v62 = vpack.c.bf16 %v6061_v1, %v6070_v56 }
 0x396   : > { %v2098_v1 = vsel %vm7996_vm14, %v6262_v59, %v6149_v12  ;;  %vm8015_vm14 = vmmov %vm8014_vm0 }
 0x397   : > { %v2418_v18 = vpack.c.bf16 %v2378_v14, %v2376_v30  ;;  %v6334_v7 = vpop.permute.xlu0 %2178  ;;  %v2122_v14 = vsel %vm957_vm2, %v6236_v31, %v6223_v6  ;;  %v2091_v31 = vpop.permute.xlu2 %2090  ;;  %v2337_v30 = vmul.f32 %v2265_v25, %v2118_v35 }
 0x398   : > { %v2191_v19 = vsel %vm1006_vm11, %v6334_v7, %v6314_v17  ;;  %v2336_v6 = vmul.f32 %v2264_v45, %v2122_v14  ;;  %v2257_v45 = vld [vmem:[%s7837_s8 + $0x68] sm:$0xff]  ;;  %v2094_v14 = vsel %vm7997_vm13, %v6149_v12, %v6262_v59  ;;  %v8001_v12 = vpack.c.bf16 %v6120_v51, %v6135_v34  ;;  %vm8016_vm13 = vmmov %vm8014_vm0 }
 0x399   : > { %2507 = vmatpush.bf16.msra.mxu1 %v2418_v18  ;;  %v2370_v28 = vmul.f32 %v2298_v41, %v2191_v19  ;;  %2489 = vmatpush.bf16.msra.mxu0 %v7993_v38  ;;  %v2329_v38 = vmul.f32 %v2257_v45, %v2094_v14  ;;  %v2166_v51 = vsel %vm8003_vm7, %v6254_v32, %v6231_v21 }
 0x39a   : > { %2546 = vmatpush.bf16.msra.mxu3 %v7994_v5  ;;  %v8000_v5 = vpack.c.bf16 %v6122_v8, %v6132_v15  ;;  %v2290_v8 = vld [vmem:[%s7837_s8 + $0x170] sm:$0xff]  ;;  %v8006_v21 = vpack.c.bf16 %v6189_v53, %v6202_v3  ;;  %v2249_v53 = vld [vmem:[%s7837_s8 + $0x28] sm:$0xff] }
 0x39b   : > { %v2115_v33 = vpop.permute.xlu1 %2114  ;;  %v2414_v4 = vpack.c.bf16 %v2370_v28, %v2368_v26 }
 0x39c   : > { %v2119_v63 = vsel %vm957_vm2, %v2107_v2, %v2115_v33  ;;  %v2123_v13 = vsel %vm957_vm2, %v2115_v33, %v2107_v2  ;;  %v2256_v2 = vld [vmem:[%s7837_s8 + $0x60] sm:$0xff]  ;;  %v8002_v33 = vpack.c.bf16 %v6126_v36, %v6138_v11 }
 0x39d   : > { %v2338_v18 = vmul.f32 %v2266_v57, %v2123_v13  ;;  %v2339_v41 = vmul.f32 %v2267_v47, %v2119_v63  ;;  %2508 = vmatpush.bf16.msra.mxu1 %v7995_v62  ;;  %v2328_v47 = vmul.f32 %v2256_v2, %v2098_v1  ;;  %v2288_v63 = vld [vmem:[%s7837_s8 + $0x160] sm:$0xff]  ;;  %v8005_v13 = vpack.c.bf16 %v6187_v46, %v6199_v61 }
 0x39e   : > { %v2360_v34 = vmul.f32 %v2288_v63, %v2166_v51  ;;  %v2248_v62 = vld [vmem:[%s7837_s8 + $0x20] sm:$0xff] }
 0x39f   : > { %v2398_v55 = vpack.c.bf16 %v2338_v18, %v2336_v6  ;;  %v2399_v50 = vpack.c.bf16 %v2339_v41, %v2337_v30  ;;  %v2083_v56 = vpop.permute.xlu0 %2082  ;;  %v2065_v26 = vpop.permute.xlu2 %2064  ;;  %v2282_v41 = vld [vmem:[%s7837_s8 + $0x130] sm:$0xff]  ;;  %v2280_v46 = vld [vmem:[%s7837_s8 + $0x120] sm:$0xff] }
 0x3a0   : > { %v2095_v19 = vsel %vm7998_vm15, %v2083_v56, %v2091_v31  ;;  %v2099_v25 = vsel %vm7999_vm8, %v2091_v31, %v2083_v56  ;;  %v2070_v61 = vsel %vm8007_vm12, %v6273_v27, %v2065_v26  ;;  %v2074_v3 = vsel %vm8008_vm9, %v2065_v26, %v6273_v27  ;;  %v2278_v27 = vld [vmem:[%s7837_s8 + $0x110] sm:$0xff] }
 0x3a1   : > { %2490 = vmatpush.bf16.msra.mxu0 %v2398_v55  ;;  %2509 = vmatpush.bf16.msra.mxu1 %v2414_v4  ;;  %v2330_v35 = vmul.f32 %v2258_v49, %v2099_v25  ;;  %v2331_v57 = vmul.f32 %v2259_v23, %v2095_v19  ;;  %v2250_v4 = vld [vmem:[%s7837_s8 + $0x30] sm:$0xff]  ;;  %v2251_v55 = vld [vmem:[%s7837_s8 + $0x38] sm:$0xff]  ;;  %v2354_v49 = vmul.f32 %v2282_v41, %v5836_v29  ;;  %v2276_v29 = vld [vmem:[%s7837_s8 + $0x100] sm:$0xff]  ;;  %vm8018_vm15 = vcmp.lt.s32.totalorder %v7975_v16, 111 }
 0x3a2   : > { %2547 = vmatpush.bf16.msra.mxu3 %v2399_v50  ;;  %v2352_v1 = vmul.f32 %v2280_v46, %v5798_v10  ;;  %v2320_v56 = vmul.f32 %v2248_v62, %v2074_v3  ;;  %v2321_v45 = vmul.f32 %v2249_v53, %v2070_v61  ;;  %v8011_v25 = vpack.c.bf16 %v6191_v9, %v6205_v52  ;;  %v2307_v52 = vld [vmem:[%s7837_s8 + $0x1f8] sm:$0xff]  ;;  %v4178_v41 = vld [vmem:[%s7839_s10] sm:$0xf]  ;;  %v4327_v62 = vld [vmem:[%s7839_s10 + $0x8] sm:$0xf0] }
 0x3a3   : > { %v2053_v28 = vpop.permute.xlu1 %2052  ;;  %v2394_v59 = vpack.c.bf16 %v2330_v35, %v2328_v47  ;;  %v2395_v6 = vpack.c.bf16 %v2331_v57, %v2329_v38  ;;  %v2350_v10 = vmul.f32 %v2278_v27, %v5769_v44  ;;  %v2244_v38 = vld [vmem:[%s7837_s8] sm:$0xff]  ;;  %v2348_v9 = vmul.f32 %v2276_v29, %v5693_v43  ;;  %vm8019_vm8 = vmmov %vm8018_vm15 }
 0x3a4   : > { %v2406_v57 = vpack.c.bf16 %v2354_v49, %v2352_v1  ;;  %v2219_v44 = vsel %vm8012_vm6, %v6319_v37, %v6249_v20  ;;  %v4326_v43 = vld [vmem:[%s7839_s10 + $0x4] sm:$0xf]  ;;  %v2246_v37 = vld [vmem:[%s7837_s8 + $0x10] sm:$0xff]  ;;  %v2247_v20 = vld [vmem:[%s7837_s8 + $0x18] sm:$0xff] }
 0x3a5   : > { %2491 = vmatpush.bf16.msra.mxu0 %v8000_v5  ;;  %2510 = vmatpush.bf16.msra.mxu1 %v8001_v12  ;;  %v2245_v5 = vld [vmem:[%s7837_s8 + $0x8] sm:$0xff]  ;;  %v2312_v27 = vld [vmem:[%s7837_s8 + $0x220] sm:$0xff]  ;;  %vm8021_vm12 = vmmov %vm8019_vm8 }
 0x3a6   : > { %2548 = vmatpush.bf16.msra.mxu3 %v8002_v33  ;;  %v4180_v33 = vld [vmem:[%s7839_s10 + $0xc] sm:$0xf0]  ;;  %vm8023_vm9 = vmmov %vm8019_vm8 }
 0x3a7   : > { %v6406_v31 = vpop.permute.xlu0 %2162  ;;  %v2055_v30 = vpop.permute.xlu2 %2054 }
 0x3a9   : > { %2492 = vmatpush.bf16.msra.mxu0 %v2394_v59 }
 0x3aa   : > { %2549 = vmatpush.bf16.msra.mxu3 %v2395_v6 }
 0x3ab   : > { %v6418_v36 = vpop.permute.xlu1 %2154 }
 0x3ac   : > { %v2167_v15 = vsel %vm8004_vm10, %v6418_v36, %v6406_v31  ;;  %vm8020_vm10 = vmmov %vm8019_vm8 }
 0x3ad   : > { %v2362_v11 = vmul.f32 %v2290_v8, %v2167_v15  ;;  %2493 = vmatpush.bf16.msra.mxu0 %v8005_v13  ;;  %v2404_v15 = vpack.c.bf16 %v2350_v10, %v2348_v9 }
 0x3ae   : > { %2550 = vmatpush.bf16.msra.mxu3 %v8006_v21  ;;  %v6507_v21 = vor.u32 %v4326_v43, %v4180_v33 }
 0x3af   : > { %v2410_v32 = vpack.c.bf16 %v2362_v11, %v2360_v34  ;;  %v2067_v18 = vpop.permute.xlu0 %2066  ;;  %v2225_v6 = vpop.permute.xlu2 %2224  ;;  %v2379_v34 = vmul.f32 %v2307_v52, %v2219_v44 }
 0x3b1   : > { %2511 = vmatpush.bf16.msra.mxu1 %v2410_v32 }
 0x3b3   : > { %v2059_v50 = vpop.permute.xlu1 %2058 }
 0x3b4   : > { %v2071_v23 = vsel %vm8009_vm4, %v2059_v50, %v2067_v18  ;;  %v2075_v2 = vsel %vm8010_vm1, %v2067_v18, %v2059_v50  ;;  %v2195_v50 = vsel %vm1006_vm11, %v6314_v17, %v6334_v7  ;;  %v8017_v17 = vpack.c.bf16 %v6063_v40, %v6072_v0  ;;  %v2313_v7 = vld [vmem:[%s7837_s8 + $0x228] sm:$0xff]  ;;  %vm8024_vm4 = vmmov %vm8019_vm8 }
 0x3b5   : > { %v2322_v14 = vmul.f32 %v2250_v4, %v2075_v2  ;;  %v2323_v19 = vmul.f32 %v2251_v55, %v2071_v23  ;;  %2512 = vmatpush.bf16.msra.mxu1 %v8011_v25  ;;  %v4179_v4 = vor.u32 %v4327_v62, %v4178_v41  ;;  %v2299_v55 = vld [vmem:[%s7837_s8 + $0x1b8] sm:$0xff]  ;;  %v2171_v25 = vsel %vm8003_vm7, %v6406_v31, %v6418_v36  ;;  %v2289_v31 = vld [vmem:[%s7837_s8 + $0x168] sm:$0xff]  ;;  %vm8025_vm1 = vmmov %vm8024_vm4 }
 0x3b6   : > { %v2371_v49 = vmul.f32 %v2299_v55, %v2195_v50  ;;  %v2361_v43 = vmul.f32 %v2289_v31, %v6260_v58  ;;  %vm8026_vm6 = vmmov %vm8025_vm1  ;;  %v2279_v50 = vld [vmem:[%s7837_s8 + $0x118] sm:$0xff] }
 0x3b7   : > { %v2390_v35 = vpack.c.bf16 %v2322_v14, %v2320_v56  ;;  %v2391_v47 = vpack.c.bf16 %v2323_v19, %v2321_v45  ;;  %v2061_v12 = vpop.permute.xlu0 %2060  ;;  %v2235_v23 = vpop.permute.xlu2 %2234  ;;  %v2315_v14 = vld [vmem:[%s7837_s8 + $0x238] sm:$0xff] }
 0x3b8   : > { %v2068_v59 = vsel %vm8013_vm5, %v2053_v28, %v2061_v12  ;;  %v2072_v26 = vsel %vm8014_vm0, %v2061_v12, %v2053_v28  ;;  %v2305_v28 = vld [vmem:[%s7837_s8 + $0x1e8] sm:$0xff]  ;;  %v2291_v19 = vld [vmem:[%s7837_s8 + $0x178] sm:$0xff]  ;;  %vm8030_vm5 = vcmask 261120  }
 0x3b9   : > { %2494 = vmatpush.bf16.msra.mxu0 %v2390_v35  ;;  %2513 = vmatpush.bf16.msra.mxu1 %v2406_v57  ;;  %v2316_v51 = vmul.f32 %v2244_v38, %v2072_v26  ;;  %v2317_v8 = vmul.f32 %v2245_v5, %v2068_v59  ;;  %v2377_v46 = vmul.f32 %v2305_v28, %v6213_v39  ;;  %v2297_v39 = vld [vmem:[%s7837_s8 + $0x1a8] sm:$0xff]  ;;  %v4329_v57 = vld [vmem:[%s7839_s10 + $0x1c] sm:$0xf]  ;;  %v4190_v59 = vld [vmem:[%s7839_s10 + $0x18] sm:$0xf] }
 0x3ba   : > { %2551 = vmatpush.bf16.msra.mxu3 %v2391_v47  ;;  %v2369_v1 = vmul.f32 %v2297_v39, %v6247_v22  ;;  %v2314_v22 = vld [vmem:[%s7837_s8 + $0x230] sm:$0xff]  ;;  %v4192_v47 = vld [vmem:[%s7839_s10 + $0x24] sm:$0xf0]  ;;  %v2363_v36 = vmul.f32 %v2291_v19, %v2171_v25  ;;  %v4330_v26 = vld [vmem:[%s7839_s10 + $0x20] sm:$0xf0]  ;;  %v8027_v39 = vpack.c.bf16 %v6193_v60, %v6208_v48 }
 0x3bb   : > { %v2063_v63 = vpop.permute.xlu1 %2062  ;;  %v2419_v3 = vpack.c.bf16 %v2379_v34, %v2377_v46  ;;  %v4195_v44 = vor.u32 %v4329_v57, %v4192_v47  ;;  %v4186_v46 = vld [vmem:[%s7839_s10 + $0x8] sm:$0xf]  ;;  %vm8031_vm0 = vmmov %vm8030_vm5  ;;  %v4198_v60 = vld [vmem:[%s7839_s10 + $0x20] sm:$0xf] }
 0x3bc   : > { %v2069_v11 = vsel %vm8015_vm14, %v2055_v30, %v2063_v63  ;;  %v2073_v13 = vsel %vm8016_vm13, %v2063_v63, %v2055_v30  ;;  %v2415_v40 = vpack.c.bf16 %v2371_v49, %v2369_v1  ;;  %v2310_v63 = vld [vmem:[%s7837_s8 + $0x210] sm:$0xff]  ;;  %v8028_v49 = vld [vmem:[#allocation10_spill] sm:$0xff]  ;;  %v4331_v48 = vld [vmem:[%s7839_s10 + $0x28] sm:$0xf0] }
 0x3bd   : > { %v2318_v32 = vmul.f32 %v2246_v37, %v2073_v13  ;;  %v2319_v18 = vmul.f32 %v2247_v20, %v2069_v11  ;;  %2514 = vmatpush.bf16.msra.mxu1 %v2404_v15  ;;  %v8022_v37 = vpack.c.bf16 %v6124_v42, %v6141_v24  ;;  %v2309_v20 = vld [vmem:[%s7837_s8 + $0x208] sm:$0xff]  ;;  %v2311_v42 = vld [vmem:[%s7837_s8 + $0x218] sm:$0xff]  ;;  %v4191_v15 = vor.u32 %v4330_v26, %v4190_v59  ;;  %vm8032_vm14 = vmmov %vm8031_vm0 }
 0x3be   : > { %v2283_v13 = vld [vmem:[%s7837_s8 + $0x138] sm:$0xff]  ;;  %vm8033_vm13 = vmmov %vm8031_vm0  ;;  %v6663_v26 = vld [vmem:[%s800_s27 + $0x10] sm:$0xff] }
 0x3bf   : > { %v2388_v53 = vpack.c.bf16 %v2318_v32, %v2316_v51  ;;  %v2389_v61 = vpack.c.bf16 %v2319_v18, %v2317_v8  ;;  %v2221_v30 = vpop.permute.xlu0 %2220  ;;  %v2229_v33 = vpop.permute.xlu2 %2228  ;;  %v2411_v51 = vpack.c.bf16 %v2363_v36, %v2361_v43  ;;  %v6653_v36 = vld [vmem:[%s800_s27 + $0x38] sm:$0xff]  ;;  %vm8036_vm7 = vmmov %vm8031_vm0 }
 0x3c0   : > { %2515 = vmatmul.bf16.vlgmr.msra.gmra.mxu1 %v6507_v21  ;;  %v2236_v28 = vsel %vm8023_vm9, %v2221_v30, %v2229_v33  ;;  %v2240_v58 = vsel %vm8024_vm4, %v2229_v33, %v2221_v30  ;;  %v6665_v43 = vld [vmem:[%s800_s27 + $0x18] sm:$0xff]  ;;  %vm8040_vm4 = vmmov %vm8031_vm0 }
 0x3c1   : > { %2495 = vmatpush.bf16.msra.mxu0 %v2388_v53  ;;  %2552 = vmatpush.bf16.msra.mxu3 %v2389_v61  ;;  %v2381_v18 = vmul.f32 %v2309_v20, %v2240_v58  ;;  %v4328_v53 = vld [vmem:[%s7839_s10 + $0x10] sm:$0xf0]  ;;  %v2281_v61 = vld [vmem:[%s7837_s8 + $0x128] sm:$0xff]  ;;  %v2623_v20 = vpack.c.bf16 %v6665_v43, %v6663_v26 }
 0x3c2   : > { %v4187_v55 = vor.u32 %v4328_v53, %v4186_v46 }
 0x3c3   : > { %v2233_v2 = vpop.permute.xlu1 %2232 }
 0x3c4   : > { %2496 = vmatmul.bf16.vlgmr.msra.gmra.mxu0 %v4179_v4  ;;  %2553 = vmatmul.bf16.vlgmr.msra.gmra.mxu3 %v4179_v4  ;;  %v2238_v56 = vsel %vm8018_vm15, %v2225_v6, %v2233_v2  ;;  %v2242_v45 = vsel %vm8019_vm8, %v2233_v2, %v2225_v6  ;;  %v2308_v6 = vld [vmem:[%s7837_s8 + $0x200] sm:$0xff]  ;;  %v2355_v4 = vmul.f32 %v2283_v13, %v5838_v54  ;;  %v2277_v2 = vld [vmem:[%s7837_s8 + $0x108] sm:$0xff]  ;;  %vm8034_vm15 = vcmask 523264  }
 0x3c5   : > { %2564 = vmatpush.bf16.msrb.mxu0 %v2419_v3  ;;  %v2384_v10 = vmul.f32 %v2312_v27, %v2238_v56  ;;  %v2385_v38 = vmul.f32 %v2313_v7, %v2242_v45  ;;  %v2380_v32 = vmul.f32 %v2308_v6, %v2236_v28  ;;  %v8029_v27 = vld [vmem:[#allocation9_spill] sm:$0xff]  ;;  %v4199_v45 = vor.u32 %v4331_v48, %v4198_v60  ;;  %vm8035_vm8 = vmmov %vm8034_vm15 }
 0x3c6   : > { %v2351_v54 = vmul.f32 %v2279_v50, %v8029_v27  ;;  %vm8039_vm9 = vmmov %vm8035_vm8 }
 0x3c7   : > { %v2227_v0 = vpop.permute.xlu0 %2226 }
 0x3c8   : > { %v2239_v29 = vsel %vm8020_vm10, %v2227_v0, %v2235_v23  ;;  %v2243_v35 = vsel %vm8021_vm12, %v2235_v23, %v2227_v0  ;;  %v2353_v23 = vmul.f32 %v2281_v61, %v8028_v49  ;;  %v2450_v49 = vpop.permute.xlu2 %2449  ;;  %vm8037_vm10 = vmmov %vm8031_vm0 }
 0x3c9   : > { %2565 = vmatpush.bf16.msrb.mxu0 %v8017_v17  ;;  %v2386_v5 = vmul.f32 %v2314_v22, %v2239_v29  ;;  %v2387_v12 = vmul.f32 %v2315_v14, %v2243_v35  ;;  %v4536_v17 = vld [vmem:[%s5681_s0 + $0x8] sm:$0xff]  ;;  %vm8038_vm12 = vmmov %vm8035_vm8  ;;  %s8077_s0 = smov 127  }
 0x3ca   : > { %v2407_v1 = vpack.c.bf16 %v2355_v4, %v2353_v23  ;;  %v2349_v7 = vmul.f32 %v4536_v17, %v2277_v2 }
 0x3cb   : > { %v2422_v9 = vpack.c.bf16 %v2386_v5, %v2384_v10  ;;  %v2423_v52 = vpack.c.bf16 %v2387_v12, %v2385_v38  ;;  %v2223_v24 = vpop.permute.xlu1 %2222  ;;  %v6647_v10 = vld [vmem:[%s800_s27 + $0x20] sm:$0xff]  ;;  %v6649_v38 = vld [vmem:[%s800_s27 + $0x28] sm:$0xff]  ;;  %v6651_v5 = vld [vmem:[%s800_s27 + $0x30] sm:$0xff] }
 0x3cc   : > { %v2405_v56 = vpack.c.bf16 %v2351_v54, %v2349_v7  ;;  %v2625_v59 = vpack.c.bf16 %v6653_v36, %v6651_v5 }
 0x3cd   : > { %2566 = vmatpush.bf16.msrb.mxu0 %v2415_v40  ;;  %2532 = vmatpush.bf16.msra.mxu2 %v2422_v9  ;;  %v2624_v9 = vpack.c.bf16 %v6649_v38, %v6647_v10 }
 0x3ce   : > { %2589 = vmatpush.bf16.msrb.mxu1 %v2423_v52  ;;  %v6657_v52 = vld [vmem:[%s800_s27] sm:$0xff]  ;;  %v2656_v58 = vunpack.c.l.b16 %v2625_v59 }
 0x3cf   : > { %v2231_v8 = vpop.permute.xlu0 %2230  ;;  %v2654_v6 = vunpack.c.l.b16 %v2624_v9 }
 0x3d0   : > { %2520 = vmatmul.bf16.gmra.mxu1 %v4195_v44  ;;  %v2237_v34 = vsel %vm8025_vm1, %v2223_v24, %v2231_v8  ;;  %v2241_v11 = vsel %vm8026_vm6, %v2231_v8, %v2223_v24  ;;  %v2652_v24 = vunpack.c.l.b16 %v2623_v20  ;;  %v2653_v8 = vunpack.c.h.b16 %v2623_v20  ;;  %vm8041_vm1 = vmmov %vm8031_vm0 }
 0x3d1   : > { %2567 = vmatpush.bf16.msrb.mxu0 %v8022_v37  ;;  %v2382_v41 = vmul.f32 %v2310_v63, %v2237_v34  ;;  %v2383_v62 = vmul.f32 %v2311_v42, %v2241_v11  ;;  %v2655_v37 = vunpack.c.h.b16 %v2624_v9  ;;  %v2657_v63 = vunpack.c.h.b16 %v2625_v59  ;;  %vm8042_vm6 = vmmov %vm8035_vm8 }
 0x3d2   : > { %v6671_v34 = vpack.c.b16 %v2656_v58, %v2654_v6 }
 0x3d3   : > { %v2420_v3 = vpack.c.bf16 %v2382_v41, %v2380_v32  ;;  %v2421_v30 = vpack.c.bf16 %v2383_v62, %v2381_v18  ;;  %v6673_v11 = vpack.c.b16 %v2657_v63, %v2655_v37 }
 0x3d4   : > { %2501 = vmatmul.bf16.gmra.mxu0 %v4191_v15  ;;  %2558 = vmatmul.bf16.gmra.mxu3 %v4191_v15  ;;  %v2445_v15 = vpop.permute.xlu1 %2444 }
 0x3d5   : > { %2568 = vmatpush.bf16.msrb.mxu0 %v2411_v51  ;;  %2533 = vmatpush.bf16.msra.mxu2 %v2420_v3 }
 0x3d6   : > { %2590 = vmatpush.bf16.msrb.mxu1 %v2421_v30  ;;  %2789 = vmatpush.bf16.msrb.mxu3 %v6673_v11 }
 0x3d7   : > { %v2435_v4 = vpop.permute.xlu0 %2434 }
 0x3d8   : > { %4200 = vmatmul.msk.bf16.vlgmr.msra.gmra.mxu2 %vm8030_vm5, %v4187_v55  ;;  %vm8043_vm5 = vmmov %vm8042_vm6 }
 0x3d9   : > { %2569 = vmatpush.bf16.msrb.mxu0 %v8027_v39  ;;  %2760 = vmatpush.bf16.msrb.mxu2 %v6671_v34 }
 0x3dc   : > { %v2440_v53 = vpop.permute.xlu1 %2439 }
 0x3dd   : > { %2570 = vmatpush.bf16.msrb.mxu0 %v2407_v1 }
 0x3e0   : > { %4202 = vmatmul.msk.bf16.vlgmr.msrb.gmra.mxu1 %vm8031_vm0, %v4187_v55 }
 0x3e1   : > { %2571 = vmatpush.bf16.msrb.mxu0 %v2405_v56 }
 0x3e4   : > { %2572 = vmatmul.bf16.vlgmr.msrb.gmra.mxu0 %v6507_v21 }
 0x3e8   : > { %4201 = vmatmul.msk.bf16.gmra.mxu2 %vm8032_vm14, %v4199_v45  ;;  %vm8044_vm14 = vmmov %vm8031_vm0 }
 0x3f0   : > { %4203 = vmatmul.msk.bf16.gmra.mxu1 %vm8033_vm13, %v4199_v45  ;;  %vm8045_vm13 = vmmov %vm8043_vm5 }
 0x3f4   : > { %2577 = vmatmul.bf16.gmra.mxu0 %v4195_v44  ;;  %v6659_v44 = vld [vmem:[%s800_s27 + $0x8] sm:$0xff] }
 0x3f5   : > { %v2622_v33 = vpack.c.bf16 %v6659_v44, %v6657_v52 }
 0x3f7   : > { %v2650_v42 = vunpack.c.l.b16 %v2622_v33  ;;  %v2651_v51 = vunpack.c.h.b16 %v2622_v33 }
 0x3f9   : > { %v6677_v32 = vpack.c.b16 %v2652_v24, %v2650_v42  ;;  %v6679_v18 = vpack.c.b16 %v2653_v8, %v2651_v51 }
 0x3fb   : > { %2761 = vmatpush.bf16.msrb.mxu2 %v6677_v32  ;;  %2790 = vmatpush.bf16.msrb.mxu3 %v6679_v18 }
 0x43d   : > { %v6633_v22 = vpop.f32.mrf.mxu1 }
 0x441   : > { %v2497_v14 = vpop.f32.mrf.mxu0 }
 0x442   : > { %v2498_v54 = vadd.f32 %v2497_v14, %v2435_v4 }
 0x445   : > { %v6635_v40 = vpop.f32.mrf.mxu1 }
 0x447   : > { %v2554_v35 = vpop.f32.mrf.mxu3 }
 0x448   : > { %v2555_v23 = vadd.f32 %v2554_v35, %v2435_v4 }
 0x449   : > { %v2499_v0 = vpop.f32.mrf.mxu0 }
 0x44a   : > { %v2500_v2 = vadd.f32 %v2499_v0, %v2440_v53 }
 0x44c   : > { %v2519_v48 = vadd.f32 %v6635_v40, %v2500_v2  ;;  %v2697_v2 = vpop.permute.xlu2 %2696 }
 0x44d   : > { %v2521_v19 = vpop.f32.mrf.mxu1 }
 0x44f   : > { %v2556_v12 = vpop.f32.mrf.mxu3 }
 0x450   : > { %v2557_v55 = vadd.f32 %v2556_v12, %v2440_v53 }
 0x451   : > { %v2502_v25 = vpop.f32.mrf.mxu0 }
 0x452   : > { %v2503_v50 = vadd.f32 %v2502_v25, %v2445_v15  ;;  %v2517_v25 = vadd.f32 %v6633_v22, %v2498_v54 }
 0x454   : > { %v2522_v56 = vadd.f32 %v2521_v19, %v2503_v50  ;;  %v4332_v50 = vld [vmem:[%s7842_s13 + $0x20] sm:$0xff] }
 0x455   : > { %v6637_v29 = vpop.f32.mrf.mxu1 }
 0x457   : > { %v2559_v62 = vpop.f32.mrf.mxu3 }
 0x458   : > { %v2560_v61 = vadd.f32 %v2559_v62, %v2445_v15 }
 0x459   : > { %v2504_v57 = vpop.f32.mrf.mxu0 }
 0x45a   : > { %v2505_v1 = vadd.f32 %v2504_v57, %v2450_v49 }
 0x45b   : > { %v6639_v21 = vpop.f32.mrf.mxu2 }
 0x45c   : > { %v2524_v12 = vadd.f32 %v6637_v29, %v2505_v1  ;;  %v2536_v19 = vadd.f32 %v6639_v21, %v2517_v25  ;;  %v2687_v1 = vpop.permute.xlu1 %2686  ;;  %v6742_v25 = vpop.permute.xlu0 %2701 }
 0x45d   : > { %v6641_v47 = vpop.f32.mrf.mxu1 }
 0x45e   : > { %v2602_v8 = vmax.f32 %v2536_v19, 0.0 }
 0x45f   : > { %v2561_v17 = vpop.f32.mrf.mxu3 }
 0x460   : > { %v2562_v9 = vadd.f32 %v2561_v17, %v2450_v49  ;;  %v4333_v49 = vld [vmem:[%s7842_s13 + $0x28] sm:$0xff]  ;;  %v2692_v17 = vpop.permute.xlu2 %2691 }
 0x461   : > { %v2573_v31 = vpop.f32.mrf.mxu0 }
 0x462   : > { %v2574_v7 = vadd.f32 %v2573_v31, %v2555_v23  ;;  %v4339_v23 = vld [vmem:[%s7844_s15 + $0x38] sm:$0xff] }
 0x463   : > { %v2537_v28 = vpop.f32.mrf.mxu2 }
 0x464   : > { %v2593_v35 = vadd.f32 %v6641_v47, %v2574_v7  ;;  %v2538_v57 = vadd.f32 %v2537_v28, %v2519_v48 }
 0x465   : > { %v2594_v13 = vpop.f32.mrf.mxu1 }
 0x466   : > { %v2603_v63 = vmax.f32 %v2593_v35, 0.0  ;;  %v2604_v42 = vmax.f32 %v2538_v57, 0.0 }
 0x468   : > { %v2618_v47 = vpack.c.bf16 %v2603_v63, %v2602_v8  ;;  %v6755_v8 = vpop.permute.xlu0 %2716 }
 0x469   : > { %v2575_v41 = vpop.f32.mrf.mxu0 }
 0x46a   : > { %v2576_v27 = vadd.f32 %v2575_v41, %v2557_v55 }
 0x46b   : > { %v2540_v46 = vpop.f32.mrf.mxu2 }
 0x46c   : > { %v2595_v59 = vadd.f32 %v2594_v13, %v2576_v27  ;;  %v2541_v33 = vadd.f32 %v2540_v46, %v2522_v56 }
 0x46d   : > { %v2597_v3 = vpop.f32.mrf.mxu1 }
 0x46e   : > { %v2605_v20 = vmax.f32 %v2595_v59, 0.0  ;;  %v2606_v40 = vmax.f32 %v2541_v33, 0.0 }
 0x470   : > { %v2619_v22 = vpack.c.bf16 %v2605_v20, %v2604_v42 }
 0x471   : > { %v2578_v30 = vpop.f32.mrf.mxu0 }
 0x472   : > { %v2579_v39 = vadd.f32 %v2578_v30, %v2560_v61  ;;  %v2632_v21 = vunpack.c.l.b16 %v2619_v22  ;;  %v2633_v61 = vunpack.c.h.b16 %v2619_v22  ;;  %v2631_v30 = vunpack.c.h.b16 %v2618_v47 }
 0x473   : > { %v2542_v45 = vpop.f32.mrf.mxu2 }
 0x474   : > { %v2598_v60 = vadd.f32 %v2597_v3, %v2579_v39  ;;  %v2543_v14 = vadd.f32 %v2542_v45, %v2524_v12  ;;  %v2630_v3 = vunpack.c.l.b16 %v2618_v47  ;;  %v2639_v55 = vpack.c.b16 %v2633_v61, %v2631_v30  ;;  %v4336_v39 = vld [vmem:[%s7844_s15 + $0x20] sm:$0xff]  ;;  %v6740_v12 = vpop.permute.xlu1 %2721 }
 0x475   : > { %v2599_v31 = vpop.f32.mrf.mxu1 }
 0x476   : > { %v2607_v6 = vmax.f32 %v2598_v60, 0.0  ;;  %v2608_v51 = vmax.f32 %v2543_v14, 0.0  ;;  %v2638_v4 = vpack.c.b16 %v2632_v21, %v2630_v3  ;;  %v6744_v14 = vpop.permute.xlu2 %2706 }
 0x478   : > { %v2620_v24 = vpack.c.bf16 %v2607_v6, %v2606_v40 }
 0x479   : > { %v2580_v0 = vpop.f32.mrf.mxu0 }
 0x47a   : > { %v2581_v37 = vadd.f32 %v2580_v0, %v2562_v9  ;;  %v2634_v13 = vunpack.c.l.b16 %v2620_v24  ;;  %v2635_v41 = vunpack.c.h.b16 %v2620_v24 }
 0x47c   : > { %v2600_v58 = vadd.f32 %v2599_v31, %v2581_v37  ;;  %v6752_v24 = vpop.permute.xlu1 %3224 }
 0x47e   : > { %v2609_v29 = vmax.f32 %v2600_v58, 0.0 }
 0x480   : > { %v2621_v15 = vpack.c.bf16 %v2609_v29, %v2608_v51 }
 0x482   : > { %v2636_v28 = vunpack.c.l.b16 %v2621_v15  ;;  %v2637_v62 = vunpack.c.h.b16 %v2621_v15 }
 0x484   : > { %v2640_v46 = vpack.c.b16 %v2636_v28, %v2634_v13  ;;  %v2641_v53 = vpack.c.b16 %v2637_v62, %v2635_v41  ;;  %v6759_v41 = vpop.permute.xlu2 %3229 }
 0x486   : > { %2762 = vmatpush.bf16.msrb.mxu2 %v2640_v46  ;;  %2791 = vmatpush.bf16.msrb.mxu3 %v2641_v53 }
 0x487   : > { %3170 = vmatpush.bf16.msra.mxu0 %v2640_v46  ;;  %3189 = vmatpush.bf16.msra.mxu1 %v2641_v53 }
 0x48a   : > { %2763 = vmatpush.bf16.msrb.mxu2 %v2638_v4  ;;  %2792 = vmatpush.bf16.msrb.mxu3 %v2639_v55 }
 0x48b   : > { %3171 = vmatpush.bf16.msra.mxu0 %v2638_v4  ;;  %3190 = vmatpush.bf16.msra.mxu1 %v2639_v55 }
 0x48d   : > { %4236 = vmatmul.msk.bf16.vlgmr.msrb.gmra.mxu2 %vm8034_vm15, %v4332_v50  ;;  %4240 = vmatmul.msk.bf16.vlgmr.msrb.gmra.mxu3 %vm8035_vm8, %v4332_v50  ;;  %vm8046_vm15 = vmmov %vm8043_vm5 }
 0x48e   : > { %4276 = vmatmul.msk.bf16.vlgmr.msra.gmra.mxu0 %vm8036_vm7, %v4336_v39  ;;  %4278 = vmatmul.msk.bf16.vlgmr.msra.gmra.mxu1 %vm8037_vm10, %v4336_v39  ;;  %vm8047_vm8 = vmmov %vm8031_vm0 }
 0x48f   : > { %3254 = vmatpush.bf16.msrb.mxu0 %v6671_v34  ;;  %3273 = vmatpush.bf16.msrb.mxu1 %v6673_v11  ;;  %v4337_v34 = vld [vmem:[%s7844_s15 + $0x28] sm:$0xff]  ;;  %v4334_v11 = vld [vmem:[%s7842_s13 + $0x30] sm:$0xff]  ;;  %vm8048_vm7 = vmmov %vm8031_vm0 }
 0x493   : > { %3255 = vmatpush.bf16.msrb.mxu0 %v6677_v32  ;;  %3274 = vmatpush.bf16.msrb.mxu1 %v6679_v18  ;;  %v4338_v32 = vld [vmem:[%s7844_s15 + $0x30] sm:$0xff]  ;;  %v4335_v18 = vld [vmem:[%s7842_s13 + $0x38] sm:$0xff] }
 0x49d   : > { %4237 = vmatmul.msk.bf16.gmra.mxu2 %vm8038_vm12, %v4333_v49  ;;  %4241 = vmatmul.msk.bf16.gmra.mxu3 %vm8039_vm9, %v4333_v49 }
 0x49e   : > { %4277 = vmatmul.msk.bf16.gmra.mxu0 %vm8040_vm4, %v4337_v34  ;;  %4279 = vmatmul.msk.bf16.gmra.mxu1 %vm8041_vm1, %v4337_v34  ;;  %v6764_v34 = vpop.permute.xlu1 %3145 }
 0x4ad   : > { %4238 = vmatmul.msk.bf16.gmra.mxu2 %vm8042_vm6, %v4334_v11  ;;  %4242 = vmatmul.msk.bf16.gmra.mxu3 %vm8043_vm5, %v4334_v11 }
 0x4ae   : > { %4296 = vmatmul.msk.bf16.vlgmr.msrb.gmra.mxu0 %vm8031_vm0, %v4338_v32  ;;  %4298 = vmatmul.msk.bf16.vlgmr.msrb.gmra.mxu1 %vm8044_vm14, %v4338_v32 }
 0x4bd   : > { %4239 = vmatmul.msk.bf16.gmra.mxu2 %vm8045_vm13, %v4335_v18  ;;  %4243 = vmatmul.msk.bf16.gmra.mxu3 %vm8046_vm15, %v4335_v18 }
 0x4be   : > { %4297 = vmatmul.msk.bf16.gmra.mxu0 %vm8047_vm8, %v4339_v23  ;;  %4299 = vmatmul.msk.bf16.gmra.mxu1 %vm8048_vm7, %v4339_v23 }
 0x50b   : > { %v6732_v27 = vpop.f32.mrf.mxu0  ;;  %v6734_v54 = vpop.f32.mrf.mxu1 }
 0x510   : > { %v2765_v7 = vpop.f32.mrf.mxu2  ;;  %v2794_v56 = vpop.f32.mrf.mxu3 }
 0x511   : > { %v2766_v60 = vadd.f32 %v2765_v7, %v2687_v1  ;;  %v2795_v48 = vadd.f32 %v2794_v56, %v2687_v1  ;;  %v6772_v56 = vpop.permute.xlu0 %2711 }
 0x513   : > { %v4244_v45 = vmul.f32 -1.442695, %v2766_v60  ;;  %v4245_v9 = vmul.f32 -1.442695, %v2795_v48  ;;  %v6736_v59 = vpop.f32.mrf.mxu0  ;;  %v6738_v33 = vpop.f32.mrf.mxu1 }
 0x515   : > { %4456 = vpow2.f32 %v4244_v45 }
 0x516   : > { %4458 = vpow2.f32 %v4245_v9 }
 0x518   : > { %v2767_v35 = vpop.f32.mrf.mxu2  ;;  %v2796_v0 = vpop.f32.mrf.mxu3 }
 0x519   : > { %v2768_v57 = vadd.f32 %v2767_v35, %v2692_v17  ;;  %v2797_v6 = vadd.f32 %v2796_v0, %v2692_v17 }
 0x51b   : > { %v4457_v37 = vpop.eup %4456  ;;  %v6746_v19 = vpop.f32.mrf.mxu0  ;;  %v4246_v58 = vmul.f32 -1.442695, %v2768_v57  ;;  %v4247_v42 = vmul.f32 -1.442695, %v2797_v6 }
 0x51c   : > { %v6748_v31 = vpop.f32.mrf.mxu1  ;;  %v4459_v20 = vpop.eup %4458  ;;  %v2838_v40 = vadd.f32 1.0, %v4457_v37 }
 0x51d   : > { %v6750_v63 = vadd.f32 1.0, %v4459_v20 }
 0x51e   : > { %4460 = vrcp.f32 %v2838_v40  ;;  %v2855_v50 = vand.u32 2147483647, %v2838_v40  ;;  %v2857_v39 = vand.u32 2147483648, %v2838_v40  ;;  %vm2851_vm9 = vweird.f32 %v2838_v40 }
 0x51f   : > { %4462 = vrcp.f32 %v6750_v63  ;;  %v2872_v7 = vand.u32 2147483648, %v6750_v63  ;;  %vm2866_vm1 = vweird.f32 %v6750_v63  ;;  %v2870_v45 = vand.u32 2147483647, %v6750_v63 }
 0x520   : > { %4464 = vpow2.f32 %v4246_v58  ;;  %v2770_v51 = vpop.f32.mrf.mxu2  ;;  %v2799_v29 = vpop.f32.mrf.mxu3  ;;  %v2858_v0 = vor.u32 1.1754944e-38, %v2857_v39  ;;  %vm2856_vm5 = vcmp.eq.f32.partialorder %v2855_v50, 8.507059e+37 }
 0x521   : > { %4466 = vpow2.f32 %v4247_v42  ;;  %v2771_v22 = vadd.f32 %v2770_v51, %v2697_v2  ;;  %v2800_v15 = vadd.f32 %v2799_v29, %v2697_v2  ;;  %vm2871_vm0 = vcmp.eq.f32.partialorder %v2870_v45, 8.507059e+37 }
 0x523   : > { %v6757_v47 = vpop.f32.mrf.mxu0  ;;  %v4248_v21 = vmul.f32 -1.442695, %v2771_v22  ;;  %v4249_v30 = vmul.f32 -1.442695, %v2800_v15 }
 0x524   : > { %v4461_v13 = vpop.eup %4460  ;;  %v6761_v62 = vpop.f32.mrf.mxu1 }
 0x525   : > { %v4463_v28 = vpop.eup %4462  ;;  %v2847_v46 = vmul.f32 %v4461_v13, %v2838_v40  ;;  %vm2852_vm10 = vweird.f32 %v4461_v13  ;;  %4468 = vpow2.f32 %v4248_v21  ;;  %v3215_v40 = vpop.permute.xlu2 %3214 }
 0x526   : > { %v4465_v53 = vpop.eup %4464  ;;  %v2862_v61 = vmul.f32 %v4463_v28, %v6750_v63  ;;  %vm2867_vm12 = vweird.f32 %v4463_v28  ;;  %4470 = vpow2.f32 %v4249_v30  ;;  %vm6774_vm4 = vmor %vm2851_vm9, %vm2852_vm10  ;;  %v2873_v63 = vor.u32 1.1754944e-38, %v2872_v7 }
 0x527   : > { %v4467_v3 = vpop.eup %4466  ;;  %v2848_v4 = vsub.f32 1.0, %v2847_v46  ;;  %v6766_v11 = vadd.f32 1.0, %v4465_v53  ;;  %vm6784_vm6 = vmor %vm2866_vm1, %vm2867_vm12 }
 0x528   : > { %v2772_v55 = vpop.f32.mrf.mxu2  ;;  %v2863_v49 = vsub.f32 1.0, %v2862_v61  ;;  %v2801_v18 = vpop.f32.mrf.mxu3  ;;  %v6769_v2 = vadd.f32 1.0, %v4467_v3 }
 0x529   : > { %v2773_v32 = vadd.f32 %v2772_v55, %v6742_v25  ;;  %v2849_v23 = vmul.f32 %v4461_v13, %v2848_v4  ;;  %4472 = vrcp.f32 %v6766_v11  ;;  %v2802_v37 = vadd.f32 %v2801_v18, %v6742_v25  ;;  %v3131_v3 = vpop.permute.xlu1 %3130  ;;  %v6803_v18 = vpop.permute.xlu0 %3140 }
 0x52a   : > { %v2864_v1 = vmul.f32 %v4463_v28, %v2863_v49  ;;  %4474 = vrcp.f32 %v6769_v2  ;;  %v3174_v50 = vadd.f32 %v6732_v27, %v3131_v3  ;;  %vm2881_vm14 = vweird.f32 %v6766_v11 }
 0x52b   : > { %v2850_v17 = vadd.f32 %v4461_v13, %v2849_v23  ;;  %v4250_v9 = vmul.f32 -1.442695, %v2773_v32  ;;  %v3257_v57 = vpop.f32.mrf.mxu0  ;;  %v4469_v51 = vpop.eup %4468  ;;  %v4251_v53 = vmul.f32 -1.442695, %v2802_v37  ;;  %v3193_v23 = vadd.f32 %v6734_v54, %v3131_v3 }
 0x52c   : > { %v2865_v48 = vadd.f32 %v4463_v28, %v2864_v1  ;;  %v3276_v42 = vpop.f32.mrf.mxu1  ;;  %v3258_v29 = vadd.f32 %v3257_v57, %v3215_v40  ;;  %v4471_v15 = vpop.eup %4470  ;;  %v2887_v57 = vand.u32 2147483648, %v6766_v11  ;;  %vm2896_vm13 = vweird.f32 %v6769_v2 }
 0x52d   : > { %v2854_v35 = vsel %vm6774_vm4, %v4461_v13, %v2850_v17  ;;  %4476 = vpow2.f32 %v4250_v9  ;;  %v3277_v25 = vadd.f32 %v3276_v42, %v3215_v40  ;;  %v6800_v39 = vadd.f32 1.0, %v4471_v15 }
 0x52e   : > { %v2869_v20 = vsel %vm6784_vm6, %v4463_v28, %v2865_v48  ;;  %v2859_v58 = vsel %vm2856_vm5, %v2858_v0, %v2854_v35  ;;  %v6795_v28 = vadd.f32 1.0, %v4469_v51  ;;  %v2885_v48 = vand.u32 2147483647, %v6766_v11 }
 0x52f   : > { %v2874_v13 = vsel %vm2871_vm0, %v2873_v63, %v2869_v20  ;;  %v3286_v21 = vmul.f32 %v3258_v29, %v2859_v58  ;;  %v6793_v61 = vpop.eup %4472 }
 0x530   : > { %v2775_v22 = vpop.f32.mrf.mxu2  ;;  %v2804_v4 = vpop.f32.mrf.mxu3  ;;  %v3287_v49 = vmul.f32 %v3277_v25, %v2874_v13  ;;  %v2877_v60 = vmul.f32 %v6793_v61, %v6766_v11  ;;  %vm2882_vm15 = vweird.f32 %v6793_v61  ;;  %v2902_v13 = vand.u32 2147483648, %v6769_v2 }
 0x531   : > { %v2776_v46 = vadd.f32 %v2775_v22, %v6744_v14  ;;  %v6797_v55 = vpop.eup %4474  ;;  %v2805_v32 = vadd.f32 %v2804_v4, %v6744_v14  ;;  %v3294_v1 = vadd.f32 %v3286_v21, %v3174_v50  ;;  %vm2883_vm7 = vmor %vm2881_vm14, %vm2882_vm15  ;;  %vm2886_vm10 = vcmp.eq.f32.partialorder %v2885_v48, 8.507059e+37 }
 0x532   : > { %v2892_v27 = vmul.f32 %v6797_v55, %v6769_v2  ;;  %v3295_v14 = vadd.f32 %v3287_v49, %v3193_v23  ;;  %v2878_v45 = vsub.f32 1.0, %v2877_v60  ;;  %vm2897_vm8 = vweird.f32 %v6797_v55  ;;  %v3220_v49 = vpop.permute.xlu0 %3219 }
 0x533   : > { %v4252_v30 = vmul.f32 -1.442695, %v2776_v46  ;;  %v4253_v17 = vmul.f32 -1.442695, %v2805_v32  ;;  %v4477_v7 = vpop.eup %4476  ;;  %v2900_v21 = vand.u32 2147483647, %v6769_v2  ;;  %vm6847_vm12 = vmor %vm2896_vm13, %vm2897_vm8  ;;  %vm2911_vm1 = vweird.f32 %v6795_v28 }
 0x534   : > { %v2893_v9 = vsub.f32 1.0, %v2892_v27  ;;  %v6815_v0 = vadd.f32 1.0, %v4477_v7  ;;  %v2879_v37 = vmul.f32 %v6793_v61, %v2878_v45  ;;  %v2903_v7 = vor.u32 1.1754944e-38, %v2902_v13  ;;  %v3278_v60 = vpop.f32.mrf.mxu1 }
 0x535   : > { %4478 = vpow2.f32 %v4252_v30  ;;  %vm2901_vm9 = vcmp.eq.f32.partialorder %v2900_v21, 8.507059e+37 }
 0x536   : > { %4480 = vpow2.f32 %v4251_v53  ;;  %v2894_v20 = vmul.f32 %v6797_v55, %v2893_v9  ;;  %v2880_v22 = vadd.f32 %v6793_v61, %v2879_v37  ;;  %v3259_v53 = vpop.f32.mrf.mxu0 }
 0x537   : > { %4482 = vrcp.f32 %v6795_v28  ;;  %v3260_v2 = vadd.f32 %v3259_v53, %v3220_v49 }
 0x538   : > { %4484 = vrcp.f32 %v6800_v39  ;;  %v2777_v54 = vpop.f32.mrf.mxu2  ;;  %v2806_v58 = vpop.f32.mrf.mxu3  ;;  %v2895_v15 = vadd.f32 %v6797_v55, %v2894_v20  ;;  %v2884_v30 = vsel %vm2883_vm7, %v6793_v61, %v2880_v22 }
 0x539   : > { %4486 = vpow2.f32 %v4253_v17  ;;  %v2778_v35 = vadd.f32 %v2777_v54, %v6772_v56  ;;  %v2807_v51 = vadd.f32 %v2806_v58, %v6772_v56  ;;  %v2888_v56 = vor.u32 1.1754944e-38, %v2887_v57  ;;  %v3136_v17 = vpop.permute.xlu2 %3135 }
 0x53a   : > { %4488 = vtanh.f32 %v3294_v1  ;;  %v2899_v1 = vsel %vm6847_vm12, %v6797_v55, %v2895_v15  ;;  %v3195_v48 = vadd.f32 %v6738_v33, %v3136_v17  ;;  %v2915_v58 = vand.u32 2147483647, %v6795_v28 }
 0x53b   : > { %v4479_v6 = vpop.eup %4478  ;;  %v4254_v40 = vmul.f32 -1.442695, %v2778_v35  ;;  %4490 = vtanh.f32 %v3295_v14  ;;  %v4255_v11 = vmul.f32 -1.442695, %v2807_v51  ;;  %v2889_v23 = vsel %vm2886_vm10, %v2888_v56, %v2884_v30 }
 0x53c   : > { %v4481_v63 = vpop.eup %4480  ;;  %v6822_v42 = vadd.f32 1.0, %v4479_v6  ;;  %v3176_v14 = vadd.f32 %v6736_v59, %v3136_v17  ;;  %v3288_v9 = vmul.f32 %v3260_v2, %v2889_v23  ;;  %v2904_v35 = vsel %vm2901_vm9, %v2903_v7, %v2899_v1 }
 0x53d   : > { %v6826_v29 = vpop.eup %4482  ;;  %4492 = vpow2.f32 %v4254_v40  ;;  %v6840_v3 = vadd.f32 1.0, %v4481_v63  ;;  %v3279_v6 = vadd.f32 %v3278_v60, %v3220_v49  ;;  %v2917_v63 = vand.u32 2147483648, %v6795_v28 }
 0x53e   : > { %v6831_v46 = vpop.eup %4484  ;;  %4494 = vrcp.f32 %v6822_v42  ;;  %v2907_v61 = vmul.f32 %v6826_v29, %v6795_v28  ;;  %v3007_v55 = vand.u32 2147483647, %v6822_v42  ;;  %v3009_v45 = vand.u32 2147483648, %v6822_v42 }
 0x53f   : > { %v4487_v25 = vpop.eup %4486  ;;  %4496 = vrcp.f32 %v6815_v0  ;;  %vm3003_vm4 = vweird.f32 %v6822_v42  ;;  %v3289_v22 = vmul.f32 %v3279_v6, %v2904_v35  ;;  %v3296_v53 = vadd.f32 %v3288_v9, %v3176_v14 }
 0x540   : > { %v6851_v50 = vpop.eup %4488  ;;  %v6853_v32 = vadd.f32 1.0, %v4487_v25  ;;  %4498 = vpow2.f32 %v4255_v11  ;;  %v2908_v20 = vsub.f32 1.0, %v2907_v61  ;;  %vm6882_vm6 = vcmp.eq.f32.partialorder %v3007_v55, 8.507059e+37 }
 0x541   : > { %v6860_v27 = vpop.eup %4490  ;;  %v3310_v33 = vsub.f32 %v6657_v52, %v6851_v50  ;;  %v3010_v56 = vor.u32 1.1754944e-38, %v3009_v45  ;;  %v3297_v61 = vadd.f32 %v3289_v22, %v3195_v48  ;;  %vm2912_vm14 = vweird.f32 %v6826_v29 }
 0x542   : > { %4500 = vrcp.f32 %v6853_v32  ;;  %v3311_v51 = vsub.f32 %v6659_v44, %v6860_v27  ;;  %v3022_v25 = vand.u32 2147483647, %v6853_v32  ;;  %v3024_v30 = vand.u32 2147483648, %v6853_v32  ;;  %vm6922_vm12 = vmor %vm2911_vm1, %vm2912_vm14 }
 0x543   : > { %v4493_v54 = vpop.eup %4492  ;;  %4502 = vrcp.f32 %v6840_v3  ;;  %v2909_v11 = vmul.f32 %v6826_v29, %v2908_v20  ;;  %vm3018_vm0 = vweird.f32 %v6853_v32  ;;  %v2922_v17 = vmul.f32 %v6831_v46, %v6800_v39 }
 0x544   : > { %v4495_v57 = vpop.eup %4494  ;;  %v6868_v37 = vadd.f32 1.0, %v4493_v54  ;;  %vm6902_vm15 = vcmp.eq.f32.partialorder %v3022_v25, 8.507059e+37  ;;  %v3025_v48 = vor.u32 1.1754944e-38, %v3024_v30  ;;  %vm2926_vm1 = vweird.f32 %v6800_v39 }
 0x545   : > { %v6870_v59 = vpop.eup %4496  ;;  %v2999_v40 = vmul.f32 %v4495_v57, %v6822_v42  ;;  %vm3004_vm5 = vweird.f32 %v4495_v57  ;;  %v6908_v45 = vadd.f32 %v6826_v29, %v2909_v11  ;;  %v2923_v20 = vsub.f32 1.0, %v2922_v17 }
 0x546   : > { %4504 = vrcp.f32 %v6868_v37  ;;  %v4499_v15 = vpop.eup %4498  ;;  %v3037_v60 = vand.u32 2147483647, %v6868_v37  ;;  %vm3005_vm13 = vmor %vm3003_vm4, %vm3004_vm5  ;;  %v3039_v55 = vand.u32 2147483648, %v6868_v37  ;;  %vm3033_vm7 = vweird.f32 %v6868_v37 }
 0x547   : > { %v3000_v13 = vsub.f32 1.0, %v2999_v40  ;;  %v6888_v4 = vadd.f32 1.0, %v4499_v15  ;;  %vm6946_vm5 = vcmp.eq.f32.partialorder %v2915_v58, 8.507059e+37 }
 0x548   : > { %v4501_v21 = vpop.eup %4500  ;;  %vm6914_vm10 = vcmp.eq.f32.partialorder %v3037_v60, 8.507059e+37 }
 0x549   : > { %v3001_v49 = vmul.f32 %v4495_v57, %v3000_v13  ;;  %v3014_v23 = vmul.f32 %v4501_v21, %v6853_v32  ;;  %v6893_v1 = vpop.eup %4502  ;;  %4506 = vrcp.f32 %v6888_v4  ;;  %vm3019_vm8 = vweird.f32 %v4501_v21 }
 0x54a   : > { %4508 = vtanh.f32 %v3296_v53  ;;  %vm3020_vm9 = vmor %vm3018_vm0, %vm3019_vm8  ;;  %v2780_v53 = vpop.f32.mrf.mxu2  ;;  %vm3048_vm0 = vweird.f32 %v6888_v4  ;;  %v3052_v17 = vand.u32 2147483647, %v6888_v4 }
 0x54b   : > { %v3002_v2 = vadd.f32 %v4495_v57, %v3001_v49  ;;  %v3015_v7 = vsub.f32 1.0, %v3014_v23  ;;  %4510 = vtanh.f32 %v3297_v61 }
 0x54c   : > { %v4505_v14 = vpop.eup %4504  ;;  %vm3053_vm8 = vcmp.eq.f32.partialorder %v3052_v17, 8.507059e+37 }
 0x54d   : > { %v3006_v9 = vsel %vm3005_vm13, %v4495_v57, %v3002_v2  ;;  %v3016_v35 = vmul.f32 %v4501_v21, %v3015_v7  ;;  %v3029_v6 = vmul.f32 %v4505_v14, %v6868_v37  ;;  %vm3034_vm4 = vweird.f32 %v4505_v14 }
 0x54e   : > { %v3011_v42 = vsel %vm6882_vm6, %v3010_v56, %v3006_v9  ;;  %v2914_v56 = vsel %vm6922_vm12, %v6826_v29, %v6908_v45  ;;  %vm2927_vm6 = vweird.f32 %v6831_v46  ;;  %v2809_v29 = vpop.f32.mrf.mxu3  ;;  %v2781_v7 = vadd.f32 %v2780_v53, %v6755_v8  ;;  %vm3035_vm14 = vmor %vm3033_vm7, %vm3034_vm4 }
 0x54f   : > { %v3318_v40 = vmul.f32 %v3310_v33, %v3011_v42  ;;  %v3017_v22 = vadd.f32 %v4501_v21, %v3016_v35  ;;  %v3030_v15 = vsub.f32 1.0, %v3029_v6  ;;  %v4507_v52 = vpop.eup %4506  ;;  %v3040_v33 = vor.u32 1.1754944e-38, %v3039_v55  ;;  %vm6996_vm7 = vmor %vm2926_vm1, %vm2927_vm6 }
 0x550   : > { %v4509_v25 = vpop.eup %4508  ;;  %v3044_v49 = vmul.f32 %v4507_v52, %v6888_v4  ;;  %v2810_v44 = vadd.f32 %v2809_v29, %v6755_v8  ;;  %vm3049_vm13 = vweird.f32 %v4507_v52  ;;  %v4256_v35 = vmul.f32 -1.442695, %v2781_v7 }
 0x551   : > { %v6941_v30 = vadd.f32 %v6851_v50, %v3318_v40  ;;  %v3021_v11 = vsel %vm3020_vm9, %v4501_v21, %v3017_v22  ;;  %v3031_v32 = vmul.f32 %v4505_v14, %v3030_v15  ;;  %v2924_v50 = vmul.f32 %v6831_v46, %v2923_v20  ;;  %v4511_v60 = vpop.eup %4510 }
 0x552   : > { %v3026_v61 = vsel %vm6902_vm15, %v3025_v48, %v3021_v11  ;;  %v3045_v2 = vsub.f32 1.0, %v3044_v49  ;;  %v3312_v54 = vsub.f32 %v6663_v26, %v4509_v25  ;;  %v3054_v48 = vand.u32 2147483648, %v6888_v4  ;;  %vm3050_vm15 = vmor %vm3048_vm0, %vm3049_vm13 }
 0x553   : > { %3737 = vst [vmem:[%s6930_s21] sm:$0xff] %v6941_v30  ;;  %v3319_v21 = vmul.f32 %v3311_v51, %v3026_v61  ;;  %v3032_v58 = vadd.f32 %v4505_v14, %v3031_v32  ;;  %3478 = vrot.lane.b32.xlu0 %v6941_v30, %s8065_s17  ;;  %v2937_v51 = vmul.f32 %v6870_v59, %v6815_v0  ;;  %v4257_v6 = vmul.f32 -1.442695, %v2810_v44  ;;  %v2782_v32 = vpop.f32.mrf.mxu2 }
 0x554   : > { %3406 = vrot.lane.b32.xlu2 %v6941_v30, %s8066_s3  ;;  %v3046_v9 = vmul.f32 %v4507_v52, %v3045_v2  ;;  %v2925_v37 = vadd.f32 %v6831_v46, %v2924_v50  ;;  %v2932_v20 = vand.u32 2147483648, %v6800_v39  ;;  %v2930_v22 = vand.u32 2147483647, %v6800_v39 }
 0x555   : > { %v6974_v55 = vadd.f32 %v6860_v27, %v3319_v21  ;;  %v3036_v45 = vsel %vm3035_vm14, %v4505_v14, %v3032_v58  ;;  %v2938_v40 = vsub.f32 1.0, %v2937_v51  ;;  %v3055_v27 = vor.u32 1.1754944e-38, %v3054_v48 }
 0x556   : > { %v3041_v26 = vsel %vm6914_vm10, %v3040_v33, %v3036_v45  ;;  %v3047_v42 = vadd.f32 %v4507_v52, %v3046_v9  ;;  %v2918_v14 = vor.u32 1.1754944e-38, %v2917_v63  ;;  %4512 = vpow2.f32 %v4256_v35  ;;  %v3262_v33 = vpop.f32.mrf.mxu0 }
 0x557   : > { %3738 = vst [vmem:[%s6930_s21 + $0x8] sm:$0xff] %v6974_v55  ;;  %v3320_v8 = vmul.f32 %v3312_v54, %v3041_v26  ;;  %3414 = vrot.lane.b32.xlu1 %v6974_v55, %s8066_s3  ;;  %v3313_v15 = vsub.f32 %v6665_v43, %v4511_v60  ;;  %v2929_v43 = vsel %vm6996_vm7, %v6831_v46, %v2925_v37  ;;  %4514 = vpow2.f32 %v4257_v6  ;;  %v2811_v46 = vpop.f32.mrf.mxu3 }
 0x558   : > { %v3051_v57 = vsel %vm3050_vm15, %v4507_v52, %v3047_v42  ;;  %v2919_v4 = vsel %vm6946_vm5, %v2918_v14, %v2914_v56  ;;  %v2933_v53 = vor.u32 1.1754944e-38, %v2932_v20  ;;  %v2939_v39 = vmul.f32 %v6870_v59, %v2938_v40 }
 0x559   : > { %v6990_v13 = vadd.f32 %v4509_v25, %v3320_v8  ;;  %v3056_v63 = vsel %vm3053_vm8, %v3055_v27, %v3051_v57  ;;  %v3281_v25 = vpop.f32.mrf.mxu1  ;;  %v2952_v11 = vmul.f32 %v6893_v1, %v6840_v3  ;;  %v3263_v56 = vadd.f32 %v3262_v33, %v6752_v24 }
 0x55a   : > { %v3321_v52 = vmul.f32 %v3313_v15, %v3056_v63  ;;  %vm2931_vm10 = vcmp.eq.f32.partialorder %v2930_v22, 8.507059e+37  ;;  %v3282_v50 = vadd.f32 %v3281_v25, %v6752_v24  ;;  %vm2942_vm12 = vweird.f32 %v6870_v59 }
 0x55b   : > { %3739 = vst [vmem:[%s6930_s21 + $0x10] sm:$0xff] %v6990_v13  ;;  %3382 = vrot.lane.b32.xlu0 %v6941_v30, %s8069_s2  ;;  %v2934_v23 = vsel %vm2931_vm10, %v2933_v53, %v2929_v43  ;;  %v2953_v29 = vsub.f32 1.0, %v2952_v11  ;;  %v3290_v17 = vmul.f32 %v3263_v56, %v2919_v4  ;;  %v2783_v21 = vadd.f32 %v2782_v32, %v6740_v12 }
 0x55c   : > { %3486 = vrot.lane.b32.xlu2 %v6974_v55, %s8065_s17  ;;  %v7015_v49 = vadd.f32 %v4511_v60, %v3321_v52  ;;  %v4513_v61 = vpop.eup %4512  ;;  %v2940_v2 = vadd.f32 %v6870_v59, %v2939_v39  ;;  %v2812_v60 = vadd.f32 %v2811_v46, %v6740_v12  ;;  %v3179_v48 = vadd.f32 %v6746_v19, %v6803_v18 }
 0x55d   : > { %v7022_v58 = vadd.f32 1.0, %v4513_v61  ;;  %v2954_v7 = vmul.f32 %v6893_v1, %v2953_v29  ;;  %v4515_v54 = vpop.eup %4514  ;;  %v3291_v44 = vmul.f32 %v3282_v50, %v2934_v23  ;;  %v2947_v24 = vand.u32 2147483648, %v6815_v0 }
 0x55e   : > { %8070 = vst [vmem:[#allocation7_spill] sm:$0xff] %v7015_v49  ;;  %v4258_v51 = vmul.f32 -1.442695, %v2783_v21  ;;  %vm2941_vm9 = vweird.f32 %v6815_v0  ;;  %v2945_v45 = vand.u32 2147483647, %v6815_v0  ;;  %v3198_v12 = vadd.f32 %v6748_v31, %v6803_v18  ;;  %v3264_v0 = vpop.f32.mrf.mxu0 }
 0x55f   : > { %3740 = vst [vmem:[%s6930_s21 + $0x18] sm:$0xff] %v7015_v49  ;;  %3454 = vrot.lane.b32.xlu1 %v6941_v30, %s8071_s28  ;;  %4516 = vrcp.f32 %v7022_v58  ;;  %v3298_v9 = vadd.f32 %v3290_v17, %v3179_v48  ;;  %v7037_v26 = vadd.f32 1.0, %v4515_v54  ;;  %vm7041_vm4 = vmor %vm2941_vm9, %vm2942_vm12  ;;  %v4259_v37 = vmul.f32 -1.442695, %v2812_v60 }
 0x560   : > { %v2944_v35 = vsel %vm7041_vm4, %v6870_v59, %v2940_v2  ;;  %v2955_v6 = vadd.f32 %v6893_v1, %v2954_v7  ;;  %vm2957_vm1 = vweird.f32 %v6893_v1  ;;  %4518 = vpow2.f32 %v4258_v51 }
 0x561   : > { %v3299_v31 = vadd.f32 %v3291_v44, %v3198_v12  ;;  %4520 = vrcp.f32 %v7037_v26  ;;  %v2948_v18 = vor.u32 1.1754944e-38, %v2947_v24  ;;  %v2962_v8 = vand.u32 2147483648, %v6840_v3  ;;  %v3283_v57 = vpop.f32.mrf.mxu1 }
 0x562   : > { %vm2946_vm6 = vcmp.eq.f32.partialorder %v2945_v45, 8.507059e+37  ;;  %vm2956_vm5 = vweird.f32 %v6840_v3  ;;  %v2960_v59 = vand.u32 2147483647, %v6840_v3  ;;  %4522 = vpow2.f32 %v4259_v37 }
 0x563   : > { %3462 = vrot.lane.b32.xlu0 %v6974_v55, %s8071_s28  ;;  %v2949_v42 = vsel %vm2946_vm6, %v2948_v18, %v2944_v35  ;;  %vm7058_vm0 = vmor %vm2956_vm5, %vm2957_vm1  ;;  %4524 = vtanh.f32 %v3298_v9  ;;  %v3265_v27 = vadd.f32 %v3264_v0, %v6759_v41  ;;  %v2963_v15 = vor.u32 1.1754944e-38, %v2962_v8 }
 0x564   : > { %3390 = vrot.lane.b32.xlu2 %v6974_v55, %s8069_s2  ;;  %v2959_v14 = vsel %vm7058_vm0, %v6893_v1, %v2955_v6  ;;  %4526 = vtanh.f32 %v3299_v31  ;;  %vm2961_vm14 = vcmp.eq.f32.partialorder %v2960_v59, 8.507059e+37  ;;  %v3069_v4 = vand.u32 2147483648, %v7022_v58 }
 0x565   : > { %v4517_v40 = vpop.eup %4516  ;;  %v3292_v33 = vmul.f32 %v3265_v27, %v2949_v42  ;;  %v2964_v43 = vsel %vm2961_vm14, %v2963_v15, %v2959_v14  ;;  %v3181_v1 = vadd.f32 %v6757_v47, %v6764_v34  ;;  %v3200_v25 = vadd.f32 %v6761_v62, %v6764_v34 }
 0x566   : > { %v3059_v22 = vmul.f32 %v4517_v40, %v7022_v58  ;;  %v4519_v3 = vpop.eup %4518  ;;  %v3284_v11 = vadd.f32 %v3283_v57, %v6759_v41  ;;  %vm3064_vm13 = vweird.f32 %v4517_v40  ;;  %v3067_v56 = vand.u32 2147483647, %v7022_v58 }
 0x567   : > { %3358 = vrot.lane.b32.xlu1 %v6941_v30, %s8076_s22  ;;  %v4521_v28 = vpop.eup %4520  ;;  %v7070_v52 = vadd.f32 1.0, %v4519_v3  ;;  %v3300_v23 = vadd.f32 %v3292_v33, %v3181_v1  ;;  %vm3063_vm15 = vweird.f32 %v7022_v58  ;;  %v3070_v41 = vor.u32 1.1754944e-38, %v3069_v4 }
 0x568   : > { %v3060_v63 = vsub.f32 1.0, %v3059_v22  ;;  %v4523_v53 = vpop.eup %4522  ;;  %v3074_v39 = vmul.f32 %v4521_v28, %v7037_v26  ;;  %v3293_v62 = vmul.f32 %v3284_v11, %v2964_v43  ;;  %v3084_v61 = vand.u32 2147483648, %v7037_v26  ;;  %vm3065_vm8 = vmor %vm3063_vm15, %vm3064_vm13 }
 0x569   : > { %4528 = vrcp.f32 %v7070_v52  ;;  %v4525_v47 = vpop.eup %4524  ;;  %v7084_v34 = vadd.f32 1.0, %v4523_v53  ;;  %vm3079_vm7 = vweird.f32 %v4521_v28  ;;  %v3082_v21 = vand.u32 2147483647, %v7037_v26 }
 0x56a   : > { %v3061_v32 = vmul.f32 %v4517_v40, %v3060_v63  ;;  %v3075_v46 = vsub.f32 1.0, %v3074_v39  ;;  %v4527_v17 = vpop.eup %4526  ;;  %v3314_v2 = vsub.f32 %v6647_v10, %v4525_v47  ;;  %vm3068_vm10 = vcmp.eq.f32.partialorder %v3067_v56, 8.507059e+37 }
 0x56b   : > { %3366 = vrot.lane.b32.xlu0 %v6974_v55, %s8076_s22  ;;  %4530 = vrcp.f32 %v7084_v34  ;;  %vm3078_vm12 = vweird.f32 %v7037_v26  ;;  %v3301_v54 = vadd.f32 %v3293_v62, %v3200_v25  ;;  %v3085_v24 = vor.u32 1.1754944e-38, %v3084_v61 }
 0x56c   : > { %3430 = vrot.lane.b32.xlu2 %v6941_v30, %s8077_s0  ;;  %v3062_v29 = vadd.f32 %v4517_v40, %v3061_v32  ;;  %v3076_v50 = vmul.f32 %v4521_v28, %v3075_v46  ;;  %vm3080_vm9 = vmor %vm3078_vm12, %vm3079_vm7  ;;  %4532 = vtanh.f32 %v3300_v23  ;;  %v3315_v51 = vsub.f32 %v6649_v38, %v4527_v17 }
 0x56d   : > { %vm3083_vm4 = vcmp.eq.f32.partialorder %v3082_v21, 8.507059e+37  ;;  %4534 = vtanh.f32 %v3301_v54  ;;  %v3099_v38 = vand.u32 2147483648, %v7070_v52  ;;  %v3097_v18 = vand.u32 2147483647, %v7070_v52 }
 0x56e   : > { %v3066_v7 = vsel %vm3065_vm8, %v4517_v40, %v3062_v29  ;;  %v3077_v58 = vadd.f32 %v4521_v28, %v3076_v50  ;;  %vm3093_vm6 = vweird.f32 %v7070_v52  ;;  %v3114_v42 = vand.u32 2147483648, %v7084_v34 }
 0x56f   : > { %3438 = vrot.lane.b32.xlu1 %v6974_v55, %s8077_s0  ;;  %v3071_v60 = vsel %vm3068_vm10, %v3070_v41, %v3066_v7  ;;  %v4529_v48 = vpop.eup %4528  ;;  %v3100_v20 = vor.u32 1.1754944e-38, %v3099_v38  ;;  %v3112_v27 = vand.u32 2147483647, %v7084_v34  ;;  %vm3098_vm14 = vcmp.eq.f32.partialorder %v3097_v18, 8.507059e+37  ;;  %v4537_v38 = vld [vmem:[%s7837_s8 + $0xd0] sm:$0xff] }
 0x570   : > { %v3322_v44 = vmul.f32 %v3314_v2, %v3071_v60  ;;  %v3081_v45 = vsel %vm3080_vm9, %v4521_v28, %v3077_v58  ;;  %v3089_v10 = vmul.f32 %v4529_v48, %v7070_v52  ;;  %vm3094_vm1 = vweird.f32 %v4529_v48 }
 0x571   : > { %v3086_v9 = vsel %vm3083_vm4, %v3085_v24, %v3081_v45  ;;  %v4531_v26 = vpop.eup %4530  ;;  %vm3095_vm5 = vmor %vm3093_vm6, %vm3094_vm1  ;;  %vm3108_vm13 = vweird.f32 %v7084_v34  ;;  %v3115_v28 = vor.u32 1.1754944e-38, %v3114_v42  ;;  %vm3113_vm8 = vcmp.eq.f32.partialorder %v3112_v27, 8.507059e+37 }
 0x572   : > { %v7098_v12 = vadd.f32 %v4525_v47, %v3322_v44  ;;  %v3323_v19 = vmul.f32 %v3315_v51, %v3086_v9  ;;  %v3090_v37 = vsub.f32 1.0, %v3089_v10  ;;  %v3104_v35 = vmul.f32 %v4531_v26, %v7084_v34  ;;  %v4533_v0 = vpop.eup %4532 }
 0x573   : > { %3408 = vrot.lane.b32.xlu0 %v6990_v13, %s8066_s3  ;;  %vm3109_vm0 = vweird.f32 %v4531_v26  ;;  %v4535_v14 = vpop.eup %4534  ;;  %v3316_v22 = vsub.f32 %v6651_v5, %v4533_v0  ;;  %vm8078_vm7 = vcmp.lt.s32.totalorder %v7975_v16, 112  ;;  %vm8080_vm12 = vcmp.lt.s32.totalorder %v7975_v16, 16 }
 0x574   : > { %3416 = vrot.lane.b32.xlu2 %v7015_v49, %s8066_s3  ;;  %3741 = vst [vmem:[%s6930_s21 + $0x20] sm:$0xff] %v7098_v12  ;;  %v7106_v6 = vadd.f32 %v4527_v17, %v3323_v19  ;;  %v3091_v31 = vmul.f32 %v4529_v48, %v3090_v37  ;;  %v3105_v8 = vsub.f32 1.0, %v3104_v35  ;;  %vm3110_vm15 = vmor %vm3108_vm13, %vm3109_vm0  ;;  %v3317_v63 = vsub.f32 %v6653_v36, %v4535_v14 }
 0x575   : > { %vm8079_vm10 = vmmov %vm8078_vm7  ;;  %vm8082_vm4 = vcmp.lt.s32.totalorder %v7975_v16, 127 }
 0x576   : > { %3742 = vst [vmem:[%s6930_s21 + $0x28] sm:$0xff] %v7106_v6  ;;  %v3092_v59 = vadd.f32 %v4529_v48, %v3091_v31  ;;  %v3106_v40 = vmul.f32 %v4531_v26, %v3105_v8  ;;  %vm8081_vm9 = vmmov %vm8080_vm12  ;;  %v4538_v31 = vld [vmem:[%s7837_s8 + $0xd8] sm:$0xff] }
 0x577   : > { %3334 = vrot.lane.b32.xlu1 %v6941_v30, %s7974_s4  ;;  %vm8083_vm1 = vmmov %vm8082_vm4 }
 0x578   : > { %v3096_v15 = vsel %vm3095_vm5, %v4529_v48, %v3092_v59  ;;  %v3107_v3 = vadd.f32 %v4531_v26, %v3106_v40  ;;  %v4540_v59 = vld [vmem:[%s7837_s8 + $0xc8] sm:$0xff]  ;;  %vm8084_vm6 = vmmov %vm8078_vm7 }
 0x579   : > { %v3101_v57 = vsel %vm3098_vm14, %v3100_v20, %v3096_v15  ;;  %vm8085_vm5 = vmmov %vm8084_vm6  ;;  %v4564_v15 = vld [vmem:[%s7837_s8 + $0xf8] sm:$0xff] }
 0x57a   : > { %v3324_v33 = vmul.f32 %v3316_v22, %v3101_v57  ;;  %v3111_v5 = vsel %vm3110_vm15, %v4531_v26, %v3107_v3  ;;  %v4541_v3 = vld [vmem:[%s7837_s8 + $0x1d0] sm:$0xff]  ;;  %vm8086_vm0 = vmmov %vm8083_vm1 }
 0x57b   : > { %3488 = vrot.lane.b32.xlu0 %v7015_v49, %s8065_s17  ;;  %v3116_v43 = vsel %vm3113_vm8, %v3115_v28, %v3111_v5  ;;  %v4542_v28 = vld [vmem:[%s7837_s8 + $0x1d8] sm:$0xff]  ;;  %vm8087_vm14 = vmmov %vm8086_vm0 }
 0x57c   : > { %3456 = vrot.lane.b32.xlu2 %v6990_v13, %s8071_s28  ;;  %v7123_v4 = vadd.f32 %v4533_v0, %v3324_v33  ;;  %v3325_v52 = vmul.f32 %v3317_v63, %v3116_v43  ;;  %v4539_v0 = vld [vmem:[%s7837_s8 + $0xc0] sm:$0xff]  ;;  %v4544_v43 = vld [vmem:[%s7837_s8 + $0x1c8] sm:$0xff]  ;;  %vm8088_vm13 = vmmov %vm8081_vm9 }
 0x57d   : > { %vm8089_vm15 = vmmov %vm8081_vm9 }
 0x57e   : > { %3743 = vst [vmem:[%s6930_s21 + $0x30] sm:$0xff] %v7123_v4  ;;  %v7129_v53 = vadd.f32 %v4535_v14, %v3325_v52  ;;  %vm8090_vm8 = vmmov %vm8085_vm5 }
 0x57f   : > { %3480 = vrot.lane.b32.xlu1 %v6990_v13, %s8065_s17 }
 0x580   : > { %3744 = vst [vmem:[%s6930_s21 + $0x38] sm:$0xff] %v7129_v53 }
 0x583   : > { %3392 = vrot.lane.b32.xlu0 %v7015_v49, %s8069_s2 }
 0x584   : > { %3360 = vrot.lane.b32.xlu2 %v6990_v13, %s8076_s22 }
 0x587   : > { %3384 = vrot.lane.b32.xlu1 %v6990_v13, %s8069_s2 }
 0x58b   : > { %3432 = vrot.lane.b32.xlu0 %v6990_v13, %s8077_s0 }
 0x58c   : > { %3440 = vrot.lane.b32.xlu2 %v7015_v49, %s8077_s0 }
 0x58f   : > { %3464 = vrot.lane.b32.xlu1 %v7015_v49, %s8071_s28 }
 0x593   : > { %3410 = vrot.lane.b32.xlu0 %v7098_v12, %s8066_s3 }
 0x594   : > { %3418 = vrot.lane.b32.xlu2 %v7106_v6, %s8066_s3 }
 0x597   : > { %3368 = vrot.lane.b32.xlu1 %v7015_v49, %s8076_s22 }
 0x59b   : > { %3490 = vrot.lane.b32.xlu0 %v7106_v6, %s8065_s17 }
 0x59c   : > { %3458 = vrot.lane.b32.xlu2 %v7098_v12, %s8071_s28 }
 0x59f   : > { %3482 = vrot.lane.b32.xlu1 %v7098_v12, %s8065_s17 }
 0x5a3   : > { %3394 = vrot.lane.b32.xlu0 %v7106_v6, %s8069_s2 }
 0x5a4   : > { %3362 = vrot.lane.b32.xlu2 %v7098_v12, %s8076_s22 }
 0x5a7   : > { %3386 = vrot.lane.b32.xlu1 %v7098_v12, %s8069_s2 }
 0x5ab   : > { %3434 = vrot.lane.b32.xlu0 %v7098_v12, %s8077_s0 }
 0x5ac   : > { %3442 = vrot.lane.b32.xlu2 %v7106_v6, %s8077_s0 }
 0x5ae   : > { %v3407_v36 = vpop.permute.xlu2 %3406 }
 0x5af   : > { %3466 = vrot.lane.b32.xlu1 %v7106_v6, %s8071_s28 }
 0x5b3   : > { %3338 = vrot.lane.b32.xlu0 %v7098_v12, %s7974_s4 }
 0x5b4   : > { %3346 = vrot.lane.b32.xlu2 %v7106_v6, %s7974_s4 }
 0x5b6   : > { %v3487_v1 = vpop.permute.xlu2 %3486 }
 0x5b7   : > { %3370 = vrot.lane.b32.xlu1 %v7106_v6, %s8076_s22 }
 0x5bb   : > { %3420 = vrot.lane.b32.xlu0 %v7129_v53, %s8066_s3 }
 0x5bc   : > { %3484 = vrot.lane.b32.xlu2 %v7123_v4, %s8065_s17 }
 0x5be   : > { %v3391_v25 = vpop.permute.xlu2 %3390 }
 0x5bf   : > { %3412 = vrot.lane.b32.xlu1 %v7123_v4, %s8066_s3 }
 0x5c3   : > { %3460 = vrot.lane.b32.xlu0 %v7123_v4, %s8071_s28 }
 0x5c4   : > { %3388 = vrot.lane.b32.xlu2 %v7123_v4, %s8069_s2 }
 0x5c5   : > { %v3479_v39 = vpop.permute.xlu0 %3478 }
 0x5c6   : > { %v3431_v11 = vpop.permute.xlu2 %3430  ;;  %v7187_v32 = vsel %vm8078_vm7, %v3479_v39, %v3487_v1  ;;  %v7191_v56 = vsel %vm8079_vm10, %v3487_v1, %v3479_v39  ;;  %vm8091_vm7 = vmmov %vm8086_vm0 }
 0x5c7   : > { %3492 = vrot.lane.b32.xlu1 %v7129_v53, %s8065_s17  ;;  %v7327_v52 = vmul.f32 %v4544_v43, %v7191_v56  ;;  %v4555_v43 = vld [vmem:[%s7837_s8 + $0x188] sm:$0xff] }
 0x5c9   : > { %v3415_v47 = vpop.permute.xlu1 %3414 }
 0x5ca   : > { %v3422_v46 = vsel %vm978_vm3, %v3407_v36, %v3415_v47  ;;  %v3426_v23 = vsel %vm978_vm3, %v3415_v47, %v3407_v36 }
 0x5cb   : > { %3364 = vrot.lane.b32.xlu0 %v7123_v4, %s8076_s22  ;;  %v7284_v8 = vmul.f32 %v4539_v0, %v3426_v23  ;;  %v7289_v42 = vmul.f32 %v4540_v59, %v3422_v46  ;;  %v4545_v23 = vld [vmem:[%s7837_s8 + $0x90] sm:$0xff]  ;;  %v4551_v59 = vld [vmem:[%s7837_s8 + $0x198] sm:$0xff] }
 0x5cc   : > { %3468 = vrot.lane.b32.xlu2 %v7129_v53, %s8071_s28  ;;  %v4550_v0 = vld [vmem:[%s7837_s8 + $0x150] sm:$0xff] }
 0x5cd   : > { %v3383_v62 = vpop.permute.xlu0 %3382 }
 0x5ce   : > { %v3417_v34 = vpop.permute.xlu2 %3416  ;;  %v7205_v29 = vsel %vm957_vm2, %v3383_v62, %v3391_v25  ;;  %v7209_v41 = vsel %vm957_vm2, %v3391_v25, %v3383_v62 }
 0x5cf   : > { %3396 = vrot.lane.b32.xlu1 %v7129_v53, %s8069_s2 }
 0x5d1   : > { %v3455_v61 = vpop.permute.xlu1 %3454 }
 0x5d3   : > { %3342 = vrot.lane.b32.xlu0 %v6974_v55, %s7974_s4 }
 0x5d4   : > { %3372 = vrot.lane.b32.xlu2 %v7129_v53, %s8076_s22 }
 0x5d5   : > { %v3463_v17 = vpop.permute.xlu0 %3462 }
 0x5d6   : > { %v7217_v50 = vpop.permute.xlu2 %3456  ;;  %v7221_v21 = vsel %vm1006_vm11, %v3455_v61, %v3463_v17  ;;  %v7225_v2 = vsel %vm1006_vm11, %v3463_v17, %v3455_v61  ;;  %v4547_v17 = vld [vmem:[%s7837_s8 + $0x80] sm:$0xff] }
 0x5d7   : > { %3436 = vrot.lane.b32.xlu1 %v7123_v4, %s8077_s0 }
 0x5d9   : > { %v3359_v7 = vpop.permute.xlu1 %3358 }
 0x5db   : > { %3444 = vrot.lane.b32.xlu0 %v7129_v53, %s8077_s0  ;;  %s8136_s0 = sld [smem:[#allocation17_spill]] }
 0x5dc   : > { %3336 = vrot.lane.b32.xlu2 %v6990_v13, %s7974_s4 }
 0x5dd   : > { %v3367_v60 = vpop.permute.xlu0 %3366 }
 0x5de   : > { %v7235_v58 = vsel %vm8080_vm12, %v3359_v7, %v3367_v60  ;;  %v7239_v54 = vsel %vm8081_vm9, %v3367_v60, %v3359_v7  ;;  %v7241_v48 = vpop.permute.xlu2 %3360  ;;  %v7359_v7 = vmul.f32 %v4547_v17, %v7209_v41  ;;  %v4548_v60 = vld [vmem:[%s7837_s8 + $0x88] sm:$0xff] }
 0x5df   : > { %3340 = vrot.lane.b32.xlu1 %v7123_v4, %s7974_s4  ;;  %v4562_v41 = vld [vmem:[%s7837_s8 + $0xe8] sm:$0xff] }
 0x5e1   : > { %v3439_v44 = vpop.permute.xlu1 %3438 }
 0x5e2   : > { %v7247_v24 = vsel %vm8082_vm4, %v3431_v11, %v3439_v44  ;;  %v7251_v51 = vsel %vm8083_vm1, %v3439_v44, %v3431_v11  ;;  %v7365_v44 = vmul.f32 %v4548_v60, %v7205_v29  ;;  %v4549_v29 = vld [vmem:[%s7837_s8 + $0x190] sm:$0xff]  ;;  %vm8101_vm1 = vmmov %vm8086_vm0 }
 0x5e3   : > { %3348 = vrot.lane.b32.xlu0 %v7129_v53, %s7974_s4 }
 0x5e4   : > { %3506 = vrot.lane.b32.xlu2 %v7098_v12, %s7980_s20 }
 0x5e5   : > { %v3409_v45 = vpop.permute.xlu0 %3408 }
 0x5e6   : > { %v3423_v10 = vsel %vm978_vm3, %v3409_v45, %v3417_v34  ;;  %v3427_v9 = vsel %vm978_vm3, %v3417_v34, %v3409_v45  ;;  %v3441_v26 = vpop.permute.xlu2 %3440  ;;  %v4546_v34 = vld [vmem:[%s7837_s8 + $0x98] sm:$0xff] }
 0x5e7   : > { %3344 = vrot.lane.b32.xlu1 %v7015_v49, %s7974_s4  ;;  %v7272_v35 = vmul.f32 %v4537_v38, %v3427_v9  ;;  %v7277_v18 = vmul.f32 %v4538_v31, %v3423_v10 }
 0x5e9   : > { %v7263_v19 = vpop.permute.xlu1 %3334 }
 0x5eb   : > { %3502 = vrot.lane.b32.xlu0 %v6941_v30, %s7980_s20 }
 0x5ec   : > { %3516 = vrot.lane.b32.xlu2 %v7129_v53, %s7980_s20 }
 0x5ed   : > { %v3489_v37 = vpop.permute.xlu0 %3488 }
 0x5ee   : > { %v7291_v40 = vpop.permute.xlu2 %3418 }
 0x5ef   : > { %3514 = vrot.lane.b32.xlu1 %v7106_v6, %s7980_s20 }
 0x5f1   : > { %v3481_v20 = vpop.permute.xlu1 %3480 }
 0x5f2   : > { %v3495_v27 = vsel %vm8084_vm6, %v3481_v20, %v3489_v37  ;;  %v3499_v14 = vsel %vm8085_vm5, %v3489_v37, %v3481_v20  ;;  %vm8105_vm6 = vmmov %vm8086_vm0 }
 0x5f3   : > { %3508 = vrot.lane.b32.xlu0 %v7123_v4, %s7980_s20  ;;  %v7308_v33 = vmul.f32 %v4541_v3, %v3495_v27  ;;  %v7313_v63 = vmul.f32 %v4542_v28, %v3499_v14  ;;  %v4552_v27 = vld [vmem:[%s7837_s8 + $0x158] sm:$0xff]  ;;  %v4554_v28 = vld [vmem:[%s7837_s8 + $0x140] sm:$0xff] }
 0x5f4   : > { %3510 = vrot.lane.b32.xlu2 %v6974_v55, %s7980_s20  ;;  %v4543_v55 = vld [vmem:[%s7837_s8 + $0x1c0] sm:$0xff] }
 0x5f5   : > { %v3393_v57 = vpop.permute.xlu0 %3392  ;;  %v7321_v5 = vmul.f32 %v4543_v55, %v7187_v32  ;;  %v7409_v55 = vmul.f32 %v4554_v28, %v7247_v24 }
 0x5f6   : > { %v7339_v32 = vpop.permute.xlu2 %3458 }
 0x5f7   : > { %3504 = vrot.lane.b32.xlu1 %v6990_v13, %s7980_s20 }
 0x5f9   : > { %v3385_v36 = vpop.permute.xlu1 %3384 }
 0x5fa   : > { %v3399_v1 = vsel %vm957_vm2, %v3385_v36, %v3393_v57  ;;  %v3403_v25 = vsel %vm957_vm2, %v3393_v57, %v3385_v36  ;;  %v4553_v57 = vld [vmem:[%s7837_s8 + $0x180] sm:$0xff]  ;;  %v7415_v36 = vmul.f32 %v4555_v43, %v7225_v2 }
 0x5fb   : > { %3512 = vrot.lane.b32.xlu0 %v7015_v49, %s7980_s20  ;;  %v7348_v62 = vmul.f32 %v4545_v23, %v3403_v25  ;;  %v7353_v61 = vmul.f32 %v4546_v34, %v3399_v1  ;;  %v7403_v3 = vmul.f32 %v4553_v57, %v7221_v21  ;;  %v4556_v1 = vld [vmem:[%s7837_s8 + $0x148] sm:$0xff]  ;;  %v4557_v34 = vld [vmem:[%s7837_s8 + $0x50] sm:$0xff] }
 0x5fc   : > { %v7421_v21 = vmul.f32 %v4556_v1, %v7251_v51 }
 0x5fd   : > { %v3433_v56 = vpop.permute.xlu0 %3432 }
 0x5fe   : > { %v3447_v47 = vsel %vm8086_vm0, %v3433_v56, %v3441_v26  ;;  %v3451_v46 = vsel %vm8087_vm14, %v3441_v26, %v3433_v56  ;;  %v7377_v38 = vpop.permute.xlu2 %3362  ;;  %v4561_v26 = vld [vmem:[%s7837_s8 + $0xe0] sm:$0xff] }
 0x5ff   : > { %v7397_v14 = vmul.f32 %v4552_v27, %v3451_v46 }
 0x601   : > { %v3465_v45 = vpop.permute.xlu1 %3464 }
 0x602   : > { %v3471_v10 = vsel %vm1006_vm11, %v7217_v50, %v3465_v45  ;;  %v3475_v9 = vsel %vm1006_vm11, %v3465_v45, %v7217_v50  ;;  %v7387_v50 = vmul.f32 %v4550_v0, %v3447_v47  ;;  %v4559_v45 = vld [vmem:[%s7837_s8 + $0x40] sm:$0xff] }
 0x603   : > { %v7382_v31 = vmul.f32 %v4549_v29, %v3471_v10  ;;  %v7392_v20 = vmul.f32 %v4551_v59, %v3475_v9  ;;  %v7451_v10 = vmul.f32 %v4559_v45, %v7239_v54  ;;  %v4560_v9 = vld [vmem:[%s7837_s8 + $0x48] sm:$0xff] }
 0x604   : > { %v7457_v29 = vmul.f32 %v4560_v9, %v7235_v58 }
 0x605   : > { %v3411_v37 = vpop.permute.xlu0 %3410 }
 0x606   : > { %v7459_v0 = vpop.permute.xlu2 %3442  ;;  %v3424_v46 = vsel %vm978_vm3, %v3411_v37, %v7291_v40  ;;  %v3428_v11 = vsel %vm978_vm3, %v7291_v40, %v3411_v37  ;;  %v4563_v40 = vld [vmem:[%s7837_s8 + $0xf0] sm:$0xff] }
 0x607   : > { %v3554_v2 = vmul.f32 %v4561_v26, %v3428_v11  ;;  %v3555_v39 = vmul.f32 %v4562_v41, %v3424_v46 }
 0x609   : > { %v3369_v25 = vpop.permute.xlu1 %3368 }
 0x60a   : > { %v3375_v24 = vsel %vm8088_vm13, %v7241_v48, %v3369_v25  ;;  %v3379_v56 = vsel %vm8089_vm15, %v3369_v25, %v7241_v48  ;;  %v4558_v48 = vld [vmem:[%s7837_s8 + $0x58] sm:$0xff] }
 0x60b   : > { %v7440_v17 = vmul.f32 %v4557_v34, %v3379_v56  ;;  %v7445_v60 = vmul.f32 %v4558_v48, %v3375_v24 }
 0x60d   : > { %v3491_v23 = vpop.permute.xlu0 %3490 }
 0x60e   : > { %v7469_v1 = vpop.permute.xlu2 %3346 }
 0x611   : > { %v3483_v59 = vpop.permute.xlu1 %3482 }
 0x612   : > { %v7463_v27 = vsel %vm8090_vm8, %v3491_v23, %v3483_v59 }
 0x615   : > { %v3395_v28 = vpop.permute.xlu0 %3394 }
 0x616   : > { %v7484_v34 = vpop.permute.xlu2 %3484 }
 0x619   : > { %v3387_v43 = vpop.permute.xlu1 %3386 }
 0x61d   : > { %v7471_v25 = vpop.permute.xlu0 %3434 }
 0x61e   : > { %v7477_v58 = vsel %vm8091_vm7, %v7459_v0, %v7471_v25  ;;  %v3389_v51 = vpop.permute.xlu2 %3388 }
 0x621   : > { %v3467_v24 = vpop.permute.xlu1 %3466 }
 0x622   : > { %v7482_v56 = vsel %vm1006_vm11, %v3467_v24, %v7339_v32 }
 0x625   : > { %v7486_v48 = vpop.permute.xlu0 %3338 }
 0x626   : > { %v7516_v41 = vpop.permute.xlu2 %3468 }
 0x629   : > { %v7488_v45 = vpop.permute.xlu1 %3370 }
 0x62d   : > { %v3421_v9 = vpop.permute.xlu0 %3420 }
 0x631   : > { %v3413_v47 = vpop.permute.xlu1 %3412 }
 0x632   : > { %v3425_v54 = vsel %vm978_vm3, %v3413_v47, %v3421_v9  ;;  %v3429_v57 = vsel %vm978_vm3, %v3421_v9, %v3413_v47  ;;  %vm8092_vm3 = vmmov %vm8085_vm5  ;;  %vm8106_vm5 = vcmp.lt.s32.totalorder %v7975_v16, 17 }
 0x633   : > { %v3556_v37 = vmul.f32 %v4563_v40, %v3429_v57  ;;  %v3557_v47 = vmul.f32 %v4564_v15, %v3425_v54  ;;  %v3496_v11 = vsel %vm8092_vm3, %v3483_v59, %v3491_v23  ;;  %vm8093_vm10 = vmmov %vm8092_vm3  ;;  %v4565_v15 = vld [vmem:[%s7837_s8 + $0x1e0] sm:$0xff]  ;;  %v8095_v23 = vpack.c.bf16 %v7277_v18, %v7289_v42  ;;  %v4567_v18 = vld [vmem:[%s7837_s8 + $0x1b0] sm:$0xff] }
 0x634   : > { %v3404_v40 = vsel %vm957_vm2, %v3395_v28, %v3387_v43  ;;  %vm8107_vm0 = vmmov %vm8106_vm5 }
 0x635   : > { %v7512_v9 = vpop.permute.xlu0 %3460  ;;  %v3612_v22 = vpack.c.bf16 %v3556_v37, %v3554_v2  ;;  %v3613_v49 = vpack.c.bf16 %v3557_v47, %v3555_v39  ;;  %v3586_v2 = vmul.f32 %v4565_v15, %v3496_v11  ;;  %v8094_v39 = vpack.c.bf16 %v7272_v35, %v7284_v8  ;;  %v4568_v47 = vld [vmem:[%s7837_s8 + $0xa0] sm:$0xff]  ;;  %vm8110_vm14 = vmmov %vm8107_vm0 }
 0x636   : > { %v3473_v54 = vsel %vm1006_vm11, %v7512_v9, %v7516_v41  ;;  %v3400_v37 = vsel %vm957_vm2, %v3387_v43, %v3395_v28  ;;  %v3472_v35 = vsel %vm1006_vm11, %v7339_v32, %v3467_v24  ;;  %v3546_v11 = vmul.f32 %v4568_v47, %v3404_v40  ;;  %v4569_v32 = vld [vmem:[%s7837_s8 + $0xa8] sm:$0xff]  ;;  %v4570_v24 = vld [vmem:[%s7837_s8 + $0x1a0] sm:$0xff]  ;;  %vm8111_vm13 = vmmov %vm8107_vm0 }
 0x637   : > { %3644 = vmatpush.bf16.msra.mxu2 %v3612_v22  ;;  %3683 = vmatpush.bf16.msra.mxu1 %v3613_v49  ;;  %v4566_v49 = vld [vmem:[%s7837_s8 + $0x1f0] sm:$0xff]  ;;  %v3580_v8 = vmul.f32 %v4567_v18, %v3473_v54  ;;  %v3547_v43 = vmul.f32 %v4569_v32, %v3400_v37  ;;  %v4576_v32 = vld [vmem:[%s7837_s8 + $0x68] sm:$0xff]  ;;  %vm8113_vm15 = vmmov %vm8092_vm3 }
 0x638   : > { %vm8115_vm8 = vmmov %vm8107_vm0 }
 0x639   : > { %v7518_v26 = vpop.permute.xlu1 %3492  ;;  %vm8116_vm7 = vmmov %vm8107_vm0 }
 0x63a   : > { %v3497_v46 = vsel %vm8093_vm10, %v7484_v34, %v7518_v26  ;;  %vm8117_vm3 = vmmov %vm8107_vm0 }
 0x63b   : > { %v3588_v22 = vmul.f32 %v4566_v49, %v3497_v46  ;;  %3645 = vmatpush.bf16.msra.mxu2 %v8094_v39  ;;  %3684 = vmatpush.bf16.msra.mxu1 %v8095_v23  ;;  %v3373_v46 = vpop.permute.xlu2 %3372  ;;  %v4571_v49 = vld [vmem:[%s7837_s8 + $0xb0] sm:$0xff]  ;;  %v4572_v39 = vld [vmem:[%s7837_s8 + $0xb8] sm:$0xff]  ;;  %v8096_v23 = vpack.c.bf16 %v7308_v33, %v7321_v5  ;;  %vm8118_vm10 = vmmov %vm8107_vm0 }
 0x63c   : > { %v4573_v5 = vld [vmem:[%s7837_s8 + $0x70] sm:$0xff] }
 0x63d   : > { %v3365_v59 = vpop.permute.xlu0 %3364  ;;  %v3628_v57 = vpack.c.bf16 %v3588_v22, %v3586_v2  ;;  %v3578_v2 = vmul.f32 %v4570_v24, %v3472_v35 }
 0x63f   : > { %3657 = vmatpush.bf16.msra.mxu3 %v3628_v57  ;;  %v3624_v40 = vpack.c.bf16 %v3580_v8, %v3578_v2 }
 0x641   : > { %v3397_v42 = vpop.permute.xlu1 %3396 }
 0x642   : > { %v3401_v15 = vsel %vm957_vm2, %v3389_v51, %v3397_v42  ;;  %v3405_v28 = vsel %vm957_vm2, %v3397_v42, %v3389_v51  ;;  %vm8097_vm2 = vmmov %vm8081_vm9 }
 0x643   : > { %v3548_v22 = vmul.f32 %v4571_v49, %v3405_v28  ;;  %v3549_v51 = vmul.f32 %v4572_v39, %v3401_v15  ;;  %3658 = vmatpush.bf16.msra.mxu3 %v8096_v23  ;;  %v3381_v35 = vsel %vm8097_vm2, %v3373_v46, %v3365_v59  ;;  %vm8098_vm12 = vmmov %vm8097_vm2  ;;  %v8102_v15 = vpack.c.bf16 %v7348_v62, %v7359_v7  ;;  %v3337_v24 = vpop.permute.xlu2 %3336  ;;  %v4577_v7 = vld [vmem:[%s7837_s8 + $0x160] sm:$0xff]  ;;  %v4578_v49 = vld [vmem:[%s7837_s8 + $0x170] sm:$0xff] }
 0x644   : > { %v3377_v18 = vsel %vm8098_vm12, %v3365_v59, %v3373_v46  ;;  %vm8099_vm9 = vmmov %vm8097_vm2  ;;  %v3540_v8 = vmul.f32 %v4573_v5, %v3381_v35  ;;  %v4574_v59 = vld [vmem:[%s7837_s8 + $0x78] sm:$0xff]  ;;  %v3448_v46 = vsel %vm8101_vm1, %v7471_v25, %v7459_v0  ;;  %v8103_v28 = vpack.c.bf16 %v7382_v31, %v7403_v3  ;;  %v4583_v5 = vld [vmem:[%s7837_s8 + $0x30] sm:$0xff] }
 0x645   : > { %v7572_v57 = vpop.permute.xlu0 %3342  ;;  %v3608_v54 = vpack.c.bf16 %v3548_v22, %v3546_v11  ;;  %v3609_v37 = vpack.c.bf16 %v3549_v51, %v3547_v43  ;;  %v3380_v42 = vsel %vm8099_vm9, %v7488_v45, %v7377_v38  ;;  %vm8100_vm4 = vmmov %vm8097_vm2  ;;  %v3541_v11 = vmul.f32 %v4574_v59, %v3377_v18 }
 0x646   : > { %v3376_v33 = vsel %vm8100_vm4, %v7377_v38, %v7488_v45  ;;  %v4575_v38 = vld [vmem:[%s7837_s8 + $0x60] sm:$0xff]  ;;  %v8104_v0 = vpack.c.bf16 %v7353_v61, %v7365_v44  ;;  %v3570_v31 = vmul.f32 %v4577_v7, %v3448_v46  ;;  %v3352_v51 = vsel %vm8106_vm5, %v7486_v48, %v7469_v1  ;;  %vm8122_vm12 = vmmov %vm8101_vm1 }
 0x647   : > { %3646 = vmatpush.bf16.msra.mxu2 %v3608_v54  ;;  %3659 = vmatpush.bf16.msra.mxu3 %v3624_v40  ;;  %v3538_v45 = vmul.f32 %v4575_v38, %v3380_v42  ;;  %v3539_v43 = vmul.f32 %v4576_v32, %v3376_v33  ;;  %v3634_v44 = vld [vmem:[%s7840_s11] sm:$0x7]  ;;  %v3356_v23 = vsel %vm8107_vm0, %v7469_v1, %v7486_v48  ;;  %v4579_v40 = vld [vmem:[%s7837_s8 + $0x130] sm:$0xff] }
 0x648   : > { %3685 = vmatpush.bf16.msra.mxu1 %v3609_v37  ;;  %3636 = vst [vmem:[#allocation1] ss:$9 sm:$0xff] %v3634_v44  ;;  %v8108_v54 = vpack.c.bf16 %v7440_v17, %v7451_v10  ;;  %v3564_v37 = vmul.f32 %v4579_v40, %v7123_v4  ;;  %v8109_v35 = vpack.c.bf16 %v7445_v60, %v7457_v29  ;;  %v4580_v17 = vld [vmem:[%s7837_s8 + $0x120] sm:$0xff]  ;;  %v4582_v60 = vld [vmem:[%s7837_s8 + $0x28] sm:$0xff] }
 0x649   : > { %v7589_v47 = vpop.permute.xlu1 %3436  ;;  %v3604_v2 = vpack.c.bf16 %v3540_v8, %v3538_v45  ;;  %v3605_v3 = vpack.c.bf16 %v3541_v11, %v3539_v43  ;;  %v3562_v10 = vmul.f32 %v4580_v17, %v7098_v12  ;;  %v4581_v4 = vld [vmem:[%s7837_s8 + $0x20] sm:$0xff]  ;;  %v3531_v29 = vmul.f32 %v4582_v60, %v3352_v51  ;;  %v4584_v12 = vld [vmem:[%s7837_s8 + $0x38] sm:$0xff]  ;;  %v8114_v43 = vld [vmem:[#allocation3_spill] sm:$0xff] }
 0x64a   : > { %v3530_v48 = vmul.f32 %v4581_v4, %v3356_v23  ;;  %v8112_v11 = vpack.c.bf16 %v7387_v50, %v7409_v55  ;;  %v3501_v45 = vsel %vm8113_vm15, %v7518_v26, %v7484_v34  ;;  %v3350_v50 = vsel %vm8115_vm8, %v7263_v19, %v7572_v57 }
 0x64b   : > { %3647 = vmatpush.bf16.msra.mxu2 %v8102_v15  ;;  %3660 = vmatpush.bf16.msra.mxu3 %v8103_v28  ;;  %v3507_v33 = vpop.permute.xlu2 %3506  ;;  %v3616_v15 = vpack.c.bf16 %v3564_v37, %v3562_v10  ;;  %v4585_v28 = vld [vmem:[%s7837_s8 + $0x110] sm:$0xff]  ;;  %v3354_v55 = vsel %vm8116_vm7, %v7572_v57, %v7263_v19  ;;  %v4588_v57 = vld [vmem:[%s7837_s8] sm:$0xff]  ;;  %v4594_v10 = vld [vmem:[%s7837_s8 + $0x1a8] sm:$0xff]  ;;  %vm8137_vm15 = vcmask 1041408   ;;  %vm8141_vm8 = vcmask 1043456  }
 0x64c   : > { %3686 = vmatpush.bf16.msra.mxu1 %v8104_v0  ;;  %v3560_v32 = vmul.f32 %v4585_v28, %v6990_v13  ;;  %vm8142_vm7 = vmmov %vm8141_vm8 }
 0x64d   : > { %v7613_v25 = vpop.permute.xlu0 %3444 }
 0x64e   : > { %v3449_v62 = vsel %vm8105_vm6, %v7589_v47, %v7613_v25 }
 0x64f   : > { %v3572_v61 = vmul.f32 %v4578_v49, %v3449_v62  ;;  %3648 = vmatpush.bf16.msra.mxu2 %v3604_v2  ;;  %v3637_v46 = vld [vmem:[#allocation1] sm:$0xff]  ;;  %v7669_v38 = vld [vmem:[#allocation1 + $0x9] sm:$0xff]  ;;  %v4587_v62 = vld [vmem:[%s7837_s8 + $0x1f8] sm:$0xff] }
 0x650   : > { %3687 = vmatpush.bf16.msra.mxu1 %v3605_v3  ;;  %3753 = vst [vmem:[#allocation1] ss:$2 sm:$0xff] %v8114_v43  ;;  %v4586_v2 = vld [vmem:[%s7837_s8 + $0x100] sm:$0xff]  ;;  %v3589_v7 = vmul.f32 %v4587_v62, %v3501_v45  ;;  %v3526_v3 = vmul.f32 %v4588_v57, %v3354_v55  ;;  %v4602_v57 = vld [vmem:[%s7837_s8 + $0x208] sm:$0xff] }
 0x651   : > { %v3620_v22 = vpack.c.bf16 %v3572_v61, %v3570_v31  ;;  %v3341_v39 = vpop.permute.xlu1 %3340  ;;  %v3558_v13 = vmul.f32 %v4586_v2, %v6941_v30  ;;  %v4589_v30 = vld [vmem:[%s7837_s8 + $0x8] sm:$0xff]  ;;  %v4590_v61 = vld [vmem:[%s7837_s8 + $0x10] sm:$0xff]  ;;  %v8127_v2 = vpack.c.bf16 %v7392_v20, %v7415_v36 }
 0x652   : > { %v3527_v49 = vmul.f32 %v4589_v30, %v3350_v50  ;;  %v4600_v50 = vld [vmem:[%s7837_s8 + $0x168] sm:$0xff]  ;;  %v4603_v20 = vld [vmem:[%s7837_s8 + $0x210] sm:$0xff] }
 0x653   : > { %3661 = vmatpush.bf16.msra.mxu3 %v3620_v22  ;;  %3649 = vmatpush.bf16.msra.mxu2 %v8108_v54  ;;  %v3614_v54 = vpack.c.bf16 %v3560_v32, %v3558_v13  ;;  %v3571_v55 = vmul.f32 %v4600_v50, %v7477_v58  ;;  %v4601_v58 = vld [vmem:[%s7837_s8 + $0x200] sm:$0xff] }
 0x654   : > { %3688 = vmatpush.bf16.msra.mxu1 %v8109_v35 }
 0x655   : > { %v3349_v18 = vpop.permute.xlu0 %3348 }
 0x656   : > { %v3353_v42 = vsel %vm8110_vm14, %v3341_v39, %v3349_v18  ;;  %v3357_v1 = vsel %vm8111_vm13, %v3349_v18, %v3341_v39  ;;  %v4592_v39 = vld [vmem:[%s7837_s8 + $0x1e8] sm:$0xff]  ;;  %v3477_v18 = vsel %vm1006_vm11, %v7516_v41, %v7512_v9  ;;  %v3579_v9 = vmul.f32 %v4594_v10, %v7482_v56 }
 0x657   : > { %v3532_v8 = vmul.f32 %v4583_v5, %v3357_v1  ;;  %v3533_v59 = vmul.f32 %v4584_v12, %v3353_v42  ;;  %3662 = vmatpush.bf16.msra.mxu3 %v8112_v11  ;;  %v3587_v51 = vmul.f32 %v4592_v39, %v7463_v27  ;;  %v3517_v42 = vpop.permute.xlu2 %3516  ;;  %v4593_v1 = vld [vmem:[%s7837_s8 + $0x1b8] sm:$0xff]  ;;  %vm8119_vm11 = vcmp.lt.s32.totalorder %v7975_v16, 111 }
 0x658   : > { %v3581_v27 = vmul.f32 %v4593_v1, %v3477_v18  ;;  %vm8120_vm2 = vmmov %vm8119_vm11  ;;  %v4604_v16 = vld [vmem:[%s7837_s8 + $0x218] sm:$0xff]  ;;  %v8130_v39 = vpack.c.bf16 %v7397_v14, %v7421_v21  ;;  %vm8131_vm14 = vcmask 261120   ;;  %v4608_v14 = vld [vmem:[%s7837_s8 + $0x108] sm:$0xff] }
 0x659   : > { %v3600_v34 = vpack.c.bf16 %v3532_v8, %v3530_v48  ;;  %v3601_v26 = vpack.c.bf16 %v3533_v59, %v3531_v29  ;;  %v3345_v0 = vpop.permute.xlu1 %3344  ;;  %v3629_v35 = vpack.c.bf16 %v3589_v7, %v3587_v51  ;;  %v8121_v48 = vpack.c.bf16 %v7313_v63, %v7327_v52  ;;  %vm8123_vm9 = vmmov %vm8120_vm2  ;;  %v4596_v63 = vld [vmem:[%s7837_s8 + $0x228] sm:$0xff]  ;;  %v4598_v59 = vld [vmem:[%s7837_s8 + $0x238] sm:$0xff] }
 0x65a   : > { %v3351_v31 = vsel %vm8117_vm3, %v3337_v24, %v3345_v0  ;;  %v3355_v19 = vsel %vm8118_vm10, %v3345_v0, %v3337_v24  ;;  %v4591_v24 = vld [vmem:[%s7837_s8 + $0x18] sm:$0xff]  ;;  %v3453_v29 = vsel %vm8122_vm12, %v7613_v25, %v7589_v47  ;;  %vm8124_vm4 = vmmov %vm8120_vm2  ;;  %v3625_v8 = vpack.c.bf16 %v3581_v27, %v3579_v9  ;;  %v4597_v47 = vld [vmem:[%s7837_s8 + $0x230] sm:$0xff] }
 0x65b   : > { %3650 = vmatpush.bf16.msra.mxu2 %v3600_v34  ;;  %3663 = vmatpush.bf16.msra.mxu3 %v3616_v15  ;;  %v3528_v44 = vmul.f32 %v4590_v61, %v3355_v19  ;;  %v3529_v22 = vmul.f32 %v4591_v24, %v3351_v31  ;;  %v4599_v15 = vld [vmem:[%s7837_s8 + $0x178] sm:$0xff]  ;;  %vm8125_vm1 = vmmov %vm8120_vm2  ;;  %v4606_v51 = vld [vmem:[%s7837_s8 + $0x128] sm:$0xff] }
 0x65c   : > { %3689 = vmatpush.bf16.msra.mxu1 %v3601_v26  ;;  %v3573_v28 = vmul.f32 %v4599_v15, %v3453_v29  ;;  %vm8126_vm6 = vmmov %vm8125_vm1  ;;  %v4609_v21 = vld [vmem:[%s6930_s21 + $0x8] sm:$0xff]  ;;  %v3754_v9 = vld.sshfl [vmem:[#allocation1] sm:$0xff pattern:$0x75316420]  ;;  %s8135_s21 = sshll.u32 %s8145_s25, 2 }
 0x65d   : > { %v3503_v23 = vpop.permute.xlu0 %3502  ;;  %v3598_v40 = vpack.c.bf16 %v3528_v44, %v3526_v3  ;;  %v3599_v37 = vpack.c.bf16 %v3529_v22, %v3527_v49  ;;  %vm8128_vm5 = vmmov %vm8125_vm1  ;;  %v4605_v44 = vld [vmem:[%s7837_s8 + $0x138] sm:$0xff]  ;;  %s805_s30 = scalar_lea.vmem %s8136_s0, %s8135_s21 }
 0x65e   : > { %vm8129_vm0 = vmmov %vm8125_vm1  ;;  %v3621_v31 = vpack.c.bf16 %v3573_v28, %v3571_v55  ;;  %v3565_v24 = vmul.f32 %v4605_v44, %v7129_v53  ;;  %v3639_v22 = vld [vmem:[#allocation1 + $0x12] sm:$0xff] }
 0x65f   : > { %3664 = vmatpush.bf16.msra.mxu3 %v3614_v54  ;;  %3651 = vmatpush.bf16.msra.mxu2 %v3598_v40  ;;  %v3511_v32 = vpop.permute.xlu2 %3510  ;;  %vm8132_vm13 = vmmov %vm8131_vm14  ;;  %v4607_v53 = vld [vmem:[%s7837_s8 + $0x118] sm:$0xff]  ;;  %v8133_v40 = vld [vmem:[#allocation7_spill] sm:$0xff] }
 0x660   : > { %3690 = vmatpush.bf16.msra.mxu1 %v3599_v37  ;;  %v3518_v34 = vsel %vm8125_vm1, %v3503_v23, %v3511_v32  ;;  %v3522_v26 = vsel %vm8126_vm6, %v3511_v32, %v3503_v23  ;;  %v3563_v23 = vmul.f32 %v4606_v51, %v7106_v6  ;;  %v3561_v37 = vmul.f32 %v4607_v53, %v8133_v40 }
 0x661   : > { %v3515_v17 = vpop.permute.xlu1 %3514  ;;  %v3590_v19 = vmul.f32 %v4601_v58, %v3518_v34  ;;  %v3591_v3 = vmul.f32 %v4602_v57, %v3522_v26 }
 0x662   : > { %3665 = vmatmul.bf16.vlgmr.msra.gmra.mxu3 %v7669_v38  ;;  %3652 = vmatmul.bf16.vlgmr.msra.gmra.mxu2 %v3637_v46  ;;  %v3520_v41 = vsel %vm8119_vm11, %v3507_v33, %v3515_v17  ;;  %v3524_v4 = vsel %vm8120_vm2, %v3515_v17, %v3507_v33  ;;  %v4595_v33 = vld [vmem:[%s7837_s8 + $0x220] sm:$0xff]  ;;  %v3617_v54 = vpack.c.bf16 %v3565_v24, %v3563_v23 }
 0x663   : > { %3696 = vmatpush.bf16.msrb.mxu2 %v3629_v35  ;;  %3691 = vmatmul.bf16.vlgmr.msra.gmra.mxu1 %v3637_v46  ;;  %v3594_v12 = vmul.f32 %v4595_v33, %v3520_v41  ;;  %v3595_v52 = vmul.f32 %v4596_v63, %v3524_v4  ;;  %v3559_v35 = vmul.f32 %v4609_v21, %v4608_v14  ;;  %v3755_v41 = vld.sshfl [vmem:[#allocation1 + $0x8] sm:$0xff pattern:$0x75316420]  ;;  %v8134_v4 = vld [vmem:[#allocation4_spill] sm:$0xff] }
 0x664   : > { %3767 = vst [vmem:[#allocation1] ss:$2 sm:$0xff] %v8134_v4 }
 0x665   : > { %v3509_v60 = vpop.permute.xlu0 %3508  ;;  %v3615_v18 = vpack.c.bf16 %v3561_v37, %v3559_v35 }
 0x666   : > { %v3521_v5 = vsel %vm8123_vm9, %v3509_v60, %v3517_v42  ;;  %v3525_v56 = vsel %vm8124_vm4, %v3517_v42, %v3509_v60 }
 0x667   : > { %3697 = vmatpush.bf16.msrb.mxu2 %v8121_v48  ;;  %v3596_v25 = vmul.f32 %v4597_v47, %v3521_v5  ;;  %v3597_v11 = vmul.f32 %v4598_v59, %v3525_v56 }
 0x669   : > { %v3632_v46 = vpack.c.bf16 %v3596_v25, %v3594_v12  ;;  %v3633_v45 = vpack.c.bf16 %v3597_v11, %v3595_v52  ;;  %v3505_v0 = vpop.permute.xlu1 %3504 }
 0x66b   : > { %3698 = vmatpush.bf16.msrb.mxu2 %v3625_v8  ;;  %3676 = vmatpush.bf16.msra.mxu0 %v3632_v46  ;;  %v3768_v60 = vld.sshfl [vmem:[#allocation1] sm:$0xff pattern:$0x75316420]  ;;  %v3769_v29 = vld.sshfl [vmem:[#allocation1 + $0x8] sm:$0xff pattern:$0x75316420] }
 0x66c   : > { %3715 = vmatpush.bf16.msrb.mxu3 %v3633_v45  ;;  %3782 = vst [vmem:[#allocation1] ss:$2 sm:$0xff] %v8134_v4  ;;  %v8138_v46 = vld [vmem:[#allocation5_spill] sm:$0xff] }
 0x66d   : > { %v3513_v13 = vpop.permute.xlu0 %3512 }
 0x66e   : > { %v3519_v62 = vsel %vm8128_vm5, %v3505_v0, %v3513_v13  ;;  %v3523_v7 = vsel %vm8129_vm0, %v3513_v13, %v3505_v0 }
 0x66f   : > { %3699 = vmatpush.bf16.msrb.mxu2 %v8127_v2  ;;  %v3592_v36 = vmul.f32 %v4603_v20, %v3519_v62  ;;  %v3593_v30 = vmul.f32 %v4604_v16, %v3523_v7 }
 0x671   : > { %v3630_v49 = vpack.c.bf16 %v3592_v36, %v3590_v19  ;;  %v3631_v61 = vpack.c.bf16 %v3593_v30, %v3591_v3 }
 0x673   : > { %3700 = vmatpush.bf16.msrb.mxu2 %v3621_v31  ;;  %3677 = vmatpush.bf16.msra.mxu0 %v3630_v49  ;;  %v3783_v8 = vld.sshfl [vmem:[#allocation1] sm:$0xff pattern:$0x75316420] }
 0x674   : > { %3716 = vmatpush.bf16.msrb.mxu3 %v3631_v61 }
 0x676   : > { %4300 = vmatmul.msk.bf16.vlgmr.msra.gmra.mxu0 %vm8131_vm14, %v3639_v22 }
 0x677   : > { %3701 = vmatpush.bf16.msrb.mxu2 %v8130_v39  ;;  %4301 = vmatmul.msk.bf16.vlgmr.msrb.gmra.mxu3 %vm8132_vm13, %v3639_v22 }
 0x67b   : > { %3702 = vmatpush.bf16.msrb.mxu2 %v3617_v54 }
 0x67f   : > { %3703 = vmatpush.bf16.msrb.mxu2 %v3615_v18 }
 0x682   : > { %3704 = vmatmul.bf16.vlgmr.msrb.gmra.mxu2 %v7669_v38  ;;  %v3784_v38 = vld.sshfl [vmem:[#allocation1 + $0x8] sm:$0xff pattern:$0x75316420] }
 0x683   : > { %3789 = vst [vmem:[#allocation1] ss:$2 sm:$0xff] %v8114_v43 }
 0x68a   : > { %v3790_v55 = vld.sshfl [vmem:[#allocation1] sm:$0xff pattern:$0x75316420]  ;;  %v3791_v34 = vld.sshfl [vmem:[#allocation1 + $0x8] sm:$0xff pattern:$0x75316420] }
 0x6e0   : > { %v3692_v6 = vpop.f32.mrf.mxu1 }
 0x6e5   : > { %v3666_v42 = vpop.f32.mrf.mxu3  ;;  %v3653_v1 = vpop.f32.mrf.mxu2 }
 0x6e6   : > { %v3667_v63 = vadd.f32 %v3666_v42, %v3653_v1 }
 0x6e8   : > { %v3694_v27 = vpop.f32.mrf.mxu1 }
 0x6ed   : > { %v3668_v17 = vpop.f32.mrf.mxu3  ;;  %v3655_v10 = vpop.f32.mrf.mxu2 }
 0x6f3   : > { %v3679_v48 = vpop.f32.mrf.mxu0 }
 0x6f4   : > { %v3680_v25 = vadd.f32 %v3679_v48, %v3667_v63 }
 0x6fa   : > { %v3718_v5 = vpop.f32.mrf.mxu3 }
 0x6fb   : > { %v3681_v56 = vpop.f32.mrf.mxu0 }
 0x702   : > { %v3720_v33 = vpop.f32.mrf.mxu3 }
 0x705   : > { %v3705_v12 = vpop.f32.mrf.mxu2 }
 0x706   : > { %v3706_v52 = vadd.f32 %v3705_v12, %v3692_v6 }
 0x708   : > { %v3719_v47 = vadd.f32 %v3718_v5, %v3706_v52 }
 0x70a   : > { %v3724_v59 = vrot.slane %v3719_v47, 6 }
 0x70c   : > { %v3725_v11 = vsel %vm8137_vm15, %v3680_v25, %v3724_v59 }
 0x70d   : > { %v3727_v45 = vadd.f32 %v3725_v11, %v8138_v46  ;;  %v3707_v15 = vpop.f32.mrf.mxu2 }
 0x70f   : > { %3728 = vst [vmem:[%s805_s30] sm:$0xf] %v3727_v45  ;;  %v3746_v28 = vperm.slane %v3727_v45, 0  ;;  %v3747_v43 = vperm.slane %v3727_v45, 2  ;;  %v3760_v32 = vperm.slane %v3727_v45, 1  ;;  %v3761_v50 = vperm.slane %v3727_v45, 3 }
 0x711   : > { %v3750_v26 = vperm.slane %v3746_v28, 0  ;;  %v3751_v0 = vperm.slane %v3747_v43, 0  ;;  %v3764_v2 = vperm.slane %v3760_v32, 1  ;;  %v3765_v13 = vperm.slane %v3761_v50, 1 }
 0x713   : > { %v3758_v62 = vmul.f32 %v3754_v9, %v3750_v26  ;;  %v3759_v7 = vmul.f32 %v3755_v41, %v3751_v0  ;;  %v3772_v31 = vmul.f32 %v3768_v60, %v3764_v2  ;;  %v3773_v58 = vmul.f32 %v3769_v29, %v3765_v13 }
 0x714   : > { %v3787_v19 = vmul.f32 %v3783_v8, %v3750_v26  ;;  %v3788_v57 = vmul.f32 %v3784_v38, %v3751_v0  ;;  %v3794_v3 = vmul.f32 %v3790_v55, %v3764_v2  ;;  %v3795_v20 = vmul.f32 %v3791_v34, %v3765_v13 }
 0x715   : > { %v3775_v36 = vsub.f32 %v3759_v7, %v3773_v58  ;;  %v3774_v30 = vsub.f32 %v3758_v62, %v3772_v31 }
 0x716   : > { %v3797_v16 = vadd.f32 %v3795_v20, %v3788_v57  ;;  %v3796_v61 = vadd.f32 %v3794_v3, %v3787_v19 }
 0x717   : > { %v3778_v49 = vrot.slane %v3775_v36, 4 }
 0x718   : > { %v3800_v44 = vrot.slane %v3797_v16, 4 }
 0x719   : > { %v3779_v24 = vsel %vm8141_vm8, %v3774_v30, %v3778_v49 }
 0x71a   : > { %3781 = vst [vmem:[%s820_s29] sm:$0xff] %v3779_v24  ;;  %v3801_v22 = vsel %vm8142_vm7, %v3796_v61, %v3800_v44 }
 0x71b   : > { %3803 = vst [vmem:[%s825_s23] sm:$0xff] %v3801_v22 }
 0x71c PF: > { %s8143_s24 = sld [smem:[#allocation2_spill]] }
 0x722   : > { %s32_s2 = sadd.s32 1, %s8143_s24  }
 0x723   : > { %p29_p4 = scmp.ge.s32.totalorder %s32_s2, 4  }
 0x725   :  { %31 = sbr.rel (!%p29_p4) target bundleno = 10 (0xa), region = 193 }

// kernel: rim_block_forward.3
= control target key start
LH: loop header
LB: loop body
LE: loop exit
PB: predicated region body
PF: predicated region fallthrough
CT: control target
= control target key end

     0   :  { %s8079_s0 = inlined_call_operand.vmem [shape: f32[2,4,256], index: 0, kind: input, shape index: {}]   ;;  %s8080_s1 = inlined_call_operand.vmem [shape: f32[2,4,256], index: 1, kind: input, shape index: {}]   ;;  %s8081_s2 = inlined_call_operand.vmem [shape: f32[2,4,256], index: 2, kind: input, shape index: {}]   ;;  %s8082_s3 = inlined_call_operand.vmem [shape: f32[2,4,256], index: 3, kind: input, shape index: {}]   ;;  %s8083_s4 = inlined_call_operand.vmem [shape: f32[2,2,256], index: 4, kind: input, shape index: {}, may-alias: {4,17}]   ;;  %s8084_s5 = inlined_call_operand.vmem [shape: f32[2,32,256], index: 5, kind: input, shape index: {}, may-alias: {5,18}]   ;;  %s8085_s6 = inlined_call_operand.vmem [shape: f32[2,32,256], index: 6, kind: input, shape index: {}, may-alias: {6,19}]   ;;  %s8086_s7 = inlined_call_operand.vmem [shape: f32[128,256], index: 7, kind: input, shape index: {}]   ;;  %s8087_s8 = inlined_call_operand.vmem [shape: f32[288,256], index: 8, kind: input, shape index: {}]   ;;  %s8088_s9 = inlined_call_operand.vmem [shape: bf16[32,128], index: 9, kind: input, shape index: {}]   ;;  %s8089_s10 = inlined_call_operand.vmem [shape: bf16[32,288], index: 10, kind: input, shape index: {}]   ;;  %s8090_s11 = inlined_call_operand.vmem [shape: bf16[2,288], index: 11, kind: input, shape index: {}]   ;;  %s8091_s12 = inlined_call_operand.vmem [shape: f32[2,32,1], index: 12, kind: input, shape index: {}]   ;;  %s8092_s13 = inlined_call_operand.vmem [shape: bf16[2,64,64], index: 13, kind: input, shape index: {}]   ;;  %s8093_s14 = inlined_call_operand.vmem [shape: f32[2,64,1], index: 14, kind: input, shape index: {}]   ;;  %s8094_s15 = inlined_call_operand.vmem [shape: bf16[2,2,32,32], index: 15, kind: input, shape index: {}]   ;;  %s8095_s16 = inlined_call_operand.vmem [shape: f32[2,2,32,1], index: 16, kind: input, shape index: {}]   ;;  %s8096_s17 = inlined_call_operand.vmem [shape: f32[2,2,256], index: 17, kind: output, shape index: {0}, may-alias: {4,17}]   ;;  %s8097_s18 = inlined_call_operand.vmem [shape: f32[2,32,256], index: 18, kind: output, shape index: {1}, may-alias: {5,18}]   ;;  %s8098_s19 = inlined_call_operand.vmem [shape: f32[2,32,256], index: 19, kind: output, shape index: {2}, may-alias: {6,19}]   ;;  %s8099_s20 = inlined_call_operand.hbm [shape: f32[2,4,256], index: 20, kind: output, shape index: {3}]   ;;  %s8100_s21 = inlined_call_operand.hbm [shape: f32[2,4,256], index: 21, kind: output, shape index: {4}]  }
   0x1   :  { %8147 = sst [smem:[#allocation25_spill]] %s8079_s0 }
   0x2   :  { %8148 = sst [smem:[#allocation26_spill]] %s8080_s1 }
   0x3   :  { %8149 = sst [smem:[#allocation27_spill]] %s8081_s2 }
   0x4   :  { %8150 = sst [smem:[#allocation28_spill]] %s8082_s3 }
   0x5   :  { %8151 = sst [smem:[#allocation29_spill]] %s8083_s4 }
   0x6   :  { %8152 = sst [smem:[#allocation30_spill]] %s8084_s5 }
   0x7   :  { %8153 = sst [smem:[#allocation31_spill]] %s8085_s6 }
   0x8   :  { %8154 = sst [smem:[#allocation32_spill]] %s8096_s17 }
   0x9   :  { %8155 = sst [smem:[#allocation33_spill]] %s8099_s20 }
   0xa   :  { %8156 = sst [smem:[#allocation34_spill]] %s8100_s21 }
   0xb   :  { %27 = vsyncpa [#allocation3], 0 }
   0xc   :  { %29 = vsyncpa [#allocation3 + $0x1], 0 }
   0xd   :  { %30 = vsyncpa [#allocation5], 0 }
   0xe   :  { %32 = vsyncpa [#allocation5 + $0x1], 0  ;;  %s4917_s2 = smov 0   ;;  %s4919_s25 = smov 0  }
   0xf   :  { %s4921_s26 = smov 0   ;;  %s4923_s27 = smov 0  }
  0x10 LB: > { %8157 = sst [smem:[#allocation8_spill]] %s4768_s2  ;;  %s4938_s3 = sadd.s32 4294967295, %s4780_s27   ;;  %s4780_s27 = sphi %s4923_s27, %s8416_s27   ;;  %s4776_s26 = sphi %s4921_s26, %s8419_s26   ;;  %s4772_s25 = sphi %s4919_s25, %s8418_s25   ;;  %s4768_s2 = sphi %s4917_s2, %s8417_s2  }
  0x11   : > { %8158 = sst [smem:[#allocation9_spill]] %s4772_s25  ;;  %s4100_s28 = sadd.s32 4294967294, %s4780_s27  }
  0x12   : > { %8159 = sst [smem:[#allocation10_spill]] %s4776_s26  ;;  %s4942_s29 = sadd.s32 1, %s4780_s27  }
  0x13   : > { %8160 = sst [smem:[#allocation11_spill]] %s4780_s27  ;;  %s515_s0 = sadd.s32 1, %s4776_s26 }
  0x14   : > { %8161 = sst [smem:[#allocation12_spill]] %s4938_s3  ;;  %s512_s4 = ssub.s32 %s4780_s27, %s4942_s29 }
  0x15   : > { %8162 = sst [smem:[#allocation13_spill]] %s4942_s29  ;;  %p525_p0 = scmp.ne.s32.totalorder %s4776_s26, %s4772_s25 }
  0x16   : > { %p513_p1 = scmp.eq.s32.totalorder %s512_s4, 0  ;;  %p526_p2 = scmp.eq.s32.totalorder %s4938_s3, 1 }
  0x17   : > { %p531_p3 = scmp.ne.s32.totalorder %s4772_s25, %s4768_s2  ;;  %p532_p4 = scmp.eq.s32.totalorder %s4100_s28, 1 }
  0x18   : > { %s4953_s30 = scalar_select %p513_p1, %s4776_s26, %s515_s0  }
  0x19   : > { %p4955_p5 = por %p526_p2, %p525_p0  ;;  %p4959_p6 = por %p532_p4, %p531_p3 }
  0x1a   : > { %8163 = sst [smem:[#allocation14_spill]] %s4953_s30  ;;  %p4103_p7 = scmp.ge.s32.totalorder %s4780_s27, 1 }
  0x1b   : > { %s8164_s5 = scalar_select %p4955_p5, 1, 0 }
  0x1c   : > { %s8166_s22 = scalar_select %p4959_p6, 1, 0 }
  0x1d   : > { %8165 = sst [smem:[#allocation15_spill]] %s8164_s5  ;;  %p662_p8 = scmp.lt.s32.totalorder %s4780_s27, 3 }
  0x1e   : > { %8167 = sst [smem:[#allocation16_spill]] %s8166_s22 }
  0x1f   : > { %p663_p9 = pnand %p4103_p7, %p662_p8 }
  0x21   : > { %666 = sbr.rel (%p663_p9) target bundleno = 1852 (0x73c), region = 88 }
  0x26   : > { %p772_p10 = scmp.lt.s32.totalorder %s4938_s3, 1  ;;  %s8168_s0 = sld [smem:[#allocation25_spill]]  ;;  %vm8116_vm0 = vcmask 1043456   ;;  %vm8117_vm1 = vcmask 1041408   ;;  %vm884_vm2 = vcmask 1042432   ;;  %v1187_v49 = vld [vmem:[%s8086_s7 + $0xe0] sm:$0xff]  ;;  %v895_v62 = vlaneseq }
  0x27   : > { %s8169_s29 = sld [smem:[#allocation26_spill]]  ;;  %s4782_s26 = smov 97   ;;  %v1189_v50 = vld [vmem:[%s8086_s7 + $0xf0] sm:$0xff]  ;;  %v1219_v51 = vmul.f32 0.0, %v1187_v49  ;;  %v1188_v53 = vld [vmem:[%s8086_s7 + $0xe8] sm:$0xff]  ;;  %v1190_v54 = vld [vmem:[%s8086_s7 + $0xf8] sm:$0xff] }
  0x28   : > { %s4967_s23 = scalar_select %p772_p10, %s4938_s3, 1  ;;  %v1221_v52 = vmul.f32 0.0, %v1189_v50  ;;  %v1220_v55 = vmul.f32 0.0, %v1188_v53  ;;  %v1222_v56 = vmul.f32 0.0, %v1190_v54 }
  0x29   : > { %s8170_s5 = sld [smem:[#allocation27_spill]]  ;;  %s4783_s27 = smov 94  }
  0x2a   : > { %s4344_s1 = sshll.u32 %s4967_s23, 3  ;;  %s8171_s25 = sld [smem:[#allocation28_spill]]  ;;  %v1237_v58 = vpack.c.bf16 %v1221_v52, %v1219_v51  ;;  %v1238_v59 = vpack.c.bf16 %v1222_v56, %v1220_v55 }
  0x2b   : > { %s8113_s17 = sshll.u32 %s4967_s23, 2  ;;  %s8174_s2 = sld [smem:[#allocation29_spill]] }
  0x2c   : > { %s776_s4 = scalar_lea.vmem %s8168_s0, %s4344_s1  ;;  %s4786_s30 = smov 96   ;;  %1275 = vmatpush.bf16.msra.mxu0 %v1237_v58  ;;  %1294 = vmatpush.bf16.msra.mxu1 %v1238_v59 }
  0x2d   : > { %s781_s22 = scalar_lea.vmem %s8169_s29, %s4344_s1  ;;  %v823_v0 = vld [vmem:[%s776_s4] sm:$0xff]  ;;  %s4785_s29 = smov 98  }
  0x2e   : > { %v824_v1 = vld [vmem:[%s781_s22] sm:$0xff]  ;;  %s4788_s22 = smov 110   ;;  %s8114_s24 = smov 111  }
  0x2f   : > { %s786_s21 = scalar_lea.vmem %s8170_s5, %s4344_s1  ;;  %s4787_s5 = smov 112  }
  0x30   : > { %s791_s3 = scalar_lea.vmem %s8171_s25, %s4344_s1  ;;  %v4982_v2 = vld [vmem:[%s786_s21] sm:$0xff]  ;;  %s8140_s1 = smov 113  }
  0x31   : > { %8172 = vst [vmem:[#allocation17_spill] sm:$0xff] %v4982_v2  ;;  %v4984_v3 = vld [vmem:[%s791_s3] sm:$0xff]  ;;  %v827_v4 = vmul.f32 %v4982_v2, %v823_v0  ;;  %v851_v7 = vmul.f32 %v4982_v2, %v824_v1  ;;  %s796_s25 = scalar_lea.vmem %s8174_s2, %s8113_s17  ;;  %s4784_s3 = smov 95  }
  0x32   : > { %8173 = vst [vmem:[#allocation18_spill] sm:$0xff] %v4984_v3  ;;  %v828_v5 = vmul.f32 %v4984_v3, %v824_v1  ;;  %v852_v8 = vmul.f32 %v4984_v3, %v823_v0  ;;  %v4998_v19 = vld [vmem:[%s796_s25] sm:$0xf]  ;;  %s8136_s28 = smov 127   ;;  %s4792_s0 = smov 114  }
  0x33   : > { %8175 = vst [vmem:[#allocation19_spill] sm:$0xff] %v4998_v19  ;;  %s4793_s4 = smov 126   ;;  %s4794_s20 = smov 14  }
  0x34   : > { %v829_v6 = vadd.f32 %v828_v5, %v827_v4  ;;  %v853_v9 = vsub.f32 %v851_v7, %v852_v8  ;;  %s4795_s21 = smov 1   ;;  %s8142_s2 = smov 15   ;;  %v5084_v4 = vand.u32 127, %v895_v62  ;;  %v1185_v5 = vld [vmem:[%s8086_s7 + $0xd0] sm:$0xff] }
  0x35   : > { %s4797_s25 = smov 2   ;;  %s8301_s6 = sld [smem:[#allocation31_spill]] }
  0x36   : > { %831 = vst [vmem:[#allocation1] ss:$2 sm:$0xff] %v829_v6  ;;  %vm1058_vm3 = vcmp.lt.s32.totalorder %v5084_v4, 94  ;;  %v1186_v6 = vld [vmem:[%s8086_s7 + $0xd8] sm:$0xff]  ;;  %vm1037_vm4 = vcmp.lt.s32.totalorder %v5084_v4, 97  ;;  %vm1051_vm5 = vcmp.lt.s32.totalorder %v5084_v4, 95 }
  0x37   : > { %8176 = vst [vmem:[#allocation20_spill] sm:$0xff] %v5084_v4  ;;  %vm1030_vm6 = vcmp.lt.s32.totalorder %v5084_v4, 98  ;;  %vm1044_vm7 = vcmp.lt.s32.totalorder %v5084_v4, 96  ;;  %vm8131_vm8 = vcmp.lt.s32.totalorder %v5084_v4, 112  ;;  %vm1023_vm9 = vcmp.lt.s32.totalorder %v5084_v4, 110 }
  0x38   : > { %vm8120_vm10 = vcmp.lt.s32.totalorder %v5084_v4, 111  ;;  %vm1002_vm11 = vcmp.lt.s32.totalorder %v5084_v4, 113  ;;  %vm8132_vm12 = vcmp.lt.s32.totalorder %v5084_v4, 127  ;;  %vm995_vm13 = vcmp.lt.s32.totalorder %v5084_v4, 114 }
  0x39   : > { %vm988_vm14 = vcmp.lt.s32.totalorder %v5084_v4, 126  ;;  %vm960_vm15 = vcmp.lt.s32.totalorder %v5084_v4, 14 }
  0x3d   : > { %v832_v10 = vld.sshfl [vmem:[#allocation1] sm:$0xff pattern:$0x75316420]  ;;  %v833_v11 = vld.sshfl [vmem:[#allocation1 + $0x8] sm:$0xff pattern:$0x75316420] }
  0x3e   : > { %v837_v12 = vsel %vm8116_vm0, %v832_v10, 0.0  ;;  %855 = vst [vmem:[#allocation1] ss:$2 sm:$0xff] %v853_v9  ;;  %v844_v13 = vsel %vm8116_vm0, %v833_v11, 0.0  ;;  %v1183_v9 = vld [vmem:[%s8086_s7 + $0xc0] sm:$0xff]  ;;  %v1184_v10 = vld [vmem:[%s8086_s7 + $0xc8] sm:$0xff] }
  0x3f   : > { %v838_v14 = vrot.slane %v837_v12, 4  ;;  %v845_v15 = vrot.slane %v844_v13, 4 }
  0x41   : > { %v839_v16 = vadd.f32 %v838_v14, %v837_v12  ;;  %v846_v17 = vadd.f32 %v845_v15, %v844_v13  ;;  %v1217_v13 = vmul.f32 0.0, %v1185_v5  ;;  %v1218_v14 = vmul.f32 0.0, %v1186_v6  ;;  %v1177_v5 = vld [vmem:[%s8086_s7 + $0x90] sm:$0xff] }
  0x43   : > { %v840_v18 = vrot.slane %v839_v16, 2  ;;  %v847_v24 = vrot.slane %v846_v17, 2 }
  0x45   : > { %v841_v20 = vadd.f32 %v840_v18, %v839_v16  ;;  %v856_v21 = vld.sshfl [vmem:[#allocation1] sm:$0xff pattern:$0x75316420]  ;;  %v857_v22 = vld.sshfl [vmem:[#allocation1 + $0x8] sm:$0xff pattern:$0x75316420]  ;;  %v848_v31 = vadd.f32 %v847_v24, %v846_v17 }
  0x46   : > { %v860_v23 = vsel %vm8116_vm0, %v856_v21, 0.0  ;;  %876 = vst [vmem:[#allocation1] ss:$4 sm:$0xff] %v4998_v19  ;;  %v867_v25 = vsel %vm8116_vm0, %v857_v22, 0.0 }
  0x47   : > { %v861_v26 = vrot.slane %v860_v23, 4  ;;  %v868_v27 = vrot.slane %v867_v25, 4  ;;  %v842_v28 = vrot.slane %v841_v20, 1  ;;  %v849_v38 = vrot.slane %v848_v31, 1 }
  0x49   : > { %v862_v29 = vadd.f32 %v861_v26, %v860_v23  ;;  %v869_v30 = vadd.f32 %v868_v27, %v867_v25  ;;  %v843_v34 = vadd.f32 %v842_v28, %v841_v20  ;;  %v850_v43 = vadd.f32 %v849_v38, %v848_v31 }
  0x4b   : > { %v863_v32 = vrot.slane %v862_v29, 2  ;;  %v870_v33 = vrot.slane %v869_v30, 2 }
  0x4d   : > { %v864_v35 = vadd.f32 %v863_v32, %v862_v29  ;;  %v877_v36 = vld.sshfl [vmem:[#allocation1] sm:$0xff pattern:$0x73625140]  ;;  %v871_v37 = vadd.f32 %v870_v33, %v869_v30  ;;  %v878_v45 = vld.sshfl [vmem:[#allocation1 + $0x8] sm:$0xff pattern:$0x73625140] }
  0x4e   : > { %v882_v40 = vsel %vm8117_vm1, %v877_v36, %v843_v34  ;;  %v883_v47 = vsel %vm8117_vm1, %v878_v45, %v850_v43  ;;  %v1179_v34 = vld [vmem:[%s8086_s7 + $0xa0] sm:$0xff]  ;;  %v1182_v43 = vld [vmem:[%s8086_s7 + $0xb8] sm:$0xff] }
  0x4f   : > { %v865_v39 = vrot.slane %v864_v35, 1  ;;  %v872_v42 = vrot.slane %v871_v37, 1 }
  0x51   : > { %v866_v41 = vadd.f32 %v865_v39, %v864_v35  ;;  %v873_v46 = vadd.f32 %v872_v42, %v871_v37  ;;  %v1180_v42 = vld [vmem:[%s8086_s7 + $0xa8] sm:$0xff] }
  0x53   : > { %v5004_v44 = vsel %vm884_vm2, %v882_v40, %v866_v41  ;;  %v5010_v48 = vsel %vm884_vm2, %v883_v47, %v873_v46  ;;  %v1181_v40 = vld [vmem:[%s8086_s7 + $0xb0] sm:$0xff]  ;;  %vm953_vm2 = vcmp.lt.s32.totalorder %v5084_v4, 15 }
  0x54   : > { %1033 = vrot.lane.b32.xlu1 %v5004_v44, %s4782_s26  ;;  %1054 = vrot.lane.b32.xlu0 %v5004_v44, %s4783_s27 }
  0x55   : > { %1047 = vrot.lane.b32.xlu2 %v5004_v44, %s4784_s3 }
  0x5c   : > { %1035 = vrot.lane.b32.xlu1 %v5010_v48, %s4782_s26  ;;  %1056 = vrot.lane.b32.xlu0 %v5010_v48, %s4783_s27  ;;  %s4798_s26 = smov 18   ;;  %s8138_s27 = smov 16  }
  0x5d   : > { %1049 = vrot.lane.b32.xlu2 %v5010_v48, %s4784_s3  ;;  %s8134_s3 = smov 17  }
  0x64   : > { %1028 = vrot.lane.b32.xlu1 %v5010_v48, %s4785_s29  ;;  %1026 = vrot.lane.b32.xlu0 %v5004_v44, %s4785_s29  ;;  %s4802_s29 = smov 33  }
  0x65   : > { %1040 = vrot.lane.b32.xlu2 %v5004_v44, %s4786_s30 }
  0x6c   : > { %1005 = vrot.lane.b32.xlu1 %v5004_v44, %s4787_s5  ;;  %1042 = vrot.lane.b32.xlu0 %v5010_v48, %s4786_s30  ;;  %s4803_s30 = smov 31  }
  0x6d   : > { %1007 = vrot.lane.b32.xlu2 %v5010_v48, %s4787_s5 }
  0x74   : > { %1021 = vrot.lane.b32.xlu1 %v5010_v48, %s4788_s22  ;;  %1019 = vrot.lane.b32.xlu0 %v5004_v44, %s4788_s22  ;;  %s4804_s22 = smov 34  }
  0x75   : > { %998 = vrot.lane.b32.xlu2 %v5004_v44, %s8140_s1 }
  0x7c   : > { %1012 = vrot.lane.b32.xlu1 %v5004_v44, %s8114_s24  ;;  %1000 = vrot.lane.b32.xlu0 %v5010_v48, %s8140_s1 }
  0x7d   : > { %1014 = vrot.lane.b32.xlu2 %v5010_v48, %s8114_s24  ;;  %s8177_s24 = sld [smem:[#allocation30_spill]] }
  0x84   : > { %979 = vrot.lane.b32.xlu1 %v5010_v48, %s8136_s28  ;;  %977 = vrot.lane.b32.xlu0 %v5004_v44, %s8136_s28 }
  0x85   : > { %991 = vrot.lane.b32.xlu2 %v5004_v44, %s4792_s0 }
  0x8c   : > { %984 = vrot.lane.b32.xlu1 %v5004_v44, %s4793_s4  ;;  %993 = vrot.lane.b32.xlu0 %v5010_v48, %s4792_s0  ;;  %s4805_s0 = smov 32  }
  0x8d   : > { %986 = vrot.lane.b32.xlu2 %v5010_v48, %s4793_s4  ;;  %s5338_s4 = sshll.u32 %s4967_s23, 6 }
  0x94   : > { %958 = vrot.lane.b32.xlu1 %v5010_v48, %s4794_s20  ;;  %956 = vrot.lane.b32.xlu0 %v5004_v44, %s4794_s20  ;;  %s7130_s20 = scalar_lea.vmem %s8098_s19, %s5338_s4 }
  0x95   : > { %970 = vrot.lane.b32.xlu2 %v5004_v44, %s4795_s21 }
  0x9c   : > { %949 = vrot.lane.b32.xlu1 %v5004_v44, %s8142_s2  ;;  %972 = vrot.lane.b32.xlu0 %v5010_v48, %s4795_s21 }
  0x9d   : > { %951 = vrot.lane.b32.xlu2 %v5010_v48, %s8142_s2 }
  0xa4   : > { %965 = vrot.lane.b32.xlu1 %v5010_v48, %s4797_s25  ;;  %963 = vrot.lane.b32.xlu0 %v5004_v44, %s4797_s25  ;;  %s8337_s25 = smov 113  }
  0xa5   : > { %928 = vrot.lane.b32.xlu2 %v5004_v44, %s4798_s26 }
  0xac   : > { %942 = vrot.lane.b32.xlu1 %v5004_v44, %s8138_s27  ;;  %930 = vrot.lane.b32.xlu0 %v5010_v48, %s4798_s26  ;;  %s4800_s26 = smov 30  }
  0xad   : > { %944 = vrot.lane.b32.xlu2 %v5010_v48, %s8138_s27 }
  0xaf   : > { %v1048_v57 = vpop.permute.xlu2 %1047 }
  0xb4   : > { %923 = vrot.lane.b32.xlu1 %v5010_v48, %s4800_s26  ;;  %921 = vrot.lane.b32.xlu0 %v5004_v44, %s4800_s26  ;;  %s801_s26 = scalar_lea.vmem %s8177_s24, %s5338_s4  ;;  %s5881_s24 = scalar_lea.vmem %s8097_s18, %s5338_s4 }
  0xb5   : > { %935 = vrot.lane.b32.xlu2 %v5004_v44, %s8134_s3 }
  0xb7   : > { %v1050_v60 = vpop.permute.xlu2 %1049 }
  0xb8   : > { %v1052_v28 = vsel %vm1051_vm5, %v1048_v57, %v1050_v60  ;;  %v1053_v29 = vsel %vm1051_vm5, %v1050_v60, %v1048_v57  ;;  %vm932_vm5 = vcmp.lt.s32.totalorder %v5084_v4, 18 }
  0xb9   : > { %v1145_v35 = vrot.slane %v1052_v28, 4  ;;  %v1146_v36 = vrot.slane %v1053_v29, 4 }
  0xbc   : > { %900 = vrot.lane.b32.xlu1 %v5004_v44, %s4802_s29  ;;  %937 = vrot.lane.b32.xlu0 %v5010_v48, %s8134_s3 }
  0xbd   : > { %902 = vrot.lane.b32.xlu2 %v5010_v48, %s4802_s29  ;;  %s8247_s29 = smov 111  }
  0xbf   : > { %v1041_v61 = vpop.permute.xlu2 %1040 }
  0xc4   : > { %916 = vrot.lane.b32.xlu1 %v5010_v48, %s4803_s30  ;;  %914 = vrot.lane.b32.xlu0 %v5004_v44, %s4803_s30 }
  0xc5   : > { %891 = vrot.lane.b32.xlu2 %v5004_v44, %s4804_s22 }
  0xc6   : > { %v1034_v63 = vpop.permute.xlu1 %1033  ;;  %v1055_v0 = vpop.permute.xlu0 %1054 }
  0xc7   : > { %v5082_v1 = vpop.permute.xlu2 %1007 }
  0xcc   : > { %907 = vrot.lane.b32.xlu1 %v5004_v44, %s4805_s0  ;;  %893 = vrot.lane.b32.xlu0 %v5010_v48, %s4804_s22  ;;  %s8405_s22 = sld [smem:[#allocation32_spill]] }
  0xcd   : > { %909 = vrot.lane.b32.xlu2 %v5010_v48, %s4805_s0 }
  0xce   : > { %v1036_v7 = vpop.permute.xlu1 %1035  ;;  %v1057_v8 = vpop.permute.xlu0 %1056 }
  0xcf   : > { %v1059_v11 = vsel %vm1058_vm3, %v1055_v0, %v1057_v8  ;;  %v1060_v12 = vsel %vm1058_vm3, %v1057_v8, %v1055_v0  ;;  %v5102_v15 = vpop.permute.xlu2 %998  ;;  %v1038_v26 = vsel %vm1037_vm4, %v1034_v63, %v1036_v7  ;;  %v1039_v27 = vsel %vm1037_vm4, %v1036_v7, %v1034_v63  ;;  %v1175_v0 = vld [vmem:[%s8086_s7 + $0x80] sm:$0xff] }
  0xd0   : > { %v1157_v16 = vsel %vm8116_vm0, %v1059_v11, 0.0  ;;  %v1158_v17 = vsel %vm8116_vm0, %v1060_v12, 0.0  ;;  %v1139_v32 = vrot.slane %v1038_v26, 4  ;;  %v1140_v33 = vrot.slane %v1039_v27, 4  ;;  %v1176_v11 = vld [vmem:[%s8086_s7 + $0x88] sm:$0xff]  ;;  %v1178_v12 = vld [vmem:[%s8086_s7 + $0x98] sm:$0xff] }
  0xd1   : > { %v1215_v18 = vmul.f32 %v1183_v9, %v1157_v16  ;;  %v1216_v20 = vmul.f32 %v1184_v10, %v1158_v17  ;;  %vm974_vm3 = vcmp.lt.s32.totalorder %v5084_v4, 1  ;;  %vm967_vm4 = vcmp.lt.s32.totalorder %v5084_v4, 2 }
  0xd3   : > { %v1235_v21 = vpack.c.bf16 %v1217_v13, %v1215_v18  ;;  %v1236_v22 = vpack.c.bf16 %v1218_v14, %v1216_v20 }
  0xd5   : > { %1276 = vmatpush.bf16.msra.mxu0 %v1235_v21  ;;  %1295 = vmatpush.bf16.msra.mxu1 %v1236_v22 }
  0xd6   : > { %v1029_v23 = vpop.permute.xlu1 %1028  ;;  %v1027_v24 = vpop.permute.xlu0 %1026 }
  0xd7   : > { %v1015_v25 = vpop.permute.xlu2 %1014  ;;  %v1031_v30 = vsel %vm1030_vm6, %v1027_v24, %v1029_v23  ;;  %v1032_v31 = vsel %vm1030_vm6, %v1029_v23, %v1027_v24  ;;  %vm8133_vm6 = vcmp.lt.s32.totalorder %v5084_v4, 16 }
  0xd8   : > { %v1153_v39 = vsel %vm8116_vm0, %v1031_v30, %v1139_v32  ;;  %v1154_v41 = vsel %vm8116_vm0, %v1032_v31, %v1140_v33 }
  0xd9   : > { %v1211_v50 = vmul.f32 %v1179_v34, %v1153_v39  ;;  %v1212_v52 = vmul.f32 %v1180_v42, %v1154_v41  ;;  %v1171_v39 = vld [vmem:[%s8086_s7 + $0x60] sm:$0xff] }
  0xde   : > { %v1006_v37 = vpop.permute.xlu1 %1005  ;;  %v1043_v38 = vpop.permute.xlu0 %1042 }
  0xdf   : > { %v1045_v45 = vsel %vm1044_vm7, %v1041_v61, %v1043_v38  ;;  %v1046_v46 = vsel %vm1044_vm7, %v1043_v38, %v1041_v61  ;;  %v992_v54 = vpop.permute.xlu2 %991  ;;  %v1010_v59 = vsel %vm8131_vm8, %v1006_v37, %v5082_v1  ;;  %v1011_v60 = vsel %vm8131_vm8, %v5082_v1, %v1006_v37 }
  0xe0   : > { %v1155_v47 = vsel %vm8116_vm0, %v1045_v45, %v1145_v35  ;;  %v1156_v49 = vsel %vm8116_vm0, %v1046_v46, %v1146_v36  ;;  %v1127_v6 = vrot.slane %v1010_v59, 4  ;;  %v1128_v7 = vrot.slane %v1011_v60, 4  ;;  %v1173_v45 = vld [vmem:[%s8086_s7 + $0x70] sm:$0xff] }
  0xe1   : > { %v1213_v51 = vmul.f32 %v1181_v40, %v1155_v47  ;;  %v1214_v53 = vmul.f32 %v1182_v43, %v1156_v49  ;;  %v1172_v47 = vld [vmem:[%s8086_s7 + $0x68] sm:$0xff]  ;;  %v1174_v49 = vld [vmem:[%s8086_s7 + $0x78] sm:$0xff]  ;;  %vm925_vm7 = vcmp.lt.s32.totalorder %v5084_v4, 30 }
  0xe3   : > { %v1233_v55 = vpack.c.bf16 %v1213_v51, %v1211_v50  ;;  %v1234_v56 = vpack.c.bf16 %v1214_v53, %v1212_v52 }
  0xe5   : > { %1277 = vmatpush.bf16.msra.mxu0 %v1233_v55  ;;  %1296 = vmatpush.bf16.msra.mxu1 %v1234_v56 }
  0xe6   : > { %v1022_v57 = vpop.permute.xlu1 %1021  ;;  %v1020_v58 = vpop.permute.xlu0 %1019 }
  0xe7   : > { %v1024_v61 = vsel %vm1023_vm9, %v1020_v58, %v1022_v57  ;;  %v1025_v62 = vsel %vm1023_vm9, %v1022_v57, %v1020_v58  ;;  %v987_v63 = vpop.permute.xlu2 %986  ;;  %vm8130_vm9 = vcmp.lt.s32.totalorder %v5084_v4, 17 }
  0xe8   : > { %v1133_v8 = vrot.slane %v1024_v61, 4  ;;  %v1134_v9 = vrot.slane %v1025_v62, 4 }
  0xee   : > { %v1013_v1 = vpop.permute.xlu1 %1012  ;;  %v1001_v10 = vpop.permute.xlu0 %1000 }
  0xef   : > { %v1017_v13 = vsel %vm8120_vm10, %v1013_v1, %v1015_v25  ;;  %v1018_v14 = vsel %vm8120_vm10, %v1015_v25, %v1013_v1  ;;  %v1003_v16 = vsel %vm1002_vm11, %v5102_v15, %v1001_v10  ;;  %v1004_v17 = vsel %vm1002_vm11, %v1001_v10, %v5102_v15  ;;  %v971_v29 = vpop.permute.xlu2 %970 }
  0xf0   : > { %v1149_v18 = vsel %vm8116_vm0, %v1003_v16, %v1127_v6  ;;  %v1151_v20 = vsel %vm8116_vm0, %v1017_v13, %v1133_v8  ;;  %v1150_v21 = vsel %vm8116_vm0, %v1004_v17, %v1128_v7  ;;  %v1152_v22 = vsel %vm8116_vm0, %v1018_v14, %v1134_v9 }
  0xf1   : > { %v1207_v23 = vmul.f32 %v1175_v0, %v1149_v18  ;;  %v1209_v24 = vmul.f32 %v1177_v5, %v1151_v20  ;;  %v1208_v26 = vmul.f32 %v1176_v11, %v1150_v21  ;;  %v1210_v25 = vmul.f32 %v1178_v12, %v1152_v22  ;;  %v1167_v11 = vld [vmem:[%s8086_s7 + $0x40] sm:$0xff]  ;;  %v1168_v12 = vld [vmem:[%s8086_s7 + $0x48] sm:$0xff]  ;;  %v1169_v20 = vld [vmem:[%s8086_s7 + $0x50] sm:$0xff] }
  0xf2   : > { %v1170_v22 = vld [vmem:[%s8086_s7 + $0x58] sm:$0xff] }
  0xf3   : > { %v1231_v27 = vpack.c.bf16 %v1209_v24, %v1207_v23  ;;  %v1232_v28 = vpack.c.bf16 %v1210_v25, %v1208_v26  ;;  %v4806_v23 = vmov 0   ;;  %v890_v24 = vld [vmem:[%s8091_s12 + $0x18] sm:$0xff] }
  0xf4   : > { %4450 = vset.pattern.permute.xlu1 %v4806_v23  ;;  %4449 = vset.pattern.permute.xlu0 %v4806_v23 }
  0xf5   : > { %1278 = vmatpush.bf16.msra.mxu0 %v1231_v27  ;;  %1297 = vmatpush.bf16.msra.mxu1 %v1232_v28 }
  0xf6   : > { %v980_v30 = vpop.permute.xlu1 %979  ;;  %v978_v15 = vpop.permute.xlu0 %977  ;;  %1260 = vperm.xlu1 %4450, %v890_v24   ;;  %4451 = vset.pattern.permute.xlu2 %v4806_v23 }
  0xf7   : > { %v982_v31 = vsel %vm8132_vm12, %v978_v15, %v980_v30  ;;  %v983_v32 = vsel %vm8132_vm12, %v980_v30, %v978_v15  ;;  %v952_v40 = vpop.permute.xlu2 %951 }
  0xf8   : > { %v1099_v33 = vrot.slane %v982_v31, 4  ;;  %v1100_v34 = vrot.slane %v983_v32, 4 }
  0xfa   : > { %v1121_v43 = vsel %vm8116_vm0, %v5004_v44, %v1099_v33  ;;  %v1122_v46 = vsel %vm8116_vm0, %v5010_v48, %v1100_v34 }
  0xfb   : > { %v1203_v53 = vmul.f32 %v1171_v39, %v1121_v43  ;;  %v1204_v55 = vmul.f32 %v1172_v47, %v1122_v46  ;;  %v1385_v39 = vld [vmem:[%s8093_s14] sm:$0xff]  ;;  %v1388_v43 = vld [vmem:[%s8093_s14 + $0x18] sm:$0xff] }
  0xfc   : > { %v887_v47 = vld [vmem:[%s8091_s12] sm:$0xff] }
  0xfd   : > { %1245 = vperm.xlu2 %4451, %v887_v47  }
  0xfe   : > { %v985_v35 = vpop.permute.xlu1 %984  ;;  %v994_v36 = vpop.permute.xlu0 %993 }
  0xff   : > { %v996_v37 = vsel %vm995_vm13, %v992_v54, %v994_v36  ;;  %v997_v38 = vsel %vm995_vm13, %v994_v36, %v992_v54  ;;  %v989_v50 = vsel %vm988_vm14, %v985_v35, %v987_v63  ;;  %v990_v51 = vsel %vm988_vm14, %v987_v63, %v985_v35  ;;  %v929_v60 = vpop.permute.xlu2 %928 }
 0x100   : > { %v1105_v41 = vrot.slane %v996_v37, 4  ;;  %v1106_v42 = vrot.slane %v997_v38, 4  ;;  %v888_v37 = vld [vmem:[%s8091_s12 + $0x8] sm:$0xff]  ;;  %v889_v38 = vld [vmem:[%s8091_s12 + $0x10] sm:$0xff]  ;;  %vm904_vm13 = vcmp.lt.s32.totalorder %v5084_v4, 33  ;;  %vm918_vm14 = vcmp.lt.s32.totalorder %v5084_v4, 31 }
 0x101   : > { %1250 = vperm.xlu1 %4450, %v888_v37   ;;  %1255 = vperm.xlu0 %4449, %v889_v38   ;;  %v1834_v37 = vld [vmem:[%s8095_s16 + $0x10] sm:$0xff] }
 0x102   : > { %v1123_v52 = vsel %vm8116_vm0, %v989_v50, %v1105_v41  ;;  %v1124_v44 = vsel %vm8116_vm0, %v990_v51, %v1106_v42 }
 0x103   : > { %v1205_v54 = vmul.f32 %v1173_v45, %v1123_v52  ;;  %v1206_v56 = vmul.f32 %v1174_v49, %v1124_v44 }
 0x105   : > { %v1229_v57 = vpack.c.bf16 %v1205_v54, %v1203_v53  ;;  %v1230_v48 = vpack.c.bf16 %v1206_v56, %v1204_v55  ;;  %v1392_v54 = vld [vmem:[%s8093_s14 + $0x38] sm:$0xff]  ;;  %v1163_v55 = vld [vmem:[%s8086_s7 + $0x20] sm:$0xff]  ;;  %v1164_v56 = vld [vmem:[%s8086_s7 + $0x28] sm:$0xff] }
 0x106   : > { %v959_v58 = vpop.permute.xlu1 %958  ;;  %v957_v59 = vpop.permute.xlu0 %956 }
 0x107   : > { %1279 = vmatpush.bf16.msra.mxu0 %v1229_v57  ;;  %1298 = vmatpush.bf16.msra.mxu1 %v1230_v48  ;;  %v961_v63 = vsel %vm960_vm15, %v957_v59, %v959_v58  ;;  %v962_v0 = vsel %vm960_vm15, %v959_v58, %v957_v59  ;;  %v945_v9 = vpop.permute.xlu2 %944  ;;  %vm911_vm15 = vcmp.lt.s32.totalorder %v5084_v4, 32 }
 0x108   : > { %v1087_v1 = vrot.slane %v962_v0, 4  ;;  %v1088_v10 = vrot.slane %v961_v63, 4  ;;  %v1166_v63 = vld [vmem:[%s8086_s7 + $0x38] sm:$0xff]  ;;  %v1391_v0 = vld [vmem:[%s8093_s14 + $0x30] sm:$0xff] }
 0x109   : > { %1395 = vperm.xlu1 %4450, %v1385_v39   ;;  %1410 = vperm.xlu0 %4449, %v1388_v43  }
 0x10e   : > { %v950_v61 = vpop.permute.xlu1 %949  ;;  %v973_v62 = vpop.permute.xlu0 %972 }
 0x10f   : > { %v954_v5 = vsel %vm953_vm2, %v950_v61, %v952_v40  ;;  %v955_v6 = vsel %vm953_vm2, %v952_v40, %v950_v61  ;;  %v975_v7 = vsel %vm974_vm3, %v971_v29, %v973_v62  ;;  %v976_v8 = vsel %vm974_vm3, %v973_v62, %v971_v29  ;;  %v936_v34 = vpop.permute.xlu2 %935  ;;  %v1165_v61 = vld [vmem:[%s8086_s7 + $0x30] sm:$0xff] }
 0x110   : > { %v1093_v13 = vrot.slane %v976_v8, 4  ;;  %v1094_v14 = vrot.slane %v975_v7, 4  ;;  %v1117_v18 = vsel %vm8116_vm0, %v955_v6, %v1087_v1  ;;  %v1118_v21 = vsel %vm8116_vm0, %v954_v5, %v1088_v10 }
 0x111   : > { %v1199_v29 = vmul.f32 %v1167_v11, %v1117_v18  ;;  %v1200_v15 = vmul.f32 %v1168_v12, %v1118_v21  ;;  %1430 = vperm.xlu1 %4450, %v1392_v54   ;;  %1425 = vperm.xlu0 %4449, %v1391_v0   ;;  %v1387_v21 = vld [vmem:[%s8093_s14 + $0x10] sm:$0xff]  ;;  %v4354_v54 = vld [vmem:[%s8088_s9] sm:$0xff]  ;;  %v5350_v0 = vld [vmem:[%s801_s26 + $0x38] sm:$0xff] }
 0x112   : > { %1405 = vperm.xlu2 %4451, %v1387_v21   ;;  %8179 = vst [vmem:[#allocation22_spill] sm:$0xff] %v5350_v0 }
 0x116   : > { %v966_v16 = vpop.permute.xlu1 %965  ;;  %v964_v17 = vpop.permute.xlu0 %963 }
 0x117   : > { %v968_v26 = vsel %vm967_vm4, %v964_v17, %v966_v16  ;;  %v969_v25 = vsel %vm967_vm4, %v966_v16, %v964_v17  ;;  %v903_v42 = vpop.permute.xlu2 %902  ;;  %v4192_v16 = vld [vmem:[%s8095_s16 + $0x30] sm:$0xff]  ;;  %vm897_vm4 = vcmp.lt.s32.totalorder %v5084_v4, 34 }
 0x118   : > { %v1119_v27 = vsel %vm8116_vm0, %v969_v25, %v1093_v13  ;;  %v1120_v28 = vsel %vm8116_vm0, %v968_v26, %v1094_v14 }
 0x119   : > { %v1201_v30 = vmul.f32 %v1169_v20, %v1119_v27  ;;  %v1202_v31 = vmul.f32 %v1170_v22, %v1120_v28  ;;  %1933 = vperm.xlu1 %4450, %v4192_v16   ;;  %v1390_v20 = vld [vmem:[%s8093_s14 + $0x28] sm:$0xff]  ;;  %v1835_v27 = vld [vmem:[%s8095_s16 + $0x18] sm:$0xff]  ;;  %v1159_v28 = vld [vmem:[%s8086_s7] sm:$0xff] }
 0x11a   : > { %1420 = vperm.xlu0 %4449, %v1390_v20  }
 0x11b   : > { %v1227_v32 = vpack.c.bf16 %v1201_v30, %v1199_v29  ;;  %v1228_v33 = vpack.c.bf16 %v1202_v31, %v1200_v15  ;;  %v1161_v29 = vld [vmem:[%s8086_s7 + $0x10] sm:$0xff]  ;;  %v1160_v30 = vld [vmem:[%s8086_s7 + $0x8] sm:$0xff] }
 0x11d   : > { %1280 = vmatpush.bf16.msra.mxu0 %v1227_v32  ;;  %1299 = vmatpush.bf16.msra.mxu1 %v1228_v33 }
 0x11e   : > { %v943_v35 = vpop.permute.xlu1 %942  ;;  %v931_v36 = vpop.permute.xlu0 %930 }
 0x11f   : > { %v933_v45 = vsel %vm932_vm5, %v929_v60, %v931_v36  ;;  %v934_v46 = vsel %vm932_vm5, %v931_v36, %v929_v60  ;;  %v947_v49 = vsel %vm8133_vm6, %v943_v35, %v945_v9  ;;  %v948_v50 = vsel %vm8133_vm6, %v945_v9, %v943_v35  ;;  %v892_v12 = vpop.permute.xlu2 %891  ;;  %v1162_v36 = vld [vmem:[%s8086_s7 + $0x18] sm:$0xff] }
 0x120   : > { %v1075_v44 = vrot.slane %v934_v46, 4  ;;  %v1076_v53 = vrot.slane %v933_v45, 4  ;;  %v1081_v57 = vrot.slane %v948_v50, 4  ;;  %v1082_v48 = vrot.slane %v947_v49, 4 }
 0x121   : > { %1853 = vperm.xlu1 %4450, %v1835_v27   ;;  %vm8118_vm5 = vcmask 523264  }
 0x122   : > { %1848 = vperm.xlu0 %4449, %v1834_v37  }
 0x126   : > { %v924_v40 = vpop.permute.xlu1 %923  ;;  %v922_v41 = vpop.permute.xlu0 %921 }
 0x127   : > { %v926_v51 = vsel %vm925_vm7, %v922_v41, %v924_v40  ;;  %v927_v52 = vsel %vm925_vm7, %v924_v40, %v922_v41  ;;  %v910_v25 = vpop.permute.xlu2 %909  ;;  %vm8119_vm7 = vcmask 261120  }
 0x128   : > { %v1113_v60 = vsel %vm8116_vm0, %v927_v52, %v1075_v44  ;;  %v1114_v62 = vsel %vm8116_vm0, %v926_v51, %v1076_v53 }
 0x129   : > { %v1195_v9 = vmul.f32 %v1163_v55, %v1113_v60  ;;  %v1196_v10 = vmul.f32 %v1164_v56, %v1114_v62  ;;  %v1832_v55 = vld [vmem:[%s8095_s16] sm:$0xff]  ;;  %v4191_v56 = vld [vmem:[%s8095_s16 + $0x28] sm:$0xff] }
 0x12a   : > { %1838 = vperm.xlu1 %4450, %v1832_v55   ;;  %1928 = vperm.xlu0 %4449, %v4191_v56   ;;  %v1833_v60 = vld [vmem:[%s8095_s16 + $0x8] sm:$0xff] }
 0x12b   : > { %v5346_v62 = vld [vmem:[%s801_s26 + $0x28] sm:$0xff] }
 0x12e   : > { %v901_v58 = vpop.permute.xlu1 %900  ;;  %v938_v59 = vpop.permute.xlu0 %937 }
 0x12f   : > { %v940_v5 = vsel %vm8130_vm9, %v936_v34, %v938_v59  ;;  %v941_v6 = vsel %vm8130_vm9, %v938_v59, %v936_v34  ;;  %v905_v22 = vsel %vm904_vm13, %v901_v58, %v903_v42  ;;  %v906_v23 = vsel %vm904_vm13, %v903_v42, %v901_v58  ;;  %v1386_v42 = vld [vmem:[%s8093_s14 + $0x8] sm:$0xff]  ;;  %v4190_v59 = vld [vmem:[%s8095_s16 + $0x20] sm:$0xff] }
 0x130   : > { %v1115_v7 = vsel %vm8116_vm0, %v941_v6, %v1081_v57  ;;  %v1116_v8 = vsel %vm8116_vm0, %v940_v5, %v1082_v48  ;;  %v1063_v15 = vrot.slane %v906_v23, 4  ;;  %v1064_v31 = vrot.slane %v905_v22, 4  ;;  %1400 = vperm.xlu2 %4451, %v1386_v42   ;;  %v1389_v57 = vld [vmem:[%s8093_s14 + $0x20] sm:$0xff]  ;;  %v4193_v48 = vld [vmem:[%s8095_s16 + $0x38] sm:$0xff]  ;;  %v4355_v58 = vld [vmem:[%s8088_s9 + $0x8] sm:$0xff] }
 0x131   : > { %v1197_v1 = vmul.f32 %v1165_v61, %v1115_v7  ;;  %v1198_v11 = vmul.f32 %v1166_v63, %v1116_v8  ;;  %v5344_v61 = vld [vmem:[%s801_s26 + $0x20] sm:$0xff]  ;;  %v5348_v63 = vld [vmem:[%s801_s26 + $0x30] sm:$0xff] }
 0x132   : > { %8178 = vst [vmem:[#allocation21_spill] sm:$0xff] %v5348_v63  ;;  %v1335_v5 = vpack.c.bf16 %v5346_v62, %v5344_v61  ;;  %v1336_v6 = vpack.c.bf16 %v5350_v0, %v5348_v63 }
 0x133   : > { %v1225_v13 = vpack.c.bf16 %v1197_v1, %v1195_v9  ;;  %v1226_v14 = vpack.c.bf16 %v1198_v11, %v1196_v10  ;;  %v5356_v10 = vld [vmem:[%s801_s26] sm:$0xff]  ;;  %v5358_v11 = vld [vmem:[%s801_s26 + $0x8] sm:$0xff] }
 0x134   : > { %v1365_v7 = vunpack.c.l.b16 %v1335_v5  ;;  %v1366_v8 = vunpack.c.h.b16 %v1335_v5  ;;  %v1367_v9 = vunpack.c.l.b16 %v1336_v6  ;;  %v1368_v1 = vunpack.c.h.b16 %v1336_v6 }
 0x135   : > { %1281 = vmatpush.bf16.msra.mxu0 %v1225_v13  ;;  %1300 = vmatpush.bf16.msra.mxu1 %v1226_v14  ;;  %v5362_v13 = vld [vmem:[%s801_s26 + $0x18] sm:$0xff]  ;;  %v1333_v14 = vpack.c.bf16 %v5358_v11, %v5356_v10 }
 0x136   : > { %v917_v17 = vpop.permute.xlu1 %916  ;;  %v915_v18 = vpop.permute.xlu0 %914  ;;  %v5366_v16 = vpack.c.b16 %v1367_v9, %v1365_v7 }
 0x137   : > { %v919_v24 = vsel %vm918_vm14, %v915_v18, %v917_v17  ;;  %v920_v26 = vsel %vm918_vm14, %v917_v17, %v915_v18  ;;  %v5368_v17 = vpack.c.b16 %v1368_v1, %v1366_v8  ;;  %v1361_v20 = vunpack.c.l.b16 %v1333_v14 }
 0x138   : > { %v1069_v32 = vrot.slane %v920_v26, 4  ;;  %v1070_v33 = vrot.slane %v919_v24, 4  ;;  %1415 = vperm.xlu2 %4451, %v1389_v57   ;;  %v1362_v21 = vunpack.c.h.b16 %v1333_v14  ;;  %1470 = vmatpush.bf16.msra.mxu2 %v5366_v16 }
 0x139   : > { %1499 = vmatpush.bf16.msra.mxu3 %v5368_v17 }
 0x13e   : > { %v908_v34 = vpop.permute.xlu1 %907  ;;  %v894_v35 = vpop.permute.xlu0 %893 }
 0x13f   : > { %v912_v38 = vsel %vm911_vm15, %v908_v34, %v910_v25  ;;  %v913_v39 = vsel %vm911_vm15, %v910_v25, %v908_v34  ;;  %v898_v40 = vsel %vm897_vm4, %v892_v12, %v894_v35  ;;  %v899_v41 = vsel %vm897_vm4, %v894_v35, %v892_v12  ;;  %v5360_v12 = vld [vmem:[%s801_s26 + $0x10] sm:$0xff]  ;;  %s8343_s26 = smov 127  }
 0x140   : > { %v1109_v43 = vsel %vm8116_vm0, %v899_v41, %v1063_v15  ;;  %v1111_v45 = vsel %vm8116_vm0, %v913_v39, %v1069_v32  ;;  %v1110_v46 = vsel %vm8116_vm0, %v898_v40, %v1064_v31  ;;  %v1112_v47 = vsel %vm8116_vm0, %v912_v38, %v1070_v33  ;;  %1938 = vperm.xlu2 %4451, %v4193_v48  }
 0x141   : > { %v1191_v49 = vmul.f32 %v1159_v28, %v1109_v43  ;;  %v1193_v50 = vmul.f32 %v1161_v29, %v1111_v45  ;;  %v1192_v51 = vmul.f32 %v1160_v30, %v1110_v46  ;;  %v1194_v52 = vmul.f32 %v1162_v36, %v1112_v47 }
 0x142   : > { %v1334_v18 = vpack.c.bf16 %v5362_v13, %v5360_v12 }
 0x143   : > { %v1223_v44 = vpack.c.bf16 %v1193_v50, %v1191_v49  ;;  %v1224_v53 = vpack.c.bf16 %v1194_v52, %v1192_v51 }
 0x144   : > { %v1363_v22 = vunpack.c.l.b16 %v1334_v18  ;;  %v1364_v23 = vunpack.c.h.b16 %v1334_v18 }
 0x145   : > { %1282 = vmatpush.bf16.msra.mxu0 %v1223_v44  ;;  %1301 = vmatpush.bf16.msra.mxu1 %v1224_v53 }
 0x146   : > { %v5374_v24 = vpack.c.b16 %v1363_v22, %v1361_v20  ;;  %v5376_v26 = vpack.c.b16 %v1364_v23, %v1362_v21  ;;  %v4356_v20 = vld [vmem:[%s8092_s13] sm:$0xff]  ;;  %v4357_v22 = vld [vmem:[%s8092_s13 + $0x8] sm:$0xff]  ;;  %v4359_v23 = vld [vmem:[%s8092_s13 + $0x18] sm:$0xff] }
 0x147   : > { %v4360_v21 = vld [vmem:[%s8094_s15] sm:$0xff] }
 0x148   : > { %1283 = vmatmul.bf16.vlgmr.msra.gmra.mxu0 %v4354_v54  ;;  %1302 = vmatmul.bf16.vlgmr.msra.gmra.mxu1 %v4354_v54 }
 0x149   : > { %1923 = vperm.xlu2 %4451, %v4190_v59   ;;  %1471 = vmatpush.bf16.msra.mxu2 %v5374_v24 }
 0x14a   : > { %1500 = vmatpush.bf16.msra.mxu3 %v5376_v26 }
 0x151   : > { %1843 = vperm.xlu2 %4451, %v1833_v60  }
 0x157   : > { %v1246_v36 = vpop.permute.xlu2 %1245 }
 0x158   : > { %1288 = vmatmul.bf16.gmra.mxu0 %v4355_v58  ;;  %1307 = vmatmul.bf16.gmra.mxu1 %v4355_v58 }
 0x168   : > { %v1261_v30 = vpop.permute.xlu1 %1260 }
 0x173   : > { %v1256_v32 = vpop.permute.xlu0 %1255  ;;  %v1251_v35 = vpop.permute.xlu1 %1250 }
 0x1c5   : > { %v1284_v25 = vpop.f32.mrf.mxu0  ;;  %v1303_v27 = vpop.f32.mrf.mxu1 }
 0x1c6   : > { %v1285_v39 = vadd.f32 %v1284_v25, %v1246_v36  ;;  %v1304_v40 = vadd.f32 %v1303_v27, %v1246_v36  ;;  %v1406_v25 = vpop.permute.xlu2 %1405  ;;  %v1396_v27 = vpop.permute.xlu1 %1395 }
 0x1c7   : > { %v1411_v36 = vpop.permute.xlu0 %1410 }
 0x1c8   : > { %v1313_v51 = vmax.f32 %v1285_v39, 0.0  ;;  %v1314_v52 = vmax.f32 %v1304_v40, 0.0 }
 0x1ca   : > { %v1329_v57 = vpack.c.bf16 %v1314_v52, %v1313_v51 }
 0x1cc   : > { %v1341_v9 = vunpack.c.l.b16 %v1329_v57  ;;  %v1342_v1 = vunpack.c.h.b16 %v1329_v57 }
 0x1cd   : > { %v1286_v28 = vpop.f32.mrf.mxu0  ;;  %v1305_v29 = vpop.f32.mrf.mxu1 }
 0x1ce   : > { %v1287_v37 = vadd.f32 %v1286_v28, %v1251_v35  ;;  %v1306_v38 = vadd.f32 %v1305_v29, %v1251_v35  ;;  %v1401_v28 = vpop.permute.xlu2 %1400 }
 0x1cf   : > { %v5432_v51 = vpop.permute.xlu0 %1425 }
 0x1d0   : > { %v1315_v46 = vmax.f32 %v1287_v37, 0.0  ;;  %v1316_v47 = vmax.f32 %v1306_v38, 0.0 }
 0x1d2   : > { %v1330_v55 = vpack.c.bf16 %v1316_v47, %v1315_v46 }
 0x1d4   : > { %v1343_v7 = vunpack.c.l.b16 %v1330_v55  ;;  %v1344_v8 = vunpack.c.h.b16 %v1330_v55 }
 0x1d5   : > { %v1289_v15 = vpop.f32.mrf.mxu0  ;;  %v1308_v31 = vpop.f32.mrf.mxu1 }
 0x1d6   : > { %v1290_v33 = vadd.f32 %v1289_v15, %v1256_v32  ;;  %v1309_v34 = vadd.f32 %v1308_v31, %v1256_v32  ;;  %v1349_v14 = vpack.c.b16 %v1343_v7, %v1341_v9  ;;  %v1350_v18 = vpack.c.b16 %v1344_v8, %v1342_v1  ;;  %v5424_v15 = vpop.permute.xlu1 %1430 }
 0x1d8   : > { %v1317_v41 = vmax.f32 %v1290_v33, 0.0  ;;  %v1318_v42 = vmax.f32 %v1309_v34, 0.0  ;;  %v5426_v33 = vpop.permute.xlu2 %1415 }
 0x1da   : > { %v1331_v44 = vpack.c.bf16 %v1318_v42, %v1317_v41 }
 0x1dc   : > { %v1345_v48 = vunpack.c.l.b16 %v1331_v44  ;;  %v1346_v59 = vunpack.c.h.b16 %v1331_v44 }
 0x1dd   : > { %v1291_v43 = vpop.f32.mrf.mxu0  ;;  %v1310_v45 = vpop.f32.mrf.mxu1 }
 0x1de   : > { %v1292_v49 = vadd.f32 %v1291_v43, %v1261_v30  ;;  %v1311_v50 = vadd.f32 %v1310_v45, %v1261_v30  ;;  %v5428_v43 = vpop.permute.xlu1 %1933 }
 0x1e0   : > { %v1319_v53 = vmax.f32 %v1292_v49, 0.0  ;;  %v1320_v54 = vmax.f32 %v1311_v50, 0.0  ;;  %v5430_v49 = vpop.permute.xlu2 %1938 }
 0x1e2   : > { %v1332_v56 = vpack.c.bf16 %v1320_v54, %v1319_v53 }
 0x1e4   : > { %v1347_v58 = vunpack.c.l.b16 %v1332_v56  ;;  %v1348_v60 = vunpack.c.h.b16 %v1332_v56 }
 0x1e6   : > { %v1351_v5 = vpack.c.b16 %v1347_v58, %v1345_v48  ;;  %v1352_v6 = vpack.c.b16 %v1348_v60, %v1346_v59  ;;  %v5440_v59 = vpop.permute.xlu1 %1853 }
 0x1e8   : > { %1472 = vmatpush.bf16.msra.mxu2 %v1351_v5  ;;  %1501 = vmatpush.bf16.msra.mxu3 %v1352_v6 }
 0x1e9   : > { %1879 = vmatpush.bf16.msrb.mxu0 %v1351_v5  ;;  %1898 = vmatpush.bf16.msrb.mxu1 %v1352_v6  ;;  %v5442_v6 = vpop.permute.xlu2 %1923 }
 0x1ec   : > { %1473 = vmatpush.bf16.msra.mxu2 %v1349_v14  ;;  %1502 = vmatpush.bf16.msra.mxu3 %v1350_v18 }
 0x1ed   : > { %1880 = vmatpush.bf16.msrb.mxu0 %v1349_v14  ;;  %1899 = vmatpush.bf16.msrb.mxu1 %v1350_v18  ;;  %v5446_v14 = vpop.permute.xlu0 %1420 }
 0x1ef   : > { %4150 = vmatmul.msk.bf16.vlgmr.msra.gmra.mxu2 %vm8118_vm5, %v4356_v20  ;;  %4154 = vmatmul.msk.bf16.vlgmr.msra.gmra.mxu3 %vm8118_vm5, %v4356_v20 }
 0x1f0   : > { %1963 = vmatpush.bf16.msrb.mxu2 %v5366_v16  ;;  %1982 = vmatpush.bf16.msrb.mxu3 %v5368_v17  ;;  %v4361_v16 = vld [vmem:[%s8094_s15 + $0x8] sm:$0xff]  ;;  %v4358_v17 = vld [vmem:[%s8092_s13 + $0x10] sm:$0xff] }
 0x1f1   : > { %4182 = vmatmul.msk.bf16.vlgmr.msrb.gmra.mxu0 %vm8119_vm7, %v4360_v21  ;;  %4184 = vmatmul.msk.bf16.vlgmr.msrb.gmra.mxu1 %vm8119_vm7, %v4360_v21 }
 0x1f4   : > { %1964 = vmatpush.bf16.msrb.mxu2 %v5374_v24  ;;  %1983 = vmatpush.bf16.msrb.mxu3 %v5376_v26  ;;  %v4362_v24 = vld [vmem:[%s8094_s15 + $0x10] sm:$0xff]  ;;  %v4363_v26 = vld [vmem:[%s8094_s15 + $0x18] sm:$0xff] }
 0x1ff   : > { %4151 = vmatmul.msk.bf16.gmra.mxu2 %vm8118_vm5, %v4357_v22  ;;  %4155 = vmatmul.msk.bf16.gmra.mxu3 %vm8118_vm5, %v4357_v22 }
 0x201   : > { %4183 = vmatmul.msk.bf16.gmra.mxu0 %vm8119_vm7, %v4361_v16  ;;  %4185 = vmatmul.msk.bf16.gmra.mxu1 %vm8119_vm7, %v4361_v16 }
 0x20f   : > { %4152 = vmatmul.msk.bf16.gmra.mxu2 %vm8118_vm5, %v4358_v17  ;;  %4156 = vmatmul.msk.bf16.gmra.mxu3 %vm8118_vm5, %v4358_v17 }
 0x21f   : > { %4153 = vmatmul.msk.bf16.gmra.mxu2 %vm8118_vm5, %v4359_v23  ;;  %4157 = vmatmul.msk.bf16.gmra.mxu3 %vm8118_vm5, %v4359_v23 }
 0x22f   : > { %4202 = vmatmul.msk.bf16.vlgmr.msrb.gmra.mxu2 %vm8119_vm7, %v4362_v24  ;;  %4204 = vmatmul.msk.bf16.vlgmr.msrb.gmra.mxu3 %vm8119_vm7, %v4362_v24 }
 0x23f   : > { %4203 = vmatmul.msk.bf16.gmra.mxu2 %vm8119_vm7, %v4363_v26  ;;  %4205 = vmatmul.msk.bf16.gmra.mxu3 %vm8119_vm7, %v4363_v26 }
 0x26e   : > { %v1882_v39 = vpop.f32.mrf.mxu0  ;;  %v1901_v40 = vpop.f32.mrf.mxu1 }
 0x272   : > { %v1475_v29 = vpop.f32.mrf.mxu2  ;;  %v1504_v30 = vpop.f32.mrf.mxu3 }
 0x273   : > { %v1476_v31 = vadd.f32 %v1475_v29, %v1396_v27  ;;  %v1505_v32 = vadd.f32 %v1504_v30, %v1396_v27  ;;  %v1839_v27 = vpop.permute.xlu1 %1838 }
 0x275   : > { %v4158_v34 = vmul.f32 -1.442695, %v1476_v31  ;;  %v4159_v35 = vmul.f32 -1.442695, %v1505_v32 }
 0x276   : > { %v1884_v56 = vpop.f32.mrf.mxu0  ;;  %v1903_v57 = vpop.f32.mrf.mxu1 }
 0x277   : > { %4452 = vpow2.f32 %v4158_v34 }
 0x278   : > { %4454 = vpow2.f32 %v4159_v35  ;;  %v1844_v35 = vpop.permute.xlu2 %1843 }
 0x27a   : > { %v1477_v37 = vpop.f32.mrf.mxu2  ;;  %v1506_v38 = vpop.f32.mrf.mxu3 }
 0x27b   : > { %v1478_v41 = vadd.f32 %v1477_v37, %v1401_v28  ;;  %v1507_v42 = vadd.f32 %v1506_v38, %v1401_v28  ;;  %v5462_v37 = vadd.f32 %v1882_v39, %v1839_v27 }
 0x27d   : > { %v4453_v45 = vpop.eup %4452  ;;  %v4160_v46 = vmul.f32 -1.442695, %v1478_v41  ;;  %v4161_v50 = vmul.f32 -1.442695, %v1507_v42 }
 0x27e   : > { %v4455_v47 = vpop.eup %4454  ;;  %v5434_v52 = vadd.f32 1.0, %v4453_v45  ;;  %v1887_v24 = vpop.f32.mrf.mxu0  ;;  %v5466_v45 = vadd.f32 %v1901_v40, %v1839_v27 }
 0x27f   : > { %v5436_v44 = vadd.f32 1.0, %v4455_v47  ;;  %4456 = vpow2.f32 %v4160_v46  ;;  %v1906_v26 = vpop.f32.mrf.mxu1  ;;  %v5468_v46 = vadd.f32 %v1884_v56, %v1844_v35  ;;  %v5470_v47 = vadd.f32 %v1903_v57, %v1844_v35 }
 0x280   : > { %4458 = vpow2.f32 %v4161_v50  ;;  %vm1561_vm13 = vweird.f32 %v5434_v52 }
 0x281   : > { %4460 = vrcp.f32 %v5434_v52  ;;  %vm1576_vm14 = vweird.f32 %v5436_v44 }
 0x282   : > { %v1480_v53 = vpop.f32.mrf.mxu2  ;;  %v1509_v54 = vpop.f32.mrf.mxu3  ;;  %4462 = vrcp.f32 %v5436_v44 }
 0x283   : > { %v1481_v55 = vadd.f32 %v1480_v53, %v1406_v25  ;;  %v1510_v58 = vadd.f32 %v1509_v54, %v1406_v25  ;;  %v1849_v53 = vpop.permute.xlu0 %1848 }
 0x284   : > { %v5481_v40 = vadd.f32 %v1906_v26, %v1849_v53 }
 0x285   : > { %v4162_v48 = vmul.f32 -1.442695, %v1481_v55  ;;  %v4457_v60 = vpop.eup %4456  ;;  %v4163_v7 = vmul.f32 -1.442695, %v1510_v58  ;;  %v1567_v55 = vand.u32 2147483648, %v5434_v52 }
 0x286   : > { %v4459_v5 = vpop.eup %4458  ;;  %v5448_v18 = vadd.f32 1.0, %v4457_v60 }
 0x287   : > { %4464 = vpow2.f32 %v4162_v48  ;;  %v5444_v1 = vpop.eup %4460  ;;  %v5452_v22 = vadd.f32 1.0, %v4459_v5 }
 0x288   : > { %v5450_v21 = vpop.eup %4462  ;;  %4466 = vpow2.f32 %v4163_v7  ;;  %v1557_v23 = vmul.f32 %v5444_v1, %v5434_v52  ;;  %v1580_v7 = vand.u32 2147483647, %v5436_v44  ;;  %vm1562_vm15 = vweird.f32 %v5444_v1 }
 0x289   : > { %4468 = vrcp.f32 %v5448_v18  ;;  %v1572_v25 = vmul.f32 %v5450_v21, %v5436_v44  ;;  %vm1577_vm0 = vweird.f32 %v5450_v21  ;;  %vm5525_vm5 = vmor %vm1561_vm13, %vm1562_vm15 }
 0x28a   : > { %v1482_v8 = vpop.f32.mrf.mxu2  ;;  %v1511_v9 = vpop.f32.mrf.mxu3  ;;  %4470 = vrcp.f32 %v5452_v22  ;;  %v1558_v32 = vsub.f32 1.0, %v1557_v23  ;;  %v1568_v23 = vor.u32 1.1754944e-38, %v1567_v55  ;;  %vm5510_vm1 = vcmp.eq.f32.partialorder %v1580_v7, 8.507059e+37  ;;  %vm5534_vm7 = vmor %vm1576_vm14, %vm1577_vm0 }
 0x28b   : > { %v1483_v20 = vadd.f32 %v1482_v8, %v1411_v36  ;;  %v1512_v29 = vadd.f32 %v1511_v9, %v1411_v36  ;;  %v1573_v42 = vsub.f32 1.0, %v1572_v25  ;;  %v1565_v36 = vand.u32 2147483647, %v5434_v52 }
 0x28c   : > { %v1559_v57 = vmul.f32 %v5444_v1, %v1558_v32  ;;  %v1582_v8 = vand.u32 2147483648, %v5436_v44  ;;  %vm1591_vm0 = vweird.f32 %v5448_v18  ;;  %vm1606_vm14 = vweird.f32 %v5452_v22 }
 0x28d   : > { %v4164_v16 = vmul.f32 -1.442695, %v1483_v20  ;;  %v4465_v17 = vpop.eup %4464  ;;  %v4165_v39 = vmul.f32 -1.442695, %v1512_v29  ;;  %v1574_v5 = vmul.f32 %v5450_v21, %v1573_v42  ;;  %v1889_v20 = vpop.f32.mrf.mxu0  ;;  %vm5494_vm4 = vcmp.eq.f32.partialorder %v1565_v36, 8.507059e+37 }
 0x28e   : > { %v5460_v28 = vadd.f32 1.0, %v4465_v17  ;;  %v4467_v34 = vpop.eup %4466  ;;  %v1560_v27 = vadd.f32 %v5444_v1, %v1559_v57  ;;  %v1597_v42 = vand.u32 2147483648, %v5448_v18 }
 0x28f   : > { %4472 = vpow2.f32 %v4164_v16  ;;  %v5473_v50 = vpop.eup %4468  ;;  %v5483_v56 = vadd.f32 1.0, %v4467_v34  ;;  %v1908_v16 = vpop.f32.mrf.mxu1  ;;  %v1575_v34 = vadd.f32 %v5450_v21, %v1574_v5 }
 0x290   : > { %4474 = vrcp.f32 %v5460_v28  ;;  %v5477_v48 = vpop.eup %4470  ;;  %v1587_v9 = vmul.f32 %v5473_v50, %v5448_v18  ;;  %v1564_v7 = vsel %vm5525_vm5, %v5444_v1, %v1560_v27  ;;  %vm1592_vm13 = vweird.f32 %v5473_v50 }
 0x291   : > { %v1602_v29 = vmul.f32 %v5477_v48, %v5452_v22  ;;  %v1579_v44 = vsel %vm5534_vm7, %v5450_v21, %v1575_v34  ;;  %v1612_v1 = vand.u32 2147483648, %v5452_v22  ;;  %v5559_v21 = vsel %vm5494_vm4, %v1568_v23, %v1564_v7  ;;  %vm5599_vm4 = vmor %vm1591_vm0, %vm1592_vm13 }
 0x292   : > { %v1485_v30 = vpop.f32.mrf.mxu2  ;;  %v1514_v31 = vpop.f32.mrf.mxu3  ;;  %vm1607_vm7 = vweird.f32 %v5477_v48  ;;  %vm1621_vm15 = vweird.f32 %v5460_v28  ;;  %vm1636_vm13 = vweird.f32 %v5483_v56 }
 0x293   : > { %v1486_v38 = vadd.f32 %v1485_v30, %v5426_v33  ;;  %v1515_v41 = vadd.f32 %v1514_v31, %v5426_v33  ;;  %v5479_v33 = vadd.f32 %v1887_v24, %v1849_v53  ;;  %v5516_v53 = vadd.f32 %v1889_v20, %v5440_v59  ;;  %vm5622_vm0 = vmor %vm1606_vm14, %vm1607_vm7 }
 0x294   : > { %v1598_v20 = vor.u32 1.1754944e-38, %v1597_v42  ;;  %v1625_v42 = vand.u32 2147483647, %v5460_v28  ;;  %v1613_v57 = vor.u32 1.1754944e-38, %v1612_v1 }
 0x295   : > { %v4166_v54 = vmul.f32 -1.442695, %v1486_v38  ;;  %v4473_v58 = vpop.eup %4472  ;;  %v4167_v60 = vmul.f32 -1.442695, %v1515_v41  ;;  %v1583_v38 = vor.u32 1.1754944e-38, %v1582_v8  ;;  %v1588_v41 = vsub.f32 1.0, %v1587_v9 }
 0x296   : > { %v5500_v24 = vadd.f32 1.0, %v4473_v58  ;;  %v5505_v30 = vpop.eup %4474  ;;  %v1603_v58 = vsub.f32 1.0, %v1602_v29  ;;  %vm5610_vm10 = vcmp.eq.f32.partialorder %v1625_v42, 8.507059e+37 }
 0x297   : > { %4476 = vpow2.f32 %v4166_v54  ;;  %v1617_v52 = vmul.f32 %v5505_v30, %v5460_v28  ;;  %v1589_v9 = vmul.f32 %v5473_v50, %v1588_v41  ;;  %v5563_v29 = vsel %vm5510_vm1, %v1583_v38, %v1579_v44 }
 0x298   : > { %4478 = vpow2.f32 %v4165_v39  ;;  %v5519_v39 = vadd.f32 %v1908_v16, %v5440_v59  ;;  %v1595_v59 = vand.u32 2147483647, %v5448_v18  ;;  %v1610_v16 = vand.u32 2147483647, %v5452_v22 }
 0x299   : > { %4480 = vrcp.f32 %v5483_v56  ;;  %v1618_v34 = vsub.f32 1.0, %v1617_v52  ;;  %vm1622_vm14 = vweird.f32 %v5505_v30 }
 0x29a   : > { %v1487_v26 = vpop.f32.mrf.mxu2  ;;  %v1516_v25 = vpop.f32.mrf.mxu3  ;;  %4482 = vpow2.f32 %v4167_v60  ;;  %vm5565_vm5 = vcmp.eq.f32.partialorder %v1595_v59, 8.507059e+37  ;;  %vm5583_vm1 = vcmp.eq.f32.partialorder %v1610_v16, 8.507059e+37  ;;  %v1627_v59 = vand.u32 2147483648, %v5460_v28 }
 0x29b   : > { %v1488_v31 = vadd.f32 %v1487_v26, %v5446_v14  ;;  %v1517_v32 = vadd.f32 %v1516_v25, %v5446_v14  ;;  %4484 = vrcp.f32 %v5500_v24  ;;  %v1640_v16 = vand.u32 2147483647, %v5483_v56 }
 0x29d   : > { %v4477_v36 = vpop.eup %4476  ;;  %v4168_v54 = vmul.f32 -1.442695, %v1488_v31  ;;  %v4169_v55 = vmul.f32 -1.442695, %v1517_v32  ;;  %v1604_v32 = vmul.f32 %v5477_v48, %v1603_v58 }
 0x29e   : > { %v4479_v60 = vpop.eup %4478  ;;  %v5541_v5 = vadd.f32 1.0, %v4477_v36 }
 0x29f   : > { %4486 = vpow2.f32 %v4168_v54  ;;  %v5549_v8 = vpop.eup %4480  ;;  %v5570_v41 = vadd.f32 1.0, %v4479_v60  ;;  %v1590_v54 = vadd.f32 %v5473_v50, %v1589_v9  ;;  %v1605_v60 = vadd.f32 %v5477_v48, %v1604_v32 }
 0x2a0   : > { %v4483_v26 = vpop.eup %4482  ;;  %4488 = vpow2.f32 %v4169_v55  ;;  %v1632_v17 = vmul.f32 %v5549_v8, %v5483_v56  ;;  %vm1637_vm7 = vweird.f32 %v5549_v8 }
 0x2a1   : > { %4490 = vrcp.f32 %v5541_v5  ;;  %v5576_v23 = vpop.eup %4484  ;;  %v5578_v35 = vadd.f32 1.0, %v4483_v26  ;;  %vm1666_vm6 = vweird.f32 %v5570_v41 }
 0x2a2   : > { %v1490_v25 = vpop.f32.mrf.mxu2  ;;  %v1519_v27 = vpop.f32.mrf.mxu3  ;;  %4492 = vrcp.f32 %v5570_v41  ;;  %v1633_v9 = vsub.f32 1.0, %v1632_v17  ;;  %v1647_v26 = vmul.f32 %v5576_v23, %v5500_v24  ;;  %v1628_v17 = vor.u32 1.1754944e-38, %v1627_v59 }
 0x2a3   : > { %v1491_v38 = vadd.f32 %v1490_v25, %v5432_v51  ;;  %v1520_v36 = vadd.f32 %v1519_v27, %v5432_v51  ;;  %v1619_v51 = vmul.f32 %v5505_v30, %v1618_v34  ;;  %4494 = vrcp.f32 %v5578_v35 }
 0x2a4   : > { %v1594_v25 = vsel %vm5599_vm4, %v5473_v50, %v1590_v54  ;;  %v1642_v50 = vand.u32 2147483648, %v5483_v56  ;;  %v1648_v59 = vsub.f32 1.0, %v1647_v26  ;;  %vm5657_vm4 = vcmp.eq.f32.partialorder %v1640_v16, 8.507059e+37 }
 0x2a5   : > { %v4487_v14 = vpop.eup %4486  ;;  %v4170_v52 = vmul.f32 -1.442695, %v1491_v38  ;;  %v4171_v1 = vmul.f32 -1.442695, %v1520_v36  ;;  %v1609_v36 = vsel %vm5622_vm0, %v5477_v48, %v1605_v60  ;;  %v1620_v54 = vadd.f32 %v5505_v30, %v1619_v51 }
 0x2a6   : > { %v5590_v58 = vadd.f32 1.0, %v4487_v14  ;;  %v4489_v7 = vpop.eup %4488  ;;  %v5637_v22 = vsel %vm5565_vm5, %v1598_v20, %v1594_v25  ;;  %v1634_v14 = vmul.f32 %v5549_v8, %v1633_v9  ;;  %v5649_v31 = vsel %vm5583_vm1, %v1613_v57, %v1609_v36  ;;  %vm5653_vm5 = vmor %vm1621_vm15, %vm1622_vm14 }
 0x2a7   : > { %v5614_v18 = vpop.eup %4490  ;;  %v5616_v32 = vadd.f32 1.0, %v4489_v7  ;;  %4496 = vpow2.f32 %v4170_v52  ;;  %v1643_v44 = vor.u32 1.1754944e-38, %v1642_v50  ;;  %v1655_v9 = vand.u32 2147483647, %v5500_v24 }
 0x2a8   : > { %4498 = vrcp.f32 %v5590_v58  ;;  %v1709_v52 = vmul.f32 %v5614_v18, %v5541_v5  ;;  %v5644_v48 = vpop.eup %4492  ;;  %v1624_v28 = vsel %vm5653_vm5, %v5505_v30, %v1620_v54  ;;  %v1657_v57 = vand.u32 2147483648, %v5500_v24 }
 0x2a9   : > { %4500 = vrcp.f32 %v5616_v32  ;;  %v5662_v26 = vpop.eup %4494  ;;  %v1635_v16 = vadd.f32 %v5549_v8, %v1634_v14  ;;  %v1649_v34 = vmul.f32 %v5576_v23, %v1648_v59  ;;  %vm1651_vm1 = vweird.f32 %v5500_v24 }
 0x2aa   : > { %v1492_v42 = vpop.f32.mrf.mxu2  ;;  %v1521_v38 = vpop.f32.mrf.mxu3  ;;  %4502 = vpow2.f32 %v4171_v1  ;;  %vm1652_vm15 = vweird.f32 %v5576_v23  ;;  %v1717_v30 = vand.u32 2147483647, %v5541_v5  ;;  %v1724_v54 = vmul.f32 %v5662_v26, %v5578_v35 }
 0x2ab   : > { %v1493_v7 = vadd.f32 %v1492_v42, %v5424_v15  ;;  %v1522_v60 = vadd.f32 %v1521_v38, %v5424_v15  ;;  %v1719_v15 = vand.u32 2147483648, %v5541_v5  ;;  %v1710_v42 = vsub.f32 1.0, %v1709_v52  ;;  %vm5736_vm5 = vmor %vm1651_vm1, %vm1652_vm15 }
 0x2ac   : > { %v5684_v14 = vsel %vm5610_vm10, %v1628_v17, %v1624_v28  ;;  %vm5686_vm0 = vcmp.eq.f32.partialorder %v1655_v9, 8.507059e+37  ;;  %vm1713_vm14 = vweird.f32 %v5541_v5  ;;  %vm5699_vm10 = vmor %vm1636_vm13, %vm1637_vm7  ;;  %v1658_v17 = vor.u32 1.1754944e-38, %v1657_v57 }
 0x2ad   : > { %v4172_v55 = vmul.f32 -1.442695, %v1493_v7  ;;  %v4497_v1 = vpop.eup %4496  ;;  %v4173_v25 = vmul.f32 -1.442695, %v1522_v60  ;;  %v5691_v7 = vor.u32 1.1754944e-38, %v1719_v15  ;;  %v1734_v60 = vand.u32 2147483648, %v5578_v35 }
 0x2ae   : > { %v5672_v50 = vpop.eup %4498  ;;  %v5674_v38 = vadd.f32 1.0, %v4497_v1  ;;  %v1639_v15 = vsel %vm5699_vm10, %v5549_v8, %v1635_v16  ;;  %v1650_v28 = vadd.f32 %v5576_v23, %v1649_v34  ;;  %v1662_v1 = vmul.f32 %v5644_v48, %v5570_v41 }
 0x2af   : > { %4504 = vpow2.f32 %v4172_v55  ;;  %v5677_v36 = vpop.eup %4500  ;;  %v1732_v56 = vand.u32 2147483647, %v5578_v35  ;;  %v1739_v19 = vmul.f32 %v5672_v50, %v5590_v58  ;;  %v1749_v3 = vand.u32 2147483648, %v5590_v58 }
 0x2b0   : > { %4506 = vpow2.f32 %v4173_v25  ;;  %v4503_v52 = vpop.eup %4502  ;;  %v1711_v25 = vmul.f32 %v5614_v18, %v1710_v42  ;;  %v1754_v8 = vmul.f32 %v5677_v36, %v5616_v32  ;;  %vm1714_vm13 = vweird.f32 %v5614_v18 }
 0x2b1   : > { %4508 = vrcp.f32 %v5674_v38  ;;  %v5703_v9 = vadd.f32 1.0, %v4503_v52  ;;  %v1725_v52 = vsub.f32 1.0, %v1724_v54  ;;  %vm5721_vm7 = vcmp.eq.f32.partialorder %v1717_v30, 8.507059e+37  ;;  %vm5771_vm15 = vmor %vm1713_vm14, %vm1714_vm13 }
 0x2b2   : > { %v1966_v20 = vpop.f32.mrf.mxu2  ;;  %v1985_v55 = vpop.f32.mrf.mxu3  ;;  %v5725_v42 = vor.u32 1.1754944e-38, %v1734_v60  ;;  %v5730_v54 = vsel %vm5657_vm4, %v1643_v44, %v1639_v15  ;;  %vm1728_vm10 = vweird.f32 %v5578_v35  ;;  %v1764_v60 = vand.u32 2147483648, %v5616_v32 }
 0x2b3   : > { %v1967_v57 = vadd.f32 %v1966_v20, %v5442_v6  ;;  %4510 = vrcp.f32 %v5703_v9  ;;  %v1986_v27 = vadd.f32 %v1985_v55, %v5442_v6  ;;  %v1654_v6 = vsel %vm5736_vm5, %v5576_v23, %v1650_v28 }
 0x2b4   : > { %v1663_v51 = vsub.f32 1.0, %v1662_v1  ;;  %v1712_v24 = vadd.f32 %v5614_v18, %v1711_v25  ;;  %v1740_v55 = vsub.f32 1.0, %v1739_v19  ;;  %v1747_v15 = vand.u32 2147483647, %v5590_v58 }
 0x2b5   : > { %v4505_v16 = vpop.eup %4504  ;;  %v1995_v2 = vmul.f32 %v1967_v57, %v5559_v21  ;;  %v1726_v0 = vmul.f32 %v5662_v26, %v1725_v52  ;;  %vm1729_vm4 = vweird.f32 %v5662_v26  ;;  %v5754_v63 = vor.u32 1.1754944e-38, %v1749_v3 }
 0x2b6   : > { %v4507_v30 = vpop.eup %4506  ;;  %v5750_v4 = vadd.f32 1.0, %v4505_v16  ;;  %v1755_v21 = vsub.f32 1.0, %v1754_v8  ;;  %vm1743_vm1 = vweird.f32 %v5590_v58  ;;  %v1762_v23 = vand.u32 2147483647, %v5616_v32  ;;  %vm5818_vm8 = vmor %vm1728_vm10, %vm1729_vm4 }
 0x2b7   : > { %v5746_v44 = vpop.eup %4508  ;;  %v5758_v28 = vadd.f32 1.0, %v4507_v30  ;;  %v1996_v1 = vmul.f32 %v1986_v27, %v5563_v29  ;;  %v5763_v57 = vsel %vm5686_vm0, %v1658_v17, %v1654_v6  ;;  %vm5775_vm5 = vcmp.eq.f32.partialorder %v1732_v56, 8.507059e+37  ;;  %v1929_v27 = vpop.permute.xlu0 %1928 }
 0x2b8   : > { %vm1758_vm9 = vweird.f32 %v5616_v32  ;;  %v5780_v29 = vor.u32 1.1754944e-38, %v1764_v60  ;;  %v1769_v59 = vmul.f32 %v5746_v44, %v5674_v38  ;;  %v2003_v17 = vadd.f32 %v1995_v2, %v5462_v37 }
 0x2b9   : > { %v5765_v52 = vpop.eup %4510  ;;  %v1664_v16 = vmul.f32 %v5644_v48, %v1663_v51  ;;  %v1741_v5 = vmul.f32 %v5672_v50, %v1740_v55  ;;  %vm1744_vm0 = vweird.f32 %v5672_v50  ;;  %4512 = vrcp.f32 %v5750_v4 }
 0x2ba   : > { %v1968_v19 = vpop.f32.mrf.mxu2  ;;  %v1987_v25 = vpop.f32.mrf.mxu3  ;;  %v1716_v56 = vsel %vm5771_vm15, %v5614_v18, %v1712_v24  ;;  %v1727_v20 = vadd.f32 %v5662_v26, %v1726_v0  ;;  %v1756_v30 = vmul.f32 %v5677_v36, %v1755_v21  ;;  %v1784_v2 = vmul.f32 %v5765_v52, %v5703_v9 }
 0x2bb   : > { %4514 = vtanh.f32 %v2003_v17  ;;  %v1779_v37 = vand.u32 2147483648, %v5674_v38  ;;  %v2004_v60 = vadd.f32 %v1996_v1, %v5466_v45  ;;  %v1969_v6 = vadd.f32 %v1968_v19, %v1929_v27 }
 0x2bc   : > { %4516 = vrcp.f32 %v5758_v28  ;;  %vm1667_vm14 = vweird.f32 %v5644_v48  ;;  %vm5800_vm13 = vcmp.eq.f32.partialorder %v1747_v15, 8.507059e+37  ;;  %vm5804_vm15 = vcmp.eq.f32.partialorder %v1762_v23, 8.507059e+37 }
 0x2bd   : > { %v1770_v51 = vsub.f32 1.0, %v1769_v59  ;;  %v1721_v24 = vsel %vm5721_vm7, %v5691_v7, %v1716_v56  ;;  %v1988_v55 = vadd.f32 %v1987_v25, %v1929_v27  ;;  %v5812_v21 = vadd.f32 %v5644_v48, %v1664_v16  ;;  %vm5909_vm4 = vmor %vm1666_vm6, %vm1667_vm14 }
 0x2be   : > { %v1742_v15 = vadd.f32 %v5672_v50, %v1741_v5  ;;  %vm1759_vm12 = vweird.f32 %v5677_v36  ;;  %4518 = vtanh.f32 %v2004_v60  ;;  %v1670_v7 = vand.u32 2147483647, %v5570_v41 }
 0x2bf   : > { %v1757_v34 = vadd.f32 %v5677_v36, %v1756_v30  ;;  %v1785_v23 = vsub.f32 1.0, %v1784_v2  ;;  %v1731_v35 = vsel %vm5818_vm8, %v5662_v26, %v1727_v20  ;;  %v1997_v1 = vmul.f32 %v1969_v6, %v5637_v22  ;;  %v5831_v19 = vpop.eup %4512  ;;  %vm5842_vm8 = vmor %vm1743_vm1, %vm1744_vm0 }
 0x2c0   : > { %v1777_v25 = vand.u32 2147483647, %v5674_v38  ;;  %v5834_v3 = vor.u32 1.1754944e-38, %v1779_v37  ;;  %v1792_v59 = vand.u32 2147483647, %v5703_v9  ;;  %v1998_v17 = vmul.f32 %v1988_v55, %v5649_v31  ;;  %vm5856_vm7 = vmor %vm1758_vm9, %vm1759_vm12 }
 0x2c1   : > { %v4515_v56 = vpop.eup %4514  ;;  %v1771_v22 = vmul.f32 %v5746_v44, %v1770_v51  ;;  %v1794_v27 = vand.u32 2147483648, %v5703_v9  ;;  %v2005_v20 = vadd.f32 %v1997_v1, %v5468_v46  ;;  %vm1773_vm10 = vweird.f32 %v5674_v38 }
 0x2c2   : > { %v1971_v16 = vpop.f32.mrf.mxu2  ;;  %v1990_v5 = vpop.f32.mrf.mxu3  ;;  %v2019_v2 = vsub.f32 %v5356_v10, %v4515_v56  ;;  %v1736_v46 = vsel %vm5775_vm5, %v5725_v42, %v1731_v35  ;;  %v1746_v37 = vsel %vm5842_vm8, %v5672_v50, %v1742_v15  ;;  %v2006_v60 = vadd.f32 %v1998_v17, %v5470_v47 }
 0x2c3   : > { %v1972_v30 = vadd.f32 %v1971_v16, %v5428_v43  ;;  %v5850_v31 = vpop.eup %4516  ;;  %v1786_v32 = vmul.f32 %v5765_v52, %v1785_v23  ;;  %4520 = vtanh.f32 %v2005_v20  ;;  %v1761_v6 = vsel %vm5856_vm7, %v5677_v36, %v1757_v34 }
 0x2c4   : > { %v4519_v10 = vpop.eup %4518  ;;  %v1799_v8 = vmul.f32 %v5831_v19, %v5750_v4  ;;  %v2027_v42 = vmul.f32 %v2019_v2, %v1721_v24  ;;  %4522 = vtanh.f32 %v2006_v60  ;;  %v1991_v55 = vadd.f32 %v1990_v5, %v5428_v43 }
 0x2c5   : > { %v1999_v51 = vmul.f32 %v1972_v30, %v5684_v14  ;;  %v1772_v47 = vadd.f32 %v5746_v44, %v1771_v22  ;;  %vm1788_vm12 = vweird.f32 %v5703_v9  ;;  %v1814_v50 = vmul.f32 %v5850_v31, %v5758_v28 }
 0x2c6   : > { %v2020_v36 = vsub.f32 %v5358_v11, %v4519_v10  ;;  %vm5889_vm9 = vcmp.eq.f32.partialorder %v1777_v25, 8.507059e+37  ;;  %v5893_v43 = vadd.f32 %v4515_v56, %v2027_v42  ;;  %v1751_v45 = vsel %vm5800_vm13, %v5754_v63, %v1746_v37  ;;  %v2265_v42 = vld [vmem:[%s8087_s8 + $0xc8] sm:$0xff] }
 0x2c7   : > { %v2007_v14 = vadd.f32 %v1999_v51, %v5479_v33  ;;  %v1766_v15 = vsel %vm5804_vm15, %v5780_v29, %v1761_v6  ;;  %v2000_v34 = vmul.f32 %v1991_v55, %v5730_v54  ;;  %v5903_v11 = vadd.f32 %v5765_v52, %v1786_v32 }
 0x2c8   : > { %v2028_v33 = vmul.f32 %v2020_v36, %v1736_v46  ;;  %v1672_v63 = vand.u32 2147483648, %v5570_v41  ;;  %vm1774_vm1 = vweird.f32 %v5746_v44  ;;  %v1800_v29 = vsub.f32 1.0, %v1799_v8  ;;  %3725 = vst [vmem:[%s5881_s24] sm:$0xff] %v5893_v43  ;;  %2192 = vrot.lane.b32.xlu0 %v5893_v43, %s4787_s5  ;;  %2120 = vrot.lane.b32.xlu2 %v5893_v43, %s4795_s21 }
 0x2c9   : > { %4524 = vtanh.f32 %v2007_v14  ;;  %v2008_v54 = vadd.f32 %v2000_v34, %v5481_v40  ;;  %v1669_v0 = vsel %vm5909_vm4, %v5644_v48, %v5812_v21  ;;  %v4521_v1 = vpop.eup %4520  ;;  %vm5926_vm6 = vcmp.eq.f32.partialorder %v1792_v59, 8.507059e+37  ;;  %vm5941_vm0 = vmor %vm1773_vm10, %vm1774_vm1 }
 0x2ca   : > { %v1973_v18 = vpop.f32.mrf.mxu2  ;;  %v1992_v35 = vpop.f32.mrf.mxu3  ;;  %v1815_v40 = vsub.f32 1.0, %v1814_v50  ;;  %v5930_v17 = vadd.f32 %v4519_v10, %v2028_v33  ;;  %v1673_v5 = vor.u32 1.1754944e-38, %v1672_v63  ;;  %v2021_v26 = vsub.f32 %v5360_v12, %v4521_v1 }
 0x2cb   : > { %v1974_v16 = vadd.f32 %v1973_v18, %v5430_v49  ;;  %v4523_v56 = vpop.eup %4522  ;;  %4526 = vtanh.f32 %v2008_v54  ;;  %vm1671_vm5 = vcmp.eq.f32.partialorder %v1670_v7, 8.507059e+37  ;;  %v1993_v48 = vadd.f32 %v1992_v35, %v5430_v49 }
 0x2cc   : > { %vm1789_vm14 = vweird.f32 %v5765_v52  ;;  %3726 = vst [vmem:[%s5881_s24 + $0x8] sm:$0xff] %v5930_v17  ;;  %v2022_v12 = vsub.f32 %v5362_v13, %v4523_v56  ;;  %2128 = vrot.lane.b32.xlu1 %v5930_v17, %s4795_s21  ;;  %v1674_v49 = vsel %vm1671_vm5, %v1673_v5, %v1669_v0  ;;  %v1801_v7 = vmul.f32 %v5831_v19, %v1800_v29 }
 0x2cd   : > { %v2001_v41 = vmul.f32 %v1974_v16, %v5763_v57  ;;  %v2029_v59 = vmul.f32 %v2021_v26, %v1751_v45  ;;  %v1776_v38 = vsel %vm5941_vm0, %v5746_v44, %v1772_v47  ;;  %v2002_v22 = vmul.f32 %v1993_v48, %v1674_v49  ;;  %vm5964_vm13 = vmor %vm1788_vm12, %vm1789_vm14  ;;  %v8242_v16 = vld [vmem:[#allocation20_spill] sm:$0xff] }
 0x2ce   : > { %v1795_v30 = vor.u32 1.1754944e-38, %v1794_v27  ;;  %v1816_v13 = vmul.f32 %v5850_v31, %v1815_v40  ;;  %v2030_v58 = vmul.f32 %v2022_v12, %v1766_v15  ;;  %vm1803_vm15 = vweird.f32 %v5750_v4  ;;  %v8240_v15 = vld [vmem:[#allocation21_spill] sm:$0xff] }
 0x2cf   : > { %v4525_v20 = vpop.eup %4524  ;;  %v2009_v2 = vadd.f32 %v2001_v41, %v5516_v53  ;;  %v5969_v44 = vadd.f32 %v4521_v1, %v2029_v59  ;;  %v2010_v46 = vadd.f32 %v2002_v22, %v5519_v39  ;;  %v1781_v53 = vsel %vm5889_vm9, %v5834_v3, %v1776_v38 }
 0x2d0   : > { %v2023_v27 = vsub.f32 %v5344_v61, %v4525_v20  ;;  %v5973_v37 = vadd.f32 %v4523_v56, %v2030_v58  ;;  %v1791_v9 = vsel %vm5964_vm13, %v5765_v52, %v5903_v11  ;;  %v1802_v32 = vadd.f32 %v5831_v19, %v1801_v7  ;;  %2096 = vrot.lane.b32.xlu0 %v5893_v43, %s8142_s2 }
 0x2d1   : > { %4528 = vtanh.f32 %v2009_v2  ;;  %v4527_v60 = vpop.eup %4526  ;;  %vm1804_vm8 = vweird.f32 %v5831_v19  ;;  %3727 = vst [vmem:[%s5881_s24 + $0x10] sm:$0xff] %v5969_v44  ;;  %2200 = vrot.lane.b32.xlu2 %v5930_v17, %s4787_s5  ;;  %v1809_v39 = vand.u32 2147483648, %v5750_v4  ;;  %v1817_v52 = vadd.f32 %v5850_v31, %v1816_v13 }
 0x2d2   : > { %8234 = vst [vmem:[#allocation23_spill] sm:$0xff] %v5973_v37  ;;  %v2031_v61 = vmul.f32 %v2023_v27, %v1781_v53  ;;  %4530 = vtanh.f32 %v2010_v46  ;;  %vm1819_vm7 = vweird.f32 %v5850_v31  ;;  %v2024_v3 = vsub.f32 %v5346_v62, %v4527_v60  ;;  %vm6006_vm10 = vmor %vm1803_vm15, %vm1804_vm8 }
 0x2d3   : > { %3728 = vst [vmem:[%s5881_s24 + $0x18] sm:$0xff] %v5973_v37  ;;  %v1807_v6 = vand.u32 2147483647, %v5750_v4  ;;  %v1824_v51 = vand.u32 2147483648, %v5758_v28  ;;  %v1796_v8 = vsel %vm5926_vm6, %v1795_v30, %v1791_v9  ;;  %vm1818_vm12 = vweird.f32 %v5758_v28 }
 0x2d4   : > { %v5998_v10 = vadd.f32 %v4525_v20, %v2031_v61  ;;  %v1822_v62 = vand.u32 2147483647, %v5758_v28  ;;  %v2032_v55 = vmul.f32 %v2024_v3, %v1796_v8  ;;  %2168 = vrot.lane.b32.xlu1 %v5893_v43, %s8140_s1  ;;  %vm6014_vm9 = vmor %vm1818_vm12, %vm1819_vm7  ;;  %v1806_v4 = vsel %vm6006_vm10, %v5831_v19, %v1802_v32  ;;  %v8241_v19 = vld [vmem:[#allocation22_spill] sm:$0xff]  ;;  %v2264_v8 = vld [vmem:[%s8087_s8 + $0xc0] sm:$0xff] }
 0x2d5   : > { %v1810_v36 = vor.u32 1.1754944e-38, %v1809_v39  ;;  %v1821_v28 = vsel %vm6014_vm9, %v5850_v31, %v1817_v52  ;;  %vm1808_vm4 = vcmp.eq.f32.partialorder %v1807_v6, 8.507059e+37  ;;  %v1825_v45 = vor.u32 1.1754944e-38, %v1824_v51  ;;  %v2266_v3 = vld [vmem:[%s8087_s8 + $0xd0] sm:$0xff]  ;;  %v2267_v6 = vld [vmem:[%s8087_s8 + $0xd8] sm:$0xff] }
 0x2d6   : > { %3729 = vst [vmem:[%s5881_s24 + $0x20] sm:$0xff] %v5998_v10  ;;  %v6023_v14 = vadd.f32 %v4527_v60, %v2032_v55  ;;  %vm1823_vm1 = vcmp.eq.f32.partialorder %v1822_v62, 8.507059e+37  ;;  %vm8243_vm6 = vcmp.lt.s32.totalorder %v8242_v16, 16  ;;  %vm8245_vm0 = vcmp.lt.s32.totalorder %v8242_v16, 127 }
 0x2d7   : > { %v4529_v50 = vpop.eup %4528  ;;  %v1811_v11 = vsel %vm1808_vm4, %v1810_v36, %v1806_v4  ;;  %v1826_v63 = vsel %vm1823_vm1, %v1825_v45, %v1821_v28  ;;  %vm8244_vm5 = vmmov %vm8243_vm6  ;;  %vm8248_vm13 = vcmp.lt.s32.totalorder %v8242_v16, 112 }
 0x2d8   : > { %8239 = vst [vmem:[#allocation24_spill] sm:$0xff] %v6023_v14  ;;  %v4531_v24 = vpop.eup %4530  ;;  %v2025_v34 = vsub.f32 %v8240_v15, %v4529_v50  ;;  %2176 = vrot.lane.b32.xlu0 %v5930_v17, %s8140_s1  ;;  %vm8246_vm14 = vmmov %vm8245_vm0  ;;  %v2298_v15 = vld [vmem:[%s8087_s8 + $0x1d0] sm:$0xff] }
 0x2d9   : > { %3730 = vst [vmem:[%s5881_s24 + $0x28] sm:$0xff] %v6023_v14  ;;  %v2026_v33 = vsub.f32 %v8241_v19, %v4531_v24  ;;  %2104 = vrot.lane.b32.xlu2 %v5930_v17, %s8142_s2  ;;  %vm8249_vm15 = vmmov %vm8248_vm13  ;;  %v4209_v19 = vld [vmem:[%s8091_s12 + $0x38] sm:$0xff] }
 0x2da   : > { %v2033_v23 = vmul.f32 %v2025_v34, %v1811_v11  ;;  %v2299_v34 = vld [vmem:[%s8087_s8 + $0x1d8] sm:$0xff]  ;;  %vm8250_vm8 = vmmov %vm8248_vm13 }
 0x2db   : > { %v2034_v31 = vmul.f32 %v2026_v33, %v1826_v63  ;;  %v2296_v33 = vld [vmem:[%s8087_s8 + $0x1c0] sm:$0xff]  ;;  %vm8251_vm7 = vmmov %vm8250_vm8 }
 0x2dc   : > { %v6036_v29 = vadd.f32 %v4529_v50, %v2033_v23  ;;  %2072 = vrot.lane.b32.xlu1 %v5893_v43, %s8138_s27  ;;  %v2297_v23 = vld [vmem:[%s8087_s8 + $0x1c8] sm:$0xff]  ;;  %vm8252_vm10 = vmmov %vm8245_vm0 }
 0x2dd   : > { %v6038_v54 = vadd.f32 %v4531_v24, %v2034_v31  ;;  %vm8253_vm12 = vmmov %vm8245_vm0 }
 0x2de   : > { %3731 = vst [vmem:[%s5881_s24 + $0x30] sm:$0xff] %v6036_v29  ;;  %vm8254_vm9 = vmmov %vm8244_vm5 }
 0x2df   : > { %3732 = vst [vmem:[%s5881_s24 + $0x38] sm:$0xff] %v6038_v54  ;;  %vm8255_vm4 = vmmov %vm8244_vm5 }
 0x2e0   : > { %2080 = vrot.lane.b32.xlu0 %v5930_v17, %s8138_s27  ;;  %vm8256_vm1 = vmmov %vm8251_vm7 }
 0x2e1   : > { %2144 = vrot.lane.b32.xlu2 %v5893_v43, %s8136_s28 }
 0x2e4   : > { %2152 = vrot.lane.b32.xlu1 %v5930_v17, %s8136_s28 }
 0x2e8   : > { %2122 = vrot.lane.b32.xlu0 %v5969_v44, %s4795_s21 }
 0x2e9   : > { %2130 = vrot.lane.b32.xlu2 %v5973_v37, %s4795_s21 }
 0x2ec   : > { %2194 = vrot.lane.b32.xlu1 %v5969_v44, %s4787_s5 }
 0x2f0   : > { %2202 = vrot.lane.b32.xlu0 %v5973_v37, %s4787_s5 }
 0x2f1   : > { %2170 = vrot.lane.b32.xlu2 %v5969_v44, %s8140_s1 }
 0x2f4   : > { %2098 = vrot.lane.b32.xlu1 %v5969_v44, %s8142_s2 }
 0x2f8   : > { %2106 = vrot.lane.b32.xlu0 %v5973_v37, %s8142_s2 }
 0x2f9   : > { %2074 = vrot.lane.b32.xlu2 %v5969_v44, %s8138_s27 }
 0x2fc   : > { %2178 = vrot.lane.b32.xlu1 %v5973_v37, %s8140_s1 }
 0x300   : > { %2146 = vrot.lane.b32.xlu0 %v5969_v44, %s8136_s28 }
 0x301   : > { %2154 = vrot.lane.b32.xlu2 %v5973_v37, %s8136_s28 }
 0x304   : > { %2082 = vrot.lane.b32.xlu1 %v5973_v37, %s8138_s27 }
 0x308   : > { %2124 = vrot.lane.b32.xlu0 %v5998_v10, %s4795_s21 }
 0x309   : > { %2132 = vrot.lane.b32.xlu2 %v6023_v14, %s4795_s21 }
 0x30c   : > { %2196 = vrot.lane.b32.xlu1 %v5998_v10, %s4787_s5 }
 0x310   : > { %2204 = vrot.lane.b32.xlu0 %v6023_v14, %s4787_s5 }
 0x311   : > { %2172 = vrot.lane.b32.xlu2 %v5998_v10, %s8140_s1 }
 0x314   : > { %2100 = vrot.lane.b32.xlu1 %v5998_v10, %s8142_s2 }
 0x318   : > { %2108 = vrot.lane.b32.xlu0 %v6023_v14, %s8142_s2 }
 0x319   : > { %2076 = vrot.lane.b32.xlu2 %v5998_v10, %s8138_s27 }
 0x31c   : > { %2180 = vrot.lane.b32.xlu1 %v6023_v14, %s8140_s1 }
 0x320   : > { %2148 = vrot.lane.b32.xlu0 %v5998_v10, %s8136_s28 }
 0x321   : > { %2156 = vrot.lane.b32.xlu2 %v6023_v14, %s8136_s28 }
 0x322   : > { %v2121_v18 = vpop.permute.xlu2 %2120 }
 0x324   : > { %2084 = vrot.lane.b32.xlu1 %v6023_v14, %s8138_s27 }
 0x328   : > { %2052 = vrot.lane.b32.xlu0 %v5998_v10, %s8134_s3 }
 0x329   : > { %2198 = vrot.lane.b32.xlu2 %v6036_v29, %s4787_s5 }
 0x32b   : > { %v6104_v0 = vpop.permute.xlu2 %2200 }
 0x32c   : > { %2126 = vrot.lane.b32.xlu1 %v6036_v29, %s4795_s21 }
 0x330   : > { %2134 = vrot.lane.b32.xlu0 %v6038_v54, %s4795_s21 }
 0x331   : > { %2102 = vrot.lane.b32.xlu2 %v6036_v29, %s8142_s2 }
 0x333   : > { %v2105_v35 = vpop.permute.xlu2 %2104 }
 0x334   : > { %2206 = vrot.lane.b32.xlu1 %v6038_v54, %s4787_s5 }
 0x338   : > { %2174 = vrot.lane.b32.xlu0 %v6036_v29, %s8140_s1 }
 0x339   : > { %2182 = vrot.lane.b32.xlu2 %v6038_v54, %s8140_s1  ;;  %s8342_s1 = smov 16  }
 0x33a   : > { %v6118_v25 = vpop.permute.xlu0 %2192 }
 0x33b   : > { %v2145_v1 = vpop.permute.xlu2 %2144  ;;  %v2208_v63 = vsel %vm8250_vm8, %v6118_v25, %v6104_v0  ;;  %v2212_v31 = vsel %vm8251_vm7, %v6104_v0, %v6118_v25  ;;  %vm8266_vm8 = vmmov %vm8255_vm4 }
 0x33c   : > { %2110 = vrot.lane.b32.xlu1 %v6038_v54, %s8142_s2  ;;  %v6272_v0 = vmul.f32 %v2297_v23, %v2212_v31  ;;  %v2283_v31 = vld [vmem:[%s8087_s8 + $0x158] sm:$0xff]  ;;  %v2270_v23 = vld [vmem:[%s8087_s8 + $0xf0] sm:$0xff] }
 0x33e   : > { %v2129_v40 = vpop.permute.xlu1 %2128 }
 0x33f   : > { %v2136_v5 = vsel %vm974_vm3, %v2121_v18, %v2129_v40  ;;  %v2140_v56 = vsel %vm974_vm3, %v2129_v40, %v2121_v18 }
 0x340   : > { %2078 = vrot.lane.b32.xlu0 %v6036_v29, %s8138_s27  ;;  %v6220_v4 = vmul.f32 %v2264_v8, %v2140_v56  ;;  %v6222_v50 = vmul.f32 %v2265_v42, %v2136_v5  ;;  %v4208_v5 = vld [vmem:[%s8091_s12 + $0x30] sm:$0xff]  ;;  %v6270_v56 = vmul.f32 %v2296_v33, %v2208_v63 }
 0x341   : > { %2086 = vrot.lane.b32.xlu2 %v6038_v54, %s8138_s27  ;;  %s806_s27 = scalar_lea.vmem %s8301_s6, %s5338_s4  ;;  %s8335_s4 = smov 15  }
 0x342   : > { %v2097_v48 = vpop.permute.xlu0 %2096 }
 0x343   : > { %v2131_v26 = vpop.permute.xlu2 %2130  ;;  %v6134_v21 = vsel %vm953_vm2, %v2097_v48, %v2105_v35  ;;  %v6138_v12 = vsel %vm953_vm2, %v2105_v35, %v2097_v48 }
 0x344   : > { %2048 = vrot.lane.b32.xlu1 %v5893_v43, %s8134_s3 }
 0x346   : > { %v2169_v41 = vpop.permute.xlu1 %2168 }
 0x348   : > { %2158 = vrot.lane.b32.xlu0 %v6038_v54, %s8136_s28 }
 0x349   : > { %2060 = vrot.lane.b32.xlu2 %v6023_v14, %s8134_s3 }
 0x34a   : > { %v2177_v7 = vpop.permute.xlu0 %2176 }
 0x34b   : > { %v2171_v49 = vpop.permute.xlu2 %2170  ;;  %v6148_v59 = vsel %vm1002_vm11, %v2169_v41, %v2177_v7  ;;  %v6152_v38 = vsel %vm1002_vm11, %v2177_v7, %v2169_v41  ;;  %v4299_v7 = vld [vmem:[%s8095_s16 + $0x48] sm:$0xff] }
 0x34c   : > { %2150 = vrot.lane.b32.xlu1 %v6036_v29, %s8136_s28  ;;  %s8344_s28 = smov 17  }
 0x34e   : > { %v2073_v22 = vpop.permute.xlu1 %2072 }
 0x350   : > { %2062 = vrot.lane.b32.xlu0 %v6038_v54, %s8134_s3 }
 0x351   : > { %2050 = vrot.lane.b32.xlu2 %v5969_v44, %s8134_s3 }
 0x352   : > { %v2081_v20 = vpop.permute.xlu0 %2080 }
 0x353   : > { %v6162_v30 = vsel %vm8243_vm6, %v2073_v22, %v2081_v20  ;;  %v6166_v13 = vsel %vm8244_vm5, %v2081_v20, %v2073_v22  ;;  %v6168_v58 = vpop.permute.xlu2 %2074  ;;  %v2290_v22 = vld [vmem:[%s8087_s8 + $0x190] sm:$0xff]  ;;  %v2291_v20 = vld [vmem:[%s8087_s8 + $0x198] sm:$0xff]  ;;  %vm8257_vm6 = vmmov %vm8245_vm0 }
 0x354   : > { %2054 = vrot.lane.b32.xlu1 %v6036_v29, %s8134_s3  ;;  %vm8258_vm5 = vmmov %vm8256_vm1 }
 0x355   : > { %vm8270_vm7 = vmmov %vm8257_vm6 }
 0x356   : > { %v2153_v2 = vpop.permute.xlu1 %2152 }
 0x357   : > { %v6172_v57 = vsel %vm8245_vm0, %v2145_v1, %v2153_v2  ;;  %v6176_v27 = vsel %vm8246_vm14, %v2153_v2, %v2145_v1  ;;  %v2258_v2 = vld [vmem:[%s8087_s8 + $0x90] sm:$0xff]  ;;  %vm8259_vm0 = vmmov %vm8256_vm1 }
 0x358   : > { %2056 = vrot.lane.b32.xlu0 %v5930_v17, %s8134_s3  ;;  %vm8263_vm14 = vmmov %vm8255_vm4 }
 0x359   : > { %2220 = vrot.lane.b32.xlu2 %v5998_v10, %s8247_s29 }
 0x35a   : > { %v2123_v46 = vpop.permute.xlu0 %2122 }
 0x35b   : > { %v2137_v53 = vsel %vm974_vm3, %v2123_v46, %v2131_v26  ;;  %v2141_v9 = vsel %vm974_vm3, %v2131_v26, %v2123_v46  ;;  %v2155_v32 = vpop.permute.xlu2 %2154  ;;  %v2259_v46 = vld [vmem:[%s8087_s8 + $0x98] sm:$0xff] }
 0x35c   : > { %2058 = vrot.lane.b32.xlu1 %v5973_v37, %s8134_s3  ;;  %v6210_v62 = vmul.f32 %v2266_v3, %v2141_v9  ;;  %v6212_v55 = vmul.f32 %v2267_v6, %v2137_v53  ;;  %v4248_v9 = vld [vmem:[%s8093_s14 + $0x50] sm:$0xff]  ;;  %v2257_v3 = vld [vmem:[%s8087_s8 + $0x88] sm:$0xff] }
 0x35d   : > { %v2289_v6 = vld [vmem:[%s8087_s8 + $0x188] sm:$0xff] }
 0x35e   : > { %v2195_v60 = vpop.permute.xlu1 %2194 }
 0x360   : > { %2216 = vrot.lane.b32.xlu0 %v5893_v43, %s8247_s29 }
 0x361   : > { %2230 = vrot.lane.b32.xlu2 %v6038_v54, %s8247_s29 }
 0x362   : > { %v2203_v61 = vpop.permute.xlu0 %2202 }
 0x363   : > { %v2209_v39 = vsel %vm8248_vm13, %v2195_v60, %v2203_v61  ;;  %v2213_v52 = vsel %vm8249_vm15, %v2203_v61, %v2195_v60  ;;  %v6214_v47 = vpop.permute.xlu2 %2132  ;;  %v4206_v60 = vld [vmem:[%s8091_s12 + $0x20] sm:$0xff]  ;;  %vm8264_vm13 = vmmov %vm8255_vm4 }
 0x364   : > { %2228 = vrot.lane.b32.xlu1 %v6023_v14, %s8247_s29  ;;  %v6261_v1 = vmul.f32 %v2298_v15, %v2209_v39  ;;  %v6263_v40 = vmul.f32 %v2299_v34, %v2213_v52  ;;  %v2288_v61 = vld [vmem:[%s8087_s8 + $0x180] sm:$0xff]  ;;  %vm8265_vm15 = vmmov %vm8255_vm4 }
 0x365   : > { %v6335_v34 = vmul.f32 %v2288_v61, %v6148_v59  ;;  %v2250_v59 = vld [vmem:[%s8087_s8 + $0x50] sm:$0xff] }
 0x366   : > { %v2099_v51 = vpop.permute.xlu1 %2098 }
 0x368   : > { %2222 = vrot.lane.b32.xlu0 %v6036_v29, %s8247_s29 }
 0x369   : > { %2224 = vrot.lane.b32.xlu2 %v5930_v17, %s8247_s29 }
 0x36a   : > { %v2107_v36 = vpop.permute.xlu0 %2106 }
 0x36b   : > { %v2113_v28 = vsel %vm953_vm2, %v2099_v51, %v2107_v36  ;;  %v2117_v24 = vsel %vm953_vm2, %v2107_v36, %v2099_v51  ;;  %v6274_v25 = vpop.permute.xlu2 %2172 }
 0x36c   : > { %2218 = vrot.lane.b32.xlu1 %v5969_v44, %s8247_s29  ;;  %v6322_v8 = vmul.f32 %v2258_v2, %v2117_v24  ;;  %v6326_v36 = vmul.f32 %v2259_v46, %v2113_v28  ;;  %v6341_v24 = vmul.f32 %v2289_v6, %v6152_v38  ;;  %v2282_v38 = vld [vmem:[%s8087_s8 + $0x150] sm:$0xff]  ;;  %v2281_v2 = vld [vmem:[%s8087_s8 + $0x148] sm:$0xff] }
 0x36e   : > { %v2179_v11 = vpop.permute.xlu1 %2178 }
 0x36f   : > { %v2185_v18 = vsel %vm1002_vm11, %v2171_v49, %v2179_v11  ;;  %v2189_v35 = vsel %vm1002_vm11, %v2179_v11, %v2171_v49  ;;  %v6338_v11 = vmul.f32 %v2257_v3, %v6134_v21  ;;  %v2251_v21 = vld [vmem:[%s8087_s8 + $0x58] sm:$0xff] }
 0x370   : > { %2226 = vrot.lane.b32.xlu0 %v5973_v37, %s8247_s29  ;;  %v6320_v51 = vmul.f32 %v2290_v22, %v2185_v18  ;;  %v6324_v42 = vmul.f32 %v2291_v20, %v2189_v35  ;;  %v4247_v35 = vld [vmem:[%s8093_s14 + $0x48] sm:$0xff]  ;;  %v2280_v20 = vld [vmem:[%s8087_s8 + $0x140] sm:$0xff] }
 0x371   : > { %2445 = vperm.xlu2 %4451, %v4209_v19   ;;  %v2249_v22 = vld [vmem:[%s8087_s8 + $0x48] sm:$0xff] }
 0x372   : > { %v2147_v26 = vpop.permute.xlu0 %2146  ;;  %v6402_v3 = vmul.f32 %v2249_v22, %v6162_v30  ;;  %v2269_v30 = vld [vmem:[%s8087_s8 + $0xe8] sm:$0xff] }
 0x373   : > { %v2161_v48 = vsel %vm8252_vm10, %v2147_v26, %v2155_v32  ;;  %v2165_v41 = vsel %vm8253_vm12, %v2155_v32, %v2147_v26  ;;  %v2256_v32 = vld [vmem:[%s8087_s8 + $0x80] sm:$0xff]  ;;  %vm8271_vm10 = vmmov %vm8257_vm6  ;;  %vm8274_vm12 = vcmp.lt.s32.totalorder %v8242_v16, 17 }
 0x374   : > { %2440 = vperm.xlu1 %4450, %v4208_v5   ;;  %v6332_v15 = vmul.f32 %v2256_v32, %v6138_v12  ;;  %v6349_v12 = vpop.permute.xlu2 %2076  ;;  %v4249_v5 = vld [vmem:[%s8093_s14 + $0x58] sm:$0xff]  ;;  %v2248_v26 = vld [vmem:[%s8087_s8 + $0x40] sm:$0xff] }
 0x375   : > { %v4246_v32 = vld [vmem:[%s8093_s14 + $0x40] sm:$0xff]  ;;  %v6399_v61 = vmul.f32 %v2248_v26, %v6166_v13  ;;  %v4251_v26 = vld [vmem:[%s8093_s14 + $0x68] sm:$0xff] }
 0x376   : > { %v2083_v53 = vpop.permute.xlu1 %2082 }
 0x377   : > { %v2089_v39 = vsel %vm8254_vm9, %v6168_v58, %v2083_v53  ;;  %v2093_v52 = vsel %vm8255_vm4, %v2083_v53, %v6168_v58  ;;  %v4207_v58 = vld [vmem:[%s8091_s12 + $0x28] sm:$0xff]  ;;  %vm8275_vm9 = vmmov %vm8274_vm12 }
 0x378   : > { %2430 = vperm.xlu0 %4449, %v4206_v60   ;;  %v6387_v46 = vmul.f32 %v2250_v59, %v2093_v52  ;;  %v6389_v53 = vmul.f32 %v2251_v21, %v2089_v39  ;;  %v6393_v60 = vmul.f32 %v2283_v31, %v2165_v41  ;;  %v6405_v52 = vmul.f32 %v2280_v20, %v6172_v57  ;;  %v4252_v59 = vld [vmem:[%s8093_s14 + $0x70] sm:$0xff]  ;;  %v4319_v57 = vld [vmem:[%s8095_s16 + $0x68] sm:$0xff]  ;;  %vm8276_vm4 = vmmov %vm8275_vm9 }
 0x379   : > { %2692 = vperm.xlu2 %4451, %v4248_v9   ;;  %v6391_v9 = vmul.f32 %v2282_v38, %v2161_v48  ;;  %v6408_v48 = vmul.f32 %v2281_v2, %v6176_v27  ;;  %v4253_v38 = vld [vmem:[%s8093_s14 + $0x78] sm:$0xff]  ;;  %v4320_v2 = vld [vmem:[%s8095_s16 + $0x70] sm:$0xff] }
 0x37a   : > { %v6343_v28 = vpop.permute.xlu0 %2124 }
 0x37b   : > { %v2138_v13 = vsel %vm974_vm3, %v6343_v28, %v6214_v47 }
 0x37c   : > { %2435 = vperm.xlu1 %4450, %v4207_v58   ;;  %v4250_v58 = vld [vmem:[%s8093_s14 + $0x60] sm:$0xff]  ;;  %v6431_v21 = vpop.permute.xlu2 %2156  ;;  %v2341_v45 = vmul.f32 %v2269_v30, %v2138_v13 }
 0x37e   : > { %v6367_v18 = vpop.permute.xlu1 %2196 }
 0x380   : > { %2697 = vperm.xlu0 %4449, %v4249_v5   ;;  %v4321_v5 = vld [vmem:[%s8095_s16 + $0x78] sm:$0xff] }
 0x381   : > { %2687 = vperm.xlu2 %4451, %v4247_v35  }
 0x382   : > { %v2205_v41 = vpop.permute.xlu0 %2204 }
 0x383   : > { %v6413_v39 = vsel %vm8256_vm1, %v2205_v41, %v6367_v18  ;;  %vm8277_vm1 = vmmov %vm8276_vm4 }
 0x384   : > { %2682 = vperm.xlu1 %4450, %v4246_v32   ;;  %v6449_v20 = vpop.permute.xlu2 %2198 }
 0x386   : > { %v6423_v6 = vpop.permute.xlu1 %2100 }
 0x388   : > { %2712 = vperm.xlu0 %4449, %v4252_v59  }
 0x389   : > { %2702 = vperm.xlu2 %4451, %v4250_v58  }
 0x38a   : > { %v6436_v31 = vpop.permute.xlu0 %2108 }
 0x38c   : > { %2717 = vperm.xlu1 %4450, %v4253_v38   ;;  %v4318_v38 = vld [vmem:[%s8095_s16 + $0x60] sm:$0xff] }
 0x38e   : > { %v2181_v35 = vpop.permute.xlu1 %2180 }
 0x38f   : > { %v6447_v22 = vsel %vm1002_vm11, %v2181_v35, %v6274_v25 }
 0x390   : > { %2707 = vperm.xlu0 %4449, %v4251_v26   ;;  %v4301_v26 = vld [vmem:[%s8095_s16 + $0x58] sm:$0xff] }
 0x391   : > { %3225 = vperm.xlu2 %4451, %v4321_v5   ;;  %v4300_v5 = vld [vmem:[%s8095_s16 + $0x50] sm:$0xff] }
 0x392   : > { %v6454_v32 = vpop.permute.xlu0 %2148 }
 0x393   : > { %v6460_v58 = vsel %vm8257_vm6, %v6431_v21, %v6454_v32  ;;  %vm8279_vm6 = vmmov %vm8259_vm0 }
 0x394   : > { %3220 = vperm.xlu1 %4450, %v4320_v2   ;;  %v2103_v2 = vpop.permute.xlu2 %2102 }
 0x396   : > { %v6462_v59 = vpop.permute.xlu1 %2084 }
 0x398   : > { %3136 = vperm.xlu0 %4449, %v4300_v5   ;;  %v2142_v5 = vsel %vm974_vm3, %v6214_v47, %v6343_v28  ;;  %v2300_v47 = vld [vmem:[%s8087_s8 + $0x1e0] sm:$0xff]  ;;  %v2210_v28 = vsel %vm8258_vm5, %v6367_v18, %v2205_v41  ;;  %v2294_v41 = vld [vmem:[%s8087_s8 + $0x1b0] sm:$0xff]  ;;  %vm8280_vm5 = vmmov %vm8277_vm1 }
 0x399   : > { %3210 = vperm.xlu2 %4451, %v4318_v38   ;;  %v2268_v38 = vld [vmem:[%s8087_s8 + $0xe0] sm:$0xff]  ;;  %v2372_v30 = vmul.f32 %v2300_v47, %v2210_v28  ;;  %v2263_v47 = vld [vmem:[%s8087_s8 + $0xb8] sm:$0xff] }
 0x39a   : > { %v6473_v27 = vpop.permute.xlu0 %2052  ;;  %v2340_v19 = vmul.f32 %v2268_v38, %v2142_v5  ;;  %v2302_v38 = vld [vmem:[%s8087_s8 + $0x1f0] sm:$0xff] }
 0x39c   : > { %3141 = vperm.xlu1 %4450, %v4301_v26   ;;  %v4298_v26 = vld [vmem:[%s8095_s16 + $0x40] sm:$0xff]  ;;  %v6514_v17 = vpop.permute.xlu2 %2182 }
 0x39e   : > { %v2127_v63 = vpop.permute.xlu1 %2126 }
 0x3a0   : > { %3215 = vperm.xlu0 %4449, %v4319_v57  }
 0x3a1   : > { %3131 = vperm.xlu2 %4451, %v4299_v7   ;;  %v2271_v7 = vld [vmem:[%s8087_s8 + $0xf8] sm:$0xff] }
 0x3a2   : > { %v2135_v33 = vpop.permute.xlu0 %2134 }
 0x3a3   : > { %v2139_v57 = vsel %vm974_vm3, %v2127_v63, %v2135_v33  ;;  %v2143_v49 = vsel %vm974_vm3, %v2135_v33, %v2127_v63 }
 0x3a4   : > { %3126 = vperm.xlu1 %4450, %v4298_v26   ;;  %v2342_v5 = vmul.f32 %v2270_v23, %v2143_v49  ;;  %v2343_v26 = vmul.f32 %v2271_v7, %v2139_v57  ;;  %v2292_v49 = vld [vmem:[%s8087_s8 + $0x1a0] sm:$0xff]  ;;  %v2186_v23 = vsel %vm1002_vm11, %v6274_v25, %v2181_v35  ;;  %v2261_v25 = vld [vmem:[%s8087_s8 + $0xa8] sm:$0xff]  ;;  %v2114_v35 = vsel %vm953_vm2, %v6423_v6, %v6436_v31  ;;  %v2262_v57 = vld [vmem:[%s8087_s8 + $0xb0] sm:$0xff] }
 0x3a6   : > { %v6519_v37 = vpop.permute.xlu1 %2206  ;;  %v2398_v63 = vpack.c.bf16 %v2342_v5, %v2340_v19  ;;  %v2399_v13 = vpack.c.bf16 %v2343_v26, %v2341_v45  ;;  %v2260_v45 = vld [vmem:[%s8087_s8 + $0xa0] sm:$0xff]  ;;  %v8261_v5 = vpack.c.bf16 %v6212_v55, %v6222_v50  ;;  %v2364_v26 = vmul.f32 %v2292_v49, %v2186_v23  ;;  %v2254_v49 = vld [vmem:[%s8087_s8 + $0x70] sm:$0xff]  ;;  %v2255_v23 = vld [vmem:[%s8087_s8 + $0x78] sm:$0xff] }
 0x3a7   : > { %v2211_v33 = vsel %vm8259_vm0, %v6449_v20, %v6519_v37  ;;  %vm8281_vm0 = vmmov %vm8277_vm1 }
 0x3a8   : > { %v2374_v14 = vmul.f32 %v2302_v38, %v2211_v33  ;;  %2484 = vmatpush.bf16.msra.mxu0 %v2398_v63  ;;  %2541 = vmatpush.bf16.msra.mxu3 %v2399_v13  ;;  %v8260_v38 = vpack.c.bf16 %v6210_v62, %v6220_v4  ;;  %v8262_v62 = vpack.c.bf16 %v6261_v1, %v6270_v56 }
 0x3a9   : > { %v2094_v1 = vsel %vm8263_vm14, %v6462_v59, %v6349_v12  ;;  %vm8282_vm14 = vmmov %vm8281_vm0 }
 0x3aa   : > { %v2414_v18 = vpack.c.bf16 %v2374_v14, %v2372_v30  ;;  %v6534_v7 = vpop.permute.xlu0 %2174  ;;  %v2118_v14 = vsel %vm953_vm2, %v6436_v31, %v6423_v6  ;;  %v2087_v31 = vpop.permute.xlu2 %2086  ;;  %v2333_v30 = vmul.f32 %v2261_v25, %v2114_v35 }
 0x3ab   : > { %v2187_v19 = vsel %vm1002_vm11, %v6534_v7, %v6514_v17  ;;  %v2332_v6 = vmul.f32 %v2260_v45, %v2118_v14  ;;  %v2253_v45 = vld [vmem:[%s8087_s8 + $0x68] sm:$0xff]  ;;  %v2090_v14 = vsel %vm8264_vm13, %v6349_v12, %v6462_v59  ;;  %v8268_v12 = vpack.c.bf16 %v6320_v51, %v6335_v34  ;;  %vm8283_vm13 = vmmov %vm8281_vm0 }
 0x3ac   : > { %2503 = vmatpush.bf16.msra.mxu1 %v2414_v18  ;;  %v2366_v28 = vmul.f32 %v2294_v41, %v2187_v19  ;;  %2485 = vmatpush.bf16.msra.mxu0 %v8260_v38  ;;  %v2325_v38 = vmul.f32 %v2253_v45, %v2090_v14  ;;  %v2162_v51 = vsel %vm8270_vm7, %v6454_v32, %v6431_v21 }
 0x3ad   : > { %2542 = vmatpush.bf16.msra.mxu3 %v8261_v5  ;;  %v8267_v5 = vpack.c.bf16 %v6322_v8, %v6332_v15  ;;  %v2286_v8 = vld [vmem:[%s8087_s8 + $0x170] sm:$0xff]  ;;  %v8273_v21 = vpack.c.bf16 %v6389_v53, %v6402_v3  ;;  %v2245_v53 = vld [vmem:[%s8087_s8 + $0x28] sm:$0xff] }
 0x3ae   : > { %v2111_v33 = vpop.permute.xlu1 %2110  ;;  %v2410_v4 = vpack.c.bf16 %v2366_v28, %v2364_v26 }
 0x3af   : > { %v2115_v63 = vsel %vm953_vm2, %v2103_v2, %v2111_v33  ;;  %v2119_v13 = vsel %vm953_vm2, %v2111_v33, %v2103_v2  ;;  %v2252_v2 = vld [vmem:[%s8087_s8 + $0x60] sm:$0xff]  ;;  %v8269_v33 = vpack.c.bf16 %v6326_v36, %v6338_v11 }
 0x3b0   : > { %v2334_v18 = vmul.f32 %v2262_v57, %v2119_v13  ;;  %v2335_v41 = vmul.f32 %v2263_v47, %v2115_v63  ;;  %2504 = vmatpush.bf16.msra.mxu1 %v8262_v62  ;;  %v2324_v47 = vmul.f32 %v2252_v2, %v2094_v1  ;;  %v2284_v63 = vld [vmem:[%s8087_s8 + $0x160] sm:$0xff]  ;;  %v8272_v13 = vpack.c.bf16 %v6387_v46, %v6399_v61 }
 0x3b1   : > { %v2356_v34 = vmul.f32 %v2284_v63, %v2162_v51  ;;  %v2244_v62 = vld [vmem:[%s8087_s8 + $0x20] sm:$0xff] }
 0x3b2   : > { %v2394_v55 = vpack.c.bf16 %v2334_v18, %v2332_v6  ;;  %v2395_v50 = vpack.c.bf16 %v2335_v41, %v2333_v30  ;;  %v2079_v56 = vpop.permute.xlu0 %2078  ;;  %v2061_v26 = vpop.permute.xlu2 %2060  ;;  %v2278_v41 = vld [vmem:[%s8087_s8 + $0x130] sm:$0xff]  ;;  %v2276_v46 = vld [vmem:[%s8087_s8 + $0x120] sm:$0xff] }
 0x3b3   : > { %v2091_v19 = vsel %vm8265_vm15, %v2079_v56, %v2087_v31  ;;  %v2095_v25 = vsel %vm8266_vm8, %v2087_v31, %v2079_v56  ;;  %v2066_v61 = vsel %vm8274_vm12, %v6473_v27, %v2061_v26  ;;  %v2070_v3 = vsel %vm8275_vm9, %v2061_v26, %v6473_v27  ;;  %v2274_v27 = vld [vmem:[%s8087_s8 + $0x110] sm:$0xff] }
 0x3b4   : > { %2486 = vmatpush.bf16.msra.mxu0 %v2394_v55  ;;  %2505 = vmatpush.bf16.msra.mxu1 %v2410_v4  ;;  %v2326_v35 = vmul.f32 %v2254_v49, %v2095_v25  ;;  %v2327_v57 = vmul.f32 %v2255_v23, %v2091_v19  ;;  %v2246_v4 = vld [vmem:[%s8087_s8 + $0x30] sm:$0xff]  ;;  %v2247_v55 = vld [vmem:[%s8087_s8 + $0x38] sm:$0xff]  ;;  %v2350_v49 = vmul.f32 %v2278_v41, %v6036_v29  ;;  %v2272_v29 = vld [vmem:[%s8087_s8 + $0x100] sm:$0xff]  ;;  %vm8285_vm15 = vcmp.lt.s32.totalorder %v8242_v16, 111 }
 0x3b5   : > { %2543 = vmatpush.bf16.msra.mxu3 %v2395_v50  ;;  %v2348_v1 = vmul.f32 %v2276_v46, %v5998_v10  ;;  %v2316_v56 = vmul.f32 %v2244_v62, %v2070_v3  ;;  %v2317_v45 = vmul.f32 %v2245_v53, %v2066_v61  ;;  %v8278_v25 = vpack.c.bf16 %v6391_v9, %v6405_v52  ;;  %v2303_v52 = vld [vmem:[%s8087_s8 + $0x1f8] sm:$0xff]  ;;  %v4212_v41 = vld [vmem:[%s8089_s10] sm:$0xf]  ;;  %v4365_v62 = vld [vmem:[%s8089_s10 + $0x8] sm:$0xf0] }
 0x3b6   : > { %v2049_v28 = vpop.permute.xlu1 %2048  ;;  %v2390_v59 = vpack.c.bf16 %v2326_v35, %v2324_v47  ;;  %v2391_v6 = vpack.c.bf16 %v2327_v57, %v2325_v38  ;;  %v2346_v10 = vmul.f32 %v2274_v27, %v5969_v44  ;;  %v2240_v38 = vld [vmem:[%s8087_s8] sm:$0xff]  ;;  %v2344_v9 = vmul.f32 %v2272_v29, %v5893_v43  ;;  %vm8286_vm8 = vmmov %vm8285_vm15 }
 0x3b7   : > { %v2402_v57 = vpack.c.bf16 %v2350_v49, %v2348_v1  ;;  %v2215_v44 = vsel %vm8279_vm6, %v6519_v37, %v6449_v20  ;;  %v4364_v43 = vld [vmem:[%s8089_s10 + $0x4] sm:$0xf]  ;;  %v2242_v37 = vld [vmem:[%s8087_s8 + $0x10] sm:$0xff]  ;;  %v2243_v20 = vld [vmem:[%s8087_s8 + $0x18] sm:$0xff] }
 0x3b8   : > { %2487 = vmatpush.bf16.msra.mxu0 %v8267_v5  ;;  %2506 = vmatpush.bf16.msra.mxu1 %v8268_v12  ;;  %v2241_v5 = vld [vmem:[%s8087_s8 + $0x8] sm:$0xff]  ;;  %v2308_v27 = vld [vmem:[%s8087_s8 + $0x220] sm:$0xff]  ;;  %vm8288_vm12 = vmmov %vm8286_vm8 }
 0x3b9   : > { %2544 = vmatpush.bf16.msra.mxu3 %v8269_v33  ;;  %v4214_v33 = vld [vmem:[%s8089_s10 + $0xc] sm:$0xf0]  ;;  %vm8290_vm9 = vmmov %vm8286_vm8 }
 0x3ba   : > { %v6606_v31 = vpop.permute.xlu0 %2158  ;;  %v2051_v30 = vpop.permute.xlu2 %2050 }
 0x3bc   : > { %2488 = vmatpush.bf16.msra.mxu0 %v2390_v59 }
 0x3bd   : > { %2545 = vmatpush.bf16.msra.mxu3 %v2391_v6 }
 0x3be   : > { %v6618_v36 = vpop.permute.xlu1 %2150 }
 0x3bf   : > { %v2163_v15 = vsel %vm8271_vm10, %v6618_v36, %v6606_v31  ;;  %vm8287_vm10 = vmmov %vm8286_vm8 }
 0x3c0   : > { %v2358_v11 = vmul.f32 %v2286_v8, %v2163_v15  ;;  %2489 = vmatpush.bf16.msra.mxu0 %v8272_v13  ;;  %v2400_v15 = vpack.c.bf16 %v2346_v10, %v2344_v9 }
 0x3c1   : > { %2546 = vmatpush.bf16.msra.mxu3 %v8273_v21  ;;  %v6707_v21 = vor.u32 %v4364_v43, %v4214_v33 }
 0x3c2   : > { %v2406_v32 = vpack.c.bf16 %v2358_v11, %v2356_v34  ;;  %v2063_v18 = vpop.permute.xlu0 %2062  ;;  %v2221_v6 = vpop.permute.xlu2 %2220  ;;  %v2375_v34 = vmul.f32 %v2303_v52, %v2215_v44 }
 0x3c4   : > { %2507 = vmatpush.bf16.msra.mxu1 %v2406_v32 }
 0x3c6   : > { %v2055_v50 = vpop.permute.xlu1 %2054 }
 0x3c7   : > { %v2067_v23 = vsel %vm8276_vm4, %v2055_v50, %v2063_v18  ;;  %v2071_v2 = vsel %vm8277_vm1, %v2063_v18, %v2055_v50  ;;  %v2191_v50 = vsel %vm1002_vm11, %v6514_v17, %v6534_v7  ;;  %v8284_v17 = vpack.c.bf16 %v6263_v40, %v6272_v0  ;;  %v2309_v7 = vld [vmem:[%s8087_s8 + $0x228] sm:$0xff]  ;;  %vm8291_vm4 = vmmov %vm8286_vm8 }
 0x3c8   : > { %v2318_v14 = vmul.f32 %v2246_v4, %v2071_v2  ;;  %v2319_v19 = vmul.f32 %v2247_v55, %v2067_v23  ;;  %2508 = vmatpush.bf16.msra.mxu1 %v8278_v25  ;;  %v4213_v4 = vor.u32 %v4365_v62, %v4212_v41  ;;  %v2295_v55 = vld [vmem:[%s8087_s8 + $0x1b8] sm:$0xff]  ;;  %v2167_v25 = vsel %vm8270_vm7, %v6606_v31, %v6618_v36  ;;  %v2285_v31 = vld [vmem:[%s8087_s8 + $0x168] sm:$0xff]  ;;  %vm8292_vm1 = vmmov %vm8291_vm4 }
 0x3c9   : > { %v2367_v49 = vmul.f32 %v2295_v55, %v2191_v50  ;;  %v2357_v43 = vmul.f32 %v2285_v31, %v6460_v58  ;;  %vm8293_vm6 = vmmov %vm8292_vm1  ;;  %v2275_v50 = vld [vmem:[%s8087_s8 + $0x118] sm:$0xff] }
 0x3ca   : > { %v2386_v35 = vpack.c.bf16 %v2318_v14, %v2316_v56  ;;  %v2387_v47 = vpack.c.bf16 %v2319_v19, %v2317_v45  ;;  %v2057_v12 = vpop.permute.xlu0 %2056  ;;  %v2231_v23 = vpop.permute.xlu2 %2230  ;;  %v2311_v14 = vld [vmem:[%s8087_s8 + $0x238] sm:$0xff] }
 0x3cb   : > { %v2064_v59 = vsel %vm8280_vm5, %v2049_v28, %v2057_v12  ;;  %v2068_v26 = vsel %vm8281_vm0, %v2057_v12, %v2049_v28  ;;  %v2301_v28 = vld [vmem:[%s8087_s8 + $0x1e8] sm:$0xff]  ;;  %v2287_v19 = vld [vmem:[%s8087_s8 + $0x178] sm:$0xff]  ;;  %vm8297_vm5 = vcmask 261120  }
 0x3cc   : > { %2490 = vmatpush.bf16.msra.mxu0 %v2386_v35  ;;  %2509 = vmatpush.bf16.msra.mxu1 %v2402_v57  ;;  %v2312_v51 = vmul.f32 %v2240_v38, %v2068_v26  ;;  %v2313_v8 = vmul.f32 %v2241_v5, %v2064_v59  ;;  %v2373_v46 = vmul.f32 %v2301_v28, %v6413_v39  ;;  %v2293_v39 = vld [vmem:[%s8087_s8 + $0x1a8] sm:$0xff]  ;;  %v4367_v57 = vld [vmem:[%s8089_s10 + $0x1c] sm:$0xf]  ;;  %v4224_v59 = vld [vmem:[%s8089_s10 + $0x18] sm:$0xf] }
 0x3cd   : > { %2547 = vmatpush.bf16.msra.mxu3 %v2387_v47  ;;  %v2365_v1 = vmul.f32 %v2293_v39, %v6447_v22  ;;  %v2310_v22 = vld [vmem:[%s8087_s8 + $0x230] sm:$0xff]  ;;  %v4226_v47 = vld [vmem:[%s8089_s10 + $0x24] sm:$0xf0]  ;;  %v2359_v36 = vmul.f32 %v2287_v19, %v2167_v25  ;;  %v4368_v26 = vld [vmem:[%s8089_s10 + $0x20] sm:$0xf0]  ;;  %v8294_v39 = vpack.c.bf16 %v6393_v60, %v6408_v48 }
 0x3ce   : > { %v2059_v63 = vpop.permute.xlu1 %2058  ;;  %v2415_v3 = vpack.c.bf16 %v2375_v34, %v2373_v46  ;;  %v4229_v44 = vor.u32 %v4367_v57, %v4226_v47  ;;  %v4220_v46 = vld [vmem:[%s8089_s10 + $0x8] sm:$0xf]  ;;  %vm8298_vm0 = vmmov %vm8297_vm5  ;;  %v4232_v60 = vld [vmem:[%s8089_s10 + $0x20] sm:$0xf] }
 0x3cf   : > { %v2065_v11 = vsel %vm8282_vm14, %v2051_v30, %v2059_v63  ;;  %v2069_v13 = vsel %vm8283_vm13, %v2059_v63, %v2051_v30  ;;  %v2411_v40 = vpack.c.bf16 %v2367_v49, %v2365_v1  ;;  %v2306_v63 = vld [vmem:[%s8087_s8 + $0x210] sm:$0xff]  ;;  %v8295_v49 = vld [vmem:[#allocation24_spill] sm:$0xff]  ;;  %v4369_v48 = vld [vmem:[%s8089_s10 + $0x28] sm:$0xf0] }
 0x3d0   : > { %v2314_v32 = vmul.f32 %v2242_v37, %v2069_v13  ;;  %v2315_v18 = vmul.f32 %v2243_v20, %v2065_v11  ;;  %2510 = vmatpush.bf16.msra.mxu1 %v2400_v15  ;;  %v8289_v37 = vpack.c.bf16 %v6324_v42, %v6341_v24  ;;  %v2305_v20 = vld [vmem:[%s8087_s8 + $0x208] sm:$0xff]  ;;  %v2307_v42 = vld [vmem:[%s8087_s8 + $0x218] sm:$0xff]  ;;  %v4225_v15 = vor.u32 %v4368_v26, %v4224_v59  ;;  %vm8299_vm14 = vmmov %vm8298_vm0 }
 0x3d1   : > { %v2279_v13 = vld [vmem:[%s8087_s8 + $0x138] sm:$0xff]  ;;  %vm8300_vm13 = vmmov %vm8298_vm0  ;;  %v6863_v26 = vld [vmem:[%s806_s27 + $0x10] sm:$0xff] }
 0x3d2   : > { %v2384_v53 = vpack.c.bf16 %v2314_v32, %v2312_v51  ;;  %v2385_v61 = vpack.c.bf16 %v2315_v18, %v2313_v8  ;;  %v2217_v30 = vpop.permute.xlu0 %2216  ;;  %v2225_v33 = vpop.permute.xlu2 %2224  ;;  %v2407_v51 = vpack.c.bf16 %v2359_v36, %v2357_v43  ;;  %v6853_v36 = vld [vmem:[%s806_s27 + $0x38] sm:$0xff]  ;;  %vm8304_vm7 = vmmov %vm8298_vm0 }
 0x3d3   : > { %2511 = vmatmul.bf16.vlgmr.msra.gmra.mxu1 %v6707_v21  ;;  %v2232_v28 = vsel %vm8290_vm9, %v2217_v30, %v2225_v33  ;;  %v2236_v58 = vsel %vm8291_vm4, %v2225_v33, %v2217_v30  ;;  %v6865_v43 = vld [vmem:[%s806_s27 + $0x18] sm:$0xff]  ;;  %vm8308_vm4 = vmmov %vm8298_vm0 }
 0x3d4   : > { %2491 = vmatpush.bf16.msra.mxu0 %v2384_v53  ;;  %2548 = vmatpush.bf16.msra.mxu3 %v2385_v61  ;;  %v2377_v18 = vmul.f32 %v2305_v20, %v2236_v58  ;;  %v4366_v53 = vld [vmem:[%s8089_s10 + $0x10] sm:$0xf0]  ;;  %v2277_v61 = vld [vmem:[%s8087_s8 + $0x128] sm:$0xff]  ;;  %v2619_v20 = vpack.c.bf16 %v6865_v43, %v6863_v26 }
 0x3d5   : > { %v4221_v55 = vor.u32 %v4366_v53, %v4220_v46 }
 0x3d6   : > { %v2229_v2 = vpop.permute.xlu1 %2228 }
 0x3d7   : > { %2492 = vmatmul.bf16.vlgmr.msra.gmra.mxu0 %v4213_v4  ;;  %2549 = vmatmul.bf16.vlgmr.msra.gmra.mxu3 %v4213_v4  ;;  %v2234_v56 = vsel %vm8285_vm15, %v2221_v6, %v2229_v2  ;;  %v2238_v45 = vsel %vm8286_vm8, %v2229_v2, %v2221_v6  ;;  %v2304_v6 = vld [vmem:[%s8087_s8 + $0x200] sm:$0xff]  ;;  %v2351_v4 = vmul.f32 %v2279_v13, %v6038_v54  ;;  %v2273_v2 = vld [vmem:[%s8087_s8 + $0x108] sm:$0xff]  ;;  %vm8302_vm15 = vcmask 523264  }
 0x3d8   : > { %2560 = vmatpush.bf16.msrb.mxu0 %v2415_v3  ;;  %v2380_v10 = vmul.f32 %v2308_v27, %v2234_v56  ;;  %v2381_v38 = vmul.f32 %v2309_v7, %v2238_v45  ;;  %v2376_v32 = vmul.f32 %v2304_v6, %v2232_v28  ;;  %v8296_v27 = vld [vmem:[#allocation23_spill] sm:$0xff]  ;;  %v4233_v45 = vor.u32 %v4369_v48, %v4232_v60  ;;  %vm8303_vm8 = vmmov %vm8302_vm15 }
 0x3d9   : > { %v2347_v54 = vmul.f32 %v2275_v50, %v8296_v27  ;;  %vm8307_vm9 = vmmov %vm8303_vm8 }
 0x3da   : > { %v2223_v0 = vpop.permute.xlu0 %2222 }
 0x3db   : > { %v2235_v29 = vsel %vm8287_vm10, %v2223_v0, %v2231_v23  ;;  %v2239_v35 = vsel %vm8288_vm12, %v2231_v23, %v2223_v0  ;;  %v2349_v23 = vmul.f32 %v2277_v61, %v8295_v49  ;;  %v2446_v49 = vpop.permute.xlu2 %2445  ;;  %vm8305_vm10 = vmmov %vm8298_vm0 }
 0x3dc   : > { %2561 = vmatpush.bf16.msrb.mxu0 %v8284_v17  ;;  %v2382_v5 = vmul.f32 %v2310_v22, %v2235_v29  ;;  %v2383_v12 = vmul.f32 %v2311_v14, %v2239_v35  ;;  %v4612_v17 = vld [vmem:[%s5881_s24 + $0x8] sm:$0xff]  ;;  %vm8306_vm12 = vmmov %vm8303_vm8 }
 0x3dd   : > { %v2403_v1 = vpack.c.bf16 %v2351_v4, %v2349_v23  ;;  %v2345_v7 = vmul.f32 %v4612_v17, %v2273_v2 }
 0x3de   : > { %v2418_v9 = vpack.c.bf16 %v2382_v5, %v2380_v10  ;;  %v2419_v52 = vpack.c.bf16 %v2383_v12, %v2381_v38  ;;  %v2219_v24 = vpop.permute.xlu1 %2218  ;;  %v6847_v10 = vld [vmem:[%s806_s27 + $0x20] sm:$0xff]  ;;  %v6849_v38 = vld [vmem:[%s806_s27 + $0x28] sm:$0xff]  ;;  %v6851_v5 = vld [vmem:[%s806_s27 + $0x30] sm:$0xff] }
 0x3df   : > { %v2401_v56 = vpack.c.bf16 %v2347_v54, %v2345_v7  ;;  %v2621_v59 = vpack.c.bf16 %v6853_v36, %v6851_v5 }
 0x3e0   : > { %2562 = vmatpush.bf16.msrb.mxu0 %v2411_v40  ;;  %2528 = vmatpush.bf16.msra.mxu2 %v2418_v9  ;;  %v2620_v9 = vpack.c.bf16 %v6849_v38, %v6847_v10 }
 0x3e1   : > { %2585 = vmatpush.bf16.msrb.mxu1 %v2419_v52  ;;  %v6857_v52 = vld [vmem:[%s806_s27] sm:$0xff]  ;;  %v2652_v58 = vunpack.c.l.b16 %v2621_v59 }
 0x3e2   : > { %v2227_v8 = vpop.permute.xlu0 %2226  ;;  %v2650_v6 = vunpack.c.l.b16 %v2620_v9 }
 0x3e3   : > { %2516 = vmatmul.bf16.gmra.mxu1 %v4229_v44  ;;  %v2233_v34 = vsel %vm8292_vm1, %v2219_v24, %v2227_v8  ;;  %v2237_v11 = vsel %vm8293_vm6, %v2227_v8, %v2219_v24  ;;  %v2648_v24 = vunpack.c.l.b16 %v2619_v20  ;;  %v2649_v8 = vunpack.c.h.b16 %v2619_v20  ;;  %vm8309_vm1 = vmmov %vm8298_vm0 }
 0x3e4   : > { %2563 = vmatpush.bf16.msrb.mxu0 %v8289_v37  ;;  %v2378_v41 = vmul.f32 %v2306_v63, %v2233_v34  ;;  %v2379_v62 = vmul.f32 %v2307_v42, %v2237_v11  ;;  %v2651_v37 = vunpack.c.h.b16 %v2620_v9  ;;  %v2653_v63 = vunpack.c.h.b16 %v2621_v59  ;;  %vm8310_vm6 = vmmov %vm8303_vm8 }
 0x3e5   : > { %v6871_v34 = vpack.c.b16 %v2652_v58, %v2650_v6 }
 0x3e6   : > { %v2416_v3 = vpack.c.bf16 %v2378_v41, %v2376_v32  ;;  %v2417_v30 = vpack.c.bf16 %v2379_v62, %v2377_v18  ;;  %v6873_v11 = vpack.c.b16 %v2653_v63, %v2651_v37 }
 0x3e7   : > { %2497 = vmatmul.bf16.gmra.mxu0 %v4225_v15  ;;  %2554 = vmatmul.bf16.gmra.mxu3 %v4225_v15  ;;  %v2441_v15 = vpop.permute.xlu1 %2440 }
 0x3e8   : > { %2564 = vmatpush.bf16.msrb.mxu0 %v2407_v51  ;;  %2529 = vmatpush.bf16.msra.mxu2 %v2416_v3 }
 0x3e9   : > { %2586 = vmatpush.bf16.msrb.mxu1 %v2417_v30  ;;  %2785 = vmatpush.bf16.msrb.mxu3 %v6873_v11 }
 0x3ea   : > { %v2431_v4 = vpop.permute.xlu0 %2430 }
 0x3eb   : > { %4234 = vmatmul.msk.bf16.vlgmr.msra.gmra.mxu2 %vm8297_vm5, %v4221_v55  ;;  %vm8311_vm5 = vmmov %vm8310_vm6 }
 0x3ec   : > { %2565 = vmatpush.bf16.msrb.mxu0 %v8294_v39  ;;  %2756 = vmatpush.bf16.msrb.mxu2 %v6871_v34 }
 0x3ef   : > { %v2436_v53 = vpop.permute.xlu1 %2435 }
 0x3f0   : > { %2566 = vmatpush.bf16.msrb.mxu0 %v2403_v1 }
 0x3f3   : > { %4236 = vmatmul.msk.bf16.vlgmr.msrb.gmra.mxu1 %vm8298_vm0, %v4221_v55 }
 0x3f4   : > { %2567 = vmatpush.bf16.msrb.mxu0 %v2401_v56 }
 0x3f7   : > { %2568 = vmatmul.bf16.vlgmr.msrb.gmra.mxu0 %v6707_v21 }
 0x3fb   : > { %4235 = vmatmul.msk.bf16.gmra.mxu2 %vm8299_vm14, %v4233_v45  ;;  %vm8312_vm14 = vmmov %vm8298_vm0 }
 0x403   : > { %4237 = vmatmul.msk.bf16.gmra.mxu1 %vm8300_vm13, %v4233_v45  ;;  %vm8313_vm13 = vmmov %vm8311_vm5 }
 0x407   : > { %2573 = vmatmul.bf16.gmra.mxu0 %v4229_v44  ;;  %v6859_v44 = vld [vmem:[%s806_s27 + $0x8] sm:$0xff]  ;;  %s8404_s27 = sshll.u32 %s4967_s23, 2 }
 0x408   : > { %v2618_v33 = vpack.c.bf16 %v6859_v44, %v6857_v52  ;;  %s811_s17 = scalar_lea.vmem %s8405_s22, %s8404_s27 }
 0x40a   : > { %v2646_v42 = vunpack.c.l.b16 %v2618_v33  ;;  %v2647_v51 = vunpack.c.h.b16 %v2618_v33 }
 0x40c   : > { %v6877_v32 = vpack.c.b16 %v2648_v24, %v2646_v42  ;;  %v6879_v18 = vpack.c.b16 %v2649_v8, %v2647_v51 }
 0x40e   : > { %2757 = vmatpush.bf16.msrb.mxu2 %v6877_v32  ;;  %2786 = vmatpush.bf16.msrb.mxu3 %v6879_v18 }
 0x450   : > { %v6833_v22 = vpop.f32.mrf.mxu1 }
 0x454   : > { %v2493_v14 = vpop.f32.mrf.mxu0 }
 0x455   : > { %v2494_v54 = vadd.f32 %v2493_v14, %v2431_v4 }
 0x458   : > { %v6835_v40 = vpop.f32.mrf.mxu1 }
 0x45a   : > { %v2550_v35 = vpop.f32.mrf.mxu3 }
 0x45b   : > { %v2551_v23 = vadd.f32 %v2550_v35, %v2431_v4 }
 0x45c   : > { %v2495_v0 = vpop.f32.mrf.mxu0 }
 0x45d   : > { %v2496_v2 = vadd.f32 %v2495_v0, %v2436_v53 }
 0x45f   : > { %v2515_v48 = vadd.f32 %v6835_v40, %v2496_v2  ;;  %v2693_v2 = vpop.permute.xlu2 %2692 }
 0x460   : > { %v2517_v19 = vpop.f32.mrf.mxu1 }
 0x462   : > { %v2552_v12 = vpop.f32.mrf.mxu3 }
 0x463   : > { %v2553_v55 = vadd.f32 %v2552_v12, %v2436_v53 }
 0x464   : > { %v2498_v25 = vpop.f32.mrf.mxu0 }
 0x465   : > { %v2499_v50 = vadd.f32 %v2498_v25, %v2441_v15  ;;  %v2513_v25 = vadd.f32 %v6833_v22, %v2494_v54 }
 0x467   : > { %v2518_v56 = vadd.f32 %v2517_v19, %v2499_v50  ;;  %v4370_v50 = vld [vmem:[%s8092_s13 + $0x20] sm:$0xff] }
 0x468   : > { %v6837_v29 = vpop.f32.mrf.mxu1 }
 0x46a   : > { %v2555_v62 = vpop.f32.mrf.mxu3 }
 0x46b   : > { %v2556_v61 = vadd.f32 %v2555_v62, %v2441_v15 }
 0x46c   : > { %v2500_v57 = vpop.f32.mrf.mxu0 }
 0x46d   : > { %v2501_v1 = vadd.f32 %v2500_v57, %v2446_v49 }
 0x46e   : > { %v6839_v21 = vpop.f32.mrf.mxu2 }
 0x46f   : > { %v2520_v12 = vadd.f32 %v6837_v29, %v2501_v1  ;;  %v2532_v19 = vadd.f32 %v6839_v21, %v2513_v25  ;;  %v2683_v1 = vpop.permute.xlu1 %2682  ;;  %v6942_v25 = vpop.permute.xlu0 %2697 }
 0x470   : > { %v6841_v47 = vpop.f32.mrf.mxu1 }
 0x471   : > { %v2598_v8 = vmax.f32 %v2532_v19, 0.0 }
 0x472   : > { %v2557_v17 = vpop.f32.mrf.mxu3 }
 0x473   : > { %v2558_v9 = vadd.f32 %v2557_v17, %v2446_v49  ;;  %v4371_v49 = vld [vmem:[%s8092_s13 + $0x28] sm:$0xff]  ;;  %v2688_v17 = vpop.permute.xlu2 %2687 }
 0x474   : > { %v2569_v31 = vpop.f32.mrf.mxu0 }
 0x475   : > { %v2570_v7 = vadd.f32 %v2569_v31, %v2551_v23  ;;  %v4377_v23 = vld [vmem:[%s8094_s15 + $0x38] sm:$0xff] }
 0x476   : > { %v2533_v28 = vpop.f32.mrf.mxu2 }
 0x477   : > { %v2589_v35 = vadd.f32 %v6841_v47, %v2570_v7  ;;  %v2534_v57 = vadd.f32 %v2533_v28, %v2515_v48 }
 0x478   : > { %v2590_v13 = vpop.f32.mrf.mxu1 }
 0x479   : > { %v2599_v63 = vmax.f32 %v2589_v35, 0.0  ;;  %v2600_v42 = vmax.f32 %v2534_v57, 0.0 }
 0x47b   : > { %v2614_v47 = vpack.c.bf16 %v2599_v63, %v2598_v8  ;;  %v6955_v8 = vpop.permute.xlu0 %2712 }
 0x47c   : > { %v2571_v41 = vpop.f32.mrf.mxu0 }
 0x47d   : > { %v2572_v27 = vadd.f32 %v2571_v41, %v2553_v55 }
 0x47e   : > { %v2536_v46 = vpop.f32.mrf.mxu2 }
 0x47f   : > { %v2591_v59 = vadd.f32 %v2590_v13, %v2572_v27  ;;  %v2537_v33 = vadd.f32 %v2536_v46, %v2518_v56 }
 0x480   : > { %v2593_v3 = vpop.f32.mrf.mxu1 }
 0x481   : > { %v2601_v20 = vmax.f32 %v2591_v59, 0.0  ;;  %v2602_v40 = vmax.f32 %v2537_v33, 0.0 }
 0x483   : > { %v2615_v22 = vpack.c.bf16 %v2601_v20, %v2600_v42 }
 0x484   : > { %v2574_v30 = vpop.f32.mrf.mxu0 }
 0x485   : > { %v2575_v39 = vadd.f32 %v2574_v30, %v2556_v61  ;;  %v2628_v21 = vunpack.c.l.b16 %v2615_v22  ;;  %v2629_v61 = vunpack.c.h.b16 %v2615_v22  ;;  %v2627_v30 = vunpack.c.h.b16 %v2614_v47 }
 0x486   : > { %v2538_v45 = vpop.f32.mrf.mxu2 }
 0x487   : > { %v2594_v60 = vadd.f32 %v2593_v3, %v2575_v39  ;;  %v2539_v14 = vadd.f32 %v2538_v45, %v2520_v12  ;;  %v2626_v3 = vunpack.c.l.b16 %v2614_v47  ;;  %v2635_v55 = vpack.c.b16 %v2629_v61, %v2627_v30  ;;  %v4374_v39 = vld [vmem:[%s8094_s15 + $0x20] sm:$0xff]  ;;  %v6940_v12 = vpop.permute.xlu1 %2717 }
 0x488   : > { %v2595_v31 = vpop.f32.mrf.mxu1 }
 0x489   : > { %v2603_v6 = vmax.f32 %v2594_v60, 0.0  ;;  %v2604_v51 = vmax.f32 %v2539_v14, 0.0  ;;  %v2634_v4 = vpack.c.b16 %v2628_v21, %v2626_v3  ;;  %v6944_v14 = vpop.permute.xlu2 %2702 }
 0x48b   : > { %v2616_v24 = vpack.c.bf16 %v2603_v6, %v2602_v40 }
 0x48c   : > { %v2576_v0 = vpop.f32.mrf.mxu0 }
 0x48d   : > { %v2577_v37 = vadd.f32 %v2576_v0, %v2558_v9  ;;  %v2630_v13 = vunpack.c.l.b16 %v2616_v24  ;;  %v2631_v41 = vunpack.c.h.b16 %v2616_v24 }
 0x48f   : > { %v2596_v58 = vadd.f32 %v2595_v31, %v2577_v37  ;;  %v6952_v24 = vpop.permute.xlu1 %3220 }
 0x491   : > { %v2605_v29 = vmax.f32 %v2596_v58, 0.0 }
 0x493   : > { %v2617_v15 = vpack.c.bf16 %v2605_v29, %v2604_v51 }
 0x495   : > { %v2632_v28 = vunpack.c.l.b16 %v2617_v15  ;;  %v2633_v62 = vunpack.c.h.b16 %v2617_v15 }
 0x497   : > { %v2636_v46 = vpack.c.b16 %v2632_v28, %v2630_v13  ;;  %v2637_v53 = vpack.c.b16 %v2633_v62, %v2631_v41  ;;  %v6959_v41 = vpop.permute.xlu2 %3225 }
 0x499   : > { %2758 = vmatpush.bf16.msrb.mxu2 %v2636_v46  ;;  %2787 = vmatpush.bf16.msrb.mxu3 %v2637_v53 }
 0x49a   : > { %3166 = vmatpush.bf16.msra.mxu0 %v2636_v46  ;;  %3185 = vmatpush.bf16.msra.mxu1 %v2637_v53 }
 0x49d   : > { %2759 = vmatpush.bf16.msrb.mxu2 %v2634_v4  ;;  %2788 = vmatpush.bf16.msrb.mxu3 %v2635_v55 }
 0x49e   : > { %3167 = vmatpush.bf16.msra.mxu0 %v2634_v4  ;;  %3186 = vmatpush.bf16.msra.mxu1 %v2635_v55 }
 0x4a0   : > { %4270 = vmatmul.msk.bf16.vlgmr.msrb.gmra.mxu2 %vm8302_vm15, %v4370_v50  ;;  %4274 = vmatmul.msk.bf16.vlgmr.msrb.gmra.mxu3 %vm8303_vm8, %v4370_v50  ;;  %vm8314_vm15 = vmmov %vm8311_vm5 }
 0x4a1   : > { %4310 = vmatmul.msk.bf16.vlgmr.msra.gmra.mxu0 %vm8304_vm7, %v4374_v39  ;;  %4312 = vmatmul.msk.bf16.vlgmr.msra.gmra.mxu1 %vm8305_vm10, %v4374_v39  ;;  %vm8315_vm8 = vmmov %vm8298_vm0 }
 0x4a2   : > { %3250 = vmatpush.bf16.msrb.mxu0 %v6871_v34  ;;  %3269 = vmatpush.bf16.msrb.mxu1 %v6873_v11  ;;  %v4375_v34 = vld [vmem:[%s8094_s15 + $0x28] sm:$0xff]  ;;  %v4372_v11 = vld [vmem:[%s8092_s13 + $0x30] sm:$0xff]  ;;  %vm8316_vm7 = vmmov %vm8298_vm0 }
 0x4a6   : > { %3251 = vmatpush.bf16.msrb.mxu0 %v6877_v32  ;;  %3270 = vmatpush.bf16.msrb.mxu1 %v6879_v18  ;;  %v4376_v32 = vld [vmem:[%s8094_s15 + $0x30] sm:$0xff]  ;;  %v4373_v18 = vld [vmem:[%s8092_s13 + $0x38] sm:$0xff] }
 0x4b0   : > { %4271 = vmatmul.msk.bf16.gmra.mxu2 %vm8306_vm12, %v4371_v49  ;;  %4275 = vmatmul.msk.bf16.gmra.mxu3 %vm8307_vm9, %v4371_v49 }
 0x4b1   : > { %4311 = vmatmul.msk.bf16.gmra.mxu0 %vm8308_vm4, %v4375_v34  ;;  %4313 = vmatmul.msk.bf16.gmra.mxu1 %vm8309_vm1, %v4375_v34  ;;  %v6964_v34 = vpop.permute.xlu1 %3141 }
 0x4c0   : > { %4272 = vmatmul.msk.bf16.gmra.mxu2 %vm8310_vm6, %v4372_v11  ;;  %4276 = vmatmul.msk.bf16.gmra.mxu3 %vm8311_vm5, %v4372_v11 }
 0x4c1   : > { %4330 = vmatmul.msk.bf16.vlgmr.msrb.gmra.mxu0 %vm8298_vm0, %v4376_v32  ;;  %4332 = vmatmul.msk.bf16.vlgmr.msrb.gmra.mxu1 %vm8312_vm14, %v4376_v32 }
 0x4d0   : > { %4273 = vmatmul.msk.bf16.gmra.mxu2 %vm8313_vm13, %v4373_v18  ;;  %4277 = vmatmul.msk.bf16.gmra.mxu3 %vm8314_vm15, %v4373_v18 }
 0x4d1   : > { %4331 = vmatmul.msk.bf16.gmra.mxu0 %vm8315_vm8, %v4377_v23  ;;  %4333 = vmatmul.msk.bf16.gmra.mxu1 %vm8316_vm7, %v4377_v23 }
 0x51e   : > { %v6932_v27 = vpop.f32.mrf.mxu0  ;;  %v6934_v54 = vpop.f32.mrf.mxu1 }
 0x523   : > { %v2761_v7 = vpop.f32.mrf.mxu2  ;;  %v2790_v56 = vpop.f32.mrf.mxu3 }
 0x524   : > { %v2762_v60 = vadd.f32 %v2761_v7, %v2683_v1  ;;  %v2791_v48 = vadd.f32 %v2790_v56, %v2683_v1  ;;  %v6972_v56 = vpop.permute.xlu0 %2707 }
 0x526   : > { %v4278_v45 = vmul.f32 -1.442695, %v2762_v60  ;;  %v4279_v9 = vmul.f32 -1.442695, %v2791_v48  ;;  %v6936_v59 = vpop.f32.mrf.mxu0  ;;  %v6938_v33 = vpop.f32.mrf.mxu1 }
 0x528   : > { %4532 = vpow2.f32 %v4278_v45 }
 0x529   : > { %4534 = vpow2.f32 %v4279_v9 }
 0x52b   : > { %v2763_v35 = vpop.f32.mrf.mxu2  ;;  %v2792_v0 = vpop.f32.mrf.mxu3 }
 0x52c   : > { %v2764_v57 = vadd.f32 %v2763_v35, %v2688_v17  ;;  %v2793_v6 = vadd.f32 %v2792_v0, %v2688_v17 }
 0x52e   : > { %v4533_v37 = vpop.eup %4532  ;;  %v6946_v19 = vpop.f32.mrf.mxu0  ;;  %v4280_v58 = vmul.f32 -1.442695, %v2764_v57  ;;  %v4281_v42 = vmul.f32 -1.442695, %v2793_v6 }
 0x52f   : > { %v6948_v31 = vpop.f32.mrf.mxu1  ;;  %v4535_v20 = vpop.eup %4534  ;;  %v2834_v40 = vadd.f32 1.0, %v4533_v37 }
 0x530   : > { %v6950_v63 = vadd.f32 1.0, %v4535_v20 }
 0x531   : > { %4536 = vrcp.f32 %v2834_v40  ;;  %v2851_v50 = vand.u32 2147483647, %v2834_v40  ;;  %v2853_v39 = vand.u32 2147483648, %v2834_v40  ;;  %vm2847_vm9 = vweird.f32 %v2834_v40 }
 0x532   : > { %4538 = vrcp.f32 %v6950_v63  ;;  %v2868_v7 = vand.u32 2147483648, %v6950_v63  ;;  %vm2862_vm1 = vweird.f32 %v6950_v63  ;;  %v2866_v45 = vand.u32 2147483647, %v6950_v63 }
 0x533   : > { %4540 = vpow2.f32 %v4280_v58  ;;  %v2766_v51 = vpop.f32.mrf.mxu2  ;;  %v2795_v29 = vpop.f32.mrf.mxu3  ;;  %v2854_v0 = vor.u32 1.1754944e-38, %v2853_v39  ;;  %vm2852_vm5 = vcmp.eq.f32.partialorder %v2851_v50, 8.507059e+37 }
 0x534   : > { %4542 = vpow2.f32 %v4281_v42  ;;  %v2767_v22 = vadd.f32 %v2766_v51, %v2693_v2  ;;  %v2796_v15 = vadd.f32 %v2795_v29, %v2693_v2  ;;  %vm2867_vm0 = vcmp.eq.f32.partialorder %v2866_v45, 8.507059e+37 }
 0x536   : > { %v6957_v47 = vpop.f32.mrf.mxu0  ;;  %v4282_v21 = vmul.f32 -1.442695, %v2767_v22  ;;  %v4283_v30 = vmul.f32 -1.442695, %v2796_v15 }
 0x537   : > { %v4537_v13 = vpop.eup %4536  ;;  %v6961_v62 = vpop.f32.mrf.mxu1 }
 0x538   : > { %v4539_v28 = vpop.eup %4538  ;;  %v2843_v46 = vmul.f32 %v4537_v13, %v2834_v40  ;;  %vm2848_vm10 = vweird.f32 %v4537_v13  ;;  %4544 = vpow2.f32 %v4282_v21  ;;  %v3211_v40 = vpop.permute.xlu2 %3210 }
 0x539   : > { %v4541_v53 = vpop.eup %4540  ;;  %v2858_v61 = vmul.f32 %v4539_v28, %v6950_v63  ;;  %vm2863_vm12 = vweird.f32 %v4539_v28  ;;  %4546 = vpow2.f32 %v4283_v30  ;;  %vm6974_vm4 = vmor %vm2847_vm9, %vm2848_vm10  ;;  %v2869_v63 = vor.u32 1.1754944e-38, %v2868_v7 }
 0x53a   : > { %v4543_v3 = vpop.eup %4542  ;;  %v2844_v4 = vsub.f32 1.0, %v2843_v46  ;;  %v6966_v11 = vadd.f32 1.0, %v4541_v53  ;;  %vm6984_vm6 = vmor %vm2862_vm1, %vm2863_vm12 }
 0x53b   : > { %v2768_v55 = vpop.f32.mrf.mxu2  ;;  %v2859_v49 = vsub.f32 1.0, %v2858_v61  ;;  %v2797_v18 = vpop.f32.mrf.mxu3  ;;  %v6969_v2 = vadd.f32 1.0, %v4543_v3 }
 0x53c   : > { %v2769_v32 = vadd.f32 %v2768_v55, %v6942_v25  ;;  %v2845_v23 = vmul.f32 %v4537_v13, %v2844_v4  ;;  %4548 = vrcp.f32 %v6966_v11  ;;  %v2798_v37 = vadd.f32 %v2797_v18, %v6942_v25  ;;  %v3127_v3 = vpop.permute.xlu1 %3126  ;;  %v7003_v18 = vpop.permute.xlu0 %3136 }
 0x53d   : > { %v2860_v1 = vmul.f32 %v4539_v28, %v2859_v49  ;;  %4550 = vrcp.f32 %v6969_v2  ;;  %v3170_v50 = vadd.f32 %v6932_v27, %v3127_v3  ;;  %vm2877_vm14 = vweird.f32 %v6966_v11 }
 0x53e   : > { %v2846_v17 = vadd.f32 %v4537_v13, %v2845_v23  ;;  %v4284_v9 = vmul.f32 -1.442695, %v2769_v32  ;;  %v3253_v57 = vpop.f32.mrf.mxu0  ;;  %v4545_v51 = vpop.eup %4544  ;;  %v4285_v53 = vmul.f32 -1.442695, %v2798_v37  ;;  %v3189_v23 = vadd.f32 %v6934_v54, %v3127_v3 }
 0x53f   : > { %v2861_v48 = vadd.f32 %v4539_v28, %v2860_v1  ;;  %v3272_v42 = vpop.f32.mrf.mxu1  ;;  %v3254_v29 = vadd.f32 %v3253_v57, %v3211_v40  ;;  %v4547_v15 = vpop.eup %4546  ;;  %v2883_v57 = vand.u32 2147483648, %v6966_v11  ;;  %vm2892_vm13 = vweird.f32 %v6969_v2 }
 0x540   : > { %v2850_v35 = vsel %vm6974_vm4, %v4537_v13, %v2846_v17  ;;  %4552 = vpow2.f32 %v4284_v9  ;;  %v3273_v25 = vadd.f32 %v3272_v42, %v3211_v40  ;;  %v7000_v39 = vadd.f32 1.0, %v4547_v15 }
 0x541   : > { %v2865_v20 = vsel %vm6984_vm6, %v4539_v28, %v2861_v48  ;;  %v2855_v58 = vsel %vm2852_vm5, %v2854_v0, %v2850_v35  ;;  %v6995_v28 = vadd.f32 1.0, %v4545_v51  ;;  %v2881_v48 = vand.u32 2147483647, %v6966_v11 }
 0x542   : > { %v2870_v13 = vsel %vm2867_vm0, %v2869_v63, %v2865_v20  ;;  %v3282_v21 = vmul.f32 %v3254_v29, %v2855_v58  ;;  %v6993_v61 = vpop.eup %4548 }
 0x543   : > { %v2771_v22 = vpop.f32.mrf.mxu2  ;;  %v2800_v4 = vpop.f32.mrf.mxu3  ;;  %v3283_v49 = vmul.f32 %v3273_v25, %v2870_v13  ;;  %v2873_v60 = vmul.f32 %v6993_v61, %v6966_v11  ;;  %vm2878_vm15 = vweird.f32 %v6993_v61  ;;  %v2898_v13 = vand.u32 2147483648, %v6969_v2 }
 0x544   : > { %v2772_v46 = vadd.f32 %v2771_v22, %v6944_v14  ;;  %v6997_v55 = vpop.eup %4550  ;;  %v2801_v32 = vadd.f32 %v2800_v4, %v6944_v14  ;;  %v3290_v1 = vadd.f32 %v3282_v21, %v3170_v50  ;;  %vm2879_vm7 = vmor %vm2877_vm14, %vm2878_vm15  ;;  %vm2882_vm10 = vcmp.eq.f32.partialorder %v2881_v48, 8.507059e+37 }
 0x545   : > { %v2888_v27 = vmul.f32 %v6997_v55, %v6969_v2  ;;  %v3291_v14 = vadd.f32 %v3283_v49, %v3189_v23  ;;  %v2874_v45 = vsub.f32 1.0, %v2873_v60  ;;  %vm2893_vm8 = vweird.f32 %v6997_v55  ;;  %v3216_v49 = vpop.permute.xlu0 %3215 }
 0x546   : > { %v4286_v30 = vmul.f32 -1.442695, %v2772_v46  ;;  %v4287_v17 = vmul.f32 -1.442695, %v2801_v32  ;;  %v4553_v7 = vpop.eup %4552  ;;  %v2896_v21 = vand.u32 2147483647, %v6969_v2  ;;  %vm7047_vm12 = vmor %vm2892_vm13, %vm2893_vm8  ;;  %vm2907_vm1 = vweird.f32 %v6995_v28 }
 0x547   : > { %v2889_v9 = vsub.f32 1.0, %v2888_v27  ;;  %v7015_v0 = vadd.f32 1.0, %v4553_v7  ;;  %v2875_v37 = vmul.f32 %v6993_v61, %v2874_v45  ;;  %v2899_v7 = vor.u32 1.1754944e-38, %v2898_v13  ;;  %v3274_v60 = vpop.f32.mrf.mxu1 }
 0x548   : > { %4554 = vpow2.f32 %v4286_v30  ;;  %vm2897_vm9 = vcmp.eq.f32.partialorder %v2896_v21, 8.507059e+37 }
 0x549   : > { %4556 = vpow2.f32 %v4285_v53  ;;  %v2890_v20 = vmul.f32 %v6997_v55, %v2889_v9  ;;  %v2876_v22 = vadd.f32 %v6993_v61, %v2875_v37  ;;  %v3255_v53 = vpop.f32.mrf.mxu0 }
 0x54a   : > { %4558 = vrcp.f32 %v6995_v28  ;;  %v3256_v2 = vadd.f32 %v3255_v53, %v3216_v49 }
 0x54b   : > { %4560 = vrcp.f32 %v7000_v39  ;;  %v2773_v54 = vpop.f32.mrf.mxu2  ;;  %v2802_v58 = vpop.f32.mrf.mxu3  ;;  %v2891_v15 = vadd.f32 %v6997_v55, %v2890_v20  ;;  %v2880_v30 = vsel %vm2879_vm7, %v6993_v61, %v2876_v22 }
 0x54c   : > { %4562 = vpow2.f32 %v4287_v17  ;;  %v2774_v35 = vadd.f32 %v2773_v54, %v6972_v56  ;;  %v2803_v51 = vadd.f32 %v2802_v58, %v6972_v56  ;;  %v2884_v56 = vor.u32 1.1754944e-38, %v2883_v57  ;;  %v3132_v17 = vpop.permute.xlu2 %3131 }
 0x54d   : > { %4564 = vtanh.f32 %v3290_v1  ;;  %v2895_v1 = vsel %vm7047_vm12, %v6997_v55, %v2891_v15  ;;  %v3191_v48 = vadd.f32 %v6938_v33, %v3132_v17  ;;  %v2911_v58 = vand.u32 2147483647, %v6995_v28 }
 0x54e   : > { %v4555_v6 = vpop.eup %4554  ;;  %v4288_v40 = vmul.f32 -1.442695, %v2774_v35  ;;  %4566 = vtanh.f32 %v3291_v14  ;;  %v4289_v11 = vmul.f32 -1.442695, %v2803_v51  ;;  %v2885_v23 = vsel %vm2882_vm10, %v2884_v56, %v2880_v30 }
 0x54f   : > { %v4557_v63 = vpop.eup %4556  ;;  %v7022_v42 = vadd.f32 1.0, %v4555_v6  ;;  %v3172_v14 = vadd.f32 %v6936_v59, %v3132_v17  ;;  %v3284_v9 = vmul.f32 %v3256_v2, %v2885_v23  ;;  %v2900_v35 = vsel %vm2897_vm9, %v2899_v7, %v2895_v1 }
 0x550   : > { %v7026_v29 = vpop.eup %4558  ;;  %4568 = vpow2.f32 %v4288_v40  ;;  %v7040_v3 = vadd.f32 1.0, %v4557_v63  ;;  %v3275_v6 = vadd.f32 %v3274_v60, %v3216_v49  ;;  %v2913_v63 = vand.u32 2147483648, %v6995_v28 }
 0x551   : > { %v7031_v46 = vpop.eup %4560  ;;  %4570 = vrcp.f32 %v7022_v42  ;;  %v2903_v61 = vmul.f32 %v7026_v29, %v6995_v28  ;;  %v3003_v55 = vand.u32 2147483647, %v7022_v42  ;;  %v3005_v45 = vand.u32 2147483648, %v7022_v42 }
 0x552   : > { %v4563_v25 = vpop.eup %4562  ;;  %4572 = vrcp.f32 %v7015_v0  ;;  %vm2999_vm4 = vweird.f32 %v7022_v42  ;;  %v3285_v22 = vmul.f32 %v3275_v6, %v2900_v35  ;;  %v3292_v53 = vadd.f32 %v3284_v9, %v3172_v14 }
 0x553   : > { %v7051_v50 = vpop.eup %4564  ;;  %v7053_v32 = vadd.f32 1.0, %v4563_v25  ;;  %4574 = vpow2.f32 %v4289_v11  ;;  %v2904_v20 = vsub.f32 1.0, %v2903_v61  ;;  %vm7082_vm6 = vcmp.eq.f32.partialorder %v3003_v55, 8.507059e+37 }
 0x554   : > { %v7060_v27 = vpop.eup %4566  ;;  %v3306_v33 = vsub.f32 %v6857_v52, %v7051_v50  ;;  %v3006_v56 = vor.u32 1.1754944e-38, %v3005_v45  ;;  %v3293_v61 = vadd.f32 %v3285_v22, %v3191_v48  ;;  %vm2908_vm14 = vweird.f32 %v7026_v29 }
 0x555   : > { %4576 = vrcp.f32 %v7053_v32  ;;  %v3307_v51 = vsub.f32 %v6859_v44, %v7060_v27  ;;  %v3018_v25 = vand.u32 2147483647, %v7053_v32  ;;  %v3020_v30 = vand.u32 2147483648, %v7053_v32  ;;  %vm7122_vm12 = vmor %vm2907_vm1, %vm2908_vm14 }
 0x556   : > { %v4569_v54 = vpop.eup %4568  ;;  %4578 = vrcp.f32 %v7040_v3  ;;  %v2905_v11 = vmul.f32 %v7026_v29, %v2904_v20  ;;  %vm3014_vm0 = vweird.f32 %v7053_v32  ;;  %v2918_v17 = vmul.f32 %v7031_v46, %v7000_v39 }
 0x557   : > { %v4571_v57 = vpop.eup %4570  ;;  %v7068_v37 = vadd.f32 1.0, %v4569_v54  ;;  %vm7102_vm15 = vcmp.eq.f32.partialorder %v3018_v25, 8.507059e+37  ;;  %v3021_v48 = vor.u32 1.1754944e-38, %v3020_v30  ;;  %vm2922_vm1 = vweird.f32 %v7000_v39 }
 0x558   : > { %v7070_v59 = vpop.eup %4572  ;;  %v2995_v40 = vmul.f32 %v4571_v57, %v7022_v42  ;;  %vm3000_vm5 = vweird.f32 %v4571_v57  ;;  %v7108_v45 = vadd.f32 %v7026_v29, %v2905_v11  ;;  %v2919_v20 = vsub.f32 1.0, %v2918_v17 }
 0x559   : > { %4580 = vrcp.f32 %v7068_v37  ;;  %v4575_v15 = vpop.eup %4574  ;;  %v3033_v60 = vand.u32 2147483647, %v7068_v37  ;;  %vm3001_vm13 = vmor %vm2999_vm4, %vm3000_vm5  ;;  %v3035_v55 = vand.u32 2147483648, %v7068_v37  ;;  %vm3029_vm7 = vweird.f32 %v7068_v37 }
 0x55a   : > { %v2996_v13 = vsub.f32 1.0, %v2995_v40  ;;  %v7088_v4 = vadd.f32 1.0, %v4575_v15  ;;  %vm7146_vm5 = vcmp.eq.f32.partialorder %v2911_v58, 8.507059e+37 }
 0x55b   : > { %v4577_v21 = vpop.eup %4576  ;;  %vm7114_vm10 = vcmp.eq.f32.partialorder %v3033_v60, 8.507059e+37 }
 0x55c   : > { %v2997_v49 = vmul.f32 %v4571_v57, %v2996_v13  ;;  %v3010_v23 = vmul.f32 %v4577_v21, %v7053_v32  ;;  %v7093_v1 = vpop.eup %4578  ;;  %4582 = vrcp.f32 %v7088_v4  ;;  %vm3015_vm8 = vweird.f32 %v4577_v21 }
 0x55d   : > { %4584 = vtanh.f32 %v3292_v53  ;;  %vm3016_vm9 = vmor %vm3014_vm0, %vm3015_vm8  ;;  %v2776_v53 = vpop.f32.mrf.mxu2  ;;  %vm3044_vm0 = vweird.f32 %v7088_v4  ;;  %v3048_v17 = vand.u32 2147483647, %v7088_v4 }
 0x55e   : > { %v2998_v2 = vadd.f32 %v4571_v57, %v2997_v49  ;;  %v3011_v7 = vsub.f32 1.0, %v3010_v23  ;;  %4586 = vtanh.f32 %v3293_v61 }
 0x55f   : > { %v4581_v14 = vpop.eup %4580  ;;  %vm3049_vm8 = vcmp.eq.f32.partialorder %v3048_v17, 8.507059e+37 }
 0x560   : > { %v3002_v9 = vsel %vm3001_vm13, %v4571_v57, %v2998_v2  ;;  %v3012_v35 = vmul.f32 %v4577_v21, %v3011_v7  ;;  %v3025_v6 = vmul.f32 %v4581_v14, %v7068_v37  ;;  %vm3030_vm4 = vweird.f32 %v4581_v14 }
 0x561   : > { %v3007_v42 = vsel %vm7082_vm6, %v3006_v56, %v3002_v9  ;;  %v2910_v56 = vsel %vm7122_vm12, %v7026_v29, %v7108_v45  ;;  %vm2923_vm6 = vweird.f32 %v7031_v46  ;;  %v2805_v29 = vpop.f32.mrf.mxu3  ;;  %v2777_v7 = vadd.f32 %v2776_v53, %v6955_v8  ;;  %vm3031_vm14 = vmor %vm3029_vm7, %vm3030_vm4 }
 0x562   : > { %v3314_v40 = vmul.f32 %v3306_v33, %v3007_v42  ;;  %v3013_v22 = vadd.f32 %v4577_v21, %v3012_v35  ;;  %v3026_v15 = vsub.f32 1.0, %v3025_v6  ;;  %v4583_v52 = vpop.eup %4582  ;;  %v3036_v33 = vor.u32 1.1754944e-38, %v3035_v55  ;;  %vm7196_vm7 = vmor %vm2922_vm1, %vm2923_vm6 }
 0x563   : > { %v4585_v25 = vpop.eup %4584  ;;  %v3040_v49 = vmul.f32 %v4583_v52, %v7088_v4  ;;  %v2806_v44 = vadd.f32 %v2805_v29, %v6955_v8  ;;  %vm3045_vm13 = vweird.f32 %v4583_v52  ;;  %v4290_v35 = vmul.f32 -1.442695, %v2777_v7 }
 0x564   : > { %v7141_v30 = vadd.f32 %v7051_v50, %v3314_v40  ;;  %v3017_v11 = vsel %vm3016_vm9, %v4577_v21, %v3013_v22  ;;  %v3027_v32 = vmul.f32 %v4581_v14, %v3026_v15  ;;  %v2920_v50 = vmul.f32 %v7031_v46, %v2919_v20  ;;  %v4587_v60 = vpop.eup %4586 }
 0x565   : > { %v3022_v61 = vsel %vm7102_vm15, %v3021_v48, %v3017_v11  ;;  %v3041_v2 = vsub.f32 1.0, %v3040_v49  ;;  %v3308_v54 = vsub.f32 %v6863_v26, %v4585_v25  ;;  %v3050_v48 = vand.u32 2147483648, %v7088_v4  ;;  %vm3046_vm15 = vmor %vm3044_vm0, %vm3045_vm13 }
 0x566   : > { %3733 = vst [vmem:[%s7130_s20] sm:$0xff] %v7141_v30  ;;  %v3315_v21 = vmul.f32 %v3307_v51, %v3022_v61  ;;  %v3028_v58 = vadd.f32 %v4581_v14, %v3027_v32  ;;  %3474 = vrot.lane.b32.xlu0 %v7141_v30, %s4787_s5  ;;  %v2933_v51 = vmul.f32 %v7070_v59, %v7015_v0  ;;  %v4291_v6 = vmul.f32 -1.442695, %v2806_v44  ;;  %v2778_v32 = vpop.f32.mrf.mxu2 }
 0x567   : > { %3402 = vrot.lane.b32.xlu2 %v7141_v30, %s4795_s21  ;;  %v3042_v9 = vmul.f32 %v4583_v52, %v3041_v2  ;;  %v2921_v37 = vadd.f32 %v7031_v46, %v2920_v50  ;;  %v2928_v20 = vand.u32 2147483648, %v7000_v39  ;;  %v2926_v22 = vand.u32 2147483647, %v7000_v39 }
 0x568   : > { %v7174_v55 = vadd.f32 %v7060_v27, %v3315_v21  ;;  %v3032_v45 = vsel %vm3031_vm14, %v4581_v14, %v3028_v58  ;;  %v2934_v40 = vsub.f32 1.0, %v2933_v51  ;;  %v3051_v27 = vor.u32 1.1754944e-38, %v3050_v48 }
 0x569   : > { %v3037_v26 = vsel %vm7114_vm10, %v3036_v33, %v3032_v45  ;;  %v3043_v42 = vadd.f32 %v4583_v52, %v3042_v9  ;;  %v2914_v14 = vor.u32 1.1754944e-38, %v2913_v63  ;;  %4588 = vpow2.f32 %v4290_v35  ;;  %v3258_v33 = vpop.f32.mrf.mxu0 }
 0x56a   : > { %3734 = vst [vmem:[%s7130_s20 + $0x8] sm:$0xff] %v7174_v55  ;;  %v3316_v8 = vmul.f32 %v3308_v54, %v3037_v26  ;;  %3410 = vrot.lane.b32.xlu1 %v7174_v55, %s4795_s21  ;;  %v3309_v15 = vsub.f32 %v6865_v43, %v4587_v60  ;;  %v2925_v43 = vsel %vm7196_vm7, %v7031_v46, %v2921_v37  ;;  %4590 = vpow2.f32 %v4291_v6  ;;  %v2807_v46 = vpop.f32.mrf.mxu3 }
 0x56b   : > { %v3047_v57 = vsel %vm3046_vm15, %v4583_v52, %v3043_v42  ;;  %v2915_v4 = vsel %vm7146_vm5, %v2914_v14, %v2910_v56  ;;  %v2929_v53 = vor.u32 1.1754944e-38, %v2928_v20  ;;  %v2935_v39 = vmul.f32 %v7070_v59, %v2934_v40 }
 0x56c   : > { %v7190_v13 = vadd.f32 %v4585_v25, %v3316_v8  ;;  %v3052_v63 = vsel %vm3049_vm8, %v3051_v27, %v3047_v57  ;;  %v3277_v25 = vpop.f32.mrf.mxu1  ;;  %v2948_v11 = vmul.f32 %v7093_v1, %v7040_v3  ;;  %v3259_v56 = vadd.f32 %v3258_v33, %v6952_v24 }
 0x56d   : > { %v3317_v52 = vmul.f32 %v3309_v15, %v3052_v63  ;;  %vm2927_vm10 = vcmp.eq.f32.partialorder %v2926_v22, 8.507059e+37  ;;  %v3278_v50 = vadd.f32 %v3277_v25, %v6952_v24  ;;  %vm2938_vm12 = vweird.f32 %v7070_v59 }
 0x56e   : > { %3735 = vst [vmem:[%s7130_s20 + $0x10] sm:$0xff] %v7190_v13  ;;  %3378 = vrot.lane.b32.xlu0 %v7141_v30, %s8335_s4  ;;  %v2930_v23 = vsel %vm2927_vm10, %v2929_v53, %v2925_v43  ;;  %v2949_v29 = vsub.f32 1.0, %v2948_v11  ;;  %v3286_v17 = vmul.f32 %v3259_v56, %v2915_v4  ;;  %v2779_v21 = vadd.f32 %v2778_v32, %v6940_v12 }
 0x56f   : > { %3482 = vrot.lane.b32.xlu2 %v7174_v55, %s4787_s5  ;;  %v7215_v49 = vadd.f32 %v4587_v60, %v3317_v52  ;;  %v4589_v61 = vpop.eup %4588  ;;  %v2936_v2 = vadd.f32 %v7070_v59, %v2935_v39  ;;  %v2808_v60 = vadd.f32 %v2807_v46, %v6940_v12  ;;  %v3175_v48 = vadd.f32 %v6946_v19, %v7003_v18 }
 0x570   : > { %v7222_v58 = vadd.f32 1.0, %v4589_v61  ;;  %v2950_v7 = vmul.f32 %v7093_v1, %v2949_v29  ;;  %v4591_v54 = vpop.eup %4590  ;;  %v3287_v44 = vmul.f32 %v3278_v50, %v2930_v23  ;;  %v2943_v24 = vand.u32 2147483648, %v7015_v0 }
 0x571   : > { %8336 = vst [vmem:[#allocation21_spill] sm:$0xff] %v7215_v49  ;;  %v4292_v51 = vmul.f32 -1.442695, %v2779_v21  ;;  %vm2937_vm9 = vweird.f32 %v7015_v0  ;;  %v2941_v45 = vand.u32 2147483647, %v7015_v0  ;;  %v3194_v12 = vadd.f32 %v6948_v31, %v7003_v18  ;;  %v3260_v0 = vpop.f32.mrf.mxu0 }
 0x572   : > { %3736 = vst [vmem:[%s7130_s20 + $0x18] sm:$0xff] %v7215_v49  ;;  %3450 = vrot.lane.b32.xlu1 %v7141_v30, %s8337_s25  ;;  %4592 = vrcp.f32 %v7222_v58  ;;  %v3294_v9 = vadd.f32 %v3286_v17, %v3175_v48  ;;  %v7237_v26 = vadd.f32 1.0, %v4591_v54  ;;  %vm7241_vm4 = vmor %vm2937_vm9, %vm2938_vm12  ;;  %v4293_v37 = vmul.f32 -1.442695, %v2808_v60 }
 0x573   : > { %v2940_v35 = vsel %vm7241_vm4, %v7070_v59, %v2936_v2  ;;  %v2951_v6 = vadd.f32 %v7093_v1, %v2950_v7  ;;  %vm2953_vm1 = vweird.f32 %v7093_v1  ;;  %4594 = vpow2.f32 %v4292_v51 }
 0x574   : > { %v3295_v31 = vadd.f32 %v3287_v44, %v3194_v12  ;;  %4596 = vrcp.f32 %v7237_v26  ;;  %v2944_v18 = vor.u32 1.1754944e-38, %v2943_v24  ;;  %v2958_v8 = vand.u32 2147483648, %v7040_v3  ;;  %v3279_v57 = vpop.f32.mrf.mxu1 }
 0x575   : > { %vm2942_vm6 = vcmp.eq.f32.partialorder %v2941_v45, 8.507059e+37  ;;  %vm2952_vm5 = vweird.f32 %v7040_v3  ;;  %v2956_v59 = vand.u32 2147483647, %v7040_v3  ;;  %4598 = vpow2.f32 %v4293_v37 }
 0x576   : > { %3458 = vrot.lane.b32.xlu0 %v7174_v55, %s8337_s25  ;;  %v2945_v42 = vsel %vm2942_vm6, %v2944_v18, %v2940_v35  ;;  %vm7258_vm0 = vmor %vm2952_vm5, %vm2953_vm1  ;;  %4600 = vtanh.f32 %v3294_v9  ;;  %v3261_v27 = vadd.f32 %v3260_v0, %v6959_v41  ;;  %v2959_v15 = vor.u32 1.1754944e-38, %v2958_v8 }
 0x577   : > { %3386 = vrot.lane.b32.xlu2 %v7174_v55, %s8335_s4  ;;  %v2955_v14 = vsel %vm7258_vm0, %v7093_v1, %v2951_v6  ;;  %4602 = vtanh.f32 %v3295_v31  ;;  %vm2957_vm14 = vcmp.eq.f32.partialorder %v2956_v59, 8.507059e+37  ;;  %v3065_v4 = vand.u32 2147483648, %v7222_v58 }
 0x578   : > { %v4593_v40 = vpop.eup %4592  ;;  %v3288_v33 = vmul.f32 %v3261_v27, %v2945_v42  ;;  %v2960_v43 = vsel %vm2957_vm14, %v2959_v15, %v2955_v14  ;;  %v3177_v1 = vadd.f32 %v6957_v47, %v6964_v34  ;;  %v3196_v25 = vadd.f32 %v6961_v62, %v6964_v34 }
 0x579   : > { %v3055_v22 = vmul.f32 %v4593_v40, %v7222_v58  ;;  %v4595_v3 = vpop.eup %4594  ;;  %v3280_v11 = vadd.f32 %v3279_v57, %v6959_v41  ;;  %vm3060_vm13 = vweird.f32 %v4593_v40  ;;  %v3063_v56 = vand.u32 2147483647, %v7222_v58 }
 0x57a   : > { %3354 = vrot.lane.b32.xlu1 %v7141_v30, %s8342_s1  ;;  %v4597_v28 = vpop.eup %4596  ;;  %v7270_v52 = vadd.f32 1.0, %v4595_v3  ;;  %v3296_v23 = vadd.f32 %v3288_v33, %v3177_v1  ;;  %vm3059_vm15 = vweird.f32 %v7222_v58  ;;  %v3066_v41 = vor.u32 1.1754944e-38, %v3065_v4 }
 0x57b   : > { %v3056_v63 = vsub.f32 1.0, %v3055_v22  ;;  %v4599_v53 = vpop.eup %4598  ;;  %v3070_v39 = vmul.f32 %v4597_v28, %v7237_v26  ;;  %v3289_v62 = vmul.f32 %v3280_v11, %v2960_v43  ;;  %v3080_v61 = vand.u32 2147483648, %v7237_v26  ;;  %vm3061_vm8 = vmor %vm3059_vm15, %vm3060_vm13 }
 0x57c   : > { %4604 = vrcp.f32 %v7270_v52  ;;  %v4601_v47 = vpop.eup %4600  ;;  %v7284_v34 = vadd.f32 1.0, %v4599_v53  ;;  %vm3075_vm7 = vweird.f32 %v4597_v28  ;;  %v3078_v21 = vand.u32 2147483647, %v7237_v26 }
 0x57d   : > { %v3057_v32 = vmul.f32 %v4593_v40, %v3056_v63  ;;  %v3071_v46 = vsub.f32 1.0, %v3070_v39  ;;  %v4603_v17 = vpop.eup %4602  ;;  %v3310_v2 = vsub.f32 %v6847_v10, %v4601_v47  ;;  %vm3064_vm10 = vcmp.eq.f32.partialorder %v3063_v56, 8.507059e+37 }
 0x57e   : > { %3362 = vrot.lane.b32.xlu0 %v7174_v55, %s8342_s1  ;;  %4606 = vrcp.f32 %v7284_v34  ;;  %vm3074_vm12 = vweird.f32 %v7237_v26  ;;  %v3297_v54 = vadd.f32 %v3289_v62, %v3196_v25  ;;  %v3081_v24 = vor.u32 1.1754944e-38, %v3080_v61 }
 0x57f   : > { %3426 = vrot.lane.b32.xlu2 %v7141_v30, %s8343_s26  ;;  %v3058_v29 = vadd.f32 %v4593_v40, %v3057_v32  ;;  %v3072_v50 = vmul.f32 %v4597_v28, %v3071_v46  ;;  %vm3076_vm9 = vmor %vm3074_vm12, %vm3075_vm7  ;;  %4608 = vtanh.f32 %v3296_v23  ;;  %v3311_v51 = vsub.f32 %v6849_v38, %v4603_v17 }
 0x580   : > { %vm3079_vm4 = vcmp.eq.f32.partialorder %v3078_v21, 8.507059e+37  ;;  %4610 = vtanh.f32 %v3297_v54  ;;  %v3095_v38 = vand.u32 2147483648, %v7270_v52  ;;  %v3093_v18 = vand.u32 2147483647, %v7270_v52 }
 0x581   : > { %v3062_v7 = vsel %vm3061_vm8, %v4593_v40, %v3058_v29  ;;  %v3073_v58 = vadd.f32 %v4597_v28, %v3072_v50  ;;  %vm3089_vm6 = vweird.f32 %v7270_v52  ;;  %v3110_v42 = vand.u32 2147483648, %v7284_v34 }
 0x582   : > { %3434 = vrot.lane.b32.xlu1 %v7174_v55, %s8343_s26  ;;  %v3067_v60 = vsel %vm3064_vm10, %v3066_v41, %v3062_v7  ;;  %v4605_v48 = vpop.eup %4604  ;;  %v3096_v20 = vor.u32 1.1754944e-38, %v3095_v38  ;;  %v3108_v27 = vand.u32 2147483647, %v7284_v34  ;;  %vm3094_vm14 = vcmp.eq.f32.partialorder %v3093_v18, 8.507059e+37  ;;  %v4613_v38 = vld [vmem:[%s8087_s8 + $0xd0] sm:$0xff] }
 0x583   : > { %v3318_v44 = vmul.f32 %v3310_v2, %v3067_v60  ;;  %v3077_v45 = vsel %vm3076_vm9, %v4597_v28, %v3073_v58  ;;  %v3085_v10 = vmul.f32 %v4605_v48, %v7270_v52  ;;  %vm3090_vm1 = vweird.f32 %v4605_v48 }
 0x584   : > { %v3082_v9 = vsel %vm3079_vm4, %v3081_v24, %v3077_v45  ;;  %v4607_v26 = vpop.eup %4606  ;;  %vm3091_vm5 = vmor %vm3089_vm6, %vm3090_vm1  ;;  %vm3104_vm13 = vweird.f32 %v7284_v34  ;;  %v3111_v28 = vor.u32 1.1754944e-38, %v3110_v42  ;;  %vm3109_vm8 = vcmp.eq.f32.partialorder %v3108_v27, 8.507059e+37 }
 0x585   : > { %v7298_v12 = vadd.f32 %v4601_v47, %v3318_v44  ;;  %v3319_v19 = vmul.f32 %v3311_v51, %v3082_v9  ;;  %v3086_v37 = vsub.f32 1.0, %v3085_v10  ;;  %v3100_v35 = vmul.f32 %v4607_v26, %v7284_v34  ;;  %v4609_v0 = vpop.eup %4608 }
 0x586   : > { %3404 = vrot.lane.b32.xlu0 %v7190_v13, %s4795_s21  ;;  %vm3105_vm0 = vweird.f32 %v4607_v26  ;;  %v4611_v14 = vpop.eup %4610  ;;  %v3312_v22 = vsub.f32 %v6851_v5, %v4609_v0  ;;  %vm8345_vm7 = vcmp.lt.s32.totalorder %v8242_v16, 112  ;;  %vm8347_vm12 = vcmp.lt.s32.totalorder %v8242_v16, 16 }
 0x587   : > { %3412 = vrot.lane.b32.xlu2 %v7215_v49, %s4795_s21  ;;  %3737 = vst [vmem:[%s7130_s20 + $0x20] sm:$0xff] %v7298_v12  ;;  %v7306_v6 = vadd.f32 %v4603_v17, %v3319_v19  ;;  %v3087_v31 = vmul.f32 %v4605_v48, %v3086_v37  ;;  %v3101_v8 = vsub.f32 1.0, %v3100_v35  ;;  %vm3106_vm15 = vmor %vm3104_vm13, %vm3105_vm0  ;;  %v3313_v63 = vsub.f32 %v6853_v36, %v4611_v14 }
 0x588   : > { %vm8346_vm10 = vmmov %vm8345_vm7  ;;  %vm8349_vm4 = vcmp.lt.s32.totalorder %v8242_v16, 127 }
 0x589   : > { %3738 = vst [vmem:[%s7130_s20 + $0x28] sm:$0xff] %v7306_v6  ;;  %v3088_v59 = vadd.f32 %v4605_v48, %v3087_v31  ;;  %v3102_v40 = vmul.f32 %v4607_v26, %v3101_v8  ;;  %vm8348_vm9 = vmmov %vm8347_vm12  ;;  %v4614_v31 = vld [vmem:[%s8087_s8 + $0xd8] sm:$0xff] }
 0x58a   : > { %3330 = vrot.lane.b32.xlu1 %v7141_v30, %s8344_s28  ;;  %vm8350_vm1 = vmmov %vm8349_vm4 }
 0x58b   : > { %v3092_v15 = vsel %vm3091_vm5, %v4605_v48, %v3088_v59  ;;  %v3103_v3 = vadd.f32 %v4607_v26, %v3102_v40  ;;  %v4616_v59 = vld [vmem:[%s8087_s8 + $0xc8] sm:$0xff]  ;;  %vm8351_vm6 = vmmov %vm8345_vm7 }
 0x58c   : > { %v3097_v57 = vsel %vm3094_vm14, %v3096_v20, %v3092_v15  ;;  %vm8352_vm5 = vmmov %vm8351_vm6  ;;  %v4640_v15 = vld [vmem:[%s8087_s8 + $0xf8] sm:$0xff] }
 0x58d   : > { %v3320_v33 = vmul.f32 %v3312_v22, %v3097_v57  ;;  %v3107_v5 = vsel %vm3106_vm15, %v4607_v26, %v3103_v3  ;;  %v4617_v3 = vld [vmem:[%s8087_s8 + $0x1d0] sm:$0xff]  ;;  %vm8353_vm0 = vmmov %vm8350_vm1 }
 0x58e   : > { %3484 = vrot.lane.b32.xlu0 %v7215_v49, %s4787_s5  ;;  %v3112_v43 = vsel %vm3109_vm8, %v3111_v28, %v3107_v5  ;;  %v4618_v28 = vld [vmem:[%s8087_s8 + $0x1d8] sm:$0xff]  ;;  %vm8354_vm14 = vmmov %vm8353_vm0 }
 0x58f   : > { %3452 = vrot.lane.b32.xlu2 %v7190_v13, %s8337_s25  ;;  %v7323_v4 = vadd.f32 %v4609_v0, %v3320_v33  ;;  %v3321_v52 = vmul.f32 %v3313_v63, %v3112_v43  ;;  %v4615_v0 = vld [vmem:[%s8087_s8 + $0xc0] sm:$0xff]  ;;  %v4620_v43 = vld [vmem:[%s8087_s8 + $0x1c8] sm:$0xff]  ;;  %vm8355_vm13 = vmmov %vm8348_vm9 }
 0x590   : > { %vm8356_vm15 = vmmov %vm8348_vm9 }
 0x591   : > { %3739 = vst [vmem:[%s7130_s20 + $0x30] sm:$0xff] %v7323_v4  ;;  %v7329_v53 = vadd.f32 %v4611_v14, %v3321_v52  ;;  %vm8357_vm8 = vmmov %vm8352_vm5 }
 0x592   : > { %3476 = vrot.lane.b32.xlu1 %v7190_v13, %s4787_s5 }
 0x593   : > { %3740 = vst [vmem:[%s7130_s20 + $0x38] sm:$0xff] %v7329_v53 }
 0x596   : > { %3388 = vrot.lane.b32.xlu0 %v7215_v49, %s8335_s4 }
 0x597   : > { %3356 = vrot.lane.b32.xlu2 %v7190_v13, %s8342_s1 }
 0x59a   : > { %3380 = vrot.lane.b32.xlu1 %v7190_v13, %s8335_s4 }
 0x59e   : > { %3428 = vrot.lane.b32.xlu0 %v7190_v13, %s8343_s26 }
 0x59f   : > { %3436 = vrot.lane.b32.xlu2 %v7215_v49, %s8343_s26 }
 0x5a2   : > { %3460 = vrot.lane.b32.xlu1 %v7215_v49, %s8337_s25 }
 0x5a6   : > { %3406 = vrot.lane.b32.xlu0 %v7298_v12, %s4795_s21 }
 0x5a7   : > { %3414 = vrot.lane.b32.xlu2 %v7306_v6, %s4795_s21 }
 0x5aa   : > { %3364 = vrot.lane.b32.xlu1 %v7215_v49, %s8342_s1 }
 0x5ae   : > { %3486 = vrot.lane.b32.xlu0 %v7306_v6, %s4787_s5 }
 0x5af   : > { %3454 = vrot.lane.b32.xlu2 %v7298_v12, %s8337_s25 }
 0x5b2   : > { %3478 = vrot.lane.b32.xlu1 %v7298_v12, %s4787_s5 }
 0x5b6   : > { %3390 = vrot.lane.b32.xlu0 %v7306_v6, %s8335_s4 }
 0x5b7   : > { %3358 = vrot.lane.b32.xlu2 %v7298_v12, %s8342_s1 }
 0x5ba   : > { %3382 = vrot.lane.b32.xlu1 %v7298_v12, %s8335_s4 }
 0x5be   : > { %3430 = vrot.lane.b32.xlu0 %v7298_v12, %s8343_s26 }
 0x5bf   : > { %3438 = vrot.lane.b32.xlu2 %v7306_v6, %s8343_s26 }
 0x5c1   : > { %v3403_v36 = vpop.permute.xlu2 %3402 }
 0x5c2   : > { %3462 = vrot.lane.b32.xlu1 %v7306_v6, %s8337_s25 }
 0x5c6   : > { %3334 = vrot.lane.b32.xlu0 %v7298_v12, %s8344_s28 }
 0x5c7   : > { %3342 = vrot.lane.b32.xlu2 %v7306_v6, %s8344_s28 }
 0x5c9   : > { %v3483_v1 = vpop.permute.xlu2 %3482 }
 0x5ca   : > { %3366 = vrot.lane.b32.xlu1 %v7306_v6, %s8342_s1 }
 0x5ce   : > { %3416 = vrot.lane.b32.xlu0 %v7329_v53, %s4795_s21 }
 0x5cf   : > { %3480 = vrot.lane.b32.xlu2 %v7323_v4, %s4787_s5 }
 0x5d1   : > { %v3387_v25 = vpop.permute.xlu2 %3386 }
 0x5d2   : > { %3408 = vrot.lane.b32.xlu1 %v7323_v4, %s4795_s21  ;;  %s8409_s21 = sld [smem:[#allocation34_spill]] }
 0x5d6   : > { %3456 = vrot.lane.b32.xlu0 %v7323_v4, %s8337_s25 }
 0x5d7   : > { %3384 = vrot.lane.b32.xlu2 %v7323_v4, %s8335_s4 }
 0x5d8   : > { %v3475_v39 = vpop.permute.xlu0 %3474 }
 0x5d9   : > { %v3427_v11 = vpop.permute.xlu2 %3426  ;;  %v7387_v32 = vsel %vm8345_vm7, %v3475_v39, %v3483_v1  ;;  %v7391_v56 = vsel %vm8346_vm10, %v3483_v1, %v3475_v39  ;;  %vm8358_vm7 = vmmov %vm8353_vm0 }
 0x5da   : > { %3488 = vrot.lane.b32.xlu1 %v7329_v53, %s4787_s5  ;;  %v7527_v52 = vmul.f32 %v4620_v43, %v7391_v56  ;;  %v4631_v43 = vld [vmem:[%s8087_s8 + $0x188] sm:$0xff] }
 0x5dc   : > { %v3411_v47 = vpop.permute.xlu1 %3410 }
 0x5dd   : > { %v3418_v46 = vsel %vm974_vm3, %v3403_v36, %v3411_v47  ;;  %v3422_v23 = vsel %vm974_vm3, %v3411_v47, %v3403_v36 }
 0x5de   : > { %3360 = vrot.lane.b32.xlu0 %v7323_v4, %s8342_s1  ;;  %v7484_v8 = vmul.f32 %v4615_v0, %v3422_v23  ;;  %v7489_v42 = vmul.f32 %v4616_v59, %v3418_v46  ;;  %v4621_v23 = vld [vmem:[%s8087_s8 + $0x90] sm:$0xff]  ;;  %v4627_v59 = vld [vmem:[%s8087_s8 + $0x198] sm:$0xff] }
 0x5df   : > { %3464 = vrot.lane.b32.xlu2 %v7329_v53, %s8337_s25  ;;  %v4626_v0 = vld [vmem:[%s8087_s8 + $0x150] sm:$0xff] }
 0x5e0   : > { %v3379_v62 = vpop.permute.xlu0 %3378 }
 0x5e1   : > { %v3413_v34 = vpop.permute.xlu2 %3412  ;;  %v7405_v29 = vsel %vm953_vm2, %v3379_v62, %v3387_v25  ;;  %v7409_v41 = vsel %vm953_vm2, %v3387_v25, %v3379_v62 }
 0x5e2   : > { %3392 = vrot.lane.b32.xlu1 %v7329_v53, %s8335_s4 }
 0x5e4   : > { %v3451_v61 = vpop.permute.xlu1 %3450 }
 0x5e6   : > { %3338 = vrot.lane.b32.xlu0 %v7174_v55, %s8344_s28 }
 0x5e7   : > { %3368 = vrot.lane.b32.xlu2 %v7329_v53, %s8342_s1  ;;  %s8408_s1 = sld [smem:[#allocation33_spill]] }
 0x5e8   : > { %v3459_v17 = vpop.permute.xlu0 %3458 }
 0x5e9   : > { %v7417_v50 = vpop.permute.xlu2 %3452  ;;  %v7421_v21 = vsel %vm1002_vm11, %v3451_v61, %v3459_v17  ;;  %v7425_v2 = vsel %vm1002_vm11, %v3459_v17, %v3451_v61  ;;  %v4623_v17 = vld [vmem:[%s8087_s8 + $0x80] sm:$0xff] }
 0x5ea   : > { %3432 = vrot.lane.b32.xlu1 %v7323_v4, %s8343_s26 }
 0x5ec   : > { %v3355_v7 = vpop.permute.xlu1 %3354 }
 0x5ee   : > { %3440 = vrot.lane.b32.xlu0 %v7329_v53, %s8343_s26 }
 0x5ef   : > { %3332 = vrot.lane.b32.xlu2 %v7190_v13, %s8344_s28 }
 0x5f0   : > { %v3363_v60 = vpop.permute.xlu0 %3362 }
 0x5f1   : > { %v7435_v58 = vsel %vm8347_vm12, %v3355_v7, %v3363_v60  ;;  %v7439_v54 = vsel %vm8348_vm9, %v3363_v60, %v3355_v7  ;;  %v7441_v48 = vpop.permute.xlu2 %3356  ;;  %v7559_v7 = vmul.f32 %v4623_v17, %v7409_v41  ;;  %v4624_v60 = vld [vmem:[%s8087_s8 + $0x88] sm:$0xff] }
 0x5f2   : > { %3336 = vrot.lane.b32.xlu1 %v7323_v4, %s8344_s28  ;;  %v4638_v41 = vld [vmem:[%s8087_s8 + $0xe8] sm:$0xff] }
 0x5f4   : > { %v3435_v44 = vpop.permute.xlu1 %3434 }
 0x5f5   : > { %v7447_v24 = vsel %vm8349_vm4, %v3427_v11, %v3435_v44  ;;  %v7451_v51 = vsel %vm8350_vm1, %v3435_v44, %v3427_v11  ;;  %v7565_v44 = vmul.f32 %v4624_v60, %v7405_v29  ;;  %v4625_v29 = vld [vmem:[%s8087_s8 + $0x190] sm:$0xff]  ;;  %vm8368_vm1 = vmmov %vm8353_vm0 }
 0x5f6   : > { %3344 = vrot.lane.b32.xlu0 %v7329_v53, %s8344_s28 }
 0x5f7   : > { %3502 = vrot.lane.b32.xlu2 %v7298_v12, %s8247_s29 }
 0x5f8   : > { %v3405_v45 = vpop.permute.xlu0 %3404 }
 0x5f9   : > { %v3419_v10 = vsel %vm974_vm3, %v3405_v45, %v3413_v34  ;;  %v3423_v9 = vsel %vm974_vm3, %v3413_v34, %v3405_v45  ;;  %v3437_v26 = vpop.permute.xlu2 %3436  ;;  %v4622_v34 = vld [vmem:[%s8087_s8 + $0x98] sm:$0xff] }
 0x5fa   : > { %3340 = vrot.lane.b32.xlu1 %v7215_v49, %s8344_s28  ;;  %v7472_v35 = vmul.f32 %v4613_v38, %v3423_v9  ;;  %v7477_v18 = vmul.f32 %v4614_v31, %v3419_v10  ;;  %s4706_s28 = scalar_lea.hbm %s8408_s1, 16 }
 0x5fc   : > { %v7463_v19 = vpop.permute.xlu1 %3330 }
 0x5fe   : > { %3498 = vrot.lane.b32.xlu0 %v7141_v30, %s8247_s29 }
 0x5ff   : > { %3512 = vrot.lane.b32.xlu2 %v7329_v53, %s8247_s29 }
 0x600   : > { %v3485_v37 = vpop.permute.xlu0 %3484 }
 0x601   : > { %v7491_v40 = vpop.permute.xlu2 %3414 }
 0x602   : > { %3510 = vrot.lane.b32.xlu1 %v7306_v6, %s8247_s29 }
 0x604   : > { %v3477_v20 = vpop.permute.xlu1 %3476 }
 0x605   : > { %v3491_v27 = vsel %vm8351_vm6, %v3477_v20, %v3485_v37  ;;  %v3495_v14 = vsel %vm8352_vm5, %v3485_v37, %v3477_v20  ;;  %vm8372_vm6 = vmmov %vm8353_vm0 }
 0x606   : > { %3504 = vrot.lane.b32.xlu0 %v7323_v4, %s8247_s29  ;;  %v7508_v33 = vmul.f32 %v4617_v3, %v3491_v27  ;;  %v7513_v63 = vmul.f32 %v4618_v28, %v3495_v14  ;;  %v4628_v27 = vld [vmem:[%s8087_s8 + $0x158] sm:$0xff]  ;;  %v4630_v28 = vld [vmem:[%s8087_s8 + $0x140] sm:$0xff] }
 0x607   : > { %3506 = vrot.lane.b32.xlu2 %v7174_v55, %s8247_s29  ;;  %v4619_v55 = vld [vmem:[%s8087_s8 + $0x1c0] sm:$0xff] }
 0x608   : > { %v3389_v57 = vpop.permute.xlu0 %3388  ;;  %v7521_v5 = vmul.f32 %v4619_v55, %v7387_v32  ;;  %v7609_v55 = vmul.f32 %v4630_v28, %v7447_v24 }
 0x609   : > { %v7539_v32 = vpop.permute.xlu2 %3454 }
 0x60a   : > { %3500 = vrot.lane.b32.xlu1 %v7190_v13, %s8247_s29 }
 0x60c   : > { %v3381_v36 = vpop.permute.xlu1 %3380 }
 0x60d   : > { %v3395_v1 = vsel %vm953_vm2, %v3381_v36, %v3389_v57  ;;  %v3399_v25 = vsel %vm953_vm2, %v3389_v57, %v3381_v36  ;;  %v4629_v57 = vld [vmem:[%s8087_s8 + $0x180] sm:$0xff]  ;;  %v7615_v36 = vmul.f32 %v4631_v43, %v7425_v2 }
 0x60e   : > { %3508 = vrot.lane.b32.xlu0 %v7215_v49, %s8247_s29  ;;  %v7548_v62 = vmul.f32 %v4621_v23, %v3399_v25  ;;  %v7553_v61 = vmul.f32 %v4622_v34, %v3395_v1  ;;  %v7603_v3 = vmul.f32 %v4629_v57, %v7421_v21  ;;  %v4632_v1 = vld [vmem:[%s8087_s8 + $0x148] sm:$0xff]  ;;  %v4633_v34 = vld [vmem:[%s8087_s8 + $0x50] sm:$0xff]  ;;  %s8402_s29 = sld [smem:[#allocation9_spill]] }
 0x60f   : > { %v7621_v21 = vmul.f32 %v4632_v1, %v7451_v51 }
 0x610   : > { %v3429_v56 = vpop.permute.xlu0 %3428 }
 0x611   : > { %v3443_v47 = vsel %vm8353_vm0, %v3429_v56, %v3437_v26  ;;  %v3447_v46 = vsel %vm8354_vm14, %v3437_v26, %v3429_v56  ;;  %v7577_v38 = vpop.permute.xlu2 %3358  ;;  %v4637_v26 = vld [vmem:[%s8087_s8 + $0xe0] sm:$0xff] }
 0x612   : > { %v7597_v14 = vmul.f32 %v4628_v27, %v3447_v46 }
 0x614   : > { %v3461_v45 = vpop.permute.xlu1 %3460  ;;  %s8010_s2 = sand.u32 1, %s8402_s29  }
 0x615   : > { %v3467_v10 = vsel %vm1002_vm11, %v7417_v50, %v3461_v45  ;;  %v3471_v9 = vsel %vm1002_vm11, %v3461_v45, %v7417_v50  ;;  %v7587_v50 = vmul.f32 %v4626_v0, %v3443_v47  ;;  %v4635_v45 = vld [vmem:[%s8087_s8 + $0x40] sm:$0xff]  ;;  %s4104_s0 = sshll.u32 %s8010_s2, 3 }
 0x616   : > { %v7582_v31 = vmul.f32 %v4625_v29, %v3467_v10  ;;  %v7592_v20 = vmul.f32 %v4627_v59, %v3471_v9  ;;  %v7651_v10 = vmul.f32 %v4635_v45, %v7439_v54  ;;  %v4636_v9 = vld [vmem:[%s8087_s8 + $0x48] sm:$0xff]  ;;  %s764_s29 = scalar_lea.vmem [#allocation2], %s4104_s0  ;;  %s8027_s3 = scalar_lea.vmem [#allocation4], %s4104_s0 }
 0x617   : > { %v7657_v29 = vmul.f32 %v4636_v9, %v7435_v58  ;;  %s3858_s30 = sshll.u32 %s8027_s3, 4  ;;  %s3816_s0 = scalar_lea.sflag [#allocation3], %s8010_s2  ;;  %s8031_s30 = int_to_ptr.vmem [resolvable:$true] %s3858_s30 }
 0x618   : > { %v3407_v37 = vpop.permute.xlu0 %3406 }
 0x619   : > { %v7659_v0 = vpop.permute.xlu2 %3438  ;;  %v3420_v46 = vsel %vm974_vm3, %v3407_v37, %v7491_v40  ;;  %v3424_v11 = vsel %vm974_vm3, %v7491_v40, %v3407_v37  ;;  %v4639_v40 = vld [vmem:[%s8087_s8 + $0xf0] sm:$0xff] }
 0x61a   : > { %v3550_v2 = vmul.f32 %v4637_v26, %v3424_v11  ;;  %v3551_v39 = vmul.f32 %v4638_v41, %v3420_v46 }
 0x61c   : > { %v3365_v25 = vpop.permute.xlu1 %3364 }
 0x61d   : > { %v3371_v24 = vsel %vm8355_vm13, %v7441_v48, %v3365_v25  ;;  %v3375_v56 = vsel %vm8356_vm15, %v3365_v25, %v7441_v48  ;;  %v4634_v48 = vld [vmem:[%s8087_s8 + $0x58] sm:$0xff] }
 0x61e   : > { %v7640_v17 = vmul.f32 %v4633_v34, %v3375_v56  ;;  %v7645_v60 = vmul.f32 %v4634_v48, %v3371_v24 }
 0x620   : > { %v3487_v23 = vpop.permute.xlu0 %3486 }
 0x621   : > { %v7669_v1 = vpop.permute.xlu2 %3342 }
 0x624   : > { %v3479_v59 = vpop.permute.xlu1 %3478 }
 0x625   : > { %v7663_v27 = vsel %vm8357_vm8, %v3487_v23, %v3479_v59 }
 0x628   : > { %v3391_v28 = vpop.permute.xlu0 %3390 }
 0x629   : > { %v7684_v34 = vpop.permute.xlu2 %3480 }
 0x62c   : > { %v3383_v43 = vpop.permute.xlu1 %3382 }
 0x630   : > { %v7671_v25 = vpop.permute.xlu0 %3430 }
 0x631   : > { %v7677_v58 = vsel %vm8358_vm7, %v7659_v0, %v7671_v25  ;;  %v3385_v51 = vpop.permute.xlu2 %3384 }
 0x634   : > { %v3463_v24 = vpop.permute.xlu1 %3462 }
 0x635   : > { %v7682_v56 = vsel %vm1002_vm11, %v3463_v24, %v7539_v32 }
 0x638   : > { %v7686_v48 = vpop.permute.xlu0 %3334 }
 0x639   : > { %v7716_v41 = vpop.permute.xlu2 %3464 }
 0x63c   : > { %v7688_v45 = vpop.permute.xlu1 %3366 }
 0x640   : > { %v3417_v9 = vpop.permute.xlu0 %3416 }
 0x644   : > { %v3409_v47 = vpop.permute.xlu1 %3408 }
 0x645   : > { %v3421_v54 = vsel %vm974_vm3, %v3409_v47, %v3417_v9  ;;  %v3425_v57 = vsel %vm974_vm3, %v3417_v9, %v3409_v47  ;;  %vm8359_vm3 = vmmov %vm8352_vm5  ;;  %vm8373_vm5 = vcmp.lt.s32.totalorder %v8242_v16, 17 }
 0x646   : > { %v3552_v37 = vmul.f32 %v4639_v40, %v3425_v57  ;;  %v3553_v47 = vmul.f32 %v4640_v15, %v3421_v54  ;;  %v3492_v11 = vsel %vm8359_vm3, %v3479_v59, %v3487_v23  ;;  %vm8360_vm10 = vmmov %vm8359_vm3  ;;  %v4641_v15 = vld [vmem:[%s8087_s8 + $0x1e0] sm:$0xff]  ;;  %v8362_v23 = vpack.c.bf16 %v7477_v18, %v7489_v42  ;;  %v4643_v18 = vld [vmem:[%s8087_s8 + $0x1b0] sm:$0xff] }
 0x647   : > { %v3400_v40 = vsel %vm953_vm2, %v3391_v28, %v3383_v43  ;;  %vm8374_vm0 = vmmov %vm8373_vm5 }
 0x648   : > { %v7712_v9 = vpop.permute.xlu0 %3456  ;;  %v3608_v22 = vpack.c.bf16 %v3552_v37, %v3550_v2  ;;  %v3609_v49 = vpack.c.bf16 %v3553_v47, %v3551_v39  ;;  %v3582_v2 = vmul.f32 %v4641_v15, %v3492_v11  ;;  %v8361_v39 = vpack.c.bf16 %v7472_v35, %v7484_v8  ;;  %v4644_v47 = vld [vmem:[%s8087_s8 + $0xa0] sm:$0xff]  ;;  %vm8377_vm14 = vmmov %vm8374_vm0 }
 0x649   : > { %v3469_v54 = vsel %vm1002_vm11, %v7712_v9, %v7716_v41  ;;  %v3396_v37 = vsel %vm953_vm2, %v3383_v43, %v3391_v28  ;;  %v3468_v35 = vsel %vm1002_vm11, %v7539_v32, %v3463_v24  ;;  %v3542_v11 = vmul.f32 %v4644_v47, %v3400_v40  ;;  %v4645_v32 = vld [vmem:[%s8087_s8 + $0xa8] sm:$0xff]  ;;  %v4646_v24 = vld [vmem:[%s8087_s8 + $0x1a0] sm:$0xff]  ;;  %vm8378_vm13 = vmmov %vm8374_vm0 }
 0x64a   : > { %3640 = vmatpush.bf16.msra.mxu2 %v3608_v22  ;;  %3679 = vmatpush.bf16.msra.mxu1 %v3609_v49  ;;  %v4642_v49 = vld [vmem:[%s8087_s8 + $0x1f0] sm:$0xff]  ;;  %v3576_v8 = vmul.f32 %v4643_v18, %v3469_v54  ;;  %v3543_v43 = vmul.f32 %v4645_v32, %v3396_v37  ;;  %v4652_v32 = vld [vmem:[%s8087_s8 + $0x68] sm:$0xff]  ;;  %vm8380_vm15 = vmmov %vm8359_vm3 }
 0x64b   : > { %vm8382_vm8 = vmmov %vm8374_vm0 }
 0x64c   : > { %v7718_v26 = vpop.permute.xlu1 %3488  ;;  %vm8383_vm7 = vmmov %vm8374_vm0 }
 0x64d   : > { %v3493_v46 = vsel %vm8360_vm10, %v7684_v34, %v7718_v26  ;;  %vm8384_vm3 = vmmov %vm8374_vm0 }
 0x64e   : > { %v3584_v22 = vmul.f32 %v4642_v49, %v3493_v46  ;;  %3641 = vmatpush.bf16.msra.mxu2 %v8361_v39  ;;  %3680 = vmatpush.bf16.msra.mxu1 %v8362_v23  ;;  %v3369_v46 = vpop.permute.xlu2 %3368  ;;  %v4647_v49 = vld [vmem:[%s8087_s8 + $0xb0] sm:$0xff]  ;;  %v4648_v39 = vld [vmem:[%s8087_s8 + $0xb8] sm:$0xff]  ;;  %v8363_v23 = vpack.c.bf16 %v7508_v33, %v7521_v5  ;;  %vm8385_vm10 = vmmov %vm8374_vm0 }
 0x64f   : > { %v4649_v5 = vld [vmem:[%s8087_s8 + $0x70] sm:$0xff] }
 0x650   : > { %v3361_v59 = vpop.permute.xlu0 %3360  ;;  %v3624_v57 = vpack.c.bf16 %v3584_v22, %v3582_v2  ;;  %v3574_v2 = vmul.f32 %v4646_v24, %v3468_v35 }
 0x652   : > { %3653 = vmatpush.bf16.msra.mxu3 %v3624_v57  ;;  %v3620_v40 = vpack.c.bf16 %v3576_v8, %v3574_v2 }
 0x654   : > { %v3393_v42 = vpop.permute.xlu1 %3392 }
 0x655   : > { %v3397_v15 = vsel %vm953_vm2, %v3385_v51, %v3393_v42  ;;  %v3401_v28 = vsel %vm953_vm2, %v3393_v42, %v3385_v51  ;;  %vm8364_vm2 = vmmov %vm8348_vm9 }
 0x656   : > { %v3544_v22 = vmul.f32 %v4647_v49, %v3401_v28  ;;  %v3545_v51 = vmul.f32 %v4648_v39, %v3397_v15  ;;  %3654 = vmatpush.bf16.msra.mxu3 %v8363_v23  ;;  %v3377_v35 = vsel %vm8364_vm2, %v3369_v46, %v3361_v59  ;;  %vm8365_vm12 = vmmov %vm8364_vm2  ;;  %v8369_v15 = vpack.c.bf16 %v7548_v62, %v7559_v7  ;;  %v3333_v24 = vpop.permute.xlu2 %3332  ;;  %v4653_v7 = vld [vmem:[%s8087_s8 + $0x160] sm:$0xff]  ;;  %v4654_v49 = vld [vmem:[%s8087_s8 + $0x170] sm:$0xff] }
 0x657   : > { %v3373_v18 = vsel %vm8365_vm12, %v3361_v59, %v3369_v46  ;;  %vm8366_vm9 = vmmov %vm8364_vm2  ;;  %v3536_v8 = vmul.f32 %v4649_v5, %v3377_v35  ;;  %v4650_v59 = vld [vmem:[%s8087_s8 + $0x78] sm:$0xff]  ;;  %v3444_v46 = vsel %vm8368_vm1, %v7671_v25, %v7659_v0  ;;  %v8370_v28 = vpack.c.bf16 %v7582_v31, %v7603_v3  ;;  %v4659_v5 = vld [vmem:[%s8087_s8 + $0x30] sm:$0xff] }
 0x658   : > { %v7772_v57 = vpop.permute.xlu0 %3338  ;;  %v3604_v54 = vpack.c.bf16 %v3544_v22, %v3542_v11  ;;  %v3605_v37 = vpack.c.bf16 %v3545_v51, %v3543_v43  ;;  %v3376_v42 = vsel %vm8366_vm9, %v7688_v45, %v7577_v38  ;;  %vm8367_vm4 = vmmov %vm8364_vm2  ;;  %v3537_v11 = vmul.f32 %v4650_v59, %v3373_v18 }
 0x659   : > { %v3372_v33 = vsel %vm8367_vm4, %v7577_v38, %v7688_v45  ;;  %v4651_v38 = vld [vmem:[%s8087_s8 + $0x60] sm:$0xff]  ;;  %v8371_v0 = vpack.c.bf16 %v7553_v61, %v7565_v44  ;;  %v3566_v31 = vmul.f32 %v4653_v7, %v3444_v46  ;;  %v3348_v51 = vsel %vm8373_vm5, %v7686_v48, %v7669_v1  ;;  %vm8389_vm12 = vmmov %vm8368_vm1 }
 0x65a   : > { %3642 = vmatpush.bf16.msra.mxu2 %v3604_v54  ;;  %3655 = vmatpush.bf16.msra.mxu3 %v3620_v40  ;;  %v3534_v45 = vmul.f32 %v4651_v38, %v3376_v42  ;;  %v3535_v43 = vmul.f32 %v4652_v32, %v3372_v33  ;;  %v3630_v44 = vld [vmem:[%s8090_s11] sm:$0x7]  ;;  %v3352_v23 = vsel %vm8374_vm0, %v7669_v1, %v7686_v48  ;;  %v4655_v40 = vld [vmem:[%s8087_s8 + $0x130] sm:$0xff] }
 0x65b   : > { %3681 = vmatpush.bf16.msra.mxu1 %v3605_v37  ;;  %3632 = vst [vmem:[#allocation1] ss:$9 sm:$0xff] %v3630_v44  ;;  %v8375_v54 = vpack.c.bf16 %v7640_v17, %v7651_v10  ;;  %v3560_v37 = vmul.f32 %v4655_v40, %v7323_v4  ;;  %v8376_v35 = vpack.c.bf16 %v7645_v60, %v7657_v29  ;;  %v4656_v17 = vld [vmem:[%s8087_s8 + $0x120] sm:$0xff]  ;;  %v4658_v60 = vld [vmem:[%s8087_s8 + $0x28] sm:$0xff] }
 0x65c   : > { %v7789_v47 = vpop.permute.xlu1 %3432  ;;  %v3600_v2 = vpack.c.bf16 %v3536_v8, %v3534_v45  ;;  %v3601_v3 = vpack.c.bf16 %v3537_v11, %v3535_v43  ;;  %v3558_v10 = vmul.f32 %v4656_v17, %v7298_v12  ;;  %v4657_v4 = vld [vmem:[%s8087_s8 + $0x20] sm:$0xff]  ;;  %v3527_v29 = vmul.f32 %v4658_v60, %v3348_v51  ;;  %v4660_v12 = vld [vmem:[%s8087_s8 + $0x38] sm:$0xff]  ;;  %v8381_v43 = vld [vmem:[#allocation17_spill] sm:$0xff] }
 0x65d   : > { %v3526_v48 = vmul.f32 %v4657_v4, %v3352_v23  ;;  %v8379_v11 = vpack.c.bf16 %v7587_v50, %v7609_v55  ;;  %v3497_v45 = vsel %vm8380_vm15, %v7718_v26, %v7684_v34  ;;  %v3346_v50 = vsel %vm8382_vm8, %v7463_v19, %v7772_v57 }
 0x65e   : > { %3643 = vmatpush.bf16.msra.mxu2 %v8369_v15  ;;  %3656 = vmatpush.bf16.msra.mxu3 %v8370_v28  ;;  %v3503_v33 = vpop.permute.xlu2 %3502  ;;  %v3612_v15 = vpack.c.bf16 %v3560_v37, %v3558_v10  ;;  %v4661_v28 = vld [vmem:[%s8087_s8 + $0x110] sm:$0xff]  ;;  %v3350_v55 = vsel %vm8383_vm7, %v7772_v57, %v7463_v19  ;;  %v4664_v57 = vld [vmem:[%s8087_s8] sm:$0xff]  ;;  %v4670_v10 = vld [vmem:[%s8087_s8 + $0x1a8] sm:$0xff]  ;;  %vm8406_vm15 = vcmask 1041408   ;;  %vm8411_vm8 = vcmask 1043456  }
 0x65f   : > { %3682 = vmatpush.bf16.msra.mxu1 %v8371_v0  ;;  %v3556_v32 = vmul.f32 %v4661_v28, %v7190_v13  ;;  %vm8412_vm7 = vmmov %vm8411_vm8 }
 0x660   : > { %v7813_v25 = vpop.permute.xlu0 %3440 }
 0x661   : > { %v3445_v62 = vsel %vm8372_vm6, %v7789_v47, %v7813_v25 }
 0x662   : > { %v3568_v61 = vmul.f32 %v4654_v49, %v3445_v62  ;;  %3644 = vmatpush.bf16.msra.mxu2 %v3600_v2  ;;  %v3633_v46 = vld [vmem:[#allocation1] sm:$0xff]  ;;  %v7869_v38 = vld [vmem:[#allocation1 + $0x9] sm:$0xff]  ;;  %v4663_v62 = vld [vmem:[%s8087_s8 + $0x1f8] sm:$0xff] }
 0x663   : > { %3683 = vmatpush.bf16.msra.mxu1 %v3601_v3  ;;  %3749 = vst [vmem:[#allocation1] ss:$2 sm:$0xff] %v8381_v43  ;;  %v4662_v2 = vld [vmem:[%s8087_s8 + $0x100] sm:$0xff]  ;;  %v3585_v7 = vmul.f32 %v4663_v62, %v3497_v45  ;;  %v3522_v3 = vmul.f32 %v4664_v57, %v3350_v55  ;;  %v4678_v57 = vld [vmem:[%s8087_s8 + $0x208] sm:$0xff] }
 0x664   : > { %v3616_v22 = vpack.c.bf16 %v3568_v61, %v3566_v31  ;;  %v3337_v39 = vpop.permute.xlu1 %3336  ;;  %v3554_v13 = vmul.f32 %v4662_v2, %v7141_v30  ;;  %v4665_v30 = vld [vmem:[%s8087_s8 + $0x8] sm:$0xff]  ;;  %v4666_v61 = vld [vmem:[%s8087_s8 + $0x10] sm:$0xff]  ;;  %v8394_v2 = vpack.c.bf16 %v7592_v20, %v7615_v36 }
 0x665   : > { %v3523_v49 = vmul.f32 %v4665_v30, %v3346_v50  ;;  %v4676_v50 = vld [vmem:[%s8087_s8 + $0x168] sm:$0xff]  ;;  %v4679_v20 = vld [vmem:[%s8087_s8 + $0x210] sm:$0xff] }
 0x666   : > { %3657 = vmatpush.bf16.msra.mxu3 %v3616_v22  ;;  %3645 = vmatpush.bf16.msra.mxu2 %v8375_v54  ;;  %v3610_v54 = vpack.c.bf16 %v3556_v32, %v3554_v13  ;;  %v3567_v55 = vmul.f32 %v4676_v50, %v7677_v58  ;;  %v4677_v58 = vld [vmem:[%s8087_s8 + $0x200] sm:$0xff] }
 0x667   : > { %3684 = vmatpush.bf16.msra.mxu1 %v8376_v35 }
 0x668   : > { %v3345_v18 = vpop.permute.xlu0 %3344 }
 0x669   : > { %v3349_v42 = vsel %vm8377_vm14, %v3337_v39, %v3345_v18  ;;  %v3353_v1 = vsel %vm8378_vm13, %v3345_v18, %v3337_v39  ;;  %v4668_v39 = vld [vmem:[%s8087_s8 + $0x1e8] sm:$0xff]  ;;  %v3473_v18 = vsel %vm1002_vm11, %v7716_v41, %v7712_v9  ;;  %v3575_v9 = vmul.f32 %v4670_v10, %v7682_v56 }
 0x66a   : > { %v3528_v8 = vmul.f32 %v4659_v5, %v3353_v1  ;;  %v3529_v59 = vmul.f32 %v4660_v12, %v3349_v42  ;;  %3658 = vmatpush.bf16.msra.mxu3 %v8379_v11  ;;  %v3583_v51 = vmul.f32 %v4668_v39, %v7663_v27  ;;  %v3513_v42 = vpop.permute.xlu2 %3512  ;;  %v4669_v1 = vld [vmem:[%s8087_s8 + $0x1b8] sm:$0xff]  ;;  %vm8386_vm11 = vcmp.lt.s32.totalorder %v8242_v16, 111 }
 0x66b   : > { %v3577_v27 = vmul.f32 %v4669_v1, %v3473_v18  ;;  %vm8387_vm2 = vmmov %vm8386_vm11  ;;  %v4680_v16 = vld [vmem:[%s8087_s8 + $0x218] sm:$0xff]  ;;  %v8397_v39 = vpack.c.bf16 %v7597_v14, %v7621_v21  ;;  %vm8398_vm14 = vcmask 261120   ;;  %v4684_v14 = vld [vmem:[%s8087_s8 + $0x108] sm:$0xff] }
 0x66c   : > { %v3596_v34 = vpack.c.bf16 %v3528_v8, %v3526_v48  ;;  %v3597_v26 = vpack.c.bf16 %v3529_v59, %v3527_v29  ;;  %v3341_v0 = vpop.permute.xlu1 %3340  ;;  %v3625_v35 = vpack.c.bf16 %v3585_v7, %v3583_v51  ;;  %v8388_v48 = vpack.c.bf16 %v7513_v63, %v7527_v52  ;;  %vm8390_vm9 = vmmov %vm8387_vm2  ;;  %v4672_v63 = vld [vmem:[%s8087_s8 + $0x228] sm:$0xff]  ;;  %v4674_v59 = vld [vmem:[%s8087_s8 + $0x238] sm:$0xff] }
 0x66d   : > { %v3347_v31 = vsel %vm8384_vm3, %v3333_v24, %v3341_v0  ;;  %v3351_v19 = vsel %vm8385_vm10, %v3341_v0, %v3333_v24  ;;  %v4667_v24 = vld [vmem:[%s8087_s8 + $0x18] sm:$0xff]  ;;  %v3449_v29 = vsel %vm8389_vm12, %v7813_v25, %v7789_v47  ;;  %vm8391_vm4 = vmmov %vm8387_vm2  ;;  %v3621_v8 = vpack.c.bf16 %v3577_v27, %v3575_v9  ;;  %v4673_v47 = vld [vmem:[%s8087_s8 + $0x230] sm:$0xff] }
 0x66e   : > { %3646 = vmatpush.bf16.msra.mxu2 %v3596_v34  ;;  %3659 = vmatpush.bf16.msra.mxu3 %v3612_v15  ;;  %v3524_v44 = vmul.f32 %v4666_v61, %v3351_v19  ;;  %v3525_v22 = vmul.f32 %v4667_v24, %v3347_v31  ;;  %v4675_v15 = vld [vmem:[%s8087_s8 + $0x178] sm:$0xff]  ;;  %vm8392_vm1 = vmmov %vm8387_vm2  ;;  %v4682_v51 = vld [vmem:[%s8087_s8 + $0x128] sm:$0xff] }
 0x66f   : > { %3685 = vmatpush.bf16.msra.mxu1 %v3597_v26  ;;  %v3569_v28 = vmul.f32 %v4675_v15, %v3449_v29  ;;  %vm8393_vm6 = vmmov %vm8392_vm1  ;;  %v4685_v21 = vld [vmem:[%s7130_s20 + $0x8] sm:$0xff]  ;;  %v3750_v9 = vld.sshfl [vmem:[#allocation1] sm:$0xff pattern:$0x75316420]  ;;  %s8403_s20 = sld [smem:[#allocation12_spill]] }
 0x670   : > { %v3499_v23 = vpop.permute.xlu0 %3498  ;;  %v3594_v40 = vpack.c.bf16 %v3524_v44, %v3522_v3  ;;  %v3595_v37 = vpack.c.bf16 %v3525_v22, %v3523_v49  ;;  %vm8395_vm5 = vmmov %vm8392_vm1  ;;  %v4681_v44 = vld [vmem:[%s8087_s8 + $0x138] sm:$0xff] }
 0x671   : > { %vm8396_vm0 = vmmov %vm8392_vm1  ;;  %v3617_v31 = vpack.c.bf16 %v3569_v28, %v3567_v55  ;;  %v3561_v24 = vmul.f32 %v4681_v44, %v7329_v53  ;;  %v3635_v22 = vld [vmem:[#allocation1 + $0x12] sm:$0xff] }
 0x672   : > { %3660 = vmatpush.bf16.msra.mxu3 %v3610_v54  ;;  %3647 = vmatpush.bf16.msra.mxu2 %v3594_v40  ;;  %v3507_v32 = vpop.permute.xlu2 %3506  ;;  %vm8399_vm13 = vmmov %vm8398_vm14  ;;  %v4683_v53 = vld [vmem:[%s8087_s8 + $0x118] sm:$0xff]  ;;  %v8400_v40 = vld [vmem:[#allocation21_spill] sm:$0xff] }
 0x673   : > { %3686 = vmatpush.bf16.msra.mxu1 %v3595_v37  ;;  %v3514_v34 = vsel %vm8392_vm1, %v3499_v23, %v3507_v32  ;;  %v3518_v26 = vsel %vm8393_vm6, %v3507_v32, %v3499_v23  ;;  %v3559_v23 = vmul.f32 %v4682_v51, %v7306_v6  ;;  %v3557_v37 = vmul.f32 %v4683_v53, %v8400_v40 }
 0x674   : > { %v3511_v17 = vpop.permute.xlu1 %3510  ;;  %v3586_v19 = vmul.f32 %v4677_v58, %v3514_v34  ;;  %v3587_v3 = vmul.f32 %v4678_v57, %v3518_v26 }
 0x675   : > { %3661 = vmatmul.bf16.vlgmr.msra.gmra.mxu3 %v7869_v38  ;;  %3648 = vmatmul.bf16.vlgmr.msra.gmra.mxu2 %v3633_v46  ;;  %v3516_v41 = vsel %vm8386_vm11, %v3503_v33, %v3511_v17  ;;  %v3520_v4 = vsel %vm8387_vm2, %v3511_v17, %v3503_v33  ;;  %v4671_v33 = vld [vmem:[%s8087_s8 + $0x220] sm:$0xff]  ;;  %v3613_v54 = vpack.c.bf16 %v3561_v24, %v3559_v23  ;;  %s4378_s4 = sshll.u32 %s8403_s20, 3  ;;  %s3843_s20 = sshll.u32 %s764_s29, 4  ;;  %s3844_s20 = int_to_ptr.vmem [resolvable:$true] %s3843_s20 }
 0x676   : > { %3692 = vmatpush.bf16.msrb.mxu2 %v3625_v35  ;;  %3687 = vmatmul.bf16.vlgmr.msra.gmra.mxu1 %v3633_v46  ;;  %v3590_v12 = vmul.f32 %v4671_v33, %v3516_v41  ;;  %v3591_v52 = vmul.f32 %v4672_v63, %v3520_v4  ;;  %v3555_v35 = vmul.f32 %v4685_v21, %v4684_v14  ;;  %v3751_v41 = vld.sshfl [vmem:[#allocation1 + $0x8] sm:$0xff pattern:$0x75316420]  ;;  %v8401_v4 = vld [vmem:[#allocation18_spill] sm:$0xff]  ;;  %s3841_s26 = scalar_lea.hbm %s8408_s1, %s4378_s4  ;;  %s3856_s24 = scalar_lea.hbm %s8409_s21, %s4378_s4 }
 0x677   : > { %3763 = vst [vmem:[#allocation1] ss:$2 sm:$0xff] %v8401_v4  ;;  %s3845_s27 = sshll.u32 %s3841_s26, 4  ;;  %s3860_s22 = sshll.u32 %s3856_s24, 4  ;;  %s3846_s27 = int_to_ptr.hbm [resolvable:$true] %s3845_s27  ;;  %s8033_s22 = int_to_ptr.hbm [resolvable:$true] %s3860_s22 }
 0x678   : > { %v3505_v60 = vpop.permute.xlu0 %3504  ;;  %v3611_v18 = vpack.c.bf16 %v3557_v37, %v3555_v35  ;;  %s4700_s4 = sshra.s32 %s3846_s27, 4  ;;  %s4701_s4 = int_to_ptr.hbm [resolvable:$true] %s4700_s4 }
 0x679   : > { %v3517_v5 = vsel %vm8390_vm9, %v3505_v60, %v3513_v42  ;;  %v3521_v56 = vsel %vm8391_vm4, %v3513_v42, %v3505_v60  ;;  %s4702_s23 = scalar_lea.hbm %s4701_s4, 8  ;;  %p4707_p0 = scmp.lt.s32.totalorder %s4701_s4, %s8408_s1 }
 0x67a   : > { %3693 = vmatpush.bf16.msrb.mxu2 %v8388_v48  ;;  %v3592_v25 = vmul.f32 %v4673_v47, %v3517_v5  ;;  %v3593_v11 = vmul.f32 %v4674_v59, %v3521_v56  ;;  %p4703_p11 = scmp.ne.s32.totalorder %s4701_s4, %s4702_s23  ;;  %p4708_p1 = scmp.lt.s32.totalorder %s4706_s28, %s4702_s23 }
 0x67c   : > { %v3628_v46 = vpack.c.bf16 %v3592_v25, %v3590_v12  ;;  %v3629_v45 = vpack.c.bf16 %v3593_v11, %v3591_v52  ;;  %v3501_v0 = vpop.permute.xlu1 %3500  ;;  %p4704_p12 = pnand %p4703_p11, %p4955_p5  ;;  %p4709_p2 = por %p4708_p1, %p4707_p0 }
 0x67e   : > { %3694 = vmatpush.bf16.msrb.mxu2 %v3621_v8  ;;  %3672 = vmatpush.bf16.msra.mxu0 %v3628_v46  ;;  %v3764_v60 = vld.sshfl [vmem:[#allocation1] sm:$0xff pattern:$0x75316420]  ;;  %v3765_v29 = vld.sshfl [vmem:[#allocation1 + $0x8] sm:$0xff pattern:$0x75316420]  ;;  %p4705_p13 = pneg %p4704_p12 }
 0x67f   : > { %3711 = vmatpush.bf16.msrb.mxu3 %v3629_v45  ;;  %3778 = vst [vmem:[#allocation1] ss:$2 sm:$0xff] %v8401_v4  ;;  %v8407_v46 = vld [vmem:[#allocation19_spill] sm:$0xff] }
 0x680   : > { %v3509_v13 = vpop.permute.xlu0 %3508  ;;  %p4710_p3 = pnand %p4709_p2, %p4705_p13 }
 0x681   : > { %v3515_v62 = vsel %vm8395_vm5, %v3501_v0, %v3509_v13  ;;  %v3519_v7 = vsel %vm8396_vm0, %v3509_v13, %v3501_v0 }
 0x682   : > { %3695 = vmatpush.bf16.msrb.mxu2 %v8394_v2  ;;  %v3588_v36 = vmul.f32 %v4679_v20, %v3515_v62  ;;  %v3589_v30 = vmul.f32 %v4680_v16, %v3519_v7 }
 0x684   : > { %v3626_v49 = vpack.c.bf16 %v3588_v36, %v3586_v19  ;;  %v3627_v61 = vpack.c.bf16 %v3589_v30, %v3587_v3 }
 0x686   : > { %3696 = vmatpush.bf16.msrb.mxu2 %v3617_v31  ;;  %3673 = vmatpush.bf16.msra.mxu0 %v3626_v49  ;;  %v3780_v8 = vld.sshfl [vmem:[#allocation1 + $0x8] sm:$0xff pattern:$0x75316420] }
 0x687   : > { %3712 = vmatpush.bf16.msrb.mxu3 %v3627_v61 }
 0x689   : > { %4334 = vmatmul.msk.bf16.vlgmr.msra.gmra.mxu0 %vm8398_vm14, %v3635_v22 }
 0x68a   : > { %3697 = vmatpush.bf16.msrb.mxu2 %v8397_v39  ;;  %4335 = vmatmul.msk.bf16.vlgmr.msrb.gmra.mxu3 %vm8399_vm13, %v3635_v22 }
 0x68e   : > { %3698 = vmatpush.bf16.msrb.mxu2 %v3613_v54 }
 0x692   : > { %3699 = vmatpush.bf16.msrb.mxu2 %v3611_v18 }
 0x695   : > { %3700 = vmatmul.bf16.vlgmr.msrb.gmra.mxu2 %v7869_v38  ;;  %v3779_v38 = vld.sshfl [vmem:[#allocation1] sm:$0xff pattern:$0x75316420] }
 0x696   : > { %3785 = vst [vmem:[#allocation1] ss:$2 sm:$0xff] %v8381_v43 }
 0x69d   : > { %v3786_v55 = vld.sshfl [vmem:[#allocation1] sm:$0xff pattern:$0x75316420]  ;;  %v3787_v34 = vld.sshfl [vmem:[#allocation1 + $0x8] sm:$0xff pattern:$0x75316420] }
 0x6f3   : > { %v3688_v6 = vpop.f32.mrf.mxu1 }
 0x6f8   : > { %v3662_v42 = vpop.f32.mrf.mxu3  ;;  %v3649_v1 = vpop.f32.mrf.mxu2 }
 0x6f9   : > { %v3663_v63 = vadd.f32 %v3662_v42, %v3649_v1 }
 0x6fb   : > { %v3690_v27 = vpop.f32.mrf.mxu1 }
 0x700   : > { %v3664_v17 = vpop.f32.mrf.mxu3  ;;  %v3651_v10 = vpop.f32.mrf.mxu2 }
 0x706   : > { %v3675_v48 = vpop.f32.mrf.mxu0 }
 0x707   : > { %v3676_v25 = vadd.f32 %v3675_v48, %v3663_v63 }
 0x70d   : > { %v3714_v5 = vpop.f32.mrf.mxu3 }
 0x70e   : > { %v3677_v56 = vpop.f32.mrf.mxu0 }
 0x715   : > { %v3716_v33 = vpop.f32.mrf.mxu3 }
 0x718   : > { %v3701_v12 = vpop.f32.mrf.mxu2 }
 0x719   : > { %v3702_v52 = vadd.f32 %v3701_v12, %v3688_v6 }
 0x71b   : > { %v3715_v47 = vadd.f32 %v3714_v5, %v3702_v52 }
 0x71d   : > { %v3720_v59 = vrot.slane %v3715_v47, 6 }
 0x71f   : > { %v3721_v11 = vsel %vm8406_vm15, %v3676_v25, %v3720_v59 }
 0x720   : > { %v3723_v43 = vadd.f32 %v3721_v11, %v8407_v46  ;;  %v3703_v45 = vpop.f32.mrf.mxu2 }
 0x722   : > { %3724 = vst [vmem:[%s811_s17] sm:$0xf] %v3723_v43  ;;  %v3742_v15 = vperm.slane %v3723_v43, 0  ;;  %v3743_v28 = vperm.slane %v3723_v43, 2  ;;  %v3756_v32 = vperm.slane %v3723_v43, 1  ;;  %v3757_v50 = vperm.slane %v3723_v43, 3 }
 0x724   : > { %v3746_v26 = vperm.slane %v3742_v15, 0  ;;  %v3747_v0 = vperm.slane %v3743_v28, 0  ;;  %v3760_v2 = vperm.slane %v3756_v32, 1  ;;  %v3761_v13 = vperm.slane %v3757_v50, 1 }
 0x726   : > { %v3754_v62 = vmul.f32 %v3750_v9, %v3746_v26  ;;  %v3755_v7 = vmul.f32 %v3751_v41, %v3747_v0  ;;  %v3768_v31 = vmul.f32 %v3764_v60, %v3760_v2  ;;  %v3769_v58 = vmul.f32 %v3765_v29, %v3761_v13 }
 0x727   : > { %v3783_v19 = vmul.f32 %v3779_v38, %v3746_v26  ;;  %v3784_v57 = vmul.f32 %v3780_v8, %v3747_v0  ;;  %v3790_v3 = vmul.f32 %v3786_v55, %v3760_v2  ;;  %v3791_v20 = vmul.f32 %v3787_v34, %v3761_v13 }
 0x728   : > { %v3771_v36 = vsub.f32 %v3755_v7, %v3769_v58  ;;  %v3770_v30 = vsub.f32 %v3754_v62, %v3768_v31 }
 0x729   : > { %v3793_v16 = vadd.f32 %v3791_v20, %v3784_v57  ;;  %v3792_v61 = vadd.f32 %v3790_v3, %v3783_v19 }
 0x72a   : > { %v3774_v49 = vrot.slane %v3771_v36, 4 }
 0x72b   : > { %v3796_v44 = vrot.slane %v3793_v16, 4 }
 0x72c   : > { %v3775_v24 = vsel %vm8411_vm8, %v3770_v30, %v3774_v49 }
 0x72d   : > { %3777 = vst [vmem:[%s764_s29] sm:$0xff] %v3775_v24  ;;  %v3797_v22 = vsel %vm8412_vm7, %v3792_v61, %v3796_v44 }
 0x72e   : > { %4713 = shalt.err (!%p4710_p3)
}
 0x72f   : > { %4380 = dma.vmem_to_hbm [thread:$0]  (%p4955_p5), %s3844_s20, 128, %s3846_s27, %s3816_s0   ;;  %3799 = vst [vmem:[%s8027_s3] sm:$0xff] %v3797_v22 }
 0x730   : > { %s3821_s29 = scalar_lea.sflag [#allocation5], %s8010_s2  ;;  %s4728_s6 = sshra.s32 %s8033_s22, 4  ;;  %s4729_s6 = int_to_ptr.hbm [resolvable:$true] %s4728_s6 }
 0x731   : > { %s4730_s25 = scalar_lea.hbm %s4729_s6, 8  ;;  %s4734_s26 = scalar_lea.hbm %s8409_s21, 16 }
 0x732   : > { %p4731_p4 = scmp.ne.s32.totalorder %s4729_s6, %s4730_s25  ;;  %p4735_p9 = scmp.lt.s32.totalorder %s4729_s6, %s8409_s21 }
 0x733   : > { %p4736_p10 = scmp.lt.s32.totalorder %s4734_s26, %s4730_s25 }
 0x734   : > { %p4732_p7 = pnand %p4731_p4, %p4955_p5 }
 0x735   : > { %p4737_p11 = por %p4736_p10, %p4735_p9 }
 0x736   : > { %p4733_p8 = pneg %p4732_p7 }
 0x738   : > { %p4738_p12 = pnand %p4737_p11, %p4733_p8 }
 0x73a   : > { %4741 = shalt.err (!%p4738_p12)
}
 0x73b   : > { %4381 = dma.vmem_to_hbm [thread:$0]  (%p4955_p5), %s8031_s30, 128, %s8033_s22, %s3821_s29  }
 0x73c PF: > { %s8413_s2 = sld [smem:[#allocation11_spill]] }
 0x73d   : > { %s8414_s20 = sld [smem:[#allocation8_spill]] }
 0x742   : > { %p4391_p13 = scmp.ge.s32.totalorder %s8413_s2, 2 }
 0x743   : > { %s3896_s3 = sand.u32 1, %s8414_s20  }
 0x744   : > { %p4385_p0 = pnand %p4391_p13, %p4959_p6  ;;  %s3897_s0 = scalar_lea.sflag [#allocation3], %s3896_s3 }
 0x746   : > { %p4386_p1 = pneg %p4385_p0 }
 0x748   : > { %4759 = dma.done.wait (%p4386_p1), %s3897_s0, 128  }
 0x749   : > { %4761 = vsyncadd (%p4386_p1), %s3897_s0, 4294967168  ;;  %s3907_s6 = scalar_lea.sflag [#allocation5], %s3896_s3 }
 0x74a   : > { %4763 = dma.done.wait (%p4386_p1), %s3907_s6, 128  }
 0x74b   : > { %4765 = vsyncadd (%p4386_p1), %s3907_s6, 4294967168  ;;  %s8416_s27 = sld [smem:[#allocation13_spill]] }
 0x74c   : > { %s8417_s2 = sld [smem:[#allocation9_spill]] }
 0x74d   : > { %s8418_s25 = sld [smem:[#allocation10_spill]] }
 0x74e   : > { %s8419_s26 = sld [smem:[#allocation14_spill]] }
 0x751   : > { %p35_p5 = scmp.ge.s32.totalorder %s8416_s27, 4  }
 0x753   :  { %37 = sbr.rel (!%p35_p5) target bundleno = 16 (0x10), region = 203 }
 0x758   :  { %3913 = vsyncpa [#allocation3], 1 }
 0x759   :  { %3915 = vsyncpa [#allocation3 + $0x1], 1 }
 0x75a   :  { %3916 = vsyncpa [#allocation5], 1 }
 0x75b   :  { %3918 = vsyncpa [#allocation5 + $0x1], 1 }

</bundles_post_ra>
